<compile_context>
chip_gen: v5e
topology: v5e:2x2
jax: 0.10.0
libtpu: 0.0.40
codegen_flags: <defaults>
</compile_context>

<pallas_src>
import jax
import jax.numpy as jnp
from jax import lax
from jax.experimental import pallas as pl
from jax.experimental.pallas import tpu as pltpu

# ---- stand-ins for the argparse args (small, consistent shapes) ----
NOISE = 8        # args.noise   (conv input channels == width of x)
CNNDIM = 16      # args.cnndim  (extractor latent dim == LSTM hidden size)
BATCH = 8        # args.batch   (rows of x, AvgPool kernel size; must be >= 5 so pool length == 1)
FUNCD = 32       # args.funcd   (generator output dim)
KS = 5
PAD = KS // 2 + 1            # = 3
H1, H2 = 480, 1103           # hidden sizes of the Generator MLP (fixed in the module)
H2P = 1152                   # H2 zero-padded to a multiple of 128 lanes (9 * 128)
BN_EPS = 1e-5


def _sigmoid(v):
    # Numerically stable sigmoid: exponentiate a non-positive argument only.
    e = jnp.exp(-jnp.abs(v))
    return jnp.where(v >= 0, 1.0, e) / (1.0 + e)


def generator_kernel(x_ref, im2col_ref, convw_ref,
                     wih0_ref, whh0_ref, b0_ref, wl1_ref, b1_ref,
                     w1x_ref, w1y_ref, bias1_ref,
                     w2_hbm_ref, bias2_ref, w3_hbm_ref, bias3_ref,
                     stdw_ref, eps_ref,
                     out_ref,
                     w2_vmem, w3_vmem, in0_vmem, dma_sem):
    H = CNNDIM
    B = x_ref.shape[0]

    # ---- start HBM->VMEM prefetch of the two big MLP weights; hidden behind conv/BN/LSTM ----
    w2_cp = pltpu.make_async_copy(w2_hbm_ref, w2_vmem, dma_sem.at[0])
    w3_cp = pltpu.make_async_copy(w3_hbm_ref, w3_vmem, dma_sem.at[1])
    w2_cp.start()
    w3_cp.start()

    # ---------------- Conv1d (no bias): single MXU pass over the im2col slab ----------------
    conv = jnp.dot(convw_ref[...], im2col_ref[...],
                   preferred_element_type=jnp.float32)          # (CNNDIM, L_OUT)

    # -------- BatchNorm1d (batch statistics, biased variance, weight=1, bias=0) --------
    mean = jnp.mean(conv, axis=1, keepdims=True)
    var = jnp.mean((conv - mean) ** 2, axis=1, keepdims=True)
    z = (conv - mean) * lax.rsqrt(var + BN_EPS)

    # ---------------- Logish: x * log(1 + sigmoid(x)) ----------------
    z = z * jnp.log(1.0 + _sigmoid(z))

    # ---- AvgPool1d(kernel=B, stride=B, padding=1, count_include_pad=True): length-1 output ----
    # window = [left_pad_zero, z[:, 0 : B-1]] / B
    pooled = jnp.sum(z[:, :B - 1], axis=1, keepdims=True) * (1.0 / B)   # (CNNDIM, 1)

    # Layer-0 input contribution for every timestep, written once to VMEM so the serial LSTM
    # loop only does a cheap sublane-offset load (no per-step cross-sublane gather / select).
    in0_vmem[...] = pooled * wih0_ref[...]                      # (CNNDIM, 4H)

    # Hoist the y-independent half of the first MLP layer ahead of the serial LSTM chain.
    a1_pre = (jnp.dot(x_ref[...], w1x_ref[...],
                      preferred_element_type=jnp.float32) + bias1_ref[...])   # (B, H1)

    # ---------------- 2-layer LSTM (input_size=1, hidden=CNNDIM) ----------------
    # sequence = pooled channels (seq_len = CNNDIM), PyTorch gate order i, f, g, o
    whh0 = whh0_ref[...]
    b0 = b0_ref[...]
    wl1 = wl1_ref[...]          # [W_ih_l1 ; W_hh_l1]^T  -> (2H, 4H), fused layer-2 matmul
    b1 = b1_ref[...]

    def cell(gates, c):
        sg = _sigmoid(gates)                        # one transcendental pass over all 4 gates
        i = sg[:, 0:H]
        f = sg[:, H:2 * H]
        o = sg[:, 3 * H:4 * H]
        g = jnp.tanh(gates[:, 2 * H:3 * H])
        c_new = f * c + i * g
        h_new = o * jnp.tanh(c_new)
        return h_new, c_new

    def step(t, carry):
        h0, c0, h1, c1 = carry
        g0 = (in0_vmem[pl.ds(t, 1), :]
              + jnp.dot(h0, whh0, preferred_element_type=jnp.float32) + b0)
        h0, c0 = cell(g0, c0)
        h01 = jnp.concatenate([h0, h1], axis=1)     # (1, 2H) lane concat -> single MXU push
        g1 = jnp.dot(h01, wl1, preferred_element_type=jnp.float32) + b1
        h1, c1 = cell(g1, c1)
        return h0, c0, h1, c1

    zero = jnp.zeros((1, H), jnp.float32)
    _, _, y, _ = lax.fori_loop(0, CNNDIM, step, (zero, zero, zero, zero),
                               unroll=True)         # y: (1, CNNDIM) = last-step layer-2 hidden

    # ---------------- Generator MLP ----------------
    a1 = jnp.tanh(a1_pre + jnp.dot(y, w1y_ref[...],
                                   preferred_element_type=jnp.float32))

    w2_cp.wait()        # w2 prefetch has been in flight since kernel entry
    a2 = jnp.tanh(jnp.dot(a1, w2_vmem[...],
                          preferred_element_type=jnp.float32) + bias2_ref[...])

    w3_cp.wait()
    mu = jnp.dot(a2, w3_vmem[...],
                 preferred_element_type=jnp.float32) + bias3_ref[...]

    # mu + std_weight * randn_like(mu)   (std_weight is zeros at init, as in the module)
    out_ref[...] = mu + stdw_ref[...] * eps_ref[...]


def prepare_params(params):
    """One-time layout transforms from module-shaped params to kernel-shaped params."""
    (conv_w, wih0, whh0, b0, wih1, whh1, b1,
     w1x, w1y, bias1, w2, bias2, w3, bias3, std_w) = params
    # conv_w (KS, CNNDIM, NOISE) -> (CNNDIM, KS*NOISE), matching the im2col row order
    convw_flat = jnp.transpose(conv_w, (1, 0, 2)).reshape(CNNDIM, KS * NOISE)
    # fuse layer-2 LSTM input/hidden weights: concat([h0, h1]) @ [wih1; whh1]
    w_l1 = jnp.concatenate([wih1, whh1], axis=0)                 # (2H, 4H)
    # lane-align the middle MLP dim: 1103 -> 1152 (zero pad; tanh(0)=0 and padded w3 rows are 0)
    w2_pad = jnp.pad(w2, ((0, 0), (0, H2P - H2)))
    bias2_pad = jnp.pad(bias2, ((0, 0), (0, H2P - H2)))
    w3_pad = jnp.pad(w3, ((0, H2P - H2), (0, 0)))
    return (convw_flat, wih0, whh0, b0, w_l1, b1,
            w1x, w1y, bias1, w2_pad, bias2_pad, w3_pad, bias3, std_w)


def generator_forward(x, kparams, eps):
    (convw_flat, wih0, whh0, b0, w_l1, b1,
     w1x, w1y, bias1, w2_pad, bias2_pad, w3_pad, bias3, std_w) = kparams
    B = x.shape[0]
    l_out = B + 2 * PAD - KS + 1
    pool_len = (l_out + 2 - B) // B + 1
    assert pool_len == 1, "args.batch must be >= 5 so AvgPool output length is 1 (LSTM input_size=1)"

    # im2col slab (layout plumbing in the wrapper): row k*NOISE + n = xpad[n, k : k + l_out]
    xpad = jnp.pad(x.T, ((0, 0), (PAD, PAD)))                    # (NOISE, B + 2*PAD)
    im2col = jnp.concatenate([xpad[:, k:k + l_out] for k in range(KS)], axis=0)  # (KS*NOISE, l_out)

    vmem = pl.BlockSpec(memory_space=pltpu.MemorySpace.VMEM)
    hbm = pl.BlockSpec(memory_space=pl.ANY)                      # raw HBM ref, manual DMA in-kernel
    in_specs = [vmem] * 11 + [hbm, vmem, hbm, vmem, vmem, vmem]

    return pl.pallas_call(
        generator_kernel,
        out_shape=jax.ShapeDtypeStruct((B, FUNCD), jnp.float32),
        in_specs=in_specs,
        out_specs=pl.BlockSpec(memory_space=pltpu.MemorySpace.VMEM),
        scratch_shapes=[
            pltpu.VMEM((H1, H2P), jnp.float32),                  # w2 landing buffer
            pltpu.VMEM((H2P, FUNCD), jnp.float32),               # w3 landing buffer
            pltpu.VMEM((CNNDIM, 4 * CNNDIM), jnp.float32),       # per-step LSTM input term
            pltpu.SemaphoreType.DMA((2,)),
        ],
    )(x, im2col, convw_flat, wih0, whh0, b0, w_l1, b1,
      w1x, w1y, bias1, w2_pad, bias2_pad, w3_pad, bias3, std_w, eps)


def reference_forward(x, params, eps):
    """Pure-JAX reference (same math, no Pallas, module-shaped params)."""
    (conv_w, wih0, whh0, b0, wih1, whh1, b1,
     w1x, w1y, bias1, w2, bias2, w3, bias3, std_w) = params
    B = x.shape[0]
    H = CNNDIM
    xpad = jnp.pad(x.T, ((0, 0), (PAD, PAD)))
    l_out = B + 2 * PAD - KS + 1
    conv = jnp.zeros((CNNDIM, l_out), jnp.float32)
    for k in range(KS):
        conv = conv + conv_w[k] @ xpad[:, k:k + l_out]
    mean = conv.mean(axis=1, keepdims=True)
    var = ((conv - mean) ** 2).mean(axis=1, keepdims=True)
    z = (conv - mean) / jnp.sqrt(var + BN_EPS)
    z = z * jnp.log(1.0 + jax.nn.sigmoid(z))
    pooled = jnp.sum(z[:, :B - 1], axis=1) / float(B)            # (CNNDIM,)

    def cell(g, c):
        i = jax.nn.sigmoid(g[:, :H]); f = jax.nn.sigmoid(g[:, H:2 * H])
        gg = jnp.tanh(g[:, 2 * H:3 * H]); o = jax.nn.sigmoid(g[:, 3 * H:])
        c2 = f * c + i * gg
        return o * jnp.tanh(c2), c2

    h0 = c0 = h1 = c1 = jnp.zeros((1, H), jnp.float32)
    for t in range(CNNDIM):
        g0 = pooled[t] * wih0 + h0 @ whh0 + b0
        h0, c0 = cell(g0, c0)
        g1 = h0 @ wih1 + h1 @ whh1 + b1
        h1, c1 = cell(g1, c1)
    y = h1

    a1 = jnp.tanh(x @ w1x + y @ w1y + bias1)
    a2 = jnp.tanh(a1 @ w2 + bias2)
    mu = a2 @ w3 + bias3
    return mu + std_w * eps


def make_params(key):
    keys = jax.random.split(key, 12)
    f32 = jnp.float32
    conv_w = 0.01 * jax.random.normal(keys[0], (KS, CNNDIM, NOISE), f32)   # conv.weight ~ N(0, 0.01)

    s = 1.0 / jnp.sqrt(jnp.float32(CNNDIM))                                # default torch LSTM init range
    def u(k, shape):
        return jax.random.uniform(k, shape, f32, minval=-s, maxval=s)
    wih0 = u(keys[1], (1, 4 * CNNDIM))          # (W_ih_l0)^T, input_size=1
    whh0 = u(keys[2], (CNNDIM, 4 * CNNDIM))     # (W_hh_l0)^T
    b0 = u(keys[3], (1, 4 * CNNDIM))            # b_ih_l0 + b_hh_l0
    wih1 = u(keys[4], (CNNDIM, 4 * CNNDIM))     # (W_ih_l1)^T
    whh1 = u(keys[5], (CNNDIM, 4 * CNNDIM))     # (W_hh_l1)^T
    b1 = u(keys[6], (1, 4 * CNNDIM))

    def xavier(k, fan_in, fan_out, gain):       # xavier_uniform, gain = 5/3 (init_weights)
        lim = gain * jnp.sqrt(6.0 / (fan_in + fan_out))
        return jax.random.uniform(k, (fan_in, fan_out), f32, minval=-lim, maxval=lim)

    in_dim = NOISE + CNNDIM
    w1 = xavier(keys[7], in_dim, H1, 5.0 / 3.0)
    w1x, w1y = w1[:NOISE], w1[NOISE:]
    bias1 = jnp.zeros((1, H1), f32)
    w2 = xavier(keys[8], H1, H2, 5.0 / 3.0)
    bias2 = jnp.zeros((1, H2), f32)
    w3 = xavier(keys[9], H2, FUNCD, 5.0 / 3.0)
    bias3 = jnp.zeros((1, FUNCD), f32)
    std_w = jnp.zeros((1, FUNCD), f32)          # nn.Parameter(torch.zeros(funcd))

    return (conv_w, wih0, whh0, b0, wih1, whh1, b1,
            w1x, w1y, bias1, w2, bias2, w3, bias3, std_w)


if __name__ == "__main__":
    key = jax.random.PRNGKey(0)
    k_params, k_x, k_eps = jax.random.split(key, 3)

    params = make_params(k_params)
    kparams = prepare_params(params)
    x = jax.random.normal(k_x, (BATCH, NOISE), jnp.float32)
    eps = jax.random.normal(k_eps, (BATCH, FUNCD), jnp.float32)          # randn_like(mu)

    out = generator_forward(x, kparams, eps)
    out = jax.block_until_ready(out)

    assert out.shape == (BATCH, FUNCD)
    assert bool(jnp.all(jnp.isfinite(out)))

    ref = reference_forward(x, params, eps)
    assert bool(jnp.allclose(out, ref, rtol=2e-2, atol=2e-2)), \
        f"max abs diff = {float(jnp.max(jnp.abs(out - ref)))}"

    print("KERNEL_OK")
</pallas_src>

<mosaic_0001>
module attributes {stable_mosaic.version = 11 : i64} {
  func.func @generator_kernel(%arg0: memref<8x8xf32, #tpu.memory_space<vmem>>, %arg1: memref<40x10xf32, #tpu.memory_space<vmem>>, %arg2: memref<16x40xf32, #tpu.memory_space<vmem>>, %arg3: memref<1x64xf32, #tpu.memory_space<vmem>>, %arg4: memref<16x64xf32, #tpu.memory_space<vmem>>, %arg5: memref<1x64xf32, #tpu.memory_space<vmem>>, %arg6: memref<32x64xf32, #tpu.memory_space<vmem>>, %arg7: memref<1x64xf32, #tpu.memory_space<vmem>>, %arg8: memref<8x480xf32, #tpu.memory_space<vmem>>, %arg9: memref<16x480xf32, #tpu.memory_space<vmem>>, %arg10: memref<1x480xf32, #tpu.memory_space<vmem>>, %arg11: memref<480x1152xf32, #tpu.memory_space<any>>, %arg12: memref<1x1152xf32, #tpu.memory_space<vmem>>, %arg13: memref<1152x32xf32, #tpu.memory_space<any>>, %arg14: memref<1x32xf32, #tpu.memory_space<vmem>>, %arg15: memref<1x32xf32, #tpu.memory_space<vmem>>, %arg16: memref<8x32xf32, #tpu.memory_space<vmem>>, %arg17: memref<8x32xf32, #tpu.memory_space<vmem>>, %arg18: memref<480x1152xf32, #tpu.memory_space<vmem>>, %arg19: memref<1152x32xf32, #tpu.memory_space<vmem>>, %arg20: memref<16x64xf32, #tpu.memory_space<vmem>>, %arg21: memref<2x!tpu.dma_semaphore, #tpu.memory_space<semaphore_mem>>) attributes {dimension_semantics = [], scalar_prefetch = 0 : i64, scratch_operands = 4 : i64, tpu.core_type = #tpu.core_type<tc>} {
    %c0_i32 = arith.constant 0 : i32
    %0 = tpu.memref_slice %arg21[%c0_i32] : memref<2x!tpu.dma_semaphore, #tpu.memory_space<semaphore_mem>> -> memref<1x!tpu.dma_semaphore, #tpu.memory_space<semaphore_mem>>
    %1 = tpu.memref_squeeze %0 : memref<1x!tpu.dma_semaphore, #tpu.memory_space<semaphore_mem>> -> memref<!tpu.dma_semaphore, #tpu.memory_space<semaphore_mem>>
    tpu.enqueue_dma source(%arg11 : memref<480x1152xf32, #tpu.memory_space<any>>) target(%arg18 : memref<480x1152xf32, #tpu.memory_space<vmem>>) target_semaphore(%1 : memref<!tpu.dma_semaphore, #tpu.memory_space<semaphore_mem>>)
    %c1_i32 = arith.constant 1 : i32
    %2 = tpu.memref_slice %arg21[%c1_i32] : memref<2x!tpu.dma_semaphore, #tpu.memory_space<semaphore_mem>> -> memref<1x!tpu.dma_semaphore, #tpu.memory_space<semaphore_mem>>
    %3 = tpu.memref_squeeze %2 : memref<1x!tpu.dma_semaphore, #tpu.memory_space<semaphore_mem>> -> memref<!tpu.dma_semaphore, #tpu.memory_space<semaphore_mem>>
    tpu.enqueue_dma source(%arg13 : memref<1152x32xf32, #tpu.memory_space<any>>) target(%arg19 : memref<1152x32xf32, #tpu.memory_space<vmem>>) target_semaphore(%3 : memref<!tpu.dma_semaphore, #tpu.memory_space<semaphore_mem>>)
    %c0 = arith.constant 0 : index
    %c0_0 = arith.constant 0 : index
    %4 = vector.load %arg2[%c0, %c0_0] : memref<16x40xf32, #tpu.memory_space<vmem>>, vector<16x40xf32>
    %c0_1 = arith.constant 0 : index
    %c0_2 = arith.constant 0 : index
    %5 = vector.load %arg1[%c0_1, %c0_2] : memref<40x10xf32, #tpu.memory_space<vmem>>, vector<40x10xf32>
    %cst = arith.constant dense<0.000000e+00> : vector<16x10xf32>
    %6 = tpu.matmul %4, %5, %cst {dimension_numbers = #tpu.dot_dimension_numbers<[1], [0], [0], [1], [0, 0, 1, 1], [], []>} : vector<16x40xf32>, vector<40x10xf32>, vector<16x10xf32> -> vector<16x10xf32>
    %cst_3 = arith.constant dense<0.000000e+00> : vector<16xf32>
    %7 = vector.multi_reduction <add>, %6, %cst_3 [1] : vector<16x10xf32> to vector<16xf32>
    %8 = vector.shape_cast %7 : vector<16xf32> to vector<16x1xf32>
    %cst_4 = arith.constant 1.000000e+01 : f32
    %9 = vector.broadcast %cst_4 : f32 to vector<16x1xf32>
    %10 = arith.divf %8, %9 : vector<16x1xf32>
    %11 = vector.broadcast %10 : vector<16x1xf32> to vector<16x10xf32>
    %12 = arith.subf %6, %11 : vector<16x10xf32>
    %13 = arith.mulf %12, %12 : vector<16x10xf32>
    %cst_5 = arith.constant dense<0.000000e+00> : vector<16xf32>
    %14 = vector.multi_reduction <add>, %13, %cst_5 [1] : vector<16x10xf32> to vector<16xf32>
    %15 = vector.shape_cast %14 : vector<16xf32> to vector<16x1xf32>
    %cst_6 = arith.constant 1.000000e+01 : f32
    %16 = vector.broadcast %cst_6 : f32 to vector<16x1xf32>
    %17 = arith.divf %15, %16 : vector<16x1xf32>
    %18 = vector.broadcast %10 : vector<16x1xf32> to vector<16x10xf32>
    %19 = arith.subf %6, %18 : vector<16x10xf32>
    %cst_7 = arith.constant 9.99999974E-6 : f32
    %20 = vector.broadcast %cst_7 : f32 to vector<16x1xf32>
    %21 = arith.addf %17, %20 : vector<16x1xf32>
    %22 = math.rsqrt %21 : vector<16x1xf32>
    %23 = vector.broadcast %22 : vector<16x1xf32> to vector<16x10xf32>
    %24 = arith.mulf %19, %23 : vector<16x10xf32>
    %25 = math.absf %24 : vector<16x10xf32>
    %cst_8 = arith.constant 0.000000e+00 : f32
    %26 = vector.broadcast %cst_8 : f32 to vector<16x10xf32>
    %27 = arith.subf %26, %25 : vector<16x10xf32>
    %28 = math.exp %27 : vector<16x10xf32>
    %cst_9 = arith.constant 0.000000e+00 : f32
    %29 = vector.broadcast %cst_9 : f32 to vector<16x10xf32>
    %30 = arith.cmpf oge, %24, %29 : vector<16x10xf32>
    %cst_10 = arith.constant 1.000000e+00 : f32
    %31 = vector.broadcast %cst_10 : f32 to vector<16x10xf32>
    %32 = arith.select %30, %31, %28 : vector<16x10xi1>, vector<16x10xf32>
    %cst_11 = arith.constant 1.000000e+00 : f32
    %33 = vector.broadcast %cst_11 : f32 to vector<16x10xf32>
    %34 = arith.addf %33, %28 : vector<16x10xf32>
    %35 = arith.divf %32, %34 : vector<16x10xf32>
    %cst_12 = arith.constant 1.000000e+00 : f32
    %36 = vector.broadcast %cst_12 : f32 to vector<16x10xf32>
    %37 = arith.addf %36, %35 : vector<16x10xf32>
    %38 = math.log %37 : vector<16x10xf32>
    %39 = arith.mulf %24, %38 : vector<16x10xf32>
    %40 = vector.extract_strided_slice %39 {offsets = [0, 0], sizes = [16, 7], strides = [1, 1]} : vector<16x10xf32> to vector<16x7xf32>
    %cst_13 = arith.constant dense<0.000000e+00> : vector<16xf32>
    %41 = vector.multi_reduction <add>, %40, %cst_13 [1] : vector<16x7xf32> to vector<16xf32>
    %42 = vector.shape_cast %41 : vector<16xf32> to vector<16x1xf32>
    %cst_14 = arith.constant 1.250000e-01 : f32
    %43 = vector.broadcast %cst_14 : f32 to vector<16x1xf32>
    %44 = arith.mulf %42, %43 : vector<16x1xf32>
    %c0_15 = arith.constant 0 : index
    %c0_16 = arith.constant 0 : index
    %45 = vector.load %arg3[%c0_15, %c0_16] : memref<1x64xf32, #tpu.memory_space<vmem>>, vector<1x64xf32>
    %46 = vector.broadcast %44 : vector<16x1xf32> to vector<16x64xf32>
    %47 = vector.broadcast %45 : vector<1x64xf32> to vector<16x64xf32>
    %48 = arith.mulf %46, %47 : vector<16x64xf32>
    %c0_17 = arith.constant 0 : index
    %c0_18 = arith.constant 0 : index
    %49 = vector.load %arg20[%c0_17, %c0_18] : memref<16x64xf32, #tpu.memory_space<vmem>>, vector<16x64xf32>
    tpu.vector_store %arg20[%c0_17, %c0_18], %48 {strides = array<i32>} : memref<16x64xf32, #tpu.memory_space<vmem>>, vector<16x64xf32>,
    %c0_19 = arith.constant 0 : index
    %c0_20 = arith.constant 0 : index
    %50 = vector.load %arg0[%c0_19, %c0_20] : memref<8x8xf32, #tpu.memory_space<vmem>>, vector<8x8xf32>
    %c0_21 = arith.constant 0 : index
    %c0_22 = arith.constant 0 : index
    %51 = vector.load %arg8[%c0_21, %c0_22] : memref<8x480xf32, #tpu.memory_space<vmem>>, vector<8x480xf32>
    %cst_23 = arith.constant dense<0.000000e+00> : vector<8x480xf32>
    %52 = tpu.matmul %50, %51, %cst_23 {dimension_numbers = #tpu.dot_dimension_numbers<[1], [0], [0], [1], [0, 0, 1, 1], [], []>} : vector<8x8xf32>, vector<8x480xf32>, vector<8x480xf32> -> vector<8x480xf32>
    %c0_24 = arith.constant 0 : index
    %c0_25 = arith.constant 0 : index
    %53 = vector.load %arg10[%c0_24, %c0_25] : memref<1x480xf32, #tpu.memory_space<vmem>>, vector<1x480xf32>
    %54 = vector.broadcast %53 : vector<1x480xf32> to vector<8x480xf32>
    %55 = arith.addf %52, %54 : vector<8x480xf32>
    %c0_26 = arith.constant 0 : index
    %c0_27 = arith.constant 0 : index
    %56 = vector.load %arg4[%c0_26, %c0_27] : memref<16x64xf32, #tpu.memory_space<vmem>>, vector<16x64xf32>
    %c0_28 = arith.constant 0 : index
    %c0_29 = arith.constant 0 : index
    %57 = vector.load %arg5[%c0_28, %c0_29] : memref<1x64xf32, #tpu.memory_space<vmem>>, vector<1x64xf32>
    %c0_30 = arith.constant 0 : index
    %c0_31 = arith.constant 0 : index
    %58 = vector.load %arg6[%c0_30, %c0_31] : memref<32x64xf32, #tpu.memory_space<vmem>>, vector<32x64xf32>
    %c0_32 = arith.constant 0 : index
    %c0_33 = arith.constant 0 : index
    %59 = vector.load %arg7[%c0_32, %c0_33] : memref<1x64xf32, #tpu.memory_space<vmem>>, vector<1x64xf32>
    %cst_34 = arith.constant 0.000000e+00 : f32
    %60 = vector.broadcast %cst_34 : f32 to vector<1x16xf32>
    %c0_i32_35 = arith.constant 0 : i32
    %61 = arith.index_cast %c0_i32_35 : i32 to index
    %c0_36 = arith.constant 0 : index
    %62 = vector.load %arg20[%61, %c0_36] : memref<16x64xf32, #tpu.memory_space<vmem>>, vector<1x64xf32>
    %cst_37 = arith.constant dense<0.000000e+00> : vector<1x64xf32>
    %63 = tpu.matmul %60, %56, %cst_37 {dimension_numbers = #tpu.dot_dimension_numbers<[1], [0], [0], [1], [0, 0, 1, 1], [], []>} : vector<1x16xf32>, vector<16x64xf32>, vector<1x64xf32> -> vector<1x64xf32>
    %64 = arith.addf %62, %63 : vector<1x64xf32>
    %65 = arith.addf %64, %57 : vector<1x64xf32>
    %66 = math.absf %65 : vector<1x64xf32>
    %cst_38 = arith.constant 0.000000e+00 : f32
    %67 = vector.broadcast %cst_38 : f32 to vector<1x64xf32>
    %68 = arith.subf %67, %66 : vector<1x64xf32>
    %69 = math.exp %68 : vector<1x64xf32>
    %cst_39 = arith.constant 0.000000e+00 : f32
    %70 = vector.broadcast %cst_39 : f32 to vector<1x64xf32>
    %71 = arith.cmpf oge, %65, %70 : vector<1x64xf32>
    %cst_40 = arith.constant 1.000000e+00 : f32
    %72 = vector.broadcast %cst_40 : f32 to vector<1x64xf32>
    %73 = arith.select %71, %72, %69 : vector<1x64xi1>, vector<1x64xf32>
    %cst_41 = arith.constant 1.000000e+00 : f32
    %74 = vector.broadcast %cst_41 : f32 to vector<1x64xf32>
    %75 = arith.addf %74, %69 : vector<1x64xf32>
    %76 = arith.divf %73, %75 : vector<1x64xf32>
    %77 = vector.extract_strided_slice %76 {offsets = [0, 0], sizes = [1, 16], strides = [1, 1]} : vector<1x64xf32> to vector<1x16xf32>
    %78 = vector.extract_strided_slice %76 {offsets = [0, 16], sizes = [1, 16], strides = [1, 1]} : vector<1x64xf32> to vector<1x16xf32>
    %79 = vector.extract_strided_slice %76 {offsets = [0, 48], sizes = [1, 16], strides = [1, 1]} : vector<1x64xf32> to vector<1x16xf32>
    %80 = vector.extract_strided_slice %65 {offsets = [0, 32], sizes = [1, 16], strides = [1, 1]} : vector<1x64xf32> to vector<1x16xf32>
    %81 = math.tanh %80 : vector<1x16xf32>
    %82 = arith.mulf %78, %60 : vector<1x16xf32>
    %83 = arith.mulf %77, %81 : vector<1x16xf32>
    %84 = arith.addf %82, %83 : vector<1x16xf32>
    %85 = math.tanh %84 : vector<1x16xf32>
    %86 = arith.mulf %79, %85 : vector<1x16xf32>
    %87 = tpu.concatenate %86, %60 in 1 : vector<1x16xf32>, vector<1x16xf32> -> vector<1x32xf32>
    %cst_42 = arith.constant dense<0.000000e+00> : vector<1x64xf32>
    %88 = tpu.matmul %87, %58, %cst_42 {dimension_numbers = #tpu.dot_dimension_numbers<[1], [0], [0], [1], [0, 0, 1, 1], [], []>} : vector<1x32xf32>, vector<32x64xf32>, vector<1x64xf32> -> vector<1x64xf32>
    %89 = arith.addf %88, %59 : vector<1x64xf32>
    %90 = math.absf %89 : vector<1x64xf32>
    %cst_43 = arith.constant 0.000000e+00 : f32
    %91 = vector.broadcast %cst_43 : f32 to vector<1x64xf32>
    %92 = arith.subf %91, %90 : vector<1x64xf32>
    %93 = math.exp %92 : vector<1x64xf32>
    %cst_44 = arith.constant 0.000000e+00 : f32
    %94 = vector.broadcast %cst_44 : f32 to vector<1x64xf32>
    %95 = arith.cmpf oge, %89, %94 : vector<1x64xf32>
    %cst_45 = arith.constant 1.000000e+00 : f32
    %96 = vector.broadcast %cst_45 : f32 to vector<1x64xf32>
    %97 = arith.select %95, %96, %93 : vector<1x64xi1>, vector<1x64xf32>
    %cst_46 = arith.constant 1.000000e+00 : f32
    %98 = vector.broadcast %cst_46 : f32 to vector<1x64xf32>
    %99 = arith.addf %98, %93 : vector<1x64xf32>
    %100 = arith.divf %97, %99 : vector<1x64xf32>
    %101 = vector.extract_strided_slice %100 {offsets = [0, 0], sizes = [1, 16], strides = [1, 1]} : vector<1x64xf32> to vector<1x16xf32>
    %102 = vector.extract_strided_slice %100 {offsets = [0, 16], sizes = [1, 16], strides = [1, 1]} : vector<1x64xf32> to vector<1x16xf32>
    %103 = vector.extract_strided_slice %100 {offsets = [0, 48], sizes = [1, 16], strides = [1, 1]} : vector<1x64xf32> to vector<1x16xf32>
    %104 = vector.extract_strided_slice %89 {offsets = [0, 32], sizes = [1, 16], strides = [1, 1]} : vector<1x64xf32> to vector<1x16xf32>
    %105 = math.tanh %104 : vector<1x16xf32>
    %106 = arith.mulf %102, %60 : vector<1x16xf32>
    %107 = arith.mulf %101, %105 : vector<1x16xf32>
    %108 = arith.addf %106, %107 : vector<1x16xf32>
    %109 = math.tanh %108 : vector<1x16xf32>
    %110 = arith.mulf %103, %109 : vector<1x16xf32>
    %c1_i32_47 = arith.constant 1 : i32
    %111 = arith.index_cast %c1_i32_47 : i32 to index
    %c0_48 = arith.constant 0 : index
    %112 = vector.load %arg20[%111, %c0_48] : memref<16x64xf32, #tpu.memory_space<vmem>>, vector<1x64xf32>
    %cst_49 = arith.constant dense<0.000000e+00> : vector<1x64xf32>
    %113 = tpu.matmul %86, %56, %cst_49 {dimension_numbers = #tpu.dot_dimension_numbers<[1], [0], [0], [1], [0, 0, 1, 1], [], []>} : vector<1x16xf32>, vector<16x64xf32>, vector<1x64xf32> -> vector<1x64xf32>
    %114 = arith.addf %112, %113 : vector<1x64xf32>
    %115 = arith.addf %114, %57 : vector<1x64xf32>
    %116 = math.absf %115 : vector<1x64xf32>
    %cst_50 = arith.constant 0.000000e+00 : f32
    %117 = vector.broadcast %cst_50 : f32 to vector<1x64xf32>
    %118 = arith.subf %117, %116 : vector<1x64xf32>
    %119 = math.exp %118 : vector<1x64xf32>
    %cst_51 = arith.constant 0.000000e+00 : f32
    %120 = vector.broadcast %cst_51 : f32 to vector<1x64xf32>
    %121 = arith.cmpf oge, %115, %120 : vector<1x64xf32>
    %cst_52 = arith.constant 1.000000e+00 : f32
    %122 = vector.broadcast %cst_52 : f32 to vector<1x64xf32>
    %123 = arith.select %121, %122, %119 : vector<1x64xi1>, vector<1x64xf32>
    %cst_53 = arith.constant 1.000000e+00 : f32
    %124 = vector.broadcast %cst_53 : f32 to vector<1x64xf32>
    %125 = arith.addf %124, %119 : vector<1x64xf32>
    %126 = arith.divf %123, %125 : vector<1x64xf32>
    %127 = vector.extract_strided_slice %126 {offsets = [0, 0], sizes = [1, 16], strides = [1, 1]} : vector<1x64xf32> to vector<1x16xf32>
    %128 = vector.extract_strided_slice %126 {offsets = [0, 16], sizes = [1, 16], strides = [1, 1]} : vector<1x64xf32> to vector<1x16xf32>
    %129 = vector.extract_strided_slice %126 {offsets = [0, 48], sizes = [1, 16], strides = [1, 1]} : vector<1x64xf32> to vector<1x16xf32>
    %130 = vector.extract_strided_slice %115 {offsets = [0, 32], sizes = [1, 16], strides = [1, 1]} : vector<1x64xf32> to vector<1x16xf32>
    %131 = math.tanh %130 : vector<1x16xf32>
    %132 = arith.mulf %128, %84 : vector<1x16xf32>
    %133 = arith.mulf %127, %131 : vector<1x16xf32>
    %134 = arith.addf %132, %133 : vector<1x16xf32>
    %135 = math.tanh %134 : vector<1x16xf32>
    %136 = arith.mulf %129, %135 : vector<1x16xf32>
    %137 = tpu.concatenate %136, %110 in 1 : vector<1x16xf32>, vector<1x16xf32> -> vector<1x32xf32>
    %cst_54 = arith.constant dense<0.000000e+00> : vector<1x64xf32>
    %138 = tpu.matmul %137, %58, %cst_54 {dimension_numbers = #tpu.dot_dimension_numbers<[1], [0], [0], [1], [0, 0, 1, 1], [], []>} : vector<1x32xf32>, vector<32x64xf32>, vector<1x64xf32> -> vector<1x64xf32>
    %139 = arith.addf %138, %59 : vector<1x64xf32>
    %140 = math.absf %139 : vector<1x64xf32>
    %cst_55 = arith.constant 0.000000e+00 : f32
    %141 = vector.broadcast %cst_55 : f32 to vector<1x64xf32>
    %142 = arith.subf %141, %140 : vector<1x64xf32>
    %143 = math.exp %142 : vector<1x64xf32>
    %cst_56 = arith.constant 0.000000e+00 : f32
    %144 = vector.broadcast %cst_56 : f32 to vector<1x64xf32>
    %145 = arith.cmpf oge, %139, %144 : vector<1x64xf32>
    %cst_57 = arith.constant 1.000000e+00 : f32
    %146 = vector.broadcast %cst_57 : f32 to vector<1x64xf32>
    %147 = arith.select %145, %146, %143 : vector<1x64xi1>, vector<1x64xf32>
    %cst_58 = arith.constant 1.000000e+00 : f32
    %148 = vector.broadcast %cst_58 : f32 to vector<1x64xf32>
    %149 = arith.addf %148, %143 : vector<1x64xf32>
    %150 = arith.divf %147, %149 : vector<1x64xf32>
    %151 = vector.extract_strided_slice %150 {offsets = [0, 0], sizes = [1, 16], strides = [1, 1]} : vector<1x64xf32> to vector<1x16xf32>
    %152 = vector.extract_strided_slice %150 {offsets = [0, 16], sizes = [1, 16], strides = [1, 1]} : vector<1x64xf32> to vector<1x16xf32>
    %153 = vector.extract_strided_slice %150 {offsets = [0, 48], sizes = [1, 16], strides = [1, 1]} : vector<1x64xf32> to vector<1x16xf32>
    %154 = vector.extract_strided_slice %139 {offsets = [0, 32], sizes = [1, 16], strides = [1, 1]} : vector<1x64xf32> to vector<1x16xf32>
    %155 = math.tanh %154 : vector<1x16xf32>
    %156 = arith.mulf %152, %108 : vector<1x16xf32>
    %157 = arith.mulf %151, %155 : vector<1x16xf32>
    %158 = arith.addf %156, %157 : vector<1x16xf32>
    %159 = math.tanh %158 : vector<1x16xf32>
    %160 = arith.mulf %153, %159 : vector<1x16xf32>
    %c2_i32 = arith.constant 2 : i32
    %161 = arith.index_cast %c2_i32 : i32 to index
    %c0_59 = arith.constant 0 : index
    %162 = vector.load %arg20[%161, %c0_59] : memref<16x64xf32, #tpu.memory_space<vmem>>, vector<1x64xf32>
    %cst_60 = arith.constant dense<0.000000e+00> : vector<1x64xf32>
    %163 = tpu.matmul %136, %56, %cst_60 {dimension_numbers = #tpu.dot_dimension_numbers<[1], [0], [0], [1], [0, 0, 1, 1], [], []>} : vector<1x16xf32>, vector<16x64xf32>, vector<1x64xf32> -> vector<1x64xf32>
    %164 = arith.addf %162, %163 : vector<1x64xf32>
    %165 = arith.addf %164, %57 : vector<1x64xf32>
    %166 = math.absf %165 : vector<1x64xf32>
    %cst_61 = arith.constant 0.000000e+00 : f32
    %167 = vector.broadcast %cst_61 : f32 to vector<1x64xf32>
    %168 = arith.subf %167, %166 : vector<1x64xf32>
    %169 = math.exp %168 : vector<1x64xf32>
    %cst_62 = arith.constant 0.000000e+00 : f32
    %170 = vector.broadcast %cst_62 : f32 to vector<1x64xf32>
    %171 = arith.cmpf oge, %165, %170 : vector<1x64xf32>
    %cst_63 = arith.constant 1.000000e+00 : f32
    %172 = vector.broadcast %cst_63 : f32 to vector<1x64xf32>
    %173 = arith.select %171, %172, %169 : vector<1x64xi1>, vector<1x64xf32>
    %cst_64 = arith.constant 1.000000e+00 : f32
    %174 = vector.broadcast %cst_64 : f32 to vector<1x64xf32>
    %175 = arith.addf %174, %169 : vector<1x64xf32>
    %176 = arith.divf %173, %175 : vector<1x64xf32>
    %177 = vector.extract_strided_slice %176 {offsets = [0, 0], sizes = [1, 16], strides = [1, 1]} : vector<1x64xf32> to vector<1x16xf32>
    %178 = vector.extract_strided_slice %176 {offsets = [0, 16], sizes = [1, 16], strides = [1, 1]} : vector<1x64xf32> to vector<1x16xf32>
    %179 = vector.extract_strided_slice %176 {offsets = [0, 48], sizes = [1, 16], strides = [1, 1]} : vector<1x64xf32> to vector<1x16xf32>
    %180 = vector.extract_strided_slice %165 {offsets = [0, 32], sizes = [1, 16], strides = [1, 1]} : vector<1x64xf32> to vector<1x16xf32>
    %181 = math.tanh %180 : vector<1x16xf32>
    %182 = arith.mulf %178, %134 : vector<1x16xf32>
    %183 = arith.mulf %177, %181 : vector<1x16xf32>
    %184 = arith.addf %182, %183 : vector<1x16xf32>
    %185 = math.tanh %184 : vector<1x16xf32>
    %186 = arith.mulf %179, %185 : vector<1x16xf32>
    %187 = tpu.concatenate %186, %160 in 1 : vector<1x16xf32>, vector<1x16xf32> -> vector<1x32xf32>
    %cst_65 = arith.constant dense<0.000000e+00> : vector<1x64xf32>
    %188 = tpu.matmul %187, %58, %cst_65 {dimension_numbers = #tpu.dot_dimension_numbers<[1], [0], [0], [1], [0, 0, 1, 1], [], []>} : vector<1x32xf32>, vector<32x64xf32>, vector<1x64xf32> -> vector<1x64xf32>
    %189 = arith.addf %188, %59 : vector<1x64xf32>
    %190 = math.absf %189 : vector<1x64xf32>
    %cst_66 = arith.constant 0.000000e+00 : f32
    %191 = vector.broadcast %cst_66 : f32 to vector<1x64xf32>
    %192 = arith.subf %191, %190 : vector<1x64xf32>
    %193 = math.exp %192 : vector<1x64xf32>
    %cst_67 = arith.constant 0.000000e+00 : f32
    %194 = vector.broadcast %cst_67 : f32 to vector<1x64xf32>
    %195 = arith.cmpf oge, %189, %194 : vector<1x64xf32>
    %cst_68 = arith.constant 1.000000e+00 : f32
    %196 = vector.broadcast %cst_68 : f32 to vector<1x64xf32>
    %197 = arith.select %195, %196, %193 : vector<1x64xi1>, vector<1x64xf32>
    %cst_69 = arith.constant 1.000000e+00 : f32
    %198 = vector.broadcast %cst_69 : f32 to vector<1x64xf32>
    %199 = arith.addf %198, %193 : vector<1x64xf32>
    %200 = arith.divf %197, %199 : vector<1x64xf32>
    %201 = vector.extract_strided_slice %200 {offsets = [0, 0], sizes = [1, 16], strides = [1, 1]} : vector<1x64xf32> to vector<1x16xf32>
    %202 = vector.extract_strided_slice %200 {offsets = [0, 16], sizes = [1, 16], strides = [1, 1]} : vector<1x64xf32> to vector<1x16xf32>
    %203 = vector.extract_strided_slice %200 {offsets = [0, 48], sizes = [1, 16], strides = [1, 1]} : vector<1x64xf32> to vector<1x16xf32>
    %204 = vector.extract_strided_slice %189 {offsets = [0, 32], sizes = [1, 16], strides = [1, 1]} : vector<1x64xf32> to vector<1x16xf32>
    %205 = math.tanh %204 : vector<1x16xf32>
    %206 = arith.mulf %202, %158 : vector<1x16xf32>
    %207 = arith.mulf %201, %205 : vector<1x16xf32>
    %208 = arith.addf %206, %207 : vector<1x16xf32>
    %209 = math.tanh %208 : vector<1x16xf32>
    %210 = arith.mulf %203, %209 : vector<1x16xf32>
    %c3_i32 = arith.constant 3 : i32
    %211 = arith.index_cast %c3_i32 : i32 to index
    %c0_70 = arith.constant 0 : index
    %212 = vector.load %arg20[%211, %c0_70] : memref<16x64xf32, #tpu.memory_space<vmem>>, vector<1x64xf32>
    %cst_71 = arith.constant dense<0.000000e+00> : vector<1x64xf32>
    %213 = tpu.matmul %186, %56, %cst_71 {dimension_numbers = #tpu.dot_dimension_numbers<[1], [0], [0], [1], [0, 0, 1, 1], [], []>} : vector<1x16xf32>, vector<16x64xf32>, vector<1x64xf32> -> vector<1x64xf32>
    %214 = arith.addf %212, %213 : vector<1x64xf32>
    %215 = arith.addf %214, %57 : vector<1x64xf32>
    %216 = math.absf %215 : vector<1x64xf32>
    %cst_72 = arith.constant 0.000000e+00 : f32
    %217 = vector.broadcast %cst_72 : f32 to vector<1x64xf32>
    %218 = arith.subf %217, %216 : vector<1x64xf32>
    %219 = math.exp %218 : vector<1x64xf32>
    %cst_73 = arith.constant 0.000000e+00 : f32
    %220 = vector.broadcast %cst_73 : f32 to vector<1x64xf32>
    %221 = arith.cmpf oge, %215, %220 : vector<1x64xf32>
    %cst_74 = arith.constant 1.000000e+00 : f32
    %222 = vector.broadcast %cst_74 : f32 to vector<1x64xf32>
    %223 = arith.select %221, %222, %219 : vector<1x64xi1>, vector<1x64xf32>
    %cst_75 = arith.constant 1.000000e+00 : f32
    %224 = vector.broadcast %cst_75 : f32 to vector<1x64xf32>
    %225 = arith.addf %224, %219 : vector<1x64xf32>
    %226 = arith.divf %223, %225 : vector<1x64xf32>
    %227 = vector.extract_strided_slice %226 {offsets = [0, 0], sizes = [1, 16], strides = [1, 1]} : vector<1x64xf32> to vector<1x16xf32>
    %228 = vector.extract_strided_slice %226 {offsets = [0, 16], sizes = [1, 16], strides = [1, 1]} : vector<1x64xf32> to vector<1x16xf32>
    %229 = vector.extract_strided_slice %226 {offsets = [0, 48], sizes = [1, 16], strides = [1, 1]} : vector<1x64xf32> to vector<1x16xf32>
    %230 = vector.extract_strided_slice %215 {offsets = [0, 32], sizes = [1, 16], strides = [1, 1]} : vector<1x64xf32> to vector<1x16xf32>
    %231 = math.tanh %230 : vector<1x16xf32>
    %232 = arith.mulf %228, %184 : vector<1x16xf32>
    %233 = arith.mulf %227, %231 : vector<1x16xf32>
    %234 = arith.addf %232, %233 : vector<1x16xf32>
    %235 = math.tanh %234 : vector<1x16xf32>
    %236 = arith.mulf %229, %235 : vector<1x16xf32>
    %237 = tpu.concatenate %236, %210 in 1 : vector<1x16xf32>, vector<1x16xf32> -> vector<1x32xf32>
    %cst_76 = arith.constant dense<0.000000e+00> : vector<1x64xf32>
    %238 = tpu.matmul %237, %58, %cst_76 {dimension_numbers = #tpu.dot_dimension_numbers<[1], [0], [0], [1], [0, 0, 1, 1], [], []>} : vector<1x32xf32>, vector<32x64xf32>, vector<1x64xf32> -> vector<1x64xf32>
    %239 = arith.addf %238, %59 : vector<1x64xf32>
    %240 = math.absf %239 : vector<1x64xf32>
    %cst_77 = arith.constant 0.000000e+00 : f32
    %241 = vector.broadcast %cst_77 : f32 to vector<1x64xf32>
    %242 = arith.subf %241, %240 : vector<1x64xf32>
    %243 = math.exp %242 : vector<1x64xf32>
    %cst_78 = arith.constant 0.000000e+00 : f32
    %244 = vector.broadcast %cst_78 : f32 to vector<1x64xf32>
    %245 = arith.cmpf oge, %239, %244 : vector<1x64xf32>
    %cst_79 = arith.constant 1.000000e+00 : f32
    %246 = vector.broadcast %cst_79 : f32 to vector<1x64xf32>
    %247 = arith.select %245, %246, %243 : vector<1x64xi1>, vector<1x64xf32>
    %cst_80 = arith.constant 1.000000e+00 : f32
    %248 = vector.broadcast %cst_80 : f32 to vector<1x64xf32>
    %249 = arith.addf %248, %243 : vector<1x64xf32>
    %250 = arith.divf %247, %249 : vector<1x64xf32>
    %251 = vector.extract_strided_slice %250 {offsets = [0, 0], sizes = [1, 16], strides = [1, 1]} : vector<1x64xf32> to vector<1x16xf32>
    %252 = vector.extract_strided_slice %250 {offsets = [0, 16], sizes = [1, 16], strides = [1, 1]} : vector<1x64xf32> to vector<1x16xf32>
    %253 = vector.extract_strided_slice %250 {offsets = [0, 48], sizes = [1, 16], strides = [1, 1]} : vector<1x64xf32> to vector<1x16xf32>
    %254 = vector.extract_strided_slice %239 {offsets = [0, 32], sizes = [1, 16], strides = [1, 1]} : vector<1x64xf32> to vector<1x16xf32>
    %255 = math.tanh %254 : vector<1x16xf32>
    %256 = arith.mulf %252, %208 : vector<1x16xf32>
    %257 = arith.mulf %251, %255 : vector<1x16xf32>
    %258 = arith.addf %256, %257 : vector<1x16xf32>
    %259 = math.tanh %258 : vector<1x16xf32>
    %260 = arith.mulf %253, %259 : vector<1x16xf32>
    %c4_i32 = arith.constant 4 : i32
    %261 = arith.index_cast %c4_i32 : i32 to index
    %c0_81 = arith.constant 0 : index
    %262 = vector.load %arg20[%261, %c0_81] : memref<16x64xf32, #tpu.memory_space<vmem>>, vector<1x64xf32>
    %cst_82 = arith.constant dense<0.000000e+00> : vector<1x64xf32>
    %263 = tpu.matmul %236, %56, %cst_82 {dimension_numbers = #tpu.dot_dimension_numbers<[1], [0], [0], [1], [0, 0, 1, 1], [], []>} : vector<1x16xf32>, vector<16x64xf32>, vector<1x64xf32> -> vector<1x64xf32>
    %264 = arith.addf %262, %263 : vector<1x64xf32>
    %265 = arith.addf %264, %57 : vector<1x64xf32>
    %266 = math.absf %265 : vector<1x64xf32>
    %cst_83 = arith.constant 0.000000e+00 : f32
    %267 = vector.broadcast %cst_83 : f32 to vector<1x64xf32>
    %268 = arith.subf %267, %266 : vector<1x64xf32>
    %269 = math.exp %268 : vector<1x64xf32>
    %cst_84 = arith.constant 0.000000e+00 : f32
    %270 = vector.broadcast %cst_84 : f32 to vector<1x64xf32>
    %271 = arith.cmpf oge, %265, %270 : vector<1x64xf32>
    %cst_85 = arith.constant 1.000000e+00 : f32
    %272 = vector.broadcast %cst_85 : f32 to vector<1x64xf32>
    %273 = arith.select %271, %272, %269 : vector<1x64xi1>, vector<1x64xf32>
    %cst_86 = arith.constant 1.000000e+00 : f32
    %274 = vector.broadcast %cst_86 : f32 to vector<1x64xf32>
    %275 = arith.addf %274, %269 : vector<1x64xf32>
    %276 = arith.divf %273, %275 : vector<1x64xf32>
    %277 = vector.extract_strided_slice %276 {offsets = [0, 0], sizes = [1, 16], strides = [1, 1]} : vector<1x64xf32> to vector<1x16xf32>
    %278 = vector.extract_strided_slice %276 {offsets = [0, 16], sizes = [1, 16], strides = [1, 1]} : vector<1x64xf32> to vector<1x16xf32>
    %279 = vector.extract_strided_slice %276 {offsets = [0, 48], sizes = [1, 16], strides = [1, 1]} : vector<1x64xf32> to vector<1x16xf32>
    %280 = vector.extract_strided_slice %265 {offsets = [0, 32], sizes = [1, 16], strides = [1, 1]} : vector<1x64xf32> to vector<1x16xf32>
    %281 = math.tanh %280 : vector<1x16xf32>
    %282 = arith.mulf %278, %234 : vector<1x16xf32>
    %283 = arith.mulf %277, %281 : vector<1x16xf32>
    %284 = arith.addf %282, %283 : vector<1x16xf32>
    %285 = math.tanh %284 : vector<1x16xf32>
    %286 = arith.mulf %279, %285 : vector<1x16xf32>
    %287 = tpu.concatenate %286, %260 in 1 : vector<1x16xf32>, vector<1x16xf32> -> vector<1x32xf32>
    %cst_87 = arith.constant dense<0.000000e+00> : vector<1x64xf32>
    %288 = tpu.matmul %287, %58, %cst_87 {dimension_numbers = #tpu.dot_dimension_numbers<[1], [0], [0], [1], [0, 0, 1, 1], [], []>} : vector<1x32xf32>, vector<32x64xf32>, vector<1x64xf32> -> vector<1x64xf32>
    %289 = arith.addf %288, %59 : vector<1x64xf32>
    %290 = math.absf %289 : vector<1x64xf32>
    %cst_88 = arith.constant 0.000000e+00 : f32
    %291 = vector.broadcast %cst_88 : f32 to vector<1x64xf32>
    %292 = arith.subf %291, %290 : vector<1x64xf32>
    %293 = math.exp %292 : vector<1x64xf32>
    %cst_89 = arith.constant 0.000000e+00 : f32
    %294 = vector.broadcast %cst_89 : f32 to vector<1x64xf32>
    %295 = arith.cmpf oge, %289, %294 : vector<1x64xf32>
    %cst_90 = arith.constant 1.000000e+00 : f32
    %296 = vector.broadcast %cst_90 : f32 to vector<1x64xf32>
    %297 = arith.select %295, %296, %293 : vector<1x64xi1>, vector<1x64xf32>
    %cst_91 = arith.constant 1.000000e+00 : f32
    %298 = vector.broadcast %cst_91 : f32 to vector<1x64xf32>
    %299 = arith.addf %298, %293 : vector<1x64xf32>
    %300 = arith.divf %297, %299 : vector<1x64xf32>
    %301 = vector.extract_strided_slice %300 {offsets = [0, 0], sizes = [1, 16], strides = [1, 1]} : vector<1x64xf32> to vector<1x16xf32>
    %302 = vector.extract_strided_slice %300 {offsets = [0, 16], sizes = [1, 16], strides = [1, 1]} : vector<1x64xf32> to vector<1x16xf32>
    %303 = vector.extract_strided_slice %300 {offsets = [0, 48], sizes = [1, 16], strides = [1, 1]} : vector<1x64xf32> to vector<1x16xf32>
    %304 = vector.extract_strided_slice %289 {offsets = [0, 32], sizes = [1, 16], strides = [1, 1]} : vector<1x64xf32> to vector<1x16xf32>
    %305 = math.tanh %304 : vector<1x16xf32>
    %306 = arith.mulf %302, %258 : vector<1x16xf32>
    %307 = arith.mulf %301, %305 : vector<1x16xf32>
    %308 = arith.addf %306, %307 : vector<1x16xf32>
    %309 = math.tanh %308 : vector<1x16xf32>
    %310 = arith.mulf %303, %309 : vector<1x16xf32>
    %c5_i32 = arith.constant 5 : i32
    %311 = arith.index_cast %c5_i32 : i32 to index
    %c0_92 = arith.constant 0 : index
    %312 = vector.load %arg20[%311, %c0_92] : memref<16x64xf32, #tpu.memory_space<vmem>>, vector<1x64xf32>
    %cst_93 = arith.constant dense<0.000000e+00> : vector<1x64xf32>
    %313 = tpu.matmul %286, %56, %cst_93 {dimension_numbers = #tpu.dot_dimension_numbers<[1], [0], [0], [1], [0, 0, 1, 1], [], []>} : vector<1x16xf32>, vector<16x64xf32>, vector<1x64xf32> -> vector<1x64xf32>
    %314 = arith.addf %312, %313 : vector<1x64xf32>
    %315 = arith.addf %314, %57 : vector<1x64xf32>
    %316 = math.absf %315 : vector<1x64xf32>
    %cst_94 = arith.constant 0.000000e+00 : f32
    %317 = vector.broadcast %cst_94 : f32 to vector<1x64xf32>
    %318 = arith.subf %317, %316 : vector<1x64xf32>
    %319 = math.exp %318 : vector<1x64xf32>
    %cst_95 = arith.constant 0.000000e+00 : f32
    %320 = vector.broadcast %cst_95 : f32 to vector<1x64xf32>
    %321 = arith.cmpf oge, %315, %320 : vector<1x64xf32>
    %cst_96 = arith.constant 1.000000e+00 : f32
    %322 = vector.broadcast %cst_96 : f32 to vector<1x64xf32>
    %323 = arith.select %321, %322, %319 : vector<1x64xi1>, vector<1x64xf32>
    %cst_97 = arith.constant 1.000000e+00 : f32
    %324 = vector.broadcast %cst_97 : f32 to vector<1x64xf32>
    %325 = arith.addf %324, %319 : vector<1x64xf32>
    %326 = arith.divf %323, %325 : vector<1x64xf32>
    %327 = vector.extract_strided_slice %326 {offsets = [0, 0], sizes = [1, 16], strides = [1, 1]} : vector<1x64xf32> to vector<1x16xf32>
    %328 = vector.extract_strided_slice %326 {offsets = [0, 16], sizes = [1, 16], strides = [1, 1]} : vector<1x64xf32> to vector<1x16xf32>
    %329 = vector.extract_strided_slice %326 {offsets = [0, 48], sizes = [1, 16], strides = [1, 1]} : vector<1x64xf32> to vector<1x16xf32>
    %330 = vector.extract_strided_slice %315 {offsets = [0, 32], sizes = [1, 16], strides = [1, 1]} : vector<1x64xf32> to vector<1x16xf32>
    %331 = math.tanh %330 : vector<1x16xf32>
    %332 = arith.mulf %328, %284 : vector<1x16xf32>
    %333 = arith.mulf %327, %331 : vector<1x16xf32>
    %334 = arith.addf %332, %333 : vector<1x16xf32>
    %335 = math.tanh %334 : vector<1x16xf32>
    %336 = arith.mulf %329, %335 : vector<1x16xf32>
    %337 = tpu.concatenate %336, %310 in 1 : vector<1x16xf32>, vector<1x16xf32> -> vector<1x32xf32>
    %cst_98 = arith.constant dense<0.000000e+00> : vector<1x64xf32>
    %338 = tpu.matmul %337, %58, %cst_98 {dimension_numbers = #tpu.dot_dimension_numbers<[1], [0], [0], [1], [0, 0, 1, 1], [], []>} : vector<1x32xf32>, vector<32x64xf32>, vector<1x64xf32> -> vector<1x64xf32>
    %339 = arith.addf %338, %59 : vector<1x64xf32>
    %340 = math.absf %339 : vector<1x64xf32>
    %cst_99 = arith.constant 0.000000e+00 : f32
    %341 = vector.broadcast %cst_99 : f32 to vector<1x64xf32>
    %342 = arith.subf %341, %340 : vector<1x64xf32>
    %343 = math.exp %342 : vector<1x64xf32>
    %cst_100 = arith.constant 0.000000e+00 : f32
    %344 = vector.broadcast %cst_100 : f32 to vector<1x64xf32>
    %345 = arith.cmpf oge, %339, %344 : vector<1x64xf32>
    %cst_101 = arith.constant 1.000000e+00 : f32
    %346 = vector.broadcast %cst_101 : f32 to vector<1x64xf32>
    %347 = arith.select %345, %346, %343 : vector<1x64xi1>, vector<1x64xf32>
    %cst_102 = arith.constant 1.000000e+00 : f32
    %348 = vector.broadcast %cst_102 : f32 to vector<1x64xf32>
    %349 = arith.addf %348, %343 : vector<1x64xf32>
    %350 = arith.divf %347, %349 : vector<1x64xf32>
    %351 = vector.extract_strided_slice %350 {offsets = [0, 0], sizes = [1, 16], strides = [1, 1]} : vector<1x64xf32> to vector<1x16xf32>
    %352 = vector.extract_strided_slice %350 {offsets = [0, 16], sizes = [1, 16], strides = [1, 1]} : vector<1x64xf32> to vector<1x16xf32>
    %353 = vector.extract_strided_slice %350 {offsets = [0, 48], sizes = [1, 16], strides = [1, 1]} : vector<1x64xf32> to vector<1x16xf32>
    %354 = vector.extract_strided_slice %339 {offsets = [0, 32], sizes = [1, 16], strides = [1, 1]} : vector<1x64xf32> to vector<1x16xf32>
    %355 = math.tanh %354 : vector<1x16xf32>
    %356 = arith.mulf %352, %308 : vector<1x16xf32>
    %357 = arith.mulf %351, %355 : vector<1x16xf32>
    %358 = arith.addf %356, %357 : vector<1x16xf32>
    %359 = math.tanh %358 : vector<1x16xf32>
    %360 = arith.mulf %353, %359 : vector<1x16xf32>
    %c6_i32 = arith.constant 6 : i32
    %361 = arith.index_cast %c6_i32 : i32 to index
    %c0_103 = arith.constant 0 : index
    %362 = vector.load %arg20[%361, %c0_103] : memref<16x64xf32, #tpu.memory_space<vmem>>, vector<1x64xf32>
    %cst_104 = arith.constant dense<0.000000e+00> : vector<1x64xf32>
    %363 = tpu.matmul %336, %56, %cst_104 {dimension_numbers = #tpu.dot_dimension_numbers<[1], [0], [0], [1], [0, 0, 1, 1], [], []>} : vector<1x16xf32>, vector<16x64xf32>, vector<1x64xf32> -> vector<1x64xf32>
    %364 = arith.addf %362, %363 : vector<1x64xf32>
    %365 = arith.addf %364, %57 : vector<1x64xf32>
    %366 = math.absf %365 : vector<1x64xf32>
    %cst_105 = arith.constant 0.000000e+00 : f32
    %367 = vector.broadcast %cst_105 : f32 to vector<1x64xf32>
    %368 = arith.subf %367, %366 : vector<1x64xf32>
    %369 = math.exp %368 : vector<1x64xf32>
    %cst_106 = arith.constant 0.000000e+00 : f32
    %370 = vector.broadcast %cst_106 : f32 to vector<1x64xf32>
    %371 = arith.cmpf oge, %365, %370 : vector<1x64xf32>
    %cst_107 = arith.constant 1.000000e+00 : f32
    %372 = vector.broadcast %cst_107 : f32 to vector<1x64xf32>
    %373 = arith.select %371, %372, %369 : vector<1x64xi1>, vector<1x64xf32>
    %cst_108 = arith.constant 1.000000e+00 : f32
    %374 = vector.broadcast %cst_108 : f32 to vector<1x64xf32>
    %375 = arith.addf %374, %369 : vector<1x64xf32>
    %376 = arith.divf %373, %375 : vector<1x64xf32>
    %377 = vector.extract_strided_slice %376 {offsets = [0, 0], sizes = [1, 16], strides = [1, 1]} : vector<1x64xf32> to vector<1x16xf32>
    %378 = vector.extract_strided_slice %376 {offsets = [0, 16], sizes = [1, 16], strides = [1, 1]} : vector<1x64xf32> to vector<1x16xf32>
    %379 = vector.extract_strided_slice %376 {offsets = [0, 48], sizes = [1, 16], strides = [1, 1]} : vector<1x64xf32> to vector<1x16xf32>
    %380 = vector.extract_strided_slice %365 {offsets = [0, 32], sizes = [1, 16], strides = [1, 1]} : vector<1x64xf32> to vector<1x16xf32>
    %381 = math.tanh %380 : vector<1x16xf32>
    %382 = arith.mulf %378, %334 : vector<1x16xf32>
    %383 = arith.mulf %377, %381 : vector<1x16xf32>
    %384 = arith.addf %382, %383 : vector<1x16xf32>
    %385 = math.tanh %384 : vector<1x16xf32>
    %386 = arith.mulf %379, %385 : vector<1x16xf32>
    %387 = tpu.concatenate %386, %360 in 1 : vector<1x16xf32>, vector<1x16xf32> -> vector<1x32xf32>
    %cst_109 = arith.constant dense<0.000000e+00> : vector<1x64xf32>
    %388 = tpu.matmul %387, %58, %cst_109 {dimension_numbers = #tpu.dot_dimension_numbers<[1], [0], [0], [1], [0, 0, 1, 1], [], []>} : vector<1x32xf32>, vector<32x64xf32>, vector<1x64xf32> -> vector<1x64xf32>
    %389 = arith.addf %388, %59 : vector<1x64xf32>
    %390 = math.absf %389 : vector<1x64xf32>
    %cst_110 = arith.constant 0.000000e+00 : f32
    %391 = vector.broadcast %cst_110 : f32 to vector<1x64xf32>
    %392 = arith.subf %391, %390 : vector<1x64xf32>
    %393 = math.exp %392 : vector<1x64xf32>
    %cst_111 = arith.constant 0.000000e+00 : f32
    %394 = vector.broadcast %cst_111 : f32 to vector<1x64xf32>
    %395 = arith.cmpf oge, %389, %394 : vector<1x64xf32>
    %cst_112 = arith.constant 1.000000e+00 : f32
    %396 = vector.broadcast %cst_112 : f32 to vector<1x64xf32>
    %397 = arith.select %395, %396, %393 : vector<1x64xi1>, vector<1x64xf32>
    %cst_113 = arith.constant 1.000000e+00 : f32
    %398 = vector.broadcast %cst_113 : f32 to vector<1x64xf32>
    %399 = arith.addf %398, %393 : vector<1x64xf32>
    %400 = arith.divf %397, %399 : vector<1x64xf32>
    %401 = vector.extract_strided_slice %400 {offsets = [0, 0], sizes = [1, 16], strides = [1, 1]} : vector<1x64xf32> to vector<1x16xf32>
    %402 = vector.extract_strided_slice %400 {offsets = [0, 16], sizes = [1, 16], strides = [1, 1]} : vector<1x64xf32> to vector<1x16xf32>
    %403 = vector.extract_strided_slice %400 {offsets = [0, 48], sizes = [1, 16], strides = [1, 1]} : vector<1x64xf32> to vector<1x16xf32>
    %404 = vector.extract_strided_slice %389 {offsets = [0, 32], sizes = [1, 16], strides = [1, 1]} : vector<1x64xf32> to vector<1x16xf32>
    %405 = math.tanh %404 : vector<1x16xf32>
    %406 = arith.mulf %402, %358 : vector<1x16xf32>
    %407 = arith.mulf %401, %405 : vector<1x16xf32>
    %408 = arith.addf %406, %407 : vector<1x16xf32>
    %409 = math.tanh %408 : vector<1x16xf32>
    %410 = arith.mulf %403, %409 : vector<1x16xf32>
    %c7_i32 = arith.constant 7 : i32
    %411 = arith.index_cast %c7_i32 : i32 to index
    %c0_114 = arith.constant 0 : index
    %412 = vector.load %arg20[%411, %c0_114] : memref<16x64xf32, #tpu.memory_space<vmem>>, vector<1x64xf32>
    %cst_115 = arith.constant dense<0.000000e+00> : vector<1x64xf32>
    %413 = tpu.matmul %386, %56, %cst_115 {dimension_numbers = #tpu.dot_dimension_numbers<[1], [0], [0], [1], [0, 0, 1, 1], [], []>} : vector<1x16xf32>, vector<16x64xf32>, vector<1x64xf32> -> vector<1x64xf32>
    %414 = arith.addf %412, %413 : vector<1x64xf32>
    %415 = arith.addf %414, %57 : vector<1x64xf32>
    %416 = math.absf %415 : vector<1x64xf32>
    %cst_116 = arith.constant 0.000000e+00 : f32
    %417 = vector.broadcast %cst_116 : f32 to vector<1x64xf32>
    %418 = arith.subf %417, %416 : vector<1x64xf32>
    %419 = math.exp %418 : vector<1x64xf32>
    %cst_117 = arith.constant 0.000000e+00 : f32
    %420 = vector.broadcast %cst_117 : f32 to vector<1x64xf32>
    %421 = arith.cmpf oge, %415, %420 : vector<1x64xf32>
    %cst_118 = arith.constant 1.000000e+00 : f32
    %422 = vector.broadcast %cst_118 : f32 to vector<1x64xf32>
    %423 = arith.select %421, %422, %419 : vector<1x64xi1>, vector<1x64xf32>
    %cst_119 = arith.constant 1.000000e+00 : f32
    %424 = vector.broadcast %cst_119 : f32 to vector<1x64xf32>
    %425 = arith.addf %424, %419 : vector<1x64xf32>
    %426 = arith.divf %423, %425 : vector<1x64xf32>
    %427 = vector.extract_strided_slice %426 {offsets = [0, 0], sizes = [1, 16], strides = [1, 1]} : vector<1x64xf32> to vector<1x16xf32>
    %428 = vector.extract_strided_slice %426 {offsets = [0, 16], sizes = [1, 16], strides = [1, 1]} : vector<1x64xf32> to vector<1x16xf32>
    %429 = vector.extract_strided_slice %426 {offsets = [0, 48], sizes = [1, 16], strides = [1, 1]} : vector<1x64xf32> to vector<1x16xf32>
    %430 = vector.extract_strided_slice %415 {offsets = [0, 32], sizes = [1, 16], strides = [1, 1]} : vector<1x64xf32> to vector<1x16xf32>
    %431 = math.tanh %430 : vector<1x16xf32>
    %432 = arith.mulf %428, %384 : vector<1x16xf32>
    %433 = arith.mulf %427, %431 : vector<1x16xf32>
    %434 = arith.addf %432, %433 : vector<1x16xf32>
    %435 = math.tanh %434 : vector<1x16xf32>
    %436 = arith.mulf %429, %435 : vector<1x16xf32>
    %437 = tpu.concatenate %436, %410 in 1 : vector<1x16xf32>, vector<1x16xf32> -> vector<1x32xf32>
    %cst_120 = arith.constant dense<0.000000e+00> : vector<1x64xf32>
    %438 = tpu.matmul %437, %58, %cst_120 {dimension_numbers = #tpu.dot_dimension_numbers<[1], [0], [0], [1], [0, 0, 1, 1], [], []>} : vector<1x32xf32>, vector<32x64xf32>, vector<1x64xf32> -> vector<1x64xf32>
    %439 = arith.addf %438, %59 : vector<1x64xf32>
    %440 = math.absf %439 : vector<1x64xf32>
    %cst_121 = arith.constant 0.000000e+00 : f32
    %441 = vector.broadcast %cst_121 : f32 to vector<1x64xf32>
    %442 = arith.subf %441, %440 : vector<1x64xf32>
    %443 = math.exp %442 : vector<1x64xf32>
    %cst_122 = arith.constant 0.000000e+00 : f32
    %444 = vector.broadcast %cst_122 : f32 to vector<1x64xf32>
    %445 = arith.cmpf oge, %439, %444 : vector<1x64xf32>
    %cst_123 = arith.constant 1.000000e+00 : f32
    %446 = vector.broadcast %cst_123 : f32 to vector<1x64xf32>
    %447 = arith.select %445, %446, %443 : vector<1x64xi1>, vector<1x64xf32>
    %cst_124 = arith.constant 1.000000e+00 : f32
    %448 = vector.broadcast %cst_124 : f32 to vector<1x64xf32>
    %449 = arith.addf %448, %443 : vector<1x64xf32>
    %450 = arith.divf %447, %449 : vector<1x64xf32>
    %451 = vector.extract_strided_slice %450 {offsets = [0, 0], sizes = [1, 16], strides = [1, 1]} : vector<1x64xf32> to vector<1x16xf32>
    %452 = vector.extract_strided_slice %450 {offsets = [0, 16], sizes = [1, 16], strides = [1, 1]} : vector<1x64xf32> to vector<1x16xf32>
    %453 = vector.extract_strided_slice %450 {offsets = [0, 48], sizes = [1, 16], strides = [1, 1]} : vector<1x64xf32> to vector<1x16xf32>
    %454 = vector.extract_strided_slice %439 {offsets = [0, 32], sizes = [1, 16], strides = [1, 1]} : vector<1x64xf32> to vector<1x16xf32>
    %455 = math.tanh %454 : vector<1x16xf32>
    %456 = arith.mulf %452, %408 : vector<1x16xf32>
    %457 = arith.mulf %451, %455 : vector<1x16xf32>
    %458 = arith.addf %456, %457 : vector<1x16xf32>
    %459 = math.tanh %458 : vector<1x16xf32>
    %460 = arith.mulf %453, %459 : vector<1x16xf32>
    %c8_i32 = arith.constant 8 : i32
    %461 = arith.index_cast %c8_i32 : i32 to index
    %c0_125 = arith.constant 0 : index
    %462 = vector.load %arg20[%461, %c0_125] : memref<16x64xf32, #tpu.memory_space<vmem>>, vector<1x64xf32>
    %cst_126 = arith.constant dense<0.000000e+00> : vector<1x64xf32>
    %463 = tpu.matmul %436, %56, %cst_126 {dimension_numbers = #tpu.dot_dimension_numbers<[1], [0], [0], [1], [0, 0, 1, 1], [], []>} : vector<1x16xf32>, vector<16x64xf32>, vector<1x64xf32> -> vector<1x64xf32>
    %464 = arith.addf %462, %463 : vector<1x64xf32>
    %465 = arith.addf %464, %57 : vector<1x64xf32>
    %466 = math.absf %465 : vector<1x64xf32>
    %cst_127 = arith.constant 0.000000e+00 : f32
    %467 = vector.broadcast %cst_127 : f32 to vector<1x64xf32>
    %468 = arith.subf %467, %466 : vector<1x64xf32>
    %469 = math.exp %468 : vector<1x64xf32>
    %cst_128 = arith.constant 0.000000e+00 : f32
    %470 = vector.broadcast %cst_128 : f32 to vector<1x64xf32>
    %471 = arith.cmpf oge, %465, %470 : vector<1x64xf32>
    %cst_129 = arith.constant 1.000000e+00 : f32
    %472 = vector.broadcast %cst_129 : f32 to vector<1x64xf32>
    %473 = arith.select %471, %472, %469 : vector<1x64xi1>, vector<1x64xf32>
    %cst_130 = arith.constant 1.000000e+00 : f32
    %474 = vector.broadcast %cst_130 : f32 to vector<1x64xf32>
    %475 = arith.addf %474, %469 : vector<1x64xf32>
    %476 = arith.divf %473, %475 : vector<1x64xf32>
    %477 = vector.extract_strided_slice %476 {offsets = [0, 0], sizes = [1, 16], strides = [1, 1]} : vector<1x64xf32> to vector<1x16xf32>
    %478 = vector.extract_strided_slice %476 {offsets = [0, 16], sizes = [1, 16], strides = [1, 1]} : vector<1x64xf32> to vector<1x16xf32>
    %479 = vector.extract_strided_slice %476 {offsets = [0, 48], sizes = [1, 16], strides = [1, 1]} : vector<1x64xf32> to vector<1x16xf32>
    %480 = vector.extract_strided_slice %465 {offsets = [0, 32], sizes = [1, 16], strides = [1, 1]} : vector<1x64xf32> to vector<1x16xf32>
    %481 = math.tanh %480 : vector<1x16xf32>
    %482 = arith.mulf %478, %434 : vector<1x16xf32>
    %483 = arith.mulf %477, %481 : vector<1x16xf32>
    %484 = arith.addf %482, %483 : vector<1x16xf32>
    %485 = math.tanh %484 : vector<1x16xf32>
    %486 = arith.mulf %479, %485 : vector<1x16xf32>
    %487 = tpu.concatenate %486, %460 in 1 : vector<1x16xf32>, vector<1x16xf32> -> vector<1x32xf32>
    %cst_131 = arith.constant dense<0.000000e+00> : vector<1x64xf32>
    %488 = tpu.matmul %487, %58, %cst_131 {dimension_numbers = #tpu.dot_dimension_numbers<[1], [0], [0], [1], [0, 0, 1, 1], [], []>} : vector<1x32xf32>, vector<32x64xf32>, vector<1x64xf32> -> vector<1x64xf32>
    %489 = arith.addf %488, %59 : vector<1x64xf32>
    %490 = math.absf %489 : vector<1x64xf32>
    %cst_132 = arith.constant 0.000000e+00 : f32
    %491 = vector.broadcast %cst_132 : f32 to vector<1x64xf32>
    %492 = arith.subf %491, %490 : vector<1x64xf32>
    %493 = math.exp %492 : vector<1x64xf32>
    %cst_133 = arith.constant 0.000000e+00 : f32
    %494 = vector.broadcast %cst_133 : f32 to vector<1x64xf32>
    %495 = arith.cmpf oge, %489, %494 : vector<1x64xf32>
    %cst_134 = arith.constant 1.000000e+00 : f32
    %496 = vector.broadcast %cst_134 : f32 to vector<1x64xf32>
    %497 = arith.select %495, %496, %493 : vector<1x64xi1>, vector<1x64xf32>
    %cst_135 = arith.constant 1.000000e+00 : f32
    %498 = vector.broadcast %cst_135 : f32 to vector<1x64xf32>
    %499 = arith.addf %498, %493 : vector<1x64xf32>
    %500 = arith.divf %497, %499 : vector<1x64xf32>
    %501 = vector.extract_strided_slice %500 {offsets = [0, 0], sizes = [1, 16], strides = [1, 1]} : vector<1x64xf32> to vector<1x16xf32>
    %502 = vector.extract_strided_slice %500 {offsets = [0, 16], sizes = [1, 16], strides = [1, 1]} : vector<1x64xf32> to vector<1x16xf32>
    %503 = vector.extract_strided_slice %500 {offsets = [0, 48], sizes = [1, 16], strides = [1, 1]} : vector<1x64xf32> to vector<1x16xf32>
    %504 = vector.extract_strided_slice %489 {offsets = [0, 32], sizes = [1, 16], strides = [1, 1]} : vector<1x64xf32> to vector<1x16xf32>
    %505 = math.tanh %504 : vector<1x16xf32>
    %506 = arith.mulf %502, %458 : vector<1x16xf32>
    %507 = arith.mulf %501, %505 : vector<1x16xf32>
    %508 = arith.addf %506, %507 : vector<1x16xf32>
    %509 = math.tanh %508 : vector<1x16xf32>
    %510 = arith.mulf %503, %509 : vector<1x16xf32>
    %c9_i32 = arith.constant 9 : i32
    %511 = arith.index_cast %c9_i32 : i32 to index
    %c0_136 = arith.constant 0 : index
    %512 = vector.load %arg20[%511, %c0_136] : memref<16x64xf32, #tpu.memory_space<vmem>>, vector<1x64xf32>
    %cst_137 = arith.constant dense<0.000000e+00> : vector<1x64xf32>
    %513 = tpu.matmul %486, %56, %cst_137 {dimension_numbers = #tpu.dot_dimension_numbers<[1], [0], [0], [1], [0, 0, 1, 1], [], []>} : vector<1x16xf32>, vector<16x64xf32>, vector<1x64xf32> -> vector<1x64xf32>
    %514 = arith.addf %512, %513 : vector<1x64xf32>
    %515 = arith.addf %514, %57 : vector<1x64xf32>
    %516 = math.absf %515 : vector<1x64xf32>
    %cst_138 = arith.constant 0.000000e+00 : f32
    %517 = vector.broadcast %cst_138 : f32 to vector<1x64xf32>
    %518 = arith.subf %517, %516 : vector<1x64xf32>
    %519 = math.exp %518 : vector<1x64xf32>
    %cst_139 = arith.constant 0.000000e+00 : f32
    %520 = vector.broadcast %cst_139 : f32 to vector<1x64xf32>
    %521 = arith.cmpf oge, %515, %520 : vector<1x64xf32>
    %cst_140 = arith.constant 1.000000e+00 : f32
    %522 = vector.broadcast %cst_140 : f32 to vector<1x64xf32>
    %523 = arith.select %521, %522, %519 : vector<1x64xi1>, vector<1x64xf32>
    %cst_141 = arith.constant 1.000000e+00 : f32
    %524 = vector.broadcast %cst_141 : f32 to vector<1x64xf32>
    %525 = arith.addf %524, %519 : vector<1x64xf32>
    %526 = arith.divf %523, %525 : vector<1x64xf32>
    %527 = vector.extract_strided_slice %526 {offsets = [0, 0], sizes = [1, 16], strides = [1, 1]} : vector<1x64xf32> to vector<1x16xf32>
    %528 = vector.extract_strided_slice %526 {offsets = [0, 16], sizes = [1, 16], strides = [1, 1]} : vector<1x64xf32> to vector<1x16xf32>
    %529 = vector.extract_strided_slice %526 {offsets = [0, 48], sizes = [1, 16], strides = [1, 1]} : vector<1x64xf32> to vector<1x16xf32>
    %530 = vector.extract_strided_slice %515 {offsets = [0, 32], sizes = [1, 16], strides = [1, 1]} : vector<1x64xf32> to vector<1x16xf32>
    %531 = math.tanh %530 : vector<1x16xf32>
    %532 = arith.mulf %528, %484 : vector<1x16xf32>
    %533 = arith.mulf %527, %531 : vector<1x16xf32>
    %534 = arith.addf %532, %533 : vector<1x16xf32>
    %535 = math.tanh %534 : vector<1x16xf32>
    %536 = arith.mulf %529, %535 : vector<1x16xf32>
    %537 = tpu.concatenate %536, %510 in 1 : vector<1x16xf32>, vector<1x16xf32> -> vector<1x32xf32>
    %cst_142 = arith.constant dense<0.000000e+00> : vector<1x64xf32>
    %538 = tpu.matmul %537, %58, %cst_142 {dimension_numbers = #tpu.dot_dimension_numbers<[1], [0], [0], [1], [0, 0, 1, 1], [], []>} : vector<1x32xf32>, vector<32x64xf32>, vector<1x64xf32> -> vector<1x64xf32>
    %539 = arith.addf %538, %59 : vector<1x64xf32>
    %540 = math.absf %539 : vector<1x64xf32>
    %cst_143 = arith.constant 0.000000e+00 : f32
    %541 = vector.broadcast %cst_143 : f32 to vector<1x64xf32>
    %542 = arith.subf %541, %540 : vector<1x64xf32>
    %543 = math.exp %542 : vector<1x64xf32>
    %cst_144 = arith.constant 0.000000e+00 : f32
    %544 = vector.broadcast %cst_144 : f32 to vector<1x64xf32>
    %545 = arith.cmpf oge, %539, %544 : vector<1x64xf32>
    %cst_145 = arith.constant 1.000000e+00 : f32
    %546 = vector.broadcast %cst_145 : f32 to vector<1x64xf32>
    %547 = arith.select %545, %546, %543 : vector<1x64xi1>, vector<1x64xf32>
    %cst_146 = arith.constant 1.000000e+00 : f32
    %548 = vector.broadcast %cst_146 : f32 to vector<1x64xf32>
    %549 = arith.addf %548, %543 : vector<1x64xf32>
    %550 = arith.divf %547, %549 : vector<1x64xf32>
    %551 = vector.extract_strided_slice %550 {offsets = [0, 0], sizes = [1, 16], strides = [1, 1]} : vector<1x64xf32> to vector<1x16xf32>
    %552 = vector.extract_strided_slice %550 {offsets = [0, 16], sizes = [1, 16], strides = [1, 1]} : vector<1x64xf32> to vector<1x16xf32>
    %553 = vector.extract_strided_slice %550 {offsets = [0, 48], sizes = [1, 16], strides = [1, 1]} : vector<1x64xf32> to vector<1x16xf32>
    %554 = vector.extract_strided_slice %539 {offsets = [0, 32], sizes = [1, 16], strides = [1, 1]} : vector<1x64xf32> to vector<1x16xf32>
    %555 = math.tanh %554 : vector<1x16xf32>
    %556 = arith.mulf %552, %508 : vector<1x16xf32>
    %557 = arith.mulf %551, %555 : vector<1x16xf32>
    %558 = arith.addf %556, %557 : vector<1x16xf32>
    %559 = math.tanh %558 : vector<1x16xf32>
    %560 = arith.mulf %553, %559 : vector<1x16xf32>
    %c10_i32 = arith.constant 10 : i32
    %561 = arith.index_cast %c10_i32 : i32 to index
    %c0_147 = arith.constant 0 : index
    %562 = vector.load %arg20[%561, %c0_147] : memref<16x64xf32, #tpu.memory_space<vmem>>, vector<1x64xf32>
    %cst_148 = arith.constant dense<0.000000e+00> : vector<1x64xf32>
    %563 = tpu.matmul %536, %56, %cst_148 {dimension_numbers = #tpu.dot_dimension_numbers<[1], [0], [0], [1], [0, 0, 1, 1], [], []>} : vector<1x16xf32>, vector<16x64xf32>, vector<1x64xf32> -> vector<1x64xf32>
    %564 = arith.addf %562, %563 : vector<1x64xf32>
    %565 = arith.addf %564, %57 : vector<1x64xf32>
    %566 = math.absf %565 : vector<1x64xf32>
    %cst_149 = arith.constant 0.000000e+00 : f32
    %567 = vector.broadcast %cst_149 : f32 to vector<1x64xf32>
    %568 = arith.subf %567, %566 : vector<1x64xf32>
    %569 = math.exp %568 : vector<1x64xf32>
    %cst_150 = arith.constant 0.000000e+00 : f32
    %570 = vector.broadcast %cst_150 : f32 to vector<1x64xf32>
    %571 = arith.cmpf oge, %565, %570 : vector<1x64xf32>
    %cst_151 = arith.constant 1.000000e+00 : f32
    %572 = vector.broadcast %cst_151 : f32 to vector<1x64xf32>
    %573 = arith.select %571, %572, %569 : vector<1x64xi1>, vector<1x64xf32>
    %cst_152 = arith.constant 1.000000e+00 : f32
    %574 = vector.broadcast %cst_152 : f32 to vector<1x64xf32>
    %575 = arith.addf %574, %569 : vector<1x64xf32>
    %576 = arith.divf %573, %575 : vector<1x64xf32>
    %577 = vector.extract_strided_slice %576 {offsets = [0, 0], sizes = [1, 16], strides = [1, 1]} : vector<1x64xf32> to vector<1x16xf32>
    %578 = vector.extract_strided_slice %576 {offsets = [0, 16], sizes = [1, 16], strides = [1, 1]} : vector<1x64xf32> to vector<1x16xf32>
    %579 = vector.extract_strided_slice %576 {offsets = [0, 48], sizes = [1, 16], strides = [1, 1]} : vector<1x64xf32> to vector<1x16xf32>
    %580 = vector.extract_strided_slice %565 {offsets = [0, 32], sizes = [1, 16], strides = [1, 1]} : vector<1x64xf32> to vector<1x16xf32>
    %581 = math.tanh %580 : vector<1x16xf32>
    %582 = arith.mulf %578, %534 : vector<1x16xf32>
    %583 = arith.mulf %577, %581 : vector<1x16xf32>
    %584 = arith.addf %582, %583 : vector<1x16xf32>
    %585 = math.tanh %584 : vector<1x16xf32>
    %586 = arith.mulf %579, %585 : vector<1x16xf32>
    %587 = tpu.concatenate %586, %560 in 1 : vector<1x16xf32>, vector<1x16xf32> -> vector<1x32xf32>
    %cst_153 = arith.constant dense<0.000000e+00> : vector<1x64xf32>
    %588 = tpu.matmul %587, %58, %cst_153 {dimension_numbers = #tpu.dot_dimension_numbers<[1], [0], [0], [1], [0, 0, 1, 1], [], []>} : vector<1x32xf32>, vector<32x64xf32>, vector<1x64xf32> -> vector<1x64xf32>
    %589 = arith.addf %588, %59 : vector<1x64xf32>
    %590 = math.absf %589 : vector<1x64xf32>
    %cst_154 = arith.constant 0.000000e+00 : f32
    %591 = vector.broadcast %cst_154 : f32 to vector<1x64xf32>
    %592 = arith.subf %591, %590 : vector<1x64xf32>
    %593 = math.exp %592 : vector<1x64xf32>
    %cst_155 = arith.constant 0.000000e+00 : f32
    %594 = vector.broadcast %cst_155 : f32 to vector<1x64xf32>
    %595 = arith.cmpf oge, %589, %594 : vector<1x64xf32>
    %cst_156 = arith.constant 1.000000e+00 : f32
    %596 = vector.broadcast %cst_156 : f32 to vector<1x64xf32>
    %597 = arith.select %595, %596, %593 : vector<1x64xi1>, vector<1x64xf32>
    %cst_157 = arith.constant 1.000000e+00 : f32
    %598 = vector.broadcast %cst_157 : f32 to vector<1x64xf32>
    %599 = arith.addf %598, %593 : vector<1x64xf32>
    %600 = arith.divf %597, %599 : vector<1x64xf32>
    %601 = vector.extract_strided_slice %600 {offsets = [0, 0], sizes = [1, 16], strides = [1, 1]} : vector<1x64xf32> to vector<1x16xf32>
    %602 = vector.extract_strided_slice %600 {offsets = [0, 16], sizes = [1, 16], strides = [1, 1]} : vector<1x64xf32> to vector<1x16xf32>
    %603 = vector.extract_strided_slice %600 {offsets = [0, 48], sizes = [1, 16], strides = [1, 1]} : vector<1x64xf32> to vector<1x16xf32>
    %604 = vector.extract_strided_slice %589 {offsets = [0, 32], sizes = [1, 16], strides = [1, 1]} : vector<1x64xf32> to vector<1x16xf32>
    %605 = math.tanh %604 : vector<1x16xf32>
    %606 = arith.mulf %602, %558 : vector<1x16xf32>
    %607 = arith.mulf %601, %605 : vector<1x16xf32>
    %608 = arith.addf %606, %607 : vector<1x16xf32>
    %609 = math.tanh %608 : vector<1x16xf32>
    %610 = arith.mulf %603, %609 : vector<1x16xf32>
    %c11_i32 = arith.constant 11 : i32
    %611 = arith.index_cast %c11_i32 : i32 to index
    %c0_158 = arith.constant 0 : index
    %612 = vector.load %arg20[%611, %c0_158] : memref<16x64xf32, #tpu.memory_space<vmem>>, vector<1x64xf32>
    %cst_159 = arith.constant dense<0.000000e+00> : vector<1x64xf32>
    %613 = tpu.matmul %586, %56, %cst_159 {dimension_numbers = #tpu.dot_dimension_numbers<[1], [0], [0], [1], [0, 0, 1, 1], [], []>} : vector<1x16xf32>, vector<16x64xf32>, vector<1x64xf32> -> vector<1x64xf32>
    %614 = arith.addf %612, %613 : vector<1x64xf32>
    %615 = arith.addf %614, %57 : vector<1x64xf32>
    %616 = math.absf %615 : vector<1x64xf32>
    %cst_160 = arith.constant 0.000000e+00 : f32
    %617 = vector.broadcast %cst_160 : f32 to vector<1x64xf32>
    %618 = arith.subf %617, %616 : vector<1x64xf32>
    %619 = math.exp %618 : vector<1x64xf32>
    %cst_161 = arith.constant 0.000000e+00 : f32
    %620 = vector.broadcast %cst_161 : f32 to vector<1x64xf32>
    %621 = arith.cmpf oge, %615, %620 : vector<1x64xf32>
    %cst_162 = arith.constant 1.000000e+00 : f32
    %622 = vector.broadcast %cst_162 : f32 to vector<1x64xf32>
    %623 = arith.select %621, %622, %619 : vector<1x64xi1>, vector<1x64xf32>
    %cst_163 = arith.constant 1.000000e+00 : f32
    %624 = vector.broadcast %cst_163 : f32 to vector<1x64xf32>
    %625 = arith.addf %624, %619 : vector<1x64xf32>
    %626 = arith.divf %623, %625 : vector<1x64xf32>
    %627 = vector.extract_strided_slice %626 {offsets = [0, 0], sizes = [1, 16], strides = [1, 1]} : vector<1x64xf32> to vector<1x16xf32>
    %628 = vector.extract_strided_slice %626 {offsets = [0, 16], sizes = [1, 16], strides = [1, 1]} : vector<1x64xf32> to vector<1x16xf32>
    %629 = vector.extract_strided_slice %626 {offsets = [0, 48], sizes = [1, 16], strides = [1, 1]} : vector<1x64xf32> to vector<1x16xf32>
    %630 = vector.extract_strided_slice %615 {offsets = [0, 32], sizes = [1, 16], strides = [1, 1]} : vector<1x64xf32> to vector<1x16xf32>
    %631 = math.tanh %630 : vector<1x16xf32>
    %632 = arith.mulf %628, %584 : vector<1x16xf32>
    %633 = arith.mulf %627, %631 : vector<1x16xf32>
    %634 = arith.addf %632, %633 : vector<1x16xf32>
    %635 = math.tanh %634 : vector<1x16xf32>
    %636 = arith.mulf %629, %635 : vector<1x16xf32>
    %637 = tpu.concatenate %636, %610 in 1 : vector<1x16xf32>, vector<1x16xf32> -> vector<1x32xf32>
    %cst_164 = arith.constant dense<0.000000e+00> : vector<1x64xf32>
    %638 = tpu.matmul %637, %58, %cst_164 {dimension_numbers = #tpu.dot_dimension_numbers<[1], [0], [0], [1], [0, 0, 1, 1], [], []>} : vector<1x32xf32>, vector<32x64xf32>, vector<1x64xf32> -> vector<1x64xf32>
    %639 = arith.addf %638, %59 : vector<1x64xf32>
    %640 = math.absf %639 : vector<1x64xf32>
    %cst_165 = arith.constant 0.000000e+00 : f32
    %641 = vector.broadcast %cst_165 : f32 to vector<1x64xf32>
    %642 = arith.subf %641, %640 : vector<1x64xf32>
    %643 = math.exp %642 : vector<1x64xf32>
    %cst_166 = arith.constant 0.000000e+00 : f32
    %644 = vector.broadcast %cst_166 : f32 to vector<1x64xf32>
    %645 = arith.cmpf oge, %639, %644 : vector<1x64xf32>
    %cst_167 = arith.constant 1.000000e+00 : f32
    %646 = vector.broadcast %cst_167 : f32 to vector<1x64xf32>
    %647 = arith.select %645, %646, %643 : vector<1x64xi1>, vector<1x64xf32>
    %cst_168 = arith.constant 1.000000e+00 : f32
    %648 = vector.broadcast %cst_168 : f32 to vector<1x64xf32>
    %649 = arith.addf %648, %643 : vector<1x64xf32>
    %650 = arith.divf %647, %649 : vector<1x64xf32>
    %651 = vector.extract_strided_slice %650 {offsets = [0, 0], sizes = [1, 16], strides = [1, 1]} : vector<1x64xf32> to vector<1x16xf32>
    %652 = vector.extract_strided_slice %650 {offsets = [0, 16], sizes = [1, 16], strides = [1, 1]} : vector<1x64xf32> to vector<1x16xf32>
    %653 = vector.extract_strided_slice %650 {offsets = [0, 48], sizes = [1, 16], strides = [1, 1]} : vector<1x64xf32> to vector<1x16xf32>
    %654 = vector.extract_strided_slice %639 {offsets = [0, 32], sizes = [1, 16], strides = [1, 1]} : vector<1x64xf32> to vector<1x16xf32>
    %655 = math.tanh %654 : vector<1x16xf32>
    %656 = arith.mulf %652, %608 : vector<1x16xf32>
    %657 = arith.mulf %651, %655 : vector<1x16xf32>
    %658 = arith.addf %656, %657 : vector<1x16xf32>
    %659 = math.tanh %658 : vector<1x16xf32>
    %660 = arith.mulf %653, %659 : vector<1x16xf32>
    %c12_i32 = arith.constant 12 : i32
    %661 = arith.index_cast %c12_i32 : i32 to index
    %c0_169 = arith.constant 0 : index
    %662 = vector.load %arg20[%661, %c0_169] : memref<16x64xf32, #tpu.memory_space<vmem>>, vector<1x64xf32>
    %cst_170 = arith.constant dense<0.000000e+00> : vector<1x64xf32>
    %663 = tpu.matmul %636, %56, %cst_170 {dimension_numbers = #tpu.dot_dimension_numbers<[1], [0], [0], [1], [0, 0, 1, 1], [], []>} : vector<1x16xf32>, vector<16x64xf32>, vector<1x64xf32> -> vector<1x64xf32>
    %664 = arith.addf %662, %663 : vector<1x64xf32>
    %665 = arith.addf %664, %57 : vector<1x64xf32>
    %666 = math.absf %665 : vector<1x64xf32>
    %cst_171 = arith.constant 0.000000e+00 : f32
    %667 = vector.broadcast %cst_171 : f32 to vector<1x64xf32>
    %668 = arith.subf %667, %666 : vector<1x64xf32>
    %669 = math.exp %668 : vector<1x64xf32>
    %cst_172 = arith.constant 0.000000e+00 : f32
    %670 = vector.broadcast %cst_172 : f32 to vector<1x64xf32>
    %671 = arith.cmpf oge, %665, %670 : vector<1x64xf32>
    %cst_173 = arith.constant 1.000000e+00 : f32
    %672 = vector.broadcast %cst_173 : f32 to vector<1x64xf32>
    %673 = arith.select %671, %672, %669 : vector<1x64xi1>, vector<1x64xf32>
    %cst_174 = arith.constant 1.000000e+00 : f32
    %674 = vector.broadcast %cst_174 : f32 to vector<1x64xf32>
    %675 = arith.addf %674, %669 : vector<1x64xf32>
    %676 = arith.divf %673, %675 : vector<1x64xf32>
    %677 = vector.extract_strided_slice %676 {offsets = [0, 0], sizes = [1, 16], strides = [1, 1]} : vector<1x64xf32> to vector<1x16xf32>
    %678 = vector.extract_strided_slice %676 {offsets = [0, 16], sizes = [1, 16], strides = [1, 1]} : vector<1x64xf32> to vector<1x16xf32>
    %679 = vector.extract_strided_slice %676 {offsets = [0, 48], sizes = [1, 16], strides = [1, 1]} : vector<1x64xf32> to vector<1x16xf32>
    %680 = vector.extract_strided_slice %665 {offsets = [0, 32], sizes = [1, 16], strides = [1, 1]} : vector<1x64xf32> to vector<1x16xf32>
    %681 = math.tanh %680 : vector<1x16xf32>
    %682 = arith.mulf %678, %634 : vector<1x16xf32>
    %683 = arith.mulf %677, %681 : vector<1x16xf32>
    %684 = arith.addf %682, %683 : vector<1x16xf32>
    %685 = math.tanh %684 : vector<1x16xf32>
    %686 = arith.mulf %679, %685 : vector<1x16xf32>
    %687 = tpu.concatenate %686, %660 in 1 : vector<1x16xf32>, vector<1x16xf32> -> vector<1x32xf32>
    %cst_175 = arith.constant dense<0.000000e+00> : vector<1x64xf32>
    %688 = tpu.matmul %687, %58, %cst_175 {dimension_numbers = #tpu.dot_dimension_numbers<[1], [0], [0], [1], [0, 0, 1, 1], [], []>} : vector<1x32xf32>, vector<32x64xf32>, vector<1x64xf32> -> vector<1x64xf32>
    %689 = arith.addf %688, %59 : vector<1x64xf32>
    %690 = math.absf %689 : vector<1x64xf32>
    %cst_176 = arith.constant 0.000000e+00 : f32
    %691 = vector.broadcast %cst_176 : f32 to vector<1x64xf32>
    %692 = arith.subf %691, %690 : vector<1x64xf32>
    %693 = math.exp %692 : vector<1x64xf32>
    %cst_177 = arith.constant 0.000000e+00 : f32
    %694 = vector.broadcast %cst_177 : f32 to vector<1x64xf32>
    %695 = arith.cmpf oge, %689, %694 : vector<1x64xf32>
    %cst_178 = arith.constant 1.000000e+00 : f32
    %696 = vector.broadcast %cst_178 : f32 to vector<1x64xf32>
    %697 = arith.select %695, %696, %693 : vector<1x64xi1>, vector<1x64xf32>
    %cst_179 = arith.constant 1.000000e+00 : f32
    %698 = vector.broadcast %cst_179 : f32 to vector<1x64xf32>
    %699 = arith.addf %698, %693 : vector<1x64xf32>
    %700 = arith.divf %697, %699 : vector<1x64xf32>
    %701 = vector.extract_strided_slice %700 {offsets = [0, 0], sizes = [1, 16], strides = [1, 1]} : vector<1x64xf32> to vector<1x16xf32>
    %702 = vector.extract_strided_slice %700 {offsets = [0, 16], sizes = [1, 16], strides = [1, 1]} : vector<1x64xf32> to vector<1x16xf32>
    %703 = vector.extract_strided_slice %700 {offsets = [0, 48], sizes = [1, 16], strides = [1, 1]} : vector<1x64xf32> to vector<1x16xf32>
    %704 = vector.extract_strided_slice %689 {offsets = [0, 32], sizes = [1, 16], strides = [1, 1]} : vector<1x64xf32> to vector<1x16xf32>
    %705 = math.tanh %704 : vector<1x16xf32>
    %706 = arith.mulf %702, %658 : vector<1x16xf32>
    %707 = arith.mulf %701, %705 : vector<1x16xf32>
    %708 = arith.addf %706, %707 : vector<1x16xf32>
    %709 = math.tanh %708 : vector<1x16xf32>
    %710 = arith.mulf %703, %709 : vector<1x16xf32>
    %c13_i32 = arith.constant 13 : i32
    %711 = arith.index_cast %c13_i32 : i32 to index
    %c0_180 = arith.constant 0 : index
    %712 = vector.load %arg20[%711, %c0_180] : memref<16x64xf32, #tpu.memory_space<vmem>>, vector<1x64xf32>
    %cst_181 = arith.constant dense<0.000000e+00> : vector<1x64xf32>
    %713 = tpu.matmul %686, %56, %cst_181 {dimension_numbers = #tpu.dot_dimension_numbers<[1], [0], [0], [1], [0, 0, 1, 1], [], []>} : vector<1x16xf32>, vector<16x64xf32>, vector<1x64xf32> -> vector<1x64xf32>
    %714 = arith.addf %712, %713 : vector<1x64xf32>
    %715 = arith.addf %714, %57 : vector<1x64xf32>
    %716 = math.absf %715 : vector<1x64xf32>
    %cst_182 = arith.constant 0.000000e+00 : f32
    %717 = vector.broadcast %cst_182 : f32 to vector<1x64xf32>
    %718 = arith.subf %717, %716 : vector<1x64xf32>
    %719 = math.exp %718 : vector<1x64xf32>
    %cst_183 = arith.constant 0.000000e+00 : f32
    %720 = vector.broadcast %cst_183 : f32 to vector<1x64xf32>
    %721 = arith.cmpf oge, %715, %720 : vector<1x64xf32>
    %cst_184 = arith.constant 1.000000e+00 : f32
    %722 = vector.broadcast %cst_184 : f32 to vector<1x64xf32>
    %723 = arith.select %721, %722, %719 : vector<1x64xi1>, vector<1x64xf32>
    %cst_185 = arith.constant 1.000000e+00 : f32
    %724 = vector.broadcast %cst_185 : f32 to vector<1x64xf32>
    %725 = arith.addf %724, %719 : vector<1x64xf32>
    %726 = arith.divf %723, %725 : vector<1x64xf32>
    %727 = vector.extract_strided_slice %726 {offsets = [0, 0], sizes = [1, 16], strides = [1, 1]} : vector<1x64xf32> to vector<1x16xf32>
    %728 = vector.extract_strided_slice %726 {offsets = [0, 16], sizes = [1, 16], strides = [1, 1]} : vector<1x64xf32> to vector<1x16xf32>
    %729 = vector.extract_strided_slice %726 {offsets = [0, 48], sizes = [1, 16], strides = [1, 1]} : vector<1x64xf32> to vector<1x16xf32>
    %730 = vector.extract_strided_slice %715 {offsets = [0, 32], sizes = [1, 16], strides = [1, 1]} : vector<1x64xf32> to vector<1x16xf32>
    %731 = math.tanh %730 : vector<1x16xf32>
    %732 = arith.mulf %728, %684 : vector<1x16xf32>
    %733 = arith.mulf %727, %731 : vector<1x16xf32>
    %734 = arith.addf %732, %733 : vector<1x16xf32>
    %735 = math.tanh %734 : vector<1x16xf32>
    %736 = arith.mulf %729, %735 : vector<1x16xf32>
    %737 = tpu.concatenate %736, %710 in 1 : vector<1x16xf32>, vector<1x16xf32> -> vector<1x32xf32>
    %cst_186 = arith.constant dense<0.000000e+00> : vector<1x64xf32>
    %738 = tpu.matmul %737, %58, %cst_186 {dimension_numbers = #tpu.dot_dimension_numbers<[1], [0], [0], [1], [0, 0, 1, 1], [], []>} : vector<1x32xf32>, vector<32x64xf32>, vector<1x64xf32> -> vector<1x64xf32>
    %739 = arith.addf %738, %59 : vector<1x64xf32>
    %740 = math.absf %739 : vector<1x64xf32>
    %cst_187 = arith.constant 0.000000e+00 : f32
    %741 = vector.broadcast %cst_187 : f32 to vector<1x64xf32>
    %742 = arith.subf %741, %740 : vector<1x64xf32>
    %743 = math.exp %742 : vector<1x64xf32>
    %cst_188 = arith.constant 0.000000e+00 : f32
    %744 = vector.broadcast %cst_188 : f32 to vector<1x64xf32>
    %745 = arith.cmpf oge, %739, %744 : vector<1x64xf32>
    %cst_189 = arith.constant 1.000000e+00 : f32
    %746 = vector.broadcast %cst_189 : f32 to vector<1x64xf32>
    %747 = arith.select %745, %746, %743 : vector<1x64xi1>, vector<1x64xf32>
    %cst_190 = arith.constant 1.000000e+00 : f32
    %748 = vector.broadcast %cst_190 : f32 to vector<1x64xf32>
    %749 = arith.addf %748, %743 : vector<1x64xf32>
    %750 = arith.divf %747, %749 : vector<1x64xf32>
    %751 = vector.extract_strided_slice %750 {offsets = [0, 0], sizes = [1, 16], strides = [1, 1]} : vector<1x64xf32> to vector<1x16xf32>
    %752 = vector.extract_strided_slice %750 {offsets = [0, 16], sizes = [1, 16], strides = [1, 1]} : vector<1x64xf32> to vector<1x16xf32>
    %753 = vector.extract_strided_slice %750 {offsets = [0, 48], sizes = [1, 16], strides = [1, 1]} : vector<1x64xf32> to vector<1x16xf32>
    %754 = vector.extract_strided_slice %739 {offsets = [0, 32], sizes = [1, 16], strides = [1, 1]} : vector<1x64xf32> to vector<1x16xf32>
    %755 = math.tanh %754 : vector<1x16xf32>
    %756 = arith.mulf %752, %708 : vector<1x16xf32>
    %757 = arith.mulf %751, %755 : vector<1x16xf32>
    %758 = arith.addf %756, %757 : vector<1x16xf32>
    %759 = math.tanh %758 : vector<1x16xf32>
    %760 = arith.mulf %753, %759 : vector<1x16xf32>
    %c14_i32 = arith.constant 14 : i32
    %761 = arith.index_cast %c14_i32 : i32 to index
    %c0_191 = arith.constant 0 : index
    %762 = vector.load %arg20[%761, %c0_191] : memref<16x64xf32, #tpu.memory_space<vmem>>, vector<1x64xf32>
    %cst_192 = arith.constant dense<0.000000e+00> : vector<1x64xf32>
    %763 = tpu.matmul %736, %56, %cst_192 {dimension_numbers = #tpu.dot_dimension_numbers<[1], [0], [0], [1], [0, 0, 1, 1], [], []>} : vector<1x16xf32>, vector<16x64xf32>, vector<1x64xf32> -> vector<1x64xf32>
    %764 = arith.addf %762, %763 : vector<1x64xf32>
    %765 = arith.addf %764, %57 : vector<1x64xf32>
    %766 = math.absf %765 : vector<1x64xf32>
    %cst_193 = arith.constant 0.000000e+00 : f32
    %767 = vector.broadcast %cst_193 : f32 to vector<1x64xf32>
    %768 = arith.subf %767, %766 : vector<1x64xf32>
    %769 = math.exp %768 : vector<1x64xf32>
    %cst_194 = arith.constant 0.000000e+00 : f32
    %770 = vector.broadcast %cst_194 : f32 to vector<1x64xf32>
    %771 = arith.cmpf oge, %765, %770 : vector<1x64xf32>
    %cst_195 = arith.constant 1.000000e+00 : f32
    %772 = vector.broadcast %cst_195 : f32 to vector<1x64xf32>
    %773 = arith.select %771, %772, %769 : vector<1x64xi1>, vector<1x64xf32>
    %cst_196 = arith.constant 1.000000e+00 : f32
    %774 = vector.broadcast %cst_196 : f32 to vector<1x64xf32>
    %775 = arith.addf %774, %769 : vector<1x64xf32>
    %776 = arith.divf %773, %775 : vector<1x64xf32>
    %777 = vector.extract_strided_slice %776 {offsets = [0, 0], sizes = [1, 16], strides = [1, 1]} : vector<1x64xf32> to vector<1x16xf32>
    %778 = vector.extract_strided_slice %776 {offsets = [0, 16], sizes = [1, 16], strides = [1, 1]} : vector<1x64xf32> to vector<1x16xf32>
    %779 = vector.extract_strided_slice %776 {offsets = [0, 48], sizes = [1, 16], strides = [1, 1]} : vector<1x64xf32> to vector<1x16xf32>
    %780 = vector.extract_strided_slice %765 {offsets = [0, 32], sizes = [1, 16], strides = [1, 1]} : vector<1x64xf32> to vector<1x16xf32>
    %781 = math.tanh %780 : vector<1x16xf32>
    %782 = arith.mulf %778, %734 : vector<1x16xf32>
    %783 = arith.mulf %777, %781 : vector<1x16xf32>
    %784 = arith.addf %782, %783 : vector<1x16xf32>
    %785 = math.tanh %784 : vector<1x16xf32>
    %786 = arith.mulf %779, %785 : vector<1x16xf32>
    %787 = tpu.concatenate %786, %760 in 1 : vector<1x16xf32>, vector<1x16xf32> -> vector<1x32xf32>
    %cst_197 = arith.constant dense<0.000000e+00> : vector<1x64xf32>
    %788 = tpu.matmul %787, %58, %cst_197 {dimension_numbers = #tpu.dot_dimension_numbers<[1], [0], [0], [1], [0, 0, 1, 1], [], []>} : vector<1x32xf32>, vector<32x64xf32>, vector<1x64xf32> -> vector<1x64xf32>
    %789 = arith.addf %788, %59 : vector<1x64xf32>
    %790 = math.absf %789 : vector<1x64xf32>
    %cst_198 = arith.constant 0.000000e+00 : f32
    %791 = vector.broadcast %cst_198 : f32 to vector<1x64xf32>
    %792 = arith.subf %791, %790 : vector<1x64xf32>
    %793 = math.exp %792 : vector<1x64xf32>
    %cst_199 = arith.constant 0.000000e+00 : f32
    %794 = vector.broadcast %cst_199 : f32 to vector<1x64xf32>
    %795 = arith.cmpf oge, %789, %794 : vector<1x64xf32>
    %cst_200 = arith.constant 1.000000e+00 : f32
    %796 = vector.broadcast %cst_200 : f32 to vector<1x64xf32>
    %797 = arith.select %795, %796, %793 : vector<1x64xi1>, vector<1x64xf32>
    %cst_201 = arith.constant 1.000000e+00 : f32
    %798 = vector.broadcast %cst_201 : f32 to vector<1x64xf32>
    %799 = arith.addf %798, %793 : vector<1x64xf32>
    %800 = arith.divf %797, %799 : vector<1x64xf32>
    %801 = vector.extract_strided_slice %800 {offsets = [0, 0], sizes = [1, 16], strides = [1, 1]} : vector<1x64xf32> to vector<1x16xf32>
    %802 = vector.extract_strided_slice %800 {offsets = [0, 16], sizes = [1, 16], strides = [1, 1]} : vector<1x64xf32> to vector<1x16xf32>
    %803 = vector.extract_strided_slice %800 {offsets = [0, 48], sizes = [1, 16], strides = [1, 1]} : vector<1x64xf32> to vector<1x16xf32>
    %804 = vector.extract_strided_slice %789 {offsets = [0, 32], sizes = [1, 16], strides = [1, 1]} : vector<1x64xf32> to vector<1x16xf32>
    %805 = math.tanh %804 : vector<1x16xf32>
    %806 = arith.mulf %802, %758 : vector<1x16xf32>
    %807 = arith.mulf %801, %805 : vector<1x16xf32>
    %808 = arith.addf %806, %807 : vector<1x16xf32>
    %809 = math.tanh %808 : vector<1x16xf32>
    %810 = arith.mulf %803, %809 : vector<1x16xf32>
    %c15_i32 = arith.constant 15 : i32
    %811 = arith.index_cast %c15_i32 : i32 to index
    %c0_202 = arith.constant 0 : index
    %812 = vector.load %arg20[%811, %c0_202] : memref<16x64xf32, #tpu.memory_space<vmem>>, vector<1x64xf32>
    %cst_203 = arith.constant dense<0.000000e+00> : vector<1x64xf32>
    %813 = tpu.matmul %786, %56, %cst_203 {dimension_numbers = #tpu.dot_dimension_numbers<[1], [0], [0], [1], [0, 0, 1, 1], [], []>} : vector<1x16xf32>, vector<16x64xf32>, vector<1x64xf32> -> vector<1x64xf32>
    %814 = arith.addf %812, %813 : vector<1x64xf32>
    %815 = arith.addf %814, %57 : vector<1x64xf32>
    %816 = math.absf %815 : vector<1x64xf32>
    %cst_204 = arith.constant 0.000000e+00 : f32
    %817 = vector.broadcast %cst_204 : f32 to vector<1x64xf32>
    %818 = arith.subf %817, %816 : vector<1x64xf32>
    %819 = math.exp %818 : vector<1x64xf32>
    %cst_205 = arith.constant 0.000000e+00 : f32
    %820 = vector.broadcast %cst_205 : f32 to vector<1x64xf32>
    %821 = arith.cmpf oge, %815, %820 : vector<1x64xf32>
    %cst_206 = arith.constant 1.000000e+00 : f32
    %822 = vector.broadcast %cst_206 : f32 to vector<1x64xf32>
    %823 = arith.select %821, %822, %819 : vector<1x64xi1>, vector<1x64xf32>
    %cst_207 = arith.constant 1.000000e+00 : f32
    %824 = vector.broadcast %cst_207 : f32 to vector<1x64xf32>
    %825 = arith.addf %824, %819 : vector<1x64xf32>
    %826 = arith.divf %823, %825 : vector<1x64xf32>
    %827 = vector.extract_strided_slice %826 {offsets = [0, 0], sizes = [1, 16], strides = [1, 1]} : vector<1x64xf32> to vector<1x16xf32>
    %828 = vector.extract_strided_slice %826 {offsets = [0, 16], sizes = [1, 16], strides = [1, 1]} : vector<1x64xf32> to vector<1x16xf32>
    %829 = vector.extract_strided_slice %826 {offsets = [0, 48], sizes = [1, 16], strides = [1, 1]} : vector<1x64xf32> to vector<1x16xf32>
    %830 = vector.extract_strided_slice %815 {offsets = [0, 32], sizes = [1, 16], strides = [1, 1]} : vector<1x64xf32> to vector<1x16xf32>
    %831 = math.tanh %830 : vector<1x16xf32>
    %832 = arith.mulf %828, %784 : vector<1x16xf32>
    %833 = arith.mulf %827, %831 : vector<1x16xf32>
    %834 = arith.addf %832, %833 : vector<1x16xf32>
    %835 = math.tanh %834 : vector<1x16xf32>
    %836 = arith.mulf %829, %835 : vector<1x16xf32>
    %837 = tpu.concatenate %836, %810 in 1 : vector<1x16xf32>, vector<1x16xf32> -> vector<1x32xf32>
    %cst_208 = arith.constant dense<0.000000e+00> : vector<1x64xf32>
    %838 = tpu.matmul %837, %58, %cst_208 {dimension_numbers = #tpu.dot_dimension_numbers<[1], [0], [0], [1], [0, 0, 1, 1], [], []>} : vector<1x32xf32>, vector<32x64xf32>, vector<1x64xf32> -> vector<1x64xf32>
    %839 = arith.addf %838, %59 : vector<1x64xf32>
    %840 = math.absf %839 : vector<1x64xf32>
    %cst_209 = arith.constant 0.000000e+00 : f32
    %841 = vector.broadcast %cst_209 : f32 to vector<1x64xf32>
    %842 = arith.subf %841, %840 : vector<1x64xf32>
    %843 = math.exp %842 : vector<1x64xf32>
    %cst_210 = arith.constant 0.000000e+00 : f32
    %844 = vector.broadcast %cst_210 : f32 to vector<1x64xf32>
    %845 = arith.cmpf oge, %839, %844 : vector<1x64xf32>
    %cst_211 = arith.constant 1.000000e+00 : f32
    %846 = vector.broadcast %cst_211 : f32 to vector<1x64xf32>
    %847 = arith.select %845, %846, %843 : vector<1x64xi1>, vector<1x64xf32>
    %cst_212 = arith.constant 1.000000e+00 : f32
    %848 = vector.broadcast %cst_212 : f32 to vector<1x64xf32>
    %849 = arith.addf %848, %843 : vector<1x64xf32>
    %850 = arith.divf %847, %849 : vector<1x64xf32>
    %851 = vector.extract_strided_slice %850 {offsets = [0, 0], sizes = [1, 16], strides = [1, 1]} : vector<1x64xf32> to vector<1x16xf32>
    %852 = vector.extract_strided_slice %850 {offsets = [0, 16], sizes = [1, 16], strides = [1, 1]} : vector<1x64xf32> to vector<1x16xf32>
    %853 = vector.extract_strided_slice %850 {offsets = [0, 48], sizes = [1, 16], strides = [1, 1]} : vector<1x64xf32> to vector<1x16xf32>
    %854 = vector.extract_strided_slice %839 {offsets = [0, 32], sizes = [1, 16], strides = [1, 1]} : vector<1x64xf32> to vector<1x16xf32>
    %855 = math.tanh %854 : vector<1x16xf32>
    %856 = arith.mulf %852, %808 : vector<1x16xf32>
    %857 = arith.mulf %851, %855 : vector<1x16xf32>
    %858 = arith.addf %856, %857 : vector<1x16xf32>
    %859 = math.tanh %858 : vector<1x16xf32>
    %860 = arith.mulf %853, %859 : vector<1x16xf32>
    %c16_i32 = arith.constant 16 : i32
    %c0_213 = arith.constant 0 : index
    %c0_214 = arith.constant 0 : index
    %861 = vector.load %arg9[%c0_213, %c0_214] : memref<16x480xf32, #tpu.memory_space<vmem>>, vector<16x480xf32>
    %cst_215 = arith.constant dense<0.000000e+00> : vector<1x480xf32>
    %862 = tpu.matmul %860, %861, %cst_215 {dimension_numbers = #tpu.dot_dimension_numbers<[1], [0], [0], [1], [0, 0, 1, 1], [], []>} : vector<1x16xf32>, vector<16x480xf32>, vector<1x480xf32> -> vector<1x480xf32>
    %863 = vector.broadcast %862 : vector<1x480xf32> to vector<8x480xf32>
    %864 = arith.addf %55, %863 : vector<8x480xf32>
    %865 = math.tanh %864 : vector<8x480xf32>
    %c0_i32_216 = arith.constant 0 : i32
    %866 = tpu.memref_slice %arg21[%c0_i32_216] : memref<2x!tpu.dma_semaphore, #tpu.memory_space<semaphore_mem>> -> memref<1x!tpu.dma_semaphore, #tpu.memory_space<semaphore_mem>>
    %867 = tpu.memref_squeeze %866 : memref<1x!tpu.dma_semaphore, #tpu.memory_space<semaphore_mem>> -> memref<!tpu.dma_semaphore, #tpu.memory_space<semaphore_mem>>
    tpu.wait_dma2 semaphore(%867 : memref<!tpu.dma_semaphore, #tpu.memory_space<semaphore_mem>>) src(%arg11 : memref<480x1152xf32, #tpu.memory_space<any>>) dst(%arg18 : memref<480x1152xf32, #tpu.memory_space<vmem>>)
    %c0_217 = arith.constant 0 : index
    %c0_218 = arith.constant 0 : index
    %868 = vector.load %arg18[%c0_217, %c0_218] : memref<480x1152xf32, #tpu.memory_space<vmem>>, vector<480x1152xf32>
    %cst_219 = arith.constant dense<0.000000e+00> : vector<8x1152xf32>
    %869 = tpu.matmul %865, %868, %cst_219 {dimension_numbers = #tpu.dot_dimension_numbers<[1], [0], [0], [1], [0, 0, 1, 1], [], []>} : vector<8x480xf32>, vector<480x1152xf32>, vector<8x1152xf32> -> vector<8x1152xf32>
    %c0_220 = arith.constant 0 : index
    %c0_221 = arith.constant 0 : index
    %870 = vector.load %arg12[%c0_220, %c0_221] : memref<1x1152xf32, #tpu.memory_space<vmem>>, vector<1x1152xf32>
    %871 = vector.broadcast %870 : vector<1x1152xf32> to vector<8x1152xf32>
    %872 = arith.addf %869, %871 : vector<8x1152xf32>
    %873 = math.tanh %872 : vector<8x1152xf32>
    %c1_i32_222 = arith.constant 1 : i32
    %874 = tpu.memref_slice %arg21[%c1_i32_222] : memref<2x!tpu.dma_semaphore, #tpu.memory_space<semaphore_mem>> -> memref<1x!tpu.dma_semaphore, #tpu.memory_space<semaphore_mem>>
    %875 = tpu.memref_squeeze %874 : memref<1x!tpu.dma_semaphore, #tpu.memory_space<semaphore_mem>> -> memref<!tpu.dma_semaphore, #tpu.memory_space<semaphore_mem>>
    tpu.wait_dma2 semaphore(%875 : memref<!tpu.dma_semaphore, #tpu.memory_space<semaphore_mem>>) src(%arg13 : memref<1152x32xf32, #tpu.memory_space<any>>) dst(%arg19 : memref<1152x32xf32, #tpu.memory_space<vmem>>)
    %c0_223 = arith.constant 0 : index
    %c0_224 = arith.constant 0 : index
    %876 = vector.load %arg19[%c0_223, %c0_224] : memref<1152x32xf32, #tpu.memory_space<vmem>>, vector<1152x32xf32>
    %cst_225 = arith.constant dense<0.000000e+00> : vector<8x32xf32>
    %877 = tpu.matmul %873, %876, %cst_225 {dimension_numbers = #tpu.dot_dimension_numbers<[1], [0], [0], [1], [0, 0, 1, 1], [], []>} : vector<8x1152xf32>, vector<1152x32xf32>, vector<8x32xf32> -> vector<8x32xf32>
    %c0_226 = arith.constant 0 : index
    %c0_227 = arith.constant 0 : index
    %878 = vector.load %arg14[%c0_226, %c0_227] : memref<1x32xf32, #tpu.memory_space<vmem>>, vector<1x32xf32>
    %879 = vector.broadcast %878 : vector<1x32xf32> to vector<8x32xf32>
    %880 = arith.addf %877, %879 : vector<8x32xf32>
    %c0_228 = arith.constant 0 : index
    %c0_229 = arith.constant 0 : index
    %881 = vector.load %arg15[%c0_228, %c0_229] : memref<1x32xf32, #tpu.memory_space<vmem>>, vector<1x32xf32>
    %c0_230 = arith.constant 0 : index
    %c0_231 = arith.constant 0 : index
    %882 = vector.load %arg16[%c0_230, %c0_231] : memref<8x32xf32, #tpu.memory_space<vmem>>, vector<8x32xf32>
    %883 = vector.broadcast %881 : vector<1x32xf32> to vector<8x32xf32>
    %884 = arith.mulf %883, %882 : vector<8x32xf32>
    %885 = arith.addf %880, %884 : vector<8x32xf32>
    %c0_232 = arith.constant 0 : index
    %c0_233 = arith.constant 0 : index
    %886 = vector.load %arg17[%c0_232, %c0_233] : memref<8x32xf32, #tpu.memory_space<vmem>>, vector<8x32xf32>
    tpu.vector_store %arg17[%c0_232, %c0_233], %885 {strides = array<i32>} : memref<8x32xf32, #tpu.memory_space<vmem>>, vector<8x32xf32>,
    return
  }
}

</mosaic_0001>

<bundles_post_ra>
// kernel: tpu_custom_call.1
= control target key start
LH: loop header
LB: loop body
LE: loop exit
PB: predicated region body
PF: predicated region fallthrough
CT: control target
= control target key end

     0   :  { %s7258_s0 = inlined_call_operand.hbm [shape: f32[8,8], index: 0, kind: input, shape index: {}]   ;;  %s7259_s1 = inlined_call_operand.vmem [shape: f32[40,10], index: 1, kind: input, shape index: {}]   ;;  %s7260_s2 = inlined_call_operand.hbm [shape: f32[16,40], index: 2, kind: input, shape index: {}]   ;;  %s7261_s3 = inlined_call_operand.hbm [shape: f32[1,64], index: 3, kind: input, shape index: {}]   ;;  %s7262_s4 = inlined_call_operand.hbm [shape: f32[16,64], index: 4, kind: input, shape index: {}]   ;;  %s7263_s5 = inlined_call_operand.hbm [shape: f32[1,64], index: 5, kind: input, shape index: {}]   ;;  %s7264_s6 = inlined_call_operand.hbm [shape: f32[32,64], index: 6, kind: input, shape index: {}]   ;;  %s7265_s7 = inlined_call_operand.hbm [shape: f32[1,64], index: 7, kind: input, shape index: {}]   ;;  %s7266_s8 = inlined_call_operand.hbm [shape: f32[8,480], index: 8, kind: input, shape index: {}]   ;;  %s7267_s9 = inlined_call_operand.hbm [shape: f32[16,480], index: 9, kind: input, shape index: {}]   ;;  %s7268_s10 = inlined_call_operand.hbm [shape: f32[1,480], index: 10, kind: input, shape index: {}]   ;;  %s7269_s11 = inlined_call_operand.hbm [shape: f32[480,1152], index: 11, kind: input, shape index: {}]   ;;  %s7270_s12 = inlined_call_operand.hbm [shape: f32[1,1152], index: 12, kind: input, shape index: {}]   ;;  %s7271_s13 = inlined_call_operand.vmem [shape: f32[1152,32], index: 13, kind: input, shape index: {}]   ;;  %s7272_s14 = inlined_call_operand.hbm [shape: f32[1,32], index: 14, kind: input, shape index: {}]   ;;  %s7273_s15 = inlined_call_operand.hbm [shape: f32[1,32], index: 15, kind: input, shape index: {}]   ;;  %s7274_s16 = inlined_call_operand.hbm [shape: f32[8,32], index: 16, kind: input, shape index: {}]   ;;  %s7275_s17 = inlined_call_operand.hbm [shape: f32[8,32], index: 17, kind: output, shape index: {}]  }
   0x1   :  { %7277 = sst [smem:[#allocation169_spill]] %s7258_s0 }
   0x2   :  { %7278 = sst [smem:[#allocation170_spill]] %s7259_s1 }
   0x3   :  { %22 = vsyncpa [#allocation7], 0 }
   0x4   :  { %23 = vsyncpa [#allocation10], 0 }
   0x5   :  { %24 = vsyncpa [#allocation13], 0 }
   0x6   :  { %25 = vsyncpa [#allocation16], 0 }
   0x7   :  { %26 = vsyncpa [#allocation19], 0 }
   0x8   :  { %27 = vsyncpa [#allocation22], 0 }
   0x9   :  { %28 = vsyncpa [#allocation25], 0 }
   0xa   :  { %29 = vsyncpa [#allocation28], 0  ;;  %s48_s26 = sshll.u32 %s7260_s2, 4  ;;  %s49_s26 = int_to_ptr.hbm [resolvable:$true] %s48_s26 }
   0xb   :  { %30 = vsyncpa [#allocation8], 0  ;;  %s5615_s27 = smov [#allocation9]   ;;  %s72_s30 = sshll.u32 %s7262_s4, 4  ;;  %s73_s30 = int_to_ptr.hbm [resolvable:$true] %s72_s30 }
   0xc   :  { %s50_s28 = sshll.u32 %s5615_s27, 4  ;;  %s5616_s18 = smov 128   ;;  %s51_s28 = int_to_ptr.vmem [resolvable:$true] %s50_s28 }
   0xd   :  { %s5617_s19 = smov 8   ;;  %s5618_s1 = smov [#allocation12]  }
   0xe   :  { %56 = dma.hbm_to_vmem [thread:$0]  %s49_s26, 256, %s51_s28, [#allocation10], %s5616_s18, %s5616_s18, %s5617_s19  }
   0xf   :  { %s74_s20 = sshll.u32 %s5618_s1, 4  ;;  %s96_s23 = sshll.u32 %s7264_s6, 4  ;;  %s75_s20 = int_to_ptr.vmem [resolvable:$true] %s74_s20  ;;  %s97_s23 = int_to_ptr.hbm [resolvable:$true] %s96_s23 }
  0x10   :  { %80 = dma.hbm_to_vmem [thread:$0]  %s73_s30, 256, %s75_s20, [#allocation13], %s5616_s18, %s5616_s18, %s5617_s19  }
  0x11   :  { %s121_s25 = sshll.u32 %s7266_s8, 4  ;;  %s5619_s27 = smov [#allocation15]   ;;  %s122_s25 = int_to_ptr.hbm [resolvable:$true] %s121_s25 }
  0x12   :  { %s98_s29 = sshll.u32 %s5619_s27, 4  ;;  %s5620_s4 = smov [#allocation18]   ;;  %s99_s29 = int_to_ptr.vmem [resolvable:$true] %s98_s29 }
  0x13   :  { %104 = dma.hbm_to_vmem [thread:$0]  %s97_s23, 512, %s99_s29, [#allocation16], %s5616_s18, %s5616_s18, %s5617_s19  }
  0x14   :  { %s123_s26 = sshll.u32 %s5620_s4, 4  ;;  %s145_s1 = sshll.u32 %s7268_s10, 4  ;;  %s124_s26 = int_to_ptr.vmem [resolvable:$true] %s123_s26  ;;  %s146_s1 = int_to_ptr.hbm [resolvable:$true] %s145_s1 }
  0x15   :  { %126 = dma.hbm_to_vmem [thread:$0]  %s122_s25, 512, %s124_s26, [#allocation19]  }
  0x16   :  { %s167_s20 = sshll.u32 %s7272_s14, 4  ;;  %s5621_s21 = smov [#allocation21]   ;;  %s168_s20 = int_to_ptr.hbm [resolvable:$true] %s167_s20 }
  0x17   :  { %s147_s8 = sshll.u32 %s5621_s21, 4  ;;  %s5622_s22 = smov [#allocation24]   ;;  %s148_s8 = int_to_ptr.vmem [resolvable:$true] %s147_s8 }
  0x18   :  { %150 = dma.hbm_to_vmem [thread:$0]  %s146_s1, 64, %s148_s8, [#allocation22]  }
  0x19   :  { %s169_s18 = sshll.u32 %s5622_s22, 4  ;;  %s7279_s2 = sld [smem:[#allocation169_spill]]  ;;  %s170_s18 = int_to_ptr.vmem [resolvable:$true] %s169_s18 }
  0x1a   :  { %172 = dma.hbm_to_vmem [thread:$0]  %s168_s20, 16, %s170_s18, [#allocation25]  }
  0x1b   :  { %s62_s27 = sshll.u32 %s7261_s3, 4  ;;  %s5623_s29 = smov [#allocation6]   ;;  %s63_s27 = int_to_ptr.hbm [resolvable:$true] %s62_s27 }
  0x1c   :  { %s38_s14 = sshll.u32 %s5623_s29, 4  ;;  %s5624_s4 = smov [#allocation11]   ;;  %s39_s14 = int_to_ptr.vmem [resolvable:$true] %s38_s14 }
  0x1d   :  { %s64_s26 = sshll.u32 %s5624_s4, 4  ;;  %s86_s1 = sshll.u32 %s7263_s5, 4  ;;  %s65_s26 = int_to_ptr.vmem [resolvable:$true] %s64_s26  ;;  %s87_s1 = int_to_ptr.hbm [resolvable:$true] %s86_s1 }
  0x1e   :  { %67 = dma.hbm_to_vmem [thread:$0]  %s63_s27, 16, %s65_s26, [#allocation10]  }
  0x1f   :  { %s36_s24 = sshll.u32 %s7279_s2, 4  ;;  %s110_s20 = sshll.u32 %s7265_s7, 4  ;;  %s37_s24 = int_to_ptr.hbm [resolvable:$true] %s36_s24  ;;  %s111_s20 = int_to_ptr.hbm [resolvable:$true] %s110_s20 }
  0x20   :  { %41 = dma.hbm_to_vmem [thread:$0]  %s37_s24, 128, %s39_s14, [#allocation7]  }
  0x21   :  { %s5625_s21 = smov [#allocation14]   ;;  %s5626_s8 = smov [#allocation17]  }
  0x22   :  { %s88_s3 = sshll.u32 %s5625_s21, 4  ;;  %s112_s22 = sshll.u32 %s5626_s8, 4  ;;  %s89_s3 = int_to_ptr.vmem [resolvable:$true] %s88_s3  ;;  %s113_s22 = int_to_ptr.vmem [resolvable:$true] %s112_s22 }
  0x23   :  { %91 = dma.hbm_to_vmem [thread:$0]  %s87_s1, 16, %s89_s3, [#allocation13]  }
  0x24   :  { %s131_s23 = sshll.u32 %s7267_s9, 4  ;;  %s5627_s5 = smov [#allocation20]   ;;  %s132_s23 = int_to_ptr.hbm [resolvable:$true] %s131_s23 }
  0x25   :  { %115 = dma.hbm_to_vmem [thread:$0]  %s111_s20, 16, %s113_s22, [#allocation16]  }
  0x26   :  { %s133_s2 = sshll.u32 %s5627_s5, 4  ;;  %s156_s7 = sshll.u32 %s7270_s12, 4  ;;  %s134_s2 = int_to_ptr.vmem [resolvable:$true] %s133_s2  ;;  %s157_s7 = int_to_ptr.hbm [resolvable:$true] %s156_s7 }
  0x27   :  { %s5628_s25 = smov 512   ;;  %s5629_s27 = smov 32  }
  0x28   :  { %139 = dma.hbm_to_vmem [thread:$0]  %s132_s23, 1024, %s134_s2, [#allocation19], %s5628_s25, %s5628_s25, %s5629_s27  }
  0x29   :  { %s5630_s29 = smov [#allocation23]   ;;  %s178_s9 = sshll.u32 %s7273_s15, 4  ;;  %s179_s9 = int_to_ptr.hbm [resolvable:$true] %s178_s9 }
  0x2a   :  { %s158_s14 = sshll.u32 %s5630_s29, 4  ;;  %s189_s1 = sshll.u32 %s7274_s16, 4  ;;  %s159_s14 = int_to_ptr.vmem [resolvable:$true] %s158_s14  ;;  %s190_s1 = int_to_ptr.hbm [resolvable:$true] %s189_s1 }
  0x2b   :  { %161 = dma.hbm_to_vmem [thread:$0]  %s157_s7, 144, %s159_s14, [#allocation22]  }
  0x2c   :  { %s5631_s6 = smov [#allocation26]   ;;  %s5632_s30 = smov [#allocation27]  }
  0x2d   :  { %s180_s12 = sshll.u32 %s5631_s6, 4  ;;  %s191_s20 = sshll.u32 %s5632_s30, 4  ;;  %s181_s12 = int_to_ptr.vmem [resolvable:$true] %s180_s12  ;;  %s192_s20 = int_to_ptr.vmem [resolvable:$true] %s191_s20 }
  0x2e   :  { %183 = dma.hbm_to_vmem [thread:$0]  %s179_s9, 16, %s181_s12, [#allocation25]  }
  0x2f   :  { %194 = dma.hbm_to_vmem [thread:$0]  %s190_s1, 128, %s192_s20, [#allocation28]  }
  0x30   :  { %5593 = dma.done.wait [#allocation7], 128  }
  0x31   :  { %5594 = vsyncadd [#allocation7], 4294967168 }
  0x32   :  { %5595 = dma.done.wait [#allocation10], 272  }
  0x33   :  { %5596 = vsyncadd [#allocation10], 4294967024 }
  0x34   :  { %5597 = dma.done.wait [#allocation13], 272  }
  0x35   :  { %5598 = vsyncadd [#allocation13], 4294967024 }
  0x36   :  { %5599 = dma.done.wait [#allocation16], 528  }
  0x37   :  { %5600 = vsyncadd [#allocation16], 4294966768 }
  0x38   :  { %5601 = dma.done.wait [#allocation19], 1536  }
  0x39   :  { %5602 = vsyncadd [#allocation19], 4294965760 }
  0x3a   :  { %5603 = dma.done.wait [#allocation22], 208  }
  0x3b   :  { %5604 = vsyncadd [#allocation22], 4294967088 }
  0x3c   :  { %5605 = dma.done.wait [#allocation25], 32  }
  0x3d   :  { %5606 = vsyncadd [#allocation25], 4294967264 }
  0x3e   :  { %5607 = dma.done.wait [#allocation28], 128  }
  0x3f   :  { %5608 = vsyncadd [#allocation28], 4294967168  ;;  %s258_s21 = sshll.u32 %s7269_s11, 4  ;;  %s5633_s3 = smov [#allocation2]   ;;  %v5779_v0 = vld [vmem:[%s7271_s13] sm:$0xff]  ;;  %v5784_v1 = vld [vmem:[%s7271_s13 + $0x8] sm:$0xff]  ;;  %s259_s21 = int_to_ptr.hbm [resolvable:$true] %s258_s21 }
  0x40   :  { %s260_s8 = sshll.u32 %s5633_s3, 4  ;;  %7280 = vst [vmem:[#allocation46_spill] sm:$0xff] %v5779_v0  ;;  %v5789_v2 = vld [vmem:[%s7271_s13 + $0x10] sm:$0xff]  ;;  %v5794_v3 = vld [vmem:[%s7271_s13 + $0x18] sm:$0xff]  ;;  %v5799_v4 = vld [vmem:[%s7271_s13 + $0x20] sm:$0xff]  ;;  %s261_s8 = int_to_ptr.vmem [resolvable:$true] %s260_s8 }
  0x41   :  { %263 = dma.hbm_to_vmem [thread:$0]  %s259_s21, 69120, %s261_s8, [#allocation5]  ;;  %7281 = vst [vmem:[#allocation47_spill] sm:$0xff] %v5784_v1  ;;  %v5804_v5 = vld [vmem:[%s7271_s13 + $0x28] sm:$0xff]  ;;  %v5809_v6 = vld [vmem:[%s7271_s13 + $0x30] sm:$0xff]  ;;  %v5814_v7 = vld [vmem:[%s7271_s13 + $0x38] sm:$0xff] }
  0x42   :  { %7282 = vst [vmem:[#allocation48_spill] sm:$0xff] %v5789_v2  ;;  %v5819_v8 = vld [vmem:[%s7271_s13 + $0x40] sm:$0xff]  ;;  %v5824_v9 = vld [vmem:[%s7271_s13 + $0x48] sm:$0xff]  ;;  %v5829_v10 = vld [vmem:[%s7271_s13 + $0x50] sm:$0xff] }
  0x43   :  { %7283 = vst [vmem:[#allocation49_spill] sm:$0xff] %v5794_v3  ;;  %v5834_v11 = vld [vmem:[%s7271_s13 + $0x58] sm:$0xff]  ;;  %v5839_v12 = vld [vmem:[%s7271_s13 + $0x60] sm:$0xff]  ;;  %v5844_v13 = vld [vmem:[%s7271_s13 + $0x68] sm:$0xff] }
  0x44   :  { %7284 = vst [vmem:[#allocation50_spill] sm:$0xff] %v5799_v4  ;;  %v5849_v14 = vld [vmem:[%s7271_s13 + $0x70] sm:$0xff]  ;;  %v5854_v15 = vld [vmem:[%s7271_s13 + $0x78] sm:$0xff]  ;;  %v5859_v16 = vld [vmem:[%s7271_s13 + $0x80] sm:$0xff] }
  0x45   :  { %7285 = vst [vmem:[#allocation51_spill] sm:$0xff] %v5804_v5  ;;  %v5864_v17 = vld [vmem:[%s7271_s13 + $0x88] sm:$0xff]  ;;  %v5869_v18 = vld [vmem:[%s7271_s13 + $0x90] sm:$0xff]  ;;  %v5874_v19 = vld [vmem:[%s7271_s13 + $0x98] sm:$0xff] }
  0x46   :  { %7286 = vst [vmem:[#allocation52_spill] sm:$0xff] %v5809_v6  ;;  %v5879_v20 = vld [vmem:[%s7271_s13 + $0xa0] sm:$0xff]  ;;  %v5884_v21 = vld [vmem:[%s7271_s13 + $0xa8] sm:$0xff]  ;;  %v5889_v22 = vld [vmem:[%s7271_s13 + $0xb0] sm:$0xff] }
  0x47   :  { %7287 = vst [vmem:[#allocation53_spill] sm:$0xff] %v5814_v7  ;;  %v5894_v23 = vld [vmem:[%s7271_s13 + $0xb8] sm:$0xff]  ;;  %v5899_v24 = vld [vmem:[%s7271_s13 + $0xc0] sm:$0xff]  ;;  %v5904_v25 = vld [vmem:[%s7271_s13 + $0xc8] sm:$0xff] }
  0x48   :  { %7288 = vst [vmem:[#allocation54_spill] sm:$0xff] %v5819_v8  ;;  %v5909_v26 = vld [vmem:[%s7271_s13 + $0xd0] sm:$0xff]  ;;  %v5914_v27 = vld [vmem:[%s7271_s13 + $0xd8] sm:$0xff]  ;;  %v5919_v28 = vld [vmem:[%s7271_s13 + $0xe0] sm:$0xff] }
  0x49   :  { %7289 = vst [vmem:[#allocation55_spill] sm:$0xff] %v5824_v9  ;;  %v5924_v29 = vld [vmem:[%s7271_s13 + $0xe8] sm:$0xff]  ;;  %v5929_v30 = vld [vmem:[%s7271_s13 + $0xf0] sm:$0xff]  ;;  %v5934_v31 = vld [vmem:[%s7271_s13 + $0xf8] sm:$0xff] }
  0x4a   :  { %7290 = vst [vmem:[#allocation56_spill] sm:$0xff] %v5859_v16  ;;  %v5939_v32 = vld [vmem:[%s7271_s13 + $0x100] sm:$0xff]  ;;  %v5944_v33 = vld [vmem:[%s7271_s13 + $0x108] sm:$0xff]  ;;  %v5949_v34 = vld [vmem:[%s7271_s13 + $0x110] sm:$0xff] }
  0x4b   :  { %7291 = vst [vmem:[#allocation57_spill] sm:$0xff] %v5864_v17  ;;  %v5954_v35 = vld [vmem:[%s7271_s13 + $0x118] sm:$0xff]  ;;  %v5959_v36 = vld [vmem:[%s7271_s13 + $0x120] sm:$0xff]  ;;  %v5964_v37 = vld [vmem:[%s7271_s13 + $0x128] sm:$0xff] }
  0x4c   :  { %7292 = vst [vmem:[#allocation58_spill] sm:$0xff] %v5869_v18  ;;  %v5969_v38 = vld [vmem:[%s7271_s13 + $0x130] sm:$0xff]  ;;  %v5974_v39 = vld [vmem:[%s7271_s13 + $0x138] sm:$0xff]  ;;  %v5979_v40 = vld [vmem:[%s7271_s13 + $0x140] sm:$0xff] }
  0x4d   :  { %7293 = vst [vmem:[#allocation59_spill] sm:$0xff] %v5874_v19  ;;  %v5984_v41 = vld [vmem:[%s7271_s13 + $0x148] sm:$0xff]  ;;  %v5989_v42 = vld [vmem:[%s7271_s13 + $0x150] sm:$0xff]  ;;  %v5994_v43 = vld [vmem:[%s7271_s13 + $0x158] sm:$0xff] }
  0x4e   :  { %7294 = vst [vmem:[#allocation60_spill] sm:$0xff] %v5879_v20  ;;  %v5999_v44 = vld [vmem:[%s7271_s13 + $0x160] sm:$0xff]  ;;  %v6004_v45 = vld [vmem:[%s7271_s13 + $0x168] sm:$0xff]  ;;  %v6009_v46 = vld [vmem:[%s7271_s13 + $0x170] sm:$0xff] }
  0x4f   :  { %7295 = vst [vmem:[#allocation61_spill] sm:$0xff] %v5884_v21  ;;  %v6014_v47 = vld [vmem:[%s7271_s13 + $0x178] sm:$0xff]  ;;  %v6019_v48 = vld [vmem:[%s7271_s13 + $0x180] sm:$0xff]  ;;  %v6024_v49 = vld [vmem:[%s7271_s13 + $0x188] sm:$0xff] }
  0x50   :  { %7296 = vst [vmem:[#allocation62_spill] sm:$0xff] %v5889_v22  ;;  %v6029_v50 = vld [vmem:[%s7271_s13 + $0x190] sm:$0xff]  ;;  %v6034_v51 = vld [vmem:[%s7271_s13 + $0x198] sm:$0xff]  ;;  %v6039_v52 = vld [vmem:[%s7271_s13 + $0x1a0] sm:$0xff] }
  0x51   :  { %7297 = vst [vmem:[#allocation63_spill] sm:$0xff] %v5894_v23  ;;  %v6044_v53 = vld [vmem:[%s7271_s13 + $0x1a8] sm:$0xff]  ;;  %v6049_v54 = vld [vmem:[%s7271_s13 + $0x1b0] sm:$0xff]  ;;  %v6054_v55 = vld [vmem:[%s7271_s13 + $0x1b8] sm:$0xff] }
  0x52   :  { %7298 = vst [vmem:[#allocation64_spill] sm:$0xff] %v5899_v24  ;;  %v6059_v56 = vld [vmem:[%s7271_s13 + $0x1c0] sm:$0xff]  ;;  %v6064_v57 = vld [vmem:[%s7271_s13 + $0x1c8] sm:$0xff]  ;;  %v6069_v58 = vld [vmem:[%s7271_s13 + $0x1d0] sm:$0xff] }
  0x53   :  { %7299 = vst [vmem:[#allocation65_spill] sm:$0xff] %v5904_v25  ;;  %v6074_v59 = vld [vmem:[%s7271_s13 + $0x1d8] sm:$0xff]  ;;  %v6079_v60 = vld [vmem:[%s7271_s13 + $0x1e0] sm:$0xff]  ;;  %v6084_v61 = vld [vmem:[%s7271_s13 + $0x1e8] sm:$0xff] }
  0x54   :  { %7300 = vst [vmem:[#allocation66_spill] sm:$0xff] %v5909_v26  ;;  %v6089_v62 = vld [vmem:[%s7271_s13 + $0x1f0] sm:$0xff]  ;;  %v6094_v63 = vld [vmem:[%s7271_s13 + $0x1f8] sm:$0xff] }
  0x55   :  { %7301 = vst [vmem:[#allocation67_spill] sm:$0xff] %v5939_v32  ;;  %v6104_v32 = vld [vmem:[%s7271_s13 + $0x208] sm:$0xff]  ;;  %v6109_v16 = vld [vmem:[%s7271_s13 + $0x210] sm:$0xff]  ;;  %v6114_v0 = vld [vmem:[%s7271_s13 + $0x218] sm:$0xff] }
  0x56   :  { %7302 = vst [vmem:[#allocation68_spill] sm:$0xff] %v5944_v33 }
  0x57   :  { %7303 = vst [vmem:[#allocation69_spill] sm:$0xff] %v5949_v34 }
  0x58   :  { %7304 = vst [vmem:[#allocation70_spill] sm:$0xff] %v5954_v35 }
  0x59   :  { %7305 = vst [vmem:[#allocation71_spill] sm:$0xff] %v5959_v36 }
  0x5a   :  { %7306 = vst [vmem:[#allocation72_spill] sm:$0xff] %v5964_v37 }
  0x5b   :  { %7307 = vst [vmem:[#allocation73_spill] sm:$0xff] %v5969_v38 }
  0x5c   :  { %7308 = vst [vmem:[#allocation74_spill] sm:$0xff] %v5974_v39 }
  0x5d   :  { %7309 = vst [vmem:[#allocation75_spill] sm:$0xff] %v5979_v40 }
  0x5e   :  { %7310 = vst [vmem:[#allocation76_spill] sm:$0xff] %v5984_v41 }
  0x5f   :  { %7311 = vst [vmem:[#allocation77_spill] sm:$0xff] %v5989_v42 }
  0x60   :  { %7312 = vst [vmem:[#allocation78_spill] sm:$0xff] %v6019_v48  ;;  %v6099_v48 = vld [vmem:[%s7271_s13 + $0x200] sm:$0xff] }
  0x61   :  { %7313 = vst [vmem:[#allocation79_spill] sm:$0xff] %v6024_v49  ;;  %v6119_v49 = vld [vmem:[%s7271_s13 + $0x220] sm:$0xff] }
  0x62   :  { %7314 = vst [vmem:[#allocation80_spill] sm:$0xff] %v6029_v50 }
  0x63   :  { %7315 = vst [vmem:[#allocation81_spill] sm:$0xff] %v6034_v51 }
  0x64   :  { %7316 = vst [vmem:[#allocation82_spill] sm:$0xff] %v6039_v52 }
  0x65   :  { %7317 = vst [vmem:[#allocation83_spill] sm:$0xff] %v6044_v53 }
  0x66   :  { %7318 = vst [vmem:[#allocation84_spill] sm:$0xff] %v6049_v54 }
  0x67   :  { %7319 = vst [vmem:[#allocation85_spill] sm:$0xff] %v6054_v55 }
  0x68   :  { %7320 = vst [vmem:[#allocation86_spill] sm:$0xff] %v6059_v56 }
  0x69   :  { %7321 = vst [vmem:[#allocation87_spill] sm:$0xff] %v6064_v57 }
  0x6a   :  { %7322 = vst [vmem:[#allocation88_spill] sm:$0xff] %v6069_v58 }
  0x6b   :  { %7323 = vst [vmem:[#allocation89_spill] sm:$0xff] %v6099_v48  ;;  %v6124_v48 = vld [vmem:[%s7271_s13 + $0x228] sm:$0xff] }
  0x6c   :  { %7324 = vst [vmem:[#allocation90_spill] sm:$0xff] %v6104_v32  ;;  %v6129_v32 = vld [vmem:[%s7271_s13 + $0x230] sm:$0xff] }
  0x6d   :  { %7325 = vst [vmem:[#allocation91_spill] sm:$0xff] %v6109_v16  ;;  %v6134_v16 = vld [vmem:[%s7271_s13 + $0x238] sm:$0xff] }
  0x6e   :  { %7326 = vst [vmem:[#allocation92_spill] sm:$0xff] %v6114_v0  ;;  %v6139_v0 = vld [vmem:[%s7271_s13 + $0x240] sm:$0xff] }
  0x6f   :  { %7327 = vst [vmem:[#allocation93_spill] sm:$0xff] %v6119_v49  ;;  %v6144_v49 = vld [vmem:[%s7271_s13 + $0x248] sm:$0xff] }
  0x70   :  { %7328 = vst [vmem:[#allocation94_spill] sm:$0xff] %v6124_v48  ;;  %v6149_v48 = vld [vmem:[%s7271_s13 + $0x250] sm:$0xff] }
  0x71   :  { %7329 = vst [vmem:[#allocation95_spill] sm:$0xff] %v6129_v32  ;;  %v6154_v32 = vld [vmem:[%s7271_s13 + $0x258] sm:$0xff] }
  0x72   :  { %7330 = vst [vmem:[#allocation96_spill] sm:$0xff] %v6134_v16  ;;  %v6159_v16 = vld [vmem:[%s7271_s13 + $0x260] sm:$0xff] }
  0x73   :  { %7331 = vst [vmem:[#allocation97_spill] sm:$0xff] %v6139_v0  ;;  %v6164_v0 = vld [vmem:[%s7271_s13 + $0x268] sm:$0xff] }
  0x74   :  { %7332 = vst [vmem:[#allocation98_spill] sm:$0xff] %v6144_v49  ;;  %v6169_v49 = vld [vmem:[%s7271_s13 + $0x270] sm:$0xff] }
  0x75   :  { %7333 = vst [vmem:[#allocation99_spill] sm:$0xff] %v6149_v48  ;;  %v6174_v48 = vld [vmem:[%s7271_s13 + $0x278] sm:$0xff] }
  0x76   :  { %7334 = vst [vmem:[#allocation100_spill] sm:$0xff] %v6154_v32  ;;  %v6179_v32 = vld [vmem:[%s7271_s13 + $0x280] sm:$0xff] }
  0x77   :  { %7335 = vst [vmem:[#allocation101_spill] sm:$0xff] %v6159_v16  ;;  %v6184_v16 = vld [vmem:[%s7271_s13 + $0x288] sm:$0xff] }
  0x78   :  { %7336 = vst [vmem:[#allocation102_spill] sm:$0xff] %v6164_v0  ;;  %v6189_v0 = vld [vmem:[%s7271_s13 + $0x290] sm:$0xff] }
  0x79   :  { %7337 = vst [vmem:[#allocation103_spill] sm:$0xff] %v6169_v49  ;;  %v6194_v49 = vld [vmem:[%s7271_s13 + $0x298] sm:$0xff] }
  0x7a   :  { %7338 = vst [vmem:[#allocation104_spill] sm:$0xff] %v6174_v48  ;;  %v6199_v48 = vld [vmem:[%s7271_s13 + $0x2a0] sm:$0xff] }
  0x7b   :  { %7339 = vst [vmem:[#allocation105_spill] sm:$0xff] %v6179_v32  ;;  %v6204_v32 = vld [vmem:[%s7271_s13 + $0x2a8] sm:$0xff] }
  0x7c   :  { %7340 = vst [vmem:[#allocation106_spill] sm:$0xff] %v6184_v16  ;;  %v6209_v16 = vld [vmem:[%s7271_s13 + $0x2b0] sm:$0xff] }
  0x7d   :  { %7341 = vst [vmem:[#allocation107_spill] sm:$0xff] %v6189_v0  ;;  %v6214_v0 = vld [vmem:[%s7271_s13 + $0x2b8] sm:$0xff] }
  0x7e   :  { %7342 = vst [vmem:[#allocation108_spill] sm:$0xff] %v6194_v49  ;;  %v6219_v49 = vld [vmem:[%s7271_s13 + $0x2c0] sm:$0xff] }
  0x7f   :  { %7343 = vst [vmem:[#allocation109_spill] sm:$0xff] %v6199_v48  ;;  %v6224_v48 = vld [vmem:[%s7271_s13 + $0x2c8] sm:$0xff] }
  0x80   :  { %7344 = vst [vmem:[#allocation110_spill] sm:$0xff] %v6204_v32  ;;  %v6229_v32 = vld [vmem:[%s7271_s13 + $0x2d0] sm:$0xff] }
  0x81   :  { %7345 = vst [vmem:[#allocation111_spill] sm:$0xff] %v6209_v16  ;;  %v6234_v16 = vld [vmem:[%s7271_s13 + $0x2d8] sm:$0xff] }
  0x82   :  { %7346 = vst [vmem:[#allocation112_spill] sm:$0xff] %v6214_v0  ;;  %v6239_v0 = vld [vmem:[%s7271_s13 + $0x2e0] sm:$0xff] }
  0x83   :  { %7347 = vst [vmem:[#allocation113_spill] sm:$0xff] %v6219_v49  ;;  %v6244_v49 = vld [vmem:[%s7271_s13 + $0x2e8] sm:$0xff] }
  0x84   :  { %7348 = vst [vmem:[#allocation114_spill] sm:$0xff] %v6224_v48  ;;  %v6249_v48 = vld [vmem:[%s7271_s13 + $0x2f0] sm:$0xff] }
  0x85   :  { %7349 = vst [vmem:[#allocation115_spill] sm:$0xff] %v6229_v32  ;;  %v6254_v32 = vld [vmem:[%s7271_s13 + $0x2f8] sm:$0xff] }
  0x86   :  { %7350 = vst [vmem:[#allocation116_spill] sm:$0xff] %v6234_v16  ;;  %v6259_v16 = vld [vmem:[%s7271_s13 + $0x300] sm:$0xff] }
  0x87   :  { %7351 = vst [vmem:[#allocation117_spill] sm:$0xff] %v6239_v0  ;;  %v6264_v0 = vld [vmem:[%s7271_s13 + $0x308] sm:$0xff] }
  0x88   :  { %7352 = vst [vmem:[#allocation118_spill] sm:$0xff] %v6244_v49  ;;  %v6269_v49 = vld [vmem:[%s7271_s13 + $0x310] sm:$0xff] }
  0x89   :  { %7353 = vst [vmem:[#allocation119_spill] sm:$0xff] %v6249_v48  ;;  %v6274_v48 = vld [vmem:[%s7271_s13 + $0x318] sm:$0xff] }
  0x8a   :  { %7354 = vst [vmem:[#allocation120_spill] sm:$0xff] %v6254_v32  ;;  %v6279_v32 = vld [vmem:[%s7271_s13 + $0x320] sm:$0xff] }
  0x8b   :  { %7355 = vst [vmem:[#allocation121_spill] sm:$0xff] %v6259_v16  ;;  %v6284_v16 = vld [vmem:[%s7271_s13 + $0x328] sm:$0xff] }
  0x8c   :  { %7356 = vst [vmem:[#allocation122_spill] sm:$0xff] %v6264_v0  ;;  %v6289_v0 = vld [vmem:[%s7271_s13 + $0x330] sm:$0xff] }
  0x8d   :  { %7357 = vst [vmem:[#allocation123_spill] sm:$0xff] %v6269_v49  ;;  %v6294_v49 = vld [vmem:[%s7271_s13 + $0x338] sm:$0xff] }
  0x8e   :  { %7358 = vst [vmem:[#allocation124_spill] sm:$0xff] %v6274_v48  ;;  %v6299_v48 = vld [vmem:[%s7271_s13 + $0x340] sm:$0xff] }
  0x8f   :  { %7359 = vst [vmem:[#allocation125_spill] sm:$0xff] %v6279_v32  ;;  %v6304_v32 = vld [vmem:[%s7271_s13 + $0x348] sm:$0xff] }
  0x90   :  { %7360 = vst [vmem:[#allocation126_spill] sm:$0xff] %v6284_v16  ;;  %v6309_v16 = vld [vmem:[%s7271_s13 + $0x350] sm:$0xff] }
  0x91   :  { %7361 = vst [vmem:[#allocation127_spill] sm:$0xff] %v6289_v0  ;;  %v6314_v0 = vld [vmem:[%s7271_s13 + $0x358] sm:$0xff] }
  0x92   :  { %7362 = vst [vmem:[#allocation128_spill] sm:$0xff] %v6294_v49  ;;  %v6319_v49 = vld [vmem:[%s7271_s13 + $0x360] sm:$0xff] }
  0x93   :  { %7363 = vst [vmem:[#allocation129_spill] sm:$0xff] %v6299_v48  ;;  %v6324_v48 = vld [vmem:[%s7271_s13 + $0x368] sm:$0xff] }
  0x94   :  { %7364 = vst [vmem:[#allocation130_spill] sm:$0xff] %v6304_v32  ;;  %v6329_v32 = vld [vmem:[%s7271_s13 + $0x370] sm:$0xff] }
  0x95   :  { %7365 = vst [vmem:[#allocation131_spill] sm:$0xff] %v6309_v16  ;;  %v6334_v16 = vld [vmem:[%s7271_s13 + $0x378] sm:$0xff] }
  0x96   :  { %7366 = vst [vmem:[#allocation132_spill] sm:$0xff] %v6314_v0  ;;  %v6339_v0 = vld [vmem:[%s7271_s13 + $0x380] sm:$0xff] }
  0x97   :  { %7367 = vst [vmem:[#allocation133_spill] sm:$0xff] %v6319_v49  ;;  %v6344_v49 = vld [vmem:[%s7271_s13 + $0x388] sm:$0xff] }
  0x98   :  { %7368 = vst [vmem:[#allocation134_spill] sm:$0xff] %v6324_v48  ;;  %v6349_v48 = vld [vmem:[%s7271_s13 + $0x390] sm:$0xff] }
  0x99   :  { %7369 = vst [vmem:[#allocation135_spill] sm:$0xff] %v6329_v32  ;;  %v6354_v32 = vld [vmem:[%s7271_s13 + $0x398] sm:$0xff] }
  0x9a   :  { %7370 = vst [vmem:[#allocation136_spill] sm:$0xff] %v6334_v16  ;;  %v6359_v16 = vld [vmem:[%s7271_s13 + $0x3a0] sm:$0xff] }
  0x9b   :  { %7371 = vst [vmem:[#allocation137_spill] sm:$0xff] %v6339_v0  ;;  %v6364_v0 = vld [vmem:[%s7271_s13 + $0x3a8] sm:$0xff] }
  0x9c   :  { %7372 = vst [vmem:[#allocation138_spill] sm:$0xff] %v6344_v49  ;;  %v6369_v49 = vld [vmem:[%s7271_s13 + $0x3b0] sm:$0xff] }
  0x9d   :  { %7373 = vst [vmem:[#allocation139_spill] sm:$0xff] %v6349_v48  ;;  %v6374_v48 = vld [vmem:[%s7271_s13 + $0x3b8] sm:$0xff] }
  0x9e   :  { %7374 = vst [vmem:[#allocation140_spill] sm:$0xff] %v6354_v32  ;;  %v6379_v32 = vld [vmem:[%s7271_s13 + $0x3c0] sm:$0xff] }
  0x9f   :  { %7375 = vst [vmem:[#allocation141_spill] sm:$0xff] %v6359_v16  ;;  %v6384_v16 = vld [vmem:[%s7271_s13 + $0x3c8] sm:$0xff] }
  0xa0   :  { %7376 = vst [vmem:[#allocation142_spill] sm:$0xff] %v6364_v0  ;;  %v6389_v0 = vld [vmem:[%s7271_s13 + $0x3d0] sm:$0xff] }
  0xa1   :  { %7377 = vst [vmem:[#allocation143_spill] sm:$0xff] %v6369_v49  ;;  %v6394_v49 = vld [vmem:[%s7271_s13 + $0x3d8] sm:$0xff] }
  0xa2   :  { %7378 = vst [vmem:[#allocation144_spill] sm:$0xff] %v6374_v48  ;;  %v6399_v48 = vld [vmem:[%s7271_s13 + $0x3e0] sm:$0xff] }
  0xa3   :  { %7379 = vst [vmem:[#allocation145_spill] sm:$0xff] %v6379_v32  ;;  %v6404_v32 = vld [vmem:[%s7271_s13 + $0x3e8] sm:$0xff] }
  0xa4   :  { %7380 = vst [vmem:[#allocation146_spill] sm:$0xff] %v6384_v16  ;;  %v6409_v16 = vld [vmem:[%s7271_s13 + $0x3f0] sm:$0xff] }
  0xa5   :  { %7381 = vst [vmem:[#allocation147_spill] sm:$0xff] %v6389_v0  ;;  %v6414_v0 = vld [vmem:[%s7271_s13 + $0x3f8] sm:$0xff] }
  0xa6   :  { %7382 = vst [vmem:[#allocation148_spill] sm:$0xff] %v6394_v49  ;;  %v6419_v49 = vld [vmem:[%s7271_s13 + $0x400] sm:$0xff] }
  0xa7   :  { %7383 = vst [vmem:[#allocation149_spill] sm:$0xff] %v6399_v48  ;;  %v6424_v48 = vld [vmem:[%s7271_s13 + $0x408] sm:$0xff] }
  0xa8   :  { %7384 = vst [vmem:[#allocation150_spill] sm:$0xff] %v6404_v32  ;;  %v6429_v32 = vld [vmem:[%s7271_s13 + $0x410] sm:$0xff] }
  0xa9   :  { %7385 = vst [vmem:[#allocation151_spill] sm:$0xff] %v6409_v16  ;;  %v6434_v16 = vld [vmem:[%s7271_s13 + $0x418] sm:$0xff] }
  0xaa   :  { %7386 = vst [vmem:[#allocation152_spill] sm:$0xff] %v6414_v0  ;;  %v6439_v0 = vld [vmem:[%s7271_s13 + $0x420] sm:$0xff] }
  0xab   :  { %7387 = vst [vmem:[#allocation153_spill] sm:$0xff] %v6419_v49  ;;  %v6444_v49 = vld [vmem:[%s7271_s13 + $0x428] sm:$0xff] }
  0xac   :  { %7388 = vst [vmem:[#allocation154_spill] sm:$0xff] %v6424_v48  ;;  %v6449_v48 = vld [vmem:[%s7271_s13 + $0x430] sm:$0xff] }
  0xad   :  { %7389 = vst [vmem:[#allocation155_spill] sm:$0xff] %v6429_v32  ;;  %v6454_v32 = vld [vmem:[%s7271_s13 + $0x438] sm:$0xff] }
  0xae   :  { %7390 = vst [vmem:[#allocation156_spill] sm:$0xff] %v6434_v16  ;;  %v6459_v16 = vld [vmem:[%s7271_s13 + $0x440] sm:$0xff] }
  0xaf   :  { %7391 = vst [vmem:[#allocation157_spill] sm:$0xff] %v6439_v0  ;;  %v6464_v0 = vld [vmem:[%s7271_s13 + $0x448] sm:$0xff] }
  0xb0   :  { %7392 = vst [vmem:[#allocation158_spill] sm:$0xff] %v6444_v49  ;;  %v6469_v49 = vld [vmem:[%s7271_s13 + $0x450] sm:$0xff] }
  0xb1   :  { %7393 = vst [vmem:[#allocation159_spill] sm:$0xff] %v6449_v48  ;;  %v6474_v48 = vld [vmem:[%s7271_s13 + $0x458] sm:$0xff] }
  0xb2   :  { %7394 = vst [vmem:[#allocation160_spill] sm:$0xff] %v6454_v32  ;;  %v6479_v32 = vld [vmem:[%s7271_s13 + $0x460] sm:$0xff] }
  0xb3   :  { %7395 = vst [vmem:[#allocation161_spill] sm:$0xff] %v6459_v16  ;;  %v6484_v16 = vld [vmem:[%s7271_s13 + $0x468] sm:$0xff] }
  0xb4   :  { %7396 = vst [vmem:[#allocation162_spill] sm:$0xff] %v6464_v0  ;;  %v6489_v0 = vld [vmem:[%s7271_s13 + $0x470] sm:$0xff] }
  0xb5   :  { %7397 = vst [vmem:[#allocation163_spill] sm:$0xff] %v6469_v49  ;;  %v6494_v49 = vld [vmem:[%s7271_s13 + $0x478] sm:$0xff] }
  0xb6   :  { %7398 = vst [vmem:[#allocation164_spill] sm:$0xff] %v6474_v48 }
  0xb7   :  { %7399 = vst [vmem:[#allocation165_spill] sm:$0xff] %v6479_v32 }
  0xb8   :  { %7400 = vst [vmem:[#allocation166_spill] sm:$0xff] %v6484_v16 }
  0xb9   :  { %7401 = vst [vmem:[#allocation167_spill] sm:$0xff] %v6489_v0 }
  0xba   :  { %7402 = vst [vmem:[#allocation168_spill] sm:$0xff] %v6494_v49 }
  0xbb   :  { %568 = vsyncadd [#allocation5 + $0x1], 18432  ;;  %s7403_s25 = sld [smem:[#allocation170_spill]]  ;;  %v569_v33 = vld [vmem:[#allocation9] sm:$0xff]  ;;  %vm576_vm0 = vcmask 326656   ;;  %vm606_vm1 = vcmask 80896  }
  0xbc   :  { %v731_v19 = vld [vmem:[#allocation18 + $0x10] sm:$0xff]  ;;  %vm743_vm3 = vcmask 64512   ;;  %vm710_vm12 = vcmask 56320   ;;  %vm725_vm13 = vcmask 523264   ;;  %s5636_s1 = smov 96   ;;  %s5637_s6 = smov 16  }
  0xbd   :  { %802 = vmatpush.msra.mxu3 %v731_v19  ;;  %s5638_s12 = smov 80  }
  0xc1   :  { %v575_v48 = vld [vmem:[%s7403_s25 + $0x20] sm:$0xff]  ;;  %v574_v32 = vld [vmem:[%s7403_s25 + $0x18] sm:$0xff]  ;;  %v573_v16 = vld [vmem:[%s7403_s25 + $0x10] sm:$0xff] }
  0xc2   :  { %594 = vmatpush.msra.mxu0 %v575_v48  ;;  %v572_v0 = vld [vmem:[%s7403_s25 + $0x8] sm:$0xff]  ;;  %v571_v49 = vld [vmem:[%s7403_s25] sm:$0xff] }
  0xc4   :  { %595 = vmatpush.msra.mxu0 %v574_v32  ;;  %v5634_v32 = vmov 10.0  }
  0xc5   :  { %4888 = vrcp.f32 %v5634_v32  ;;  %v6519_v32 = vld [vmem:[#allocation12 + $0x8] sm:$0xff] }
  0xc6   :  { %596 = vmatpush.msra.mxu0 %v573_v16  ;;  %854 = vmatpush.msrb.mxu3 %v6519_v32 }
  0xc8   :  { %597 = vmatpush.msra.mxu0 %v572_v0 }
  0xca   :  { %598 = vmatpush.msra.mxu0 %v571_v49 }
  0xcb   :  { %4810 = vmatmul.msk.f32.vlgmr.msra.gmra.mxu0 %vm576_vm0, %v569_v33  ;;  %v4889_v1 = vpop.eup %4888 }
  0xcc   :  { %v614_v50 = vmul.f32 10.0, %v4889_v1  ;;  %vm618_vm2 = vweird.f32 %v4889_v1 }
  0xce   :  { %v615_v16 = vsub.f32 1.0, %v614_v50 }
  0xd0   :  { %v616_v34 = vmul.f32 %v4889_v1, %v615_v16 }
  0xd2   :  { %v617_v18 = vadd.f32 %v4889_v1, %v616_v34 }
  0xd4   :  { %v6513_v2 = vsel %vm618_vm2, %v4889_v1, %v617_v18  ;;  %v6523_v1 = vld [vmem:[#allocation12] sm:$0xff]  ;;  %v5635_v18 = vmov 0.0  }
  0xd5   :  { %855 = vmatpush.msrb.mxu3 %v6523_v1 }
 0x148   :  { %v600_v48 = vpop.f32.mrf.mxu0 }
 0x149   :  { %v607_v17 = vsel %vm606_vm1, %v600_v48, 0.0 }
 0x14a   :  { %608 = vadd.xlane.f32.xlu0 %v607_v17  ;;  %v6517_v17 = vld [vmem:[#allocation6] sm:$0xff] }
 0x14b   :  { %4814 = vmatmul.msk.f32.vlgmr.msra.gmra.mxu3 %vm743_vm3, %v6517_v17 }
 0x153   :  { %856 = vmatmul.f32.vlgmr.msrb.gmra.mxu3 %v5635_v18 }
 0x1bd   :  { %v609_v0 = vpop.xlane.xlu0 %608 }
 0x1be   :  { %v620_v49 = vmul.f32 %v6513_v2, %v609_v0 }
 0x1c0   :  { %v622_v51 = vsub.f32 %v600_v48, %v620_v49 }
 0x1c2   :  { %v624_v33 = vmul.f32 %v622_v51, %v622_v51 }
 0x1c4   :  { %v626_v35 = vsel %vm606_vm1, %v624_v33, 0.0 }
 0x1c5   :  { %627 = vadd.xlane.f32.xlu0 %v626_v35 }
 0x238   :  { %v628_v34 = vpop.xlane.xlu0 %627 }
 0x239   :  { %v632_v35 = vmul.f32 %v628_v34, %v6513_v2 }
 0x23b   :  { %v634_v50 = vadd.f32 1e-05, %v632_v35 }
 0x23d   :  { %4890 = vrsqrt.f32 %v634_v50  ;;  %vm642_vm5 = vweird.f32 %v634_v50 }
 0x243   :  { %v4891_v48 = vpop.eup %4890 }
 0x244   :  { %v637_v16 = vmul.f32 %v4891_v48, %v634_v50  ;;  %vm643_vm4 = vweird.f32 %v4891_v48 }
 0x245   :  { %vm644_vm6 = vmor %vm642_vm5, %vm643_vm4 }
 0x246   :  { %v638_v0 = vmul.f32 %v4891_v48, %v637_v16 }
 0x248   :  { %v639_v19 = vmul.f32 0.5, %v638_v0 }
 0x24a   :  { %v640_v49 = vsub.f32 1.5, %v639_v19 }
 0x24c   :  { %v641_v33 = vmul.f32 %v4891_v48, %v640_v49 }
 0x24e   :  { %v645_v3 = vsel %vm644_vm6, %v4891_v48, %v641_v33  ;;  %vm836_vm6 = vcmask 130048  }
 0x24f   :  { %v656_v52 = vmul.f32 %v645_v3, %v622_v51 }
 0x251   :  { %v658_v36 = vand.u32 2147483647, %v656_v52  ;;  %vm666_vm10 = vcmp.ge.f32.partialorder %v656_v52, 0.0 }
 0x253   :  { %v660_v20 = vsub.f32 0.0, %v658_v36 }
 0x255   :  { %v662_v4 = vmul.f32 1.442695, %v660_v20 }
 0x257   :  { %4892 = vpow2.f32 %v662_v4 }
 0x25d   :  { %v4893_v18 = vpop.eup %4892 }
 0x25e   :  { %v670_v53 = vadd.f32 1.0, %v4893_v18  ;;  %v668_v36 = vsel %vm666_vm10, 1.0, %v4893_v18 }
 0x260   :  { %4894 = vrcp.f32 %v670_v53  ;;  %v683_v21 = vand.u32 2147483648, %v670_v53  ;;  %v681_v0 = vand.u32 2147483647, %v670_v53  ;;  %vm677_vm8 = vweird.f32 %v670_v53 }
 0x262   :  { %v684_v50 = vor.u32 1.1754944e-38, %v683_v21  ;;  %vm682_vm11 = vcmp.eq.f32.partialorder %v681_v0, 8.507059e+37  ;;  %v6532_v0 = vld [vmem:[#allocation14] sm:$0x1] }
 0x266   :  { %v4895_v34 = vpop.eup %4894 }
 0x267   :  { %v673_v35 = vmul.f32 %v4895_v34, %v670_v53  ;;  %vm678_vm7 = vweird.f32 %v4895_v34  ;;  %v6529_v53 = vpop.f32.mrf.mxu3 }
 0x268   :  { %vm679_vm9 = vmor %vm677_vm8, %vm678_vm7  ;;  %vm907_vm7 = vcmask 261120  }
 0x269   :  { %v674_v37 = vsub.f32 1.0, %v673_v35  ;;  %v4887_v35 = vld [vmem:[#allocation11] ss:$0 sm:$0xff] }
 0x26b   :  { %v675_v16 = vmul.f32 %v4895_v34, %v674_v37 }
 0x26d   :  { %v676_v19 = vadd.f32 %v4895_v34, %v675_v16 }
 0x26f   :  { %v680_v3 = vsel %vm679_vm9, %v4895_v34, %v676_v19  ;;  %v857_v18 = vpop.f32.mrf.mxu3 }
 0x270   :  { %v685_v20 = vsel %vm682_vm11, %v684_v50, %v680_v3 }
 0x271   :  { %v686_v4 = vmul.f32 %v685_v20, %v668_v36 }
 0x273   :  { %v702_v51 = vadd.f32 1.0, %v686_v4 }
 0x275   :  { %4896 = vlog2.f32 %v702_v51 }
 0x27b   :  { %v4897_v48 = vpop.eup %4896 }
 0x27c   :  { %v705_v49 = vmul.f32 0.6931472, %v4897_v48 }
 0x27e   :  { %v708_v33 = vmul.f32 %v705_v49, %v656_v52 }
 0x280   :  { %v711_v37 = vsel %vm710_vm12, %v708_v33, 0.0 }
 0x281   :  { %712 = vadd.xlane.f32.xlu1 %v711_v37 }
 0x2f4   :  { %v713_v16 = vpop.xlane.xlu1 %712 }
 0x2f5   :  { %v717_v21 = vmul.f32 0.125, %v713_v16 }
 0x2f7   :  { %v723_v34 = vmul.f32 %v4887_v35, %v717_v21 }
 0x2f9   :  { %726 = vst.msk [vmem:[#allocation4] sm:$0xff] %vm725_vm13, %v723_v34 }
 0x300   :  { %v835_v19 = vld [vmem:[#allocation4] sm:$0x1] }
 0x301   :  { %v860_v50 = vadd.f32 %v857_v18, %v835_v19 }
 0x303   :  { %v861_v3 = vadd.f32 %v860_v50, %v6532_v0 }
 0x305   :  { %4898 = vtanh.f32 %v861_v3  ;;  %v862_v36 = vand.u32 2147483647, %v861_v3  ;;  %vm866_vm5 = vcmp.ge.f32.partialorder %v861_v3, 0.0  ;;  %v6544_v3 = vld [vmem:[#allocation15 + $0x10] sm:$0xff] }
 0x307   :  { %v863_v20 = vsub.f32 0.0, %v862_v36 }
 0x309   :  { %v864_v4 = vmul.f32 1.442695, %v863_v20 }
 0x30b   :  { %v4899_v52 = vpop.eup %4898  ;;  %4900 = vpow2.f32 %v864_v4 }
 0x30c   :  { %887 = vrot.lane.b32.xlu1 %v4899_v52, %s5636_s1 }
 0x311   :  { %v4901_v51 = vpop.eup %4900 }
 0x312   :  { %v868_v48 = vadd.f32 1.0, %v4901_v51  ;;  %v867_v52 = vsel %vm866_vm5, 1.0, %v4901_v51  ;;  %v6548_v51 = vld [vmem:[#allocation15 + $0x8] sm:$0xff] }
 0x314   :  { %4902 = vrcp.f32 %v868_v48  ;;  %v880_v21 = vand.u32 2147483648, %v868_v48  ;;  %vm874_vm15 = vweird.f32 %v868_v48  ;;  %v878_v34 = vand.u32 2147483647, %v868_v48 }
 0x316   :  { %v881_v19 = vor.u32 1.1754944e-38, %v880_v21  ;;  %vm879_vm4 = vcmp.eq.f32.partialorder %v878_v34, 8.507059e+37  ;;  %v6541_v21 = vld [vmem:[#allocation15 + $0x18] sm:$0xff] }
 0x317   :  { %923 = vmatpush.msra.mxu3 %v6541_v21  ;;  %1060 = vmatpush.msrb.mxu0 %v6541_v21 }
 0x319   :  { %924 = vmatpush.msra.mxu3 %v6544_v3  ;;  %1061 = vmatpush.msrb.mxu0 %v6544_v3 }
 0x31a   :  { %v4903_v49 = vpop.eup %4902 }
 0x31b   :  { %v870_v33 = vmul.f32 %v4903_v49, %v868_v48  ;;  %vm875_vm14 = vweird.f32 %v4903_v49  ;;  %925 = vmatpush.msra.mxu3 %v6548_v51  ;;  %1062 = vmatpush.msrb.mxu0 %v6548_v51 }
 0x31c   :  { %vm876_vm2 = vmor %vm874_vm15, %vm875_vm14 }
 0x31d   :  { %v871_v37 = vsub.f32 1.0, %v870_v33 }
 0x31f   :  { %v872_v35 = vmul.f32 %v4903_v49, %v871_v37 }
 0x321   :  { %v873_v16 = vadd.f32 %v4903_v49, %v872_v35 }
 0x323   :  { %v877_v18 = vsel %vm876_vm2, %v4903_v49, %v873_v16  ;;  %v729_v49 = vld [vmem:[#allocation18] sm:$0xff]  ;;  %v732_v16 = vld [vmem:[#allocation18 + $0x18] sm:$0xff] }
 0x324   :  { %v882_v50 = vsel %vm879_vm4, %v881_v19, %v877_v18  ;;  %762 = vmatpush.msra.mxu1 %v729_v49  ;;  %v6562_v19 = vld [vmem:[#allocation15] sm:$0xff] }
 0x325   :  { %v883_v36 = vmul.f32 %v882_v50, %v867_v52  ;;  %4812 = vmatmul.msk.f32.vlgmr.msra.gmra.mxu1 %vm743_vm3, %v6517_v17  ;;  %926 = vmatpush.msra.mxu3 %v6562_v19  ;;  %v6584_v49 = vld [vmem:[#allocation17] sm:$0x1] }
 0x326   :  { %822 = vmatpush.msrb.mxu1 %v732_v16  ;;  %1063 = vmatpush.msrb.mxu0 %v6562_v19 }
 0x327   :  { %v885_v33 = vmul.f32 0.0, %v883_v36  ;;  %1125 = vmatpush.msrb.mxu3 %v6519_v32 }
 0x328   :  { %988 = vmatpush.msra.mxu1 %v6519_v32  ;;  %1197 = vmatpush.msra.mxu0 %v6541_v21 }
 0x329   :  { %1126 = vmatpush.msrb.mxu3 %v6523_v1 }
 0x32a   :  { %989 = vmatpush.msra.mxu1 %v6523_v1  ;;  %1198 = vmatpush.msra.mxu0 %v6544_v3 }
 0x32c   :  { %1199 = vmatpush.msra.mxu0 %v6548_v51 }
 0x32d   :  { %4815 = vmatmul.msk.f32.vlgmr.msrb.gmra.mxu1 %vm743_vm3, %v6517_v17 }
 0x32e   :  { %1262 = vmatpush.msrb.mxu1 %v6519_v32  ;;  %1200 = vmatpush.msra.mxu0 %v6562_v19 }
 0x330   :  { %1263 = vmatpush.msrb.mxu1 %v6523_v1 }
 0x37e   :  { %v888_v20 = vpop.permute.xlu1 %887 }
 0x37f   :  { %v890_v4 = vmul.f32 %v888_v20, %v883_v36 }
 0x381   :  { %892 = vrot.lane.b32.xlu2 %v890_v4, %s5637_s6  ;;  %v971_v4 = vld [vmem:[#allocation4 + $0x1] sm:$0x1] }
 0x3db   :  { %v893_v37 = vpop.permute.xlu2 %892 }
 0x3dc   :  { %v6537_v35 = vadd.f32 %v893_v37, %v885_v33 }
 0x3de   :  { %4904 = vtanh.f32 %v6537_v35 }
 0x3e4   :  { %v4905_v48 = vpop.eup %4904 }
 0x3e5   :  { %898 = vrot.lane.b32.xlu2 %v4905_v48, %s5629_s27 }
 0x43f   :  { %v899_v34 = vpop.permute.xlu2 %898 }
 0x440   :  { %v901_v18 = vmul.f32 %v899_v34, %v883_v36  ;;  %v6579_v36 = vpop.f32.mrf.mxu1 }
 0x442   :  { %903 = vrot.lane.b32.xlu0 %v901_v18, %s5638_s12 }
 0x448   :  { %v6581_v20 = vpop.f32.mrf.mxu1 }
 0x4b4   :  { %v904_v50 = vpop.permute.xlu0 %903 }
 0x4b5   :  { %v906_v52 = vsel %vm836_vm6, %v904_v50, 0.0  ;;  %4817 = vmatmul.msk.f32.vlgmr.msra.gmra.mxu1 %vm836_vm6, %v904_v50 }
 0x4b6   :  { %4816 = vmatmul.msk.f32.vlgmr.msra.gmra.mxu3 %vm907_vm7, %v906_v52  ;;  %1536 = vmatpush.msra.mxu1 %v6519_v32 }
 0x4b7   :  { %1399 = vmatpush.msra.mxu3 %v6519_v32 }
 0x4b8   :  { %1537 = vmatpush.msra.mxu1 %v6523_v1 }
 0x4b9   :  { %1400 = vmatpush.msra.mxu3 %v6523_v1 }
 0x532   :  { %v991_v33 = vpop.f32.mrf.mxu1 }
 0x533   :  { %v994_v37 = vadd.f32 %v991_v33, %v971_v4 }
 0x535   :  { %v995_v48 = vadd.f32 %v994_v37, %v6532_v0 }
 0x537   :  { %4906 = vtanh.f32 %v995_v48  ;;  %v996_v52 = vand.u32 2147483647, %v995_v48  ;;  %vm1000_vm14 = vcmp.ge.f32.partialorder %v995_v48, 0.0 }
 0x539   :  { %v928_v16 = vpop.f32.mrf.mxu3  ;;  %v997_v5 = vsub.f32 0.0, %v996_v52 }
 0x53a   :  { %v929_v34 = vadd.f32 %v928_v16, %v6584_v49 }
 0x53b   :  { %v998_v54 = vmul.f32 1.442695, %v997_v5 }
 0x53c   :  { %4908 = vtanh.f32 %v929_v34  ;;  %v931_v38 = vand.u32 2147483647, %v929_v34 }
 0x53d   :  { %v4907_v18 = vpop.eup %4906  ;;  %4910 = vpow2.f32 %v998_v54 }
 0x53e   :  { %1021 = vrot.lane.b32.xlu2 %v4907_v18, %s5636_s1  ;;  %v932_v4 = vsub.f32 0.0, %v931_v38 }
 0x540   :  { %v933_v33 = vmul.f32 1.442695, %v932_v4 }
 0x542   :  { %v4909_v50 = vpop.eup %4908  ;;  %4912 = vpow2.f32 %v933_v33 }
 0x543   :  { %v4911_v37 = vpop.eup %4910 }
 0x544   :  { %v1002_v22 = vadd.f32 1.0, %v4911_v37  ;;  %v1001_v8 = vsel %vm1000_vm14, 1.0, %v4911_v37 }
 0x546   :  { %956 = vrot.lane.b32.xlu2 %v4909_v50, %s5636_s1  ;;  %4914 = vrcp.f32 %v1002_v22  ;;  %v1014_v52 = vand.u32 2147483648, %v1002_v22  ;;  %vm1008_vm9 = vweird.f32 %v1002_v22  ;;  %v1012_v38 = vand.u32 2147483647, %v1002_v22 }
 0x548   :  { %v4913_v6 = vpop.eup %4912  ;;  %v1015_v33 = vor.u32 1.1754944e-38, %v1014_v52  ;;  %vm1013_vm11 = vcmp.eq.f32.partialorder %v1012_v38, 8.507059e+37  ;;  %v570_v38 = vld [vmem:[#allocation9 + $0x8] sm:$0xff] }
 0x549   :  { %v937_v16 = vadd.f32 1.0, %v4913_v6  ;;  %4811 = vmatmul.msk.f32.gmra.mxu0 %vm576_vm0, %v570_v38 }
 0x54b   :  { %4916 = vrcp.f32 %v937_v16  ;;  %vm943_vm2 = vweird.f32 %v937_v16 }
 0x54c   :  { %v4915_v55 = vpop.eup %4914 }
 0x54d   :  { %v1004_v18 = vmul.f32 %v4915_v55, %v1002_v22  ;;  %vm1009_vm8 = vweird.f32 %v4915_v55 }
 0x54e   :  { %vm1010_vm10 = vmor %vm1008_vm9, %vm1009_vm8  ;;  %vm935_vm8 = vcmp.ge.f32.partialorder %v929_v34, 0.0 }
 0x54f   :  { %v1005_v39 = vsub.f32 1.0, %v1004_v18  ;;  %v949_v18 = vand.u32 2147483648, %v937_v16 }
 0x551   :  { %v4917_v23 = vpop.eup %4916  ;;  %v1006_v7 = vmul.f32 %v4915_v55, %v1005_v39  ;;  %v947_v39 = vand.u32 2147483647, %v937_v16  ;;  %v950_v25 = vor.u32 1.1754944e-38, %v949_v18  ;;  %v1108_v18 = vld [vmem:[#allocation4 + $0x2] sm:$0x1] }
 0x552   :  { %v939_v50 = vmul.f32 %v4917_v23, %v937_v16  ;;  %vm944_vm15 = vweird.f32 %v4917_v23 }
 0x553   :  { %v1007_v56 = vadd.f32 %v4915_v55, %v1006_v7  ;;  %vm945_vm4 = vmor %vm943_vm2, %vm944_vm15  ;;  %vm948_vm5 = vcmp.eq.f32.partialorder %v947_v39, 8.507059e+37 }
 0x554   :  { %v940_v5 = vsub.f32 1.0, %v939_v50 }
 0x555   :  { %v1011_v54 = vsel %vm1010_vm10, %v4915_v55, %v1007_v56  ;;  %v936_v55 = vsel %vm935_vm8, 1.0, %v4913_v6 }
 0x556   :  { %v941_v4 = vmul.f32 %v4917_v23, %v940_v5  ;;  %v1016_v40 = vsel %vm1013_vm11, %v1015_v33, %v1011_v54 }
 0x557   :  { %v1017_v57 = vmul.f32 %v1016_v40, %v1001_v8 }
 0x558   :  { %v942_v24 = vadd.f32 %v4917_v23, %v941_v4 }
 0x559   :  { %v1019_v8 = vmul.f32 %v1017_v57, %v6537_v35 }
 0x55a   :  { %v946_v41 = vsel %vm945_vm4, %v4917_v23, %v942_v24 }
 0x55b   :  { %v951_v22 = vsel %vm948_vm5, %v950_v25, %v946_v41 }
 0x55c   :  { %v952_v56 = vmul.f32 %v951_v22, %v936_v55 }
 0x55e   :  { %v954_v24 = vmul.f32 0.0, %v952_v56 }
 0x598   :  { %v1022_v7 = vpop.permute.xlu2 %1021 }
 0x599   :  { %v1024_v50 = vmul.f32 %v1022_v7, %v1017_v57 }
 0x59b   :  { %1026 = vrot.lane.b32.xlu2 %v1024_v50, %s5637_s6 }
 0x5a0   :  { %v957_v48 = vpop.permute.xlu2 %956 }
 0x5a1   :  { %v959_v5 = vmul.f32 %v957_v48, %v952_v56 }
 0x5a3   :  { %961 = vrot.lane.b32.xlu1 %v959_v5, %s5637_s6 }
 0x5f5   :  { %v1027_v40 = vpop.permute.xlu2 %1026 }
 0x5f6   :  { %v6592_v37 = vadd.f32 %v1027_v40, %v1019_v8 }
 0x5f8   :  { %4918 = vtanh.f32 %v6592_v37 }
 0x5fe   :  { %v4919_v23 = vpop.eup %4918 }
 0x5ff   :  { %1032 = vrot.lane.b32.xlu0 %v4919_v23, %s5629_s27 }
 0x615   :  { %v962_v16 = vpop.permute.xlu1 %961 }
 0x616   :  { %v6596_v25 = vadd.f32 %v962_v16, %v954_v24 }
 0x618   :  { %4920 = vtanh.f32 %v6596_v25 }
 0x61e   :  { %v4921_v6 = vpop.eup %4920 }
 0x61f   :  { %967 = vrot.lane.b32.xlu2 %v4921_v6, %s5629_s27 }
 0x671   :  { %v1033_v41 = vpop.permute.xlu0 %1032 }
 0x672   :  { %v1035_v34 = vmul.f32 %v1033_v41, %v1017_v57  ;;  %v6612_v57 = vpop.f32.mrf.mxu0 }
 0x674   :  { %1037 = vrot.lane.b32.xlu1 %v1035_v34, %s5638_s12 }
 0x679   :  { %v968_v35 = vpop.permute.xlu2 %967 }
 0x67a   :  { %v970_v52 = vmul.f32 %v968_v35, %v952_v56 }
 0x67c   :  { %1041 = vrot.lane.b32.xlu0 %v970_v52, %s5636_s1 }
 0x6e6   :  { %v1038_v54 = vpop.permute.xlu1 %1037 }
 0x6e7   :  { %4819 = vmatmul.msk.f32.vlgmr.msrb.gmra.mxu3 %vm836_vm6, %v1038_v54 }
 0x6e8   :  { %1673 = vmatpush.msrb.mxu3 %v6519_v32 }
 0x6ea   :  { %1674 = vmatpush.msrb.mxu3 %v6523_v1 }
 0x6ee   :  { %v1042_v4 = vpop.permute.xlu0 %1041 }
 0x6ef   :  { %v1044_v33 = vsel %vm836_vm6, %v1038_v54, %v1042_v4 }
 0x6f0   :  { %4818 = vmatmul.msk.f32.vlgmr.msrb.gmra.mxu0 %vm907_vm7, %v1044_v33 }
 0x6f1   :  { %1471 = vmatpush.msrb.mxu0 %v6541_v21 }
 0x6f3   :  { %1472 = vmatpush.msrb.mxu0 %v6544_v3 }
 0x6f5   :  { %1473 = vmatpush.msrb.mxu0 %v6548_v51 }
 0x6f7   :  { %1474 = vmatpush.msrb.mxu0 %v6562_v19 }
 0x76a   :  { %v1128_v39 = vpop.f32.mrf.mxu3 }
 0x76b   :  { %v1131_v7 = vadd.f32 %v1128_v39, %v1108_v18 }
 0x76d   :  { %v1132_v50 = vadd.f32 %v1131_v7, %v6532_v0  ;;  %v1065_v22 = vpop.f32.mrf.mxu0 }
 0x76e   :  { %v1066_v55 = vadd.f32 %v1065_v22, %v6584_v49 }
 0x76f   :  { %4922 = vtanh.f32 %v1132_v50  ;;  %v1133_v5 = vand.u32 2147483647, %v1132_v50  ;;  %vm1137_vm14 = vcmp.ge.f32.partialorder %v1132_v50, 0.0 }
 0x770   :  { %4924 = vtanh.f32 %v1066_v55  ;;  %v1068_v16 = vand.u32 2147483647, %v1066_v55  ;;  %vm1072_vm8 = vcmp.ge.f32.partialorder %v1066_v55, 0.0 }
 0x771   :  { %v1134_v8 = vsub.f32 0.0, %v1133_v5 }
 0x772   :  { %v1069_v6 = vsub.f32 0.0, %v1068_v16 }
 0x773   :  { %v1135_v40 = vmul.f32 1.442695, %v1134_v8 }
 0x774   :  { %v1070_v34 = vmul.f32 1.442695, %v1069_v6 }
 0x775   :  { %v4923_v56 = vpop.eup %4922  ;;  %4926 = vpow2.f32 %v1135_v40 }
 0x776   :  { %v4925_v48 = vpop.eup %4924  ;;  %1158 = vrot.lane.b32.xlu2 %v4923_v56, %s5636_s1 }
 0x777   :  { %1093 = vrot.lane.b32.xlu1 %v4925_v48, %s5636_s1 }
 0x77b   :  { %v4927_v23 = vpop.eup %4926 }
 0x77c   :  { %v1139_v24 = vadd.f32 1.0, %v4927_v23  ;;  %v1138_v48 = vsel %vm1137_vm14, 1.0, %v4927_v23 }
 0x77e   :  { %4928 = vrcp.f32 %v1139_v24  ;;  %v1151_v18 = vand.u32 2147483648, %v1139_v24  ;;  %vm1145_vm9 = vweird.f32 %v1139_v24  ;;  %v1149_v39 = vand.u32 2147483647, %v1139_v24 }
 0x77f   :  { %4930 = vpow2.f32 %v1070_v34 }
 0x780   :  { %v1152_v22 = vor.u32 1.1754944e-38, %v1151_v18  ;;  %vm1150_vm11 = vcmp.eq.f32.partialorder %v1149_v39, 8.507059e+37 }
 0x784   :  { %v4929_v41 = vpop.eup %4928 }
 0x785   :  { %v1141_v35 = vmul.f32 %v4929_v41, %v1139_v24  ;;  %v4931_v54 = vpop.eup %4930  ;;  %vm1146_vm0 = vweird.f32 %v4929_v41 }
 0x786   :  { %v1074_v4 = vadd.f32 1.0, %v4931_v54  ;;  %vm1147_vm10 = vmor %vm1145_vm9, %vm1146_vm0  ;;  %v1073_v23 = vsel %vm1072_vm8, 1.0, %v4931_v54 }
 0x787   :  { %v1142_v52 = vsub.f32 1.0, %v1141_v35 }
 0x788   :  { %4932 = vrcp.f32 %v1074_v4  ;;  %v1086_v24 = vand.u32 2147483648, %v1074_v4  ;;  %vm1080_vm2 = vweird.f32 %v1074_v4 }
 0x789   :  { %v1143_v38 = vmul.f32 %v4929_v41, %v1142_v52 }
 0x78b   :  { %v1144_v33 = vadd.f32 %v4929_v41, %v1143_v38  ;;  %v1084_v38 = vand.u32 2147483647, %v1074_v4 }
 0x78d   :  { %v1148_v7 = vsel %vm1147_vm10, %v4929_v41, %v1144_v33  ;;  %v1087_v33 = vor.u32 1.1754944e-38, %v1086_v24  ;;  %vm1085_vm5 = vcmp.eq.f32.partialorder %v1084_v38, 8.507059e+37 }
 0x78e   :  { %v1153_v56 = vsel %vm1150_vm11, %v1152_v22, %v1148_v7  ;;  %v4933_v5 = vpop.eup %4932 }
 0x78f   :  { %v1154_v8 = vmul.f32 %v1153_v56, %v1138_v48  ;;  %v1076_v6 = vmul.f32 %v4933_v5, %v1074_v4  ;;  %vm1081_vm15 = vweird.f32 %v4933_v5 }
 0x790   :  { %vm1082_vm4 = vmor %vm1080_vm2, %vm1081_vm15 }
 0x791   :  { %v1077_v34 = vsub.f32 1.0, %v1076_v6  ;;  %v1156_v22 = vmul.f32 %v1154_v8, %v6592_v37 }
 0x793   :  { %v1078_v35 = vmul.f32 %v4933_v5, %v1077_v34 }
 0x795   :  { %v1079_v52 = vadd.f32 %v4933_v5, %v1078_v35 }
 0x797   :  { %v1083_v41 = vsel %vm1082_vm4, %v4933_v5, %v1079_v52 }
 0x798   :  { %v1088_v50 = vsel %vm1085_vm5, %v1087_v33, %v1083_v41 }
 0x799   :  { %v1089_v18 = vmul.f32 %v1088_v50, %v1073_v23 }
 0x79b   :  { %v1091_v48 = vmul.f32 %v1089_v18, %v6596_v25 }
 0x7d0   :  { %v1159_v40 = vpop.permute.xlu2 %1158 }
 0x7d1   :  { %v1161_v16 = vmul.f32 %v1159_v40, %v1154_v8 }
 0x7d3   :  { %1163 = vrot.lane.b32.xlu0 %v1161_v16, %s5637_s6 }
 0x7e9   :  { %v1094_v39 = vpop.permute.xlu1 %1093 }
 0x7ea   :  { %v1096_v7 = vmul.f32 %v1094_v39, %v1089_v18 }
 0x7ec   :  { %1098 = vrot.lane.b32.xlu2 %v1096_v7, %s5637_s6 }
 0x845   :  { %v1164_v56 = vpop.permute.xlu0 %1163 }
 0x846   :  { %v6622_v40 = vadd.f32 %v1164_v56, %v1156_v22  ;;  %v1099_v4 = vpop.permute.xlu2 %1098 }
 0x847   :  { %v6624_v16 = vadd.f32 %v1099_v4, %v1091_v48 }
 0x848   :  { %4934 = vtanh.f32 %v6622_v40 }
 0x849   :  { %4936 = vtanh.f32 %v6624_v16 }
 0x84e   :  { %v4935_v55 = vpop.eup %4934 }
 0x84f   :  { %v4937_v54 = vpop.eup %4936  ;;  %1169 = vrot.lane.b32.xlu1 %v4935_v55, %s5629_s27 }
 0x850   :  { %1104 = vrot.lane.b32.xlu0 %v4937_v54, %s5629_s27 }
 0x8c1   :  { %v1170_v5 = vpop.permute.xlu1 %1169 }
 0x8c2   :  { %v1172_v37 = vmul.f32 %v1170_v5, %v1154_v8  ;;  %v1105_v6 = vpop.permute.xlu0 %1104  ;;  %v1245_v8 = vld [vmem:[#allocation4 + $0x3] sm:$0x1] }
 0x8c3   :  { %v1107_v34 = vmul.f32 %v1105_v6, %v1089_v18 }
 0x8c4   :  { %1174 = vrot.lane.b32.xlu2 %v1172_v37, %s5638_s12 }
 0x8c5   :  { %1178 = vrot.lane.b32.xlu1 %v1107_v34, %s5636_s1 }
 0x91e   :  { %v1175_v25 = vpop.permute.xlu2 %1174 }
 0x91f   :  { %4821 = vmatmul.msk.f32.vlgmr.msrb.gmra.mxu1 %vm836_vm6, %v1175_v25 }
 0x920   :  { %1810 = vmatpush.msrb.mxu1 %v6519_v32 }
 0x922   :  { %1811 = vmatpush.msrb.mxu1 %v6523_v1 }
 0x937   :  { %v1179_v35 = vpop.permute.xlu1 %1178 }
 0x938   :  { %v1181_v52 = vsel %vm836_vm6, %v1175_v25, %v1179_v35 }
 0x939   :  { %4820 = vmatmul.msk.f32.vlgmr.msra.gmra.mxu0 %vm907_vm7, %v1181_v52 }
 0x93a   :  { %1745 = vmatpush.msra.mxu0 %v6541_v21 }
 0x93c   :  { %1746 = vmatpush.msra.mxu0 %v6544_v3 }
 0x93e   :  { %1747 = vmatpush.msra.mxu0 %v6548_v51 }
 0x940   :  { %1748 = vmatpush.msra.mxu0 %v6562_v19 }
 0x99c   :  { %v1265_v24 = vpop.f32.mrf.mxu1 }
 0x99d   :  { %v1268_v38 = vadd.f32 %v1265_v24, %v1245_v8 }
 0x99f   :  { %v1269_v41 = vadd.f32 %v1268_v38, %v6532_v0 }
 0x9a1   :  { %4938 = vtanh.f32 %v1269_v41  ;;  %v1270_v39 = vand.u32 2147483647, %v1269_v41  ;;  %vm1274_vm8 = vcmp.ge.f32.partialorder %v1269_v41, 0.0 }
 0x9a3   :  { %v1271_v22 = vsub.f32 0.0, %v1270_v39 }
 0x9a5   :  { %v1272_v48 = vmul.f32 1.442695, %v1271_v22 }
 0x9a7   :  { %v4939_v33 = vpop.eup %4938 }
 0x9a8   :  { %1295 = vrot.lane.b32.xlu0 %v4939_v33, %s5636_s1 }
 0x9b6   :  { %v1202_v50 = vpop.f32.mrf.mxu0 }
 0x9b7   :  { %v1203_v23 = vadd.f32 %v1202_v50, %v6584_v49 }
 0x9b9   :  { %4940 = vtanh.f32 %v1203_v23  ;;  %v1205_v7 = vand.u32 2147483647, %v1203_v23  ;;  %vm1209_vm5 = vcmp.ge.f32.partialorder %v1203_v23, 0.0 }
 0x9ba   :  { %4942 = vpow2.f32 %v1272_v48 }
 0x9bb   :  { %v1206_v56 = vsub.f32 0.0, %v1205_v7 }
 0x9bd   :  { %v1207_v4 = vmul.f32 1.442695, %v1206_v56 }
 0x9bf   :  { %v4941_v18 = vpop.eup %4940  ;;  %4944 = vpow2.f32 %v1207_v4 }
 0x9c0   :  { %1230 = vrot.lane.b32.xlu2 %v4941_v18, %s5636_s1  ;;  %v4943_v55 = vpop.eup %4942 }
 0x9c1   :  { %v1276_v5 = vadd.f32 1.0, %v4943_v55 }
 0x9c3   :  { %4946 = vrcp.f32 %v1276_v5  ;;  %vm1282_vm10 = vweird.f32 %v1276_v5  ;;  %v1288_v39 = vand.u32 2147483648, %v1276_v5  ;;  %v1286_v22 = vand.u32 2147483647, %v1276_v5 }
 0x9c5   :  { %v4945_v54 = vpop.eup %4944  ;;  %v1289_v9 = vor.u32 1.1754944e-38, %v1288_v39  ;;  %vm1287_vm4 = vcmp.eq.f32.partialorder %v1286_v22, 8.507059e+37  ;;  %v1382_v39 = vld [vmem:[#allocation4 + $0x4] sm:$0x1] }
 0x9c6   :  { %v1211_v37 = vadd.f32 1.0, %v4945_v54 }
 0x9c8   :  { %4948 = vrcp.f32 %v1211_v37  ;;  %v1223_v18 = vand.u32 2147483648, %v1211_v37  ;;  %vm1217_vm11 = vweird.f32 %v1211_v37  ;;  %v1221_v7 = vand.u32 2147483647, %v1211_v37 }
 0x9c9   :  { %v4947_v6 = vpop.eup %4946 }
 0x9ca   :  { %v1278_v35 = vmul.f32 %v4947_v6, %v1276_v5  ;;  %vm1283_vm0 = vweird.f32 %v4947_v6  ;;  %v1224_v4 = vor.u32 1.1754944e-38, %v1223_v18  ;;  %vm1222_vm2 = vcmp.eq.f32.partialorder %v1221_v7, 8.507059e+37 }
 0x9cb   :  { %vm1284_vm14 = vmor %vm1282_vm10, %vm1283_vm0 }
 0x9cc   :  { %v1279_v8 = vsub.f32 1.0, %v1278_v35 }
 0x9ce   :  { %v4949_v34 = vpop.eup %4948  ;;  %v1280_v38 = vmul.f32 %v4947_v6, %v1279_v8  ;;  %v1275_v8 = vsel %vm1274_vm8, 1.0, %v4943_v55 }
 0x9cf   :  { %v1213_v25 = vmul.f32 %v4949_v34, %v1211_v37  ;;  %vm1218_vm9 = vweird.f32 %v4949_v34 }
 0x9d0   :  { %v1281_v50 = vadd.f32 %v4947_v6, %v1280_v38  ;;  %vm1219_vm15 = vmor %vm1217_vm11, %vm1218_vm9 }
 0x9d1   :  { %v1214_v52 = vsub.f32 1.0, %v1213_v25 }
 0x9d2   :  { %v1285_v48 = vsel %vm1284_vm14, %v4947_v6, %v1281_v50 }
 0x9d3   :  { %v1215_v24 = vmul.f32 %v4949_v34, %v1214_v52  ;;  %v1290_v35 = vsel %vm1287_vm4, %v1289_v9, %v1285_v48  ;;  %v1210_v52 = vsel %vm1209_vm5, 1.0, %v4945_v54 }
 0x9d4   :  { %v1291_v38 = vmul.f32 %v1290_v35, %v1275_v8 }
 0x9d5   :  { %v1216_v33 = vadd.f32 %v4949_v34, %v1215_v24 }
 0x9d6   :  { %v1293_v5 = vmul.f32 %v1291_v38, %v6622_v40 }
 0x9d7   :  { %v1220_v56 = vsel %vm1219_vm15, %v4949_v34, %v1216_v33 }
 0x9d8   :  { %v1225_v25 = vsel %vm1222_vm2, %v1224_v4, %v1220_v56 }
 0x9d9   :  { %v1226_v24 = vmul.f32 %v1225_v25, %v1210_v52 }
 0x9db   :  { %v1228_v6 = vmul.f32 %v1226_v24, %v6624_v16 }
 0xa1a   :  { %v1231_v58 = vpop.permute.xlu2 %1230  ;;  %v1296_v42 = vpop.permute.xlu0 %1295 }
 0xa1b   :  { %v1233_v37 = vmul.f32 %v1231_v58, %v1226_v24  ;;  %v1298_v26 = vmul.f32 %v1296_v42, %v1291_v38 }
 0xa1d   :  { %1235 = vrot.lane.b32.xlu0 %v1233_v37, %s5637_s6  ;;  %1300 = vrot.lane.b32.xlu1 %v1298_v26, %s5637_s6  ;;  %v730_v26 = vld [vmem:[#allocation18 + $0x8] sm:$0xff] }
 0xa1e   :  { %782 = vmatpush.msra.mxu2 %v730_v26 }
 0xa1f   :  { %4813 = vmatmul.msk.f32.vlgmr.msra.gmra.mxu2 %vm743_vm3, %v6517_v17 }
 0xa20   :  { %1334 = vmatpush.msrb.mxu2 %v6541_v21 }
 0xa22   :  { %1335 = vmatpush.msrb.mxu2 %v6544_v3 }
 0xa24   :  { %1336 = vmatpush.msrb.mxu2 %v6548_v51 }
 0xa26   :  { %1337 = vmatpush.msrb.mxu2 %v6562_v19 }
 0xa28   :  { %1608 = vmatpush.msra.mxu2 %v6541_v21 }
 0xa2a   :  { %1609 = vmatpush.msra.mxu2 %v6544_v3 }
 0xa2c   :  { %1610 = vmatpush.msra.mxu2 %v6548_v51 }
 0xa2e   :  { %1611 = vmatpush.msra.mxu2 %v6562_v19 }
 0xa8f   :  { %v1301_v34 = vpop.permute.xlu1 %1300  ;;  %v1236_v9 = vpop.permute.xlu0 %1235 }
 0xa90   :  { %v6649_v23 = vadd.f32 %v1301_v34, %v1293_v5  ;;  %v6651_v41 = vadd.f32 %v1236_v9, %v1228_v6 }
 0xa92   :  { %4950 = vtanh.f32 %v6649_v23 }
 0xa93   :  { %4952 = vtanh.f32 %v6651_v41 }
 0xa98   :  { %v4951_v58 = vpop.eup %4950 }
 0xa99   :  { %v4953_v42 = vpop.eup %4952  ;;  %1306 = vrot.lane.b32.xlu2 %v4951_v58, %s5629_s27 }
 0xa9a   :  { %1241 = vrot.lane.b32.xlu1 %v4953_v42, %s5629_s27 }
 0xaa2   :  { %v6678_v18 = vpop.f32.mrf.mxu2 }
 0xaf3   :  { %v1307_v40 = vpop.permute.xlu2 %1306 }
 0xaf4   :  { %v1309_v16 = vmul.f32 %v1307_v40, %v1291_v38 }
 0xaf6   :  { %1311 = vrot.lane.b32.xlu0 %v1309_v16, %s5638_s12 }
 0xb0c   :  { %v1242_v17 = vpop.permute.xlu1 %1241 }
 0xb0d   :  { %v1244_v55 = vmul.f32 %v1242_v17, %v1226_v24 }
 0xb0f   :  { %1315 = vrot.lane.b32.xlu2 %v1244_v55, %s5636_s1 }
 0xb68   :  { %v1312_v54 = vpop.permute.xlu0 %1311 }
 0xb69   :  { %v1316_v33 = vpop.permute.xlu2 %1315  ;;  %4823 = vmatmul.msk.f32.vlgmr.msra.gmra.mxu3 %vm836_vm6, %v1312_v54 }
 0xb6a   :  { %v1318_v50 = vsel %vm836_vm6, %v1312_v54, %v1316_v33  ;;  %1947 = vmatpush.msra.mxu3 %v6519_v32 }
 0xb6b   :  { %4822 = vmatmul.msk.f32.vlgmr.msrb.gmra.mxu2 %vm907_vm7, %v1318_v50 }
 0xb6c   :  { %1948 = vmatpush.msra.mxu3 %v6523_v1  ;;  %1882 = vmatpush.msrb.mxu2 %v6541_v21 }
 0xb6e   :  { %1883 = vmatpush.msrb.mxu2 %v6544_v3 }
 0xb70   :  { %1884 = vmatpush.msrb.mxu2 %v6548_v51 }
 0xb72   :  { %1885 = vmatpush.msrb.mxu2 %v6562_v19 }
 0xbec   :  { %v1402_v7 = vpop.f32.mrf.mxu3 }
 0xbed   :  { %v1405_v22 = vadd.f32 %v1402_v7, %v1382_v39 }
 0xbee   :  { %v1339_v56 = vpop.f32.mrf.mxu2 }
 0xbef   :  { %v1406_v32 = vadd.f32 %v1405_v22, %v6532_v0  ;;  %v1340_v48 = vadd.f32 %v1339_v56, %v6584_v49 }
 0xbf1   :  { %4954 = vtanh.f32 %v1406_v32  ;;  %v1407_v25 = vand.u32 2147483647, %v1406_v32  ;;  %v1342_v35 = vand.u32 2147483647, %v1340_v48  ;;  %vm1411_vm4 = vcmp.ge.f32.partialorder %v1406_v32, 0.0 }
 0xbf2   :  { %4956 = vtanh.f32 %v1340_v48  ;;  %vm1346_vm5 = vcmp.ge.f32.partialorder %v1340_v48, 0.0 }
 0xbf3   :  { %v1408_v52 = vsub.f32 0.0, %v1407_v25  ;;  %v1343_v8 = vsub.f32 0.0, %v1342_v35 }
 0xbf5   :  { %v1409_v24 = vmul.f32 1.442695, %v1408_v52  ;;  %v1344_v38 = vmul.f32 1.442695, %v1343_v8 }
 0xbf7   :  { %v4955_v1 = vpop.eup %4954  ;;  %4958 = vpow2.f32 %v1409_v24 }
 0xbf8   :  { %v4957_v4 = vpop.eup %4956  ;;  %1432 = vrot.lane.b32.xlu1 %v4955_v1, %s5636_s1  ;;  %4960 = vpow2.f32 %v1344_v38 }
 0xbf9   :  { %1367 = vrot.lane.b32.xlu0 %v4957_v4, %s5636_s1 }
 0xbfd   :  { %v4959_v37 = vpop.eup %4958 }
 0xbfe   :  { %v4961_v5 = vpop.eup %4960  ;;  %v1413_v6 = vadd.f32 1.0, %v4959_v37  ;;  %v1412_v8 = vsel %vm1411_vm4, 1.0, %v4959_v37 }
 0xbff   :  { %v1348_v34 = vadd.f32 1.0, %v4961_v5  ;;  %v1347_v24 = vsel %vm1346_vm5, 1.0, %v4961_v5 }
 0xc00   :  { %4962 = vrcp.f32 %v1413_v6  ;;  %v1425_v50 = vand.u32 2147483648, %v1413_v6  ;;  %vm1419_vm9 = vweird.f32 %v1413_v6  ;;  %v1423_v7 = vand.u32 2147483647, %v1413_v6 }
 0xc01   :  { %4964 = vrcp.f32 %v1348_v34  ;;  %v1360_v39 = vand.u32 2147483648, %v1348_v34  ;;  %vm1354_vm10 = vweird.f32 %v1348_v34  ;;  %v1358_v22 = vand.u32 2147483647, %v1348_v34 }
 0xc02   :  { %v1426_v4 = vor.u32 1.1754944e-38, %v1425_v50  ;;  %vm1424_vm15 = vcmp.eq.f32.partialorder %v1423_v7, 8.507059e+37  ;;  %v6700_v7 = vld [vmem:[#allocation12 + $0x8] sm:$0xff] }
 0xc03   :  { %v1361_v25 = vor.u32 1.1754944e-38, %v1360_v39  ;;  %vm1359_vm2 = vcmp.eq.f32.partialorder %v1358_v22, 8.507059e+37  ;;  %v6704_v22 = vld [vmem:[#allocation12] sm:$0xff] }
 0xc06   :  { %v4963_v9 = vpop.eup %4962 }
 0xc07   :  { %v4965_v58 = vpop.eup %4964  ;;  %v1415_v42 = vmul.f32 %v4963_v9, %v1413_v6  ;;  %vm1420_vm3 = vweird.f32 %v4963_v9 }
 0xc08   :  { %v1350_v26 = vmul.f32 %v4965_v58, %v1348_v34  ;;  %vm1355_vm0 = vweird.f32 %v4965_v58  ;;  %vm1421_vm11 = vmor %vm1419_vm9, %vm1420_vm3 }
 0xc09   :  { %v1416_v40 = vsub.f32 1.0, %v1415_v42  ;;  %vm1356_vm14 = vmor %vm1354_vm10, %vm1355_vm0 }
 0xc0a   :  { %v1351_v16 = vsub.f32 1.0, %v1350_v26 }
 0xc0b   :  { %v1417_v17 = vmul.f32 %v4963_v9, %v1416_v40 }
 0xc0c   :  { %v1352_v55 = vmul.f32 %v4965_v58, %v1351_v16 }
 0xc0d   :  { %v1418_v54 = vadd.f32 %v4963_v9, %v1417_v17 }
 0xc0e   :  { %v1353_v33 = vadd.f32 %v4965_v58, %v1352_v55 }
 0xc0f   :  { %v1422_v56 = vsel %vm1421_vm11, %v4963_v9, %v1418_v54 }
 0xc10   :  { %v1357_v1 = vsel %vm1356_vm14, %v4965_v58, %v1353_v33  ;;  %v1427_v35 = vsel %vm1424_vm15, %v1426_v4, %v1422_v56  ;;  %v1519_v56 = vld [vmem:[#allocation4 + $0x5] sm:$0x1] }
 0xc11   :  { %v1362_v52 = vsel %vm1359_vm2, %v1361_v25, %v1357_v1  ;;  %v1428_v38 = vmul.f32 %v1427_v35, %v1412_v8 }
 0xc12   :  { %v1363_v42 = vmul.f32 %v1362_v52, %v1347_v24 }
 0xc13   :  { %v1430_v9 = vmul.f32 %v1428_v38, %v6649_v23 }
 0xc14   :  { %v1365_v48 = vmul.f32 %v1363_v42, %v6651_v41 }
 0xc6a   :  { %v1433_v26 = vpop.permute.xlu1 %1432 }
 0xc6b   :  { %v1368_v6 = vpop.permute.xlu0 %1367  ;;  %v1435_v40 = vmul.f32 %v1433_v26, %v1428_v38 }
 0xc6c   :  { %v1370_v34 = vmul.f32 %v1368_v6, %v1363_v42 }
 0xc6d   :  { %1437 = vrot.lane.b32.xlu2 %v1435_v40, %s5637_s6 }
 0xc6e   :  { %1372 = vrot.lane.b32.xlu1 %v1370_v34, %s5637_s6 }
 0xcc7   :  { %v1438_v58 = vpop.permute.xlu2 %1437 }
 0xcc8   :  { %v6687_v16 = vadd.f32 %v1438_v58, %v1430_v9 }
 0xcca   :  { %4966 = vtanh.f32 %v6687_v16 }
 0xcd0   :  { %v4967_v32 = vpop.eup %4966 }
 0xcd1   :  { %1443 = vrot.lane.b32.xlu0 %v4967_v32, %s5629_s27 }
 0xce0   :  { %v1373_v37 = vpop.permute.xlu1 %1372 }
 0xce1   :  { %v6692_v5 = vadd.f32 %v1373_v37, %v1365_v48 }
 0xce3   :  { %4968 = vtanh.f32 %v6692_v5 }
 0xce9   :  { %v4969_v17 = vpop.eup %4968 }
 0xcea   :  { %1378 = vrot.lane.b32.xlu2 %v4969_v17, %s5629_s27 }
 0xd43   :  { %v1444_v55 = vpop.permute.xlu0 %1443 }
 0xd44   :  { %v1379_v23 = vpop.permute.xlu2 %1378  ;;  %v1446_v54 = vmul.f32 %v1444_v55, %v1428_v38 }
 0xd45   :  { %v1381_v33 = vmul.f32 %v1379_v23, %v1363_v42 }
 0xd46   :  { %1448 = vrot.lane.b32.xlu1 %v1446_v54, %s5638_s12 }
 0xd47   :  { %1452 = vrot.lane.b32.xlu0 %v1381_v33, %s5636_s1 }
 0xdb8   :  { %v1449_v50 = vpop.permute.xlu1 %1448 }
 0xdb9   :  { %v1453_v39 = vpop.permute.xlu0 %1452  ;;  %4825 = vmatmul.msk.f32.vlgmr.msra.gmra.mxu1 %vm836_vm6, %v1449_v50 }
 0xdba   :  { %v1455_v41 = vsel %vm836_vm6, %v1449_v50, %v1453_v39  ;;  %2084 = vmatpush.msra.mxu1 %v6700_v7 }
 0xdbb   :  { %4824 = vmatmul.msk.f32.vlgmr.msrb.gmra.mxu0 %vm907_vm7, %v1455_v41 }
 0xdbc   :  { %2085 = vmatpush.msra.mxu1 %v6704_v22  ;;  %2019 = vmatpush.msrb.mxu0 %v6541_v21 }
 0xdbe   :  { %2020 = vmatpush.msrb.mxu0 %v6544_v3 }
 0xdc0   :  { %2021 = vmatpush.msrb.mxu0 %v6548_v51 }
 0xdc2   :  { %2022 = vmatpush.msrb.mxu0 %v6562_v19 }
 0xe36   :  { %v1539_v1 = vpop.f32.mrf.mxu1 }
 0xe37   :  { %v1542_v4 = vadd.f32 %v1539_v1, %v1519_v56 }
 0xe38   :  { %v1476_v25 = vpop.f32.mrf.mxu0 }
 0xe39   :  { %v1543_v35 = vadd.f32 %v1542_v4, %v6532_v0  ;;  %v1477_v52 = vadd.f32 %v1476_v25, %v6584_v49 }
 0xe3b   :  { %4970 = vtanh.f32 %v1543_v35  ;;  %v1544_v21 = vand.u32 2147483647, %v1543_v35  ;;  %v1479_v26 = vand.u32 2147483647, %v1477_v52  ;;  %vm1548_vm10 = vcmp.ge.f32.partialorder %v1543_v35, 0.0 }
 0xe3c   :  { %4972 = vtanh.f32 %v1477_v52  ;;  %vm1483_vm4 = vcmp.ge.f32.partialorder %v1477_v52, 0.0 }
 0xe3d   :  { %v1545_v3 = vsub.f32 0.0, %v1544_v21  ;;  %v1480_v6 = vsub.f32 0.0, %v1479_v26 }
 0xe3f   :  { %v1546_v51 = vmul.f32 1.442695, %v1545_v3  ;;  %v1481_v40 = vmul.f32 1.442695, %v1480_v6 }
 0xe41   :  { %v4971_v8 = vpop.eup %4970  ;;  %4974 = vpow2.f32 %v1546_v51 }
 0xe42   :  { %v4973_v24 = vpop.eup %4972  ;;  %1569 = vrot.lane.b32.xlu2 %v4971_v8, %s5636_s1 }
 0xe43   :  { %1504 = vrot.lane.b32.xlu1 %v4973_v24, %s5636_s1 }
 0xe47   :  { %v4975_v38 = vpop.eup %4974 }
 0xe48   :  { %v1550_v42 = vadd.f32 1.0, %v4975_v38  ;;  %v1549_v50 = vsel %vm1548_vm10, 1.0, %v4975_v38 }
 0xe4a   :  { %4976 = vrcp.f32 %v1550_v42  ;;  %v1562_v17 = vand.u32 2147483648, %v1550_v42  ;;  %vm1556_vm3 = vweird.f32 %v1550_v42  ;;  %v1560_v55 = vand.u32 2147483647, %v1550_v42 }
 0xe4b   :  { %4978 = vpow2.f32 %v1481_v40 }
 0xe4c   :  { %v1563_v54 = vor.u32 1.1754944e-38, %v1562_v17  ;;  %vm1561_vm9 = vcmp.eq.f32.partialorder %v1560_v55, 8.507059e+37 }
 0xe50   :  { %v4977_v0 = vpop.eup %4976 }
 0xe51   :  { %v1552_v34 = vmul.f32 %v4977_v0, %v1550_v42  ;;  %v4979_v32 = vpop.eup %4978  ;;  %vm1557_vm8 = vweird.f32 %v4977_v0 }
 0xe52   :  { %v1485_v48 = vadd.f32 1.0, %v4979_v32  ;;  %vm1558_vm0 = vmor %vm1556_vm3, %vm1557_vm8  ;;  %v1484_v38 = vsel %vm1483_vm4, 1.0, %v4979_v32 }
 0xe53   :  { %v1553_v9 = vsub.f32 1.0, %v1552_v34 }
 0xe54   :  { %4980 = vrcp.f32 %v1485_v48  ;;  %v1497_v21 = vand.u32 2147483648, %v1485_v48  ;;  %vm1491_vm14 = vweird.f32 %v1485_v48  ;;  %v1495_v3 = vand.u32 2147483647, %v1485_v48 }
 0xe55   :  { %v1554_v58 = vmul.f32 %v4977_v0, %v1553_v9 }
 0xe56   :  { %v1498_v42 = vor.u32 1.1754944e-38, %v1497_v21  ;;  %vm1496_vm2 = vcmp.eq.f32.partialorder %v1495_v3, 8.507059e+37 }
 0xe57   :  { %v1555_v37 = vadd.f32 %v4977_v0, %v1554_v58 }
 0xe59   :  { %v1559_v23 = vsel %vm1558_vm0, %v4977_v0, %v1555_v37 }
 0xe5a   :  { %v1564_v33 = vsel %vm1561_vm9, %v1563_v54, %v1559_v23  ;;  %v4981_v39 = vpop.eup %4980 }
 0xe5b   :  { %v1565_v41 = vmul.f32 %v1564_v33, %v1549_v50  ;;  %v1487_v4 = vmul.f32 %v4981_v39, %v1485_v48  ;;  %vm1492_vm11 = vweird.f32 %v4981_v39  ;;  %v6734_v50 = vld [vmem:[#allocation15 + $0x18] sm:$0xff] }
 0xe5c   :  { %vm1493_vm15 = vmor %vm1491_vm14, %vm1492_vm11 }
 0xe5d   :  { %v1488_v25 = vsub.f32 1.0, %v1487_v4  ;;  %v1567_v40 = vmul.f32 %v1565_v41, %v6687_v16 }
 0xe5f   :  { %v1489_v8 = vmul.f32 %v4981_v39, %v1488_v25  ;;  %v6744_v25 = vld [vmem:[#allocation14] sm:$0x1] }
 0xe61   :  { %v1490_v24 = vadd.f32 %v4981_v39, %v1489_v8 }
 0xe63   :  { %v1494_v51 = vsel %vm1493_vm15, %v4981_v39, %v1490_v24  ;;  %v6737_v39 = vld [vmem:[#allocation15 + $0x10] sm:$0xff] }
 0xe64   :  { %v1499_v35 = vsel %vm1496_vm2, %v1498_v42, %v1494_v51 }
 0xe65   :  { %v1500_v26 = vmul.f32 %v1499_v35, %v1484_v38 }
 0xe67   :  { %v1502_v34 = vmul.f32 %v1500_v26, %v6692_v5 }
 0xe9c   :  { %v1570_v56 = vpop.permute.xlu2 %1569 }
 0xe9d   :  { %v1572_v1 = vmul.f32 %v1570_v56, %v1565_v41  ;;  %v1656_v56 = vld [vmem:[#allocation4 + $0x6] sm:$0x1] }
 0xe9f   :  { %1574 = vrot.lane.b32.xlu0 %v1572_v1, %s5637_s6 }
 0xeb5   :  { %v1505_v6 = vpop.permute.xlu1 %1504 }
 0xeb6   :  { %v1507_v0 = vmul.f32 %v1505_v6, %v1500_v26 }
 0xeb8   :  { %1509 = vrot.lane.b32.xlu2 %v1507_v0, %s5637_s6 }
 0xf11   :  { %v1575_v9 = vpop.permute.xlu0 %1574 }
 0xf12   :  { %v1510_v58 = vpop.permute.xlu2 %1509  ;;  %v6719_v37 = vadd.f32 %v1575_v9, %v1567_v40 }
 0xf13   :  { %v6721_v48 = vadd.f32 %v1510_v58, %v1502_v34 }
 0xf14   :  { %4982 = vtanh.f32 %v6719_v37 }
 0xf15   :  { %4984 = vtanh.f32 %v6721_v48 }
 0xf1a   :  { %v4983_v52 = vpop.eup %4982 }
 0xf1b   :  { %v4985_v32 = vpop.eup %4984  ;;  %1580 = vrot.lane.b32.xlu1 %v4983_v52, %s5629_s27 }
 0xf1c   :  { %1515 = vrot.lane.b32.xlu0 %v4985_v32, %s5629_s27 }
 0xf8d   :  { %v1581_v17 = vpop.permute.xlu1 %1580 }
 0xf8e   :  { %v1516_v16 = vpop.permute.xlu0 %1515  ;;  %v1583_v55 = vmul.f32 %v1581_v17, %v1565_v41  ;;  %v6740_v41 = vld [vmem:[#allocation15 + $0x8] sm:$0xff] }
 0xf8f   :  { %v1518_v5 = vmul.f32 %v1516_v16, %v1500_v26 }
 0xf90   :  { %1585 = vrot.lane.b32.xlu2 %v1583_v55, %s5638_s12 }
 0xf91   :  { %1589 = vrot.lane.b32.xlu1 %v1518_v5, %s5636_s1 }
 0xfea   :  { %v1586_v23 = vpop.permute.xlu2 %1585 }
 0xfeb   :  { %4827 = vmatmul.msk.f32.vlgmr.msrb.gmra.mxu3 %vm836_vm6, %v1586_v23 }
 0xfec   :  { %2221 = vmatpush.msrb.mxu3 %v6700_v7 }
 0xfee   :  { %2222 = vmatpush.msrb.mxu3 %v6704_v22 }
0x1003   :  { %v1590_v54 = vpop.permute.xlu1 %1589 }
0x1004   :  { %v1592_v33 = vsel %vm836_vm6, %v1586_v23, %v1590_v54 }
0x1005   :  { %4826 = vmatmul.msk.f32.vlgmr.msra.gmra.mxu2 %vm907_vm7, %v1592_v33 }
0x1006   :  { %2156 = vmatpush.msra.mxu2 %v6734_v50 }
0x1008   :  { %2157 = vmatpush.msra.mxu2 %v6737_v39 }
0x100a   :  { %2158 = vmatpush.msra.mxu2 %v6740_v41 }
0x100c   :  { %2159 = vmatpush.msra.mxu2 %v6562_v19 }
0x106e   :  { %v1676_v1 = vpop.f32.mrf.mxu3 }
0x106f   :  { %v1679_v4 = vadd.f32 %v1676_v1, %v1656_v56 }
0x1071   :  { %v1680_v8 = vadd.f32 %v6744_v25, %v1679_v4 }
0x1073   :  { %4986 = vtanh.f32 %v1680_v8  ;;  %v1681_v42 = vand.u32 2147483647, %v1680_v8  ;;  %vm1685_vm2 = vcmp.ge.f32.partialorder %v1680_v8, 0.0 }
0x1075   :  { %v1682_v35 = vsub.f32 0.0, %v1681_v42 }
0x1077   :  { %v1683_v26 = vmul.f32 1.442695, %v1682_v35 }
0x1079   :  { %v4987_v24 = vpop.eup %4986 }
0x107a   :  { %1706 = vrot.lane.b32.xlu0 %v4987_v24, %s5636_s1 }
0x1088   :  { %v1613_v21 = vpop.f32.mrf.mxu2 }
0x1089   :  { %v1614_v3 = vadd.f32 %v1613_v21, %v6584_v49 }
0x108b   :  { %4988 = vtanh.f32 %v1614_v3  ;;  %v1616_v19 = vand.u32 2147483647, %v1614_v3  ;;  %vm1620_vm15 = vcmp.ge.f32.partialorder %v1614_v3, 0.0 }
0x108c   :  { %4990 = vpow2.f32 %v1683_v26 }
0x108d   :  { %v1617_v38 = vsub.f32 0.0, %v1616_v19 }
0x108f   :  { %v1618_v6 = vmul.f32 1.442695, %v1617_v38 }
0x1091   :  { %v4989_v51 = vpop.eup %4988  ;;  %4992 = vpow2.f32 %v1618_v6 }
0x1092   :  { %1641 = vrot.lane.b32.xlu2 %v4989_v51, %s5636_s1  ;;  %v4991_v0 = vpop.eup %4990 }
0x1093   :  { %v1687_v34 = vadd.f32 1.0, %v4991_v0  ;;  %v1686_v26 = vsel %vm1685_vm2, 1.0, %v4991_v0 }
0x1095   :  { %4994 = vrcp.f32 %v1687_v34  ;;  %vm1693_vm3 = vweird.f32 %v1687_v34  ;;  %v1699_v56 = vand.u32 2147483648, %v1687_v34  ;;  %v1697_v4 = vand.u32 2147483647, %v1687_v34 }
0x1097   :  { %v4993_v40 = vpop.eup %4992  ;;  %v1700_v42 = vor.u32 1.1754944e-38, %v1699_v56  ;;  %vm1698_vm14 = vcmp.eq.f32.partialorder %v1697_v4, 8.507059e+37  ;;  %v1793_v4 = vld [vmem:[#allocation4 + $0x7] sm:$0x1] }
0x1098   :  { %v1622_v9 = vadd.f32 1.0, %v4993_v40  ;;  %v1621_v38 = vsel %vm1620_vm15, 1.0, %v4993_v40 }
0x109a   :  { %4996 = vrcp.f32 %v1622_v9  ;;  %v1634_v33 = vand.u32 2147483648, %v1622_v9  ;;  %vm1628_vm0 = vweird.f32 %v1622_v9  ;;  %v1632_v1 = vand.u32 2147483647, %v1622_v9 }
0x109b   :  { %v4995_v58 = vpop.eup %4994 }
0x109c   :  { %v1689_v32 = vmul.f32 %v4995_v58, %v1687_v34  ;;  %vm1694_vm5 = vweird.f32 %v4995_v58  ;;  %v1635_v51 = vor.u32 1.1754944e-38, %v1634_v33  ;;  %vm1633_vm11 = vcmp.eq.f32.partialorder %v1632_v1, 8.507059e+37  ;;  %v6772_v1 = vld [vmem:[#allocation15] sm:$0xff] }
0x109d   :  { %vm1695_vm9 = vmor %vm1693_vm3, %vm1694_vm5 }
0x109e   :  { %v1690_v16 = vsub.f32 1.0, %v1689_v32 }
0x10a0   :  { %v4997_v49 = vpop.eup %4996  ;;  %v1691_v5 = vmul.f32 %v4995_v58, %v1690_v16 }
0x10a1   :  { %v1624_v52 = vmul.f32 %v4997_v49, %v1622_v9  ;;  %vm1629_vm8 = vweird.f32 %v4997_v49 }
0x10a2   :  { %v1692_v54 = vadd.f32 %v4995_v58, %v1691_v5  ;;  %vm1630_vm10 = vmor %vm1628_vm0, %vm1629_vm8 }
0x10a3   :  { %v1625_v17 = vsub.f32 1.0, %v1624_v52 }
0x10a4   :  { %v1696_v21 = vsel %vm1695_vm9, %v4995_v58, %v1692_v54 }
0x10a5   :  { %v1626_v55 = vmul.f32 %v4997_v49, %v1625_v17  ;;  %v1701_v35 = vsel %vm1698_vm14, %v1700_v42, %v1696_v21  ;;  %v6775_v42 = vld [vmem:[#allocation17] sm:$0x1] }
0x10a6   :  { %v1702_v52 = vmul.f32 %v1701_v35, %v1686_v26 }
0x10a7   :  { %v1627_v23 = vadd.f32 %v4997_v49, %v1626_v55 }
0x10a8   :  { %v1704_v58 = vmul.f32 %v1702_v52, %v6719_v37 }
0x10a9   :  { %v1631_v24 = vsel %vm1630_vm10, %v4997_v49, %v1627_v23 }
0x10aa   :  { %v1636_v19 = vsel %vm1633_vm11, %v1635_v51, %v1631_v24 }
0x10ab   :  { %v1637_v6 = vmul.f32 %v1636_v19, %v1621_v38 }
0x10ad   :  { %v1639_v34 = vmul.f32 %v1637_v6, %v6721_v48 }
0x10ec   :  { %v1642_v32 = vpop.permute.xlu2 %1641  ;;  %v1707_v17 = vpop.permute.xlu0 %1706 }
0x10ed   :  { %v1644_v9 = vmul.f32 %v1642_v32, %v1637_v6  ;;  %v1709_v16 = vmul.f32 %v1707_v17, %v1702_v52 }
0x10ef   :  { %1646 = vrot.lane.b32.xlu0 %v1644_v9, %s5637_s6  ;;  %1711 = vrot.lane.b32.xlu1 %v1709_v16, %s5637_s6 }
0x1161   :  { %v1647_v49 = vpop.permute.xlu0 %1646  ;;  %v1712_v55 = vpop.permute.xlu1 %1711 }
0x1162   :  { %v6754_v3 = vadd.f32 %v1647_v49, %v1639_v34  ;;  %v6756_v8 = vadd.f32 %v1712_v55, %v1704_v58 }
0x1164   :  { %4998 = vtanh.f32 %v6754_v3 }
0x1165   :  { %5000 = vtanh.f32 %v6756_v8 }
0x116a   :  { %v4999_v0 = vpop.eup %4998 }
0x116b   :  { %v5001_v40 = vpop.eup %5000  ;;  %1652 = vrot.lane.b32.xlu1 %v4999_v0, %s5629_s27 }
0x116c   :  { %1717 = vrot.lane.b32.xlu2 %v5001_v40, %s5629_s27 }
0x11c6   :  { %v1718_v5 = vpop.permute.xlu2 %1717 }
0x11c7   :  { %v1720_v48 = vmul.f32 %v1718_v5, %v1702_v52 }
0x11c9   :  { %1722 = vrot.lane.b32.xlu0 %v1720_v48, %s5638_s12 }
0x11dd   :  { %v1653_v37 = vpop.permute.xlu1 %1652 }
0x11de   :  { %v1655_v23 = vmul.f32 %v1653_v37, %v1637_v6 }
0x11e0   :  { %1726 = vrot.lane.b32.xlu2 %v1655_v23, %s5636_s1 }
0x123a   :  { %v1727_v54 = vpop.permute.xlu2 %1726 }
0x123b   :  { %v1723_v33 = vpop.permute.xlu0 %1722 }
0x123c   :  { %v1729_v56 = vsel %vm836_vm6, %v1723_v33, %v1727_v54  ;;  %4829 = vmatmul.msk.f32.vlgmr.msrb.gmra.mxu1 %vm836_vm6, %v1723_v33 }
0x123d   :  { %4828 = vmatmul.msk.f32.vlgmr.msra.gmra.mxu0 %vm907_vm7, %v1729_v56  ;;  %2358 = vmatpush.msrb.mxu1 %v6700_v7 }
0x123e   :  { %2293 = vmatpush.msra.mxu0 %v6734_v50 }
0x123f   :  { %2359 = vmatpush.msrb.mxu1 %v6704_v22 }
0x1240   :  { %2294 = vmatpush.msra.mxu0 %v6737_v39 }
0x1242   :  { %2295 = vmatpush.msra.mxu0 %v6740_v41 }
0x1244   :  { %2296 = vmatpush.msra.mxu0 %v6772_v1 }
0x12b9   :  { %v1813_v24 = vpop.f32.mrf.mxu1 }
0x12ba   :  { %v1816_v21 = vadd.f32 %v1813_v24, %v1793_v4  ;;  %v1750_v51 = vpop.f32.mrf.mxu0 }
0x12bb   :  { %v1751_v19 = vadd.f32 %v6775_v42, %v1750_v51 }
0x12bc   :  { %v1817_v35 = vadd.f32 %v6744_v25, %v1816_v21 }
0x12bd   :  { %5002 = vtanh.f32 %v1751_v19  ;;  %v1753_v6 = vand.u32 2147483647, %v1751_v19  ;;  %vm1757_vm14 = vcmp.ge.f32.partialorder %v1751_v19, 0.0 }
0x12be   :  { %5004 = vtanh.f32 %v1817_v35  ;;  %v1818_v52 = vand.u32 2147483647, %v1817_v35  ;;  %vm1822_vm15 = vcmp.ge.f32.partialorder %v1817_v35, 0.0 }
0x12bf   :  { %v1754_v32 = vsub.f32 0.0, %v1753_v6 }
0x12c0   :  { %v1819_v17 = vsub.f32 0.0, %v1818_v52 }
0x12c1   :  { %v1755_v9 = vmul.f32 1.442695, %v1754_v32 }
0x12c2   :  { %v1820_v16 = vmul.f32 1.442695, %v1819_v17 }
0x12c3   :  { %v5003_v38 = vpop.eup %5002  ;;  %5006 = vpow2.f32 %v1755_v9 }
0x12c4   :  { %v5005_v26 = vpop.eup %5004  ;;  %1778 = vrot.lane.b32.xlu0 %v5003_v38, %s5636_s1  ;;  %5008 = vpow2.f32 %v1820_v16 }
0x12c5   :  { %1843 = vrot.lane.b32.xlu1 %v5005_v26, %s5636_s1 }
0x12c9   :  { %v5007_v34 = vpop.eup %5006 }
0x12ca   :  { %v5009_v58 = vpop.eup %5008  ;;  %v1759_v49 = vadd.f32 1.0, %v5007_v34  ;;  %v1758_v16 = vsel %vm1757_vm14, 1.0, %v5007_v34 }
0x12cb   :  { %v1824_v55 = vadd.f32 1.0, %v5009_v58 }
0x12cc   :  { %5010 = vrcp.f32 %v1759_v49  ;;  %v1771_v4 = vand.u32 2147483648, %v1759_v49  ;;  %vm1765_vm8 = vweird.f32 %v1759_v49  ;;  %v1769_v21 = vand.u32 2147483647, %v1759_v49 }
0x12cd   :  { %5012 = vrcp.f32 %v1824_v55  ;;  %v1836_v51 = vand.u32 2147483648, %v1824_v55  ;;  %vm1830_vm0 = vweird.f32 %v1824_v55  ;;  %v1834_v38 = vand.u32 2147483647, %v1824_v55 }
0x12ce   :  { %v1772_v6 = vor.u32 1.1754944e-38, %v1771_v4  ;;  %vm1770_vm10 = vcmp.eq.f32.partialorder %v1769_v21, 8.507059e+37 }
0x12cf   :  { %v1837_v32 = vor.u32 1.1754944e-38, %v1836_v51  ;;  %vm1835_vm11 = vcmp.eq.f32.partialorder %v1834_v38, 8.507059e+37 }
0x12d2   :  { %v5011_v0 = vpop.eup %5010 }
0x12d3   :  { %v5013_v40 = vpop.eup %5012  ;;  %v1761_v5 = vmul.f32 %v5011_v0, %v1759_v49  ;;  %vm1766_vm4 = vweird.f32 %v5011_v0 }
0x12d4   :  { %v1826_v48 = vmul.f32 %v5013_v40, %v1824_v55  ;;  %vm1831_vm5 = vweird.f32 %v5013_v40  ;;  %vm1767_vm3 = vmor %vm1765_vm8, %vm1766_vm4  ;;  %v610_v55 = vsel %vm606_vm1, %v6612_v57, 0.0 }
0x12d5   :  { %v1762_v37 = vsub.f32 1.0, %v1761_v5  ;;  %vm1832_vm9 = vmor %vm1830_vm0, %vm1831_vm5 }
0x12d6   :  { %v1827_v23 = vsub.f32 1.0, %v1826_v48  ;;  %v1823_v48 = vsel %vm1822_vm15, 1.0, %v5009_v58 }
0x12d7   :  { %v1763_v54 = vmul.f32 %v5011_v0, %v1762_v37 }
0x12d8   :  { %v1828_v33 = vmul.f32 %v5013_v40, %v1827_v23 }
0x12d9   :  { %v1764_v56 = vadd.f32 %v5011_v0, %v1763_v54 }
0x12da   :  { %v1829_v24 = vadd.f32 %v5013_v40, %v1828_v33 }
0x12db   :  { %v1768_v26 = vsel %vm1767_vm3, %v5011_v0, %v1764_v56 }
0x12dc   :  { %v1833_v52 = vsel %vm1832_vm9, %v5013_v40, %v1829_v24  ;;  %v1773_v17 = vsel %vm1770_vm10, %v1772_v6, %v1768_v26 }
0x12dd   :  { %v1838_v9 = vsel %vm1835_vm11, %v1837_v32, %v1833_v52  ;;  %v1774_v5 = vmul.f32 %v1773_v17, %v1758_v16 }
0x12de   :  { %v1839_v49 = vmul.f32 %v1838_v9, %v1823_v48 }
0x12df   :  { %v1776_v58 = vmul.f32 %v1774_v5, %v6754_v3 }
0x12e0   :  { %v1841_v19 = vmul.f32 %v1839_v49, %v6756_v8 }
0x1336   :  { %v1779_v37 = vpop.permute.xlu0 %1778 }
0x1337   :  { %v1781_v23 = vmul.f32 %v1779_v37, %v1774_v5  ;;  %v1844_v54 = vpop.permute.xlu1 %1843 }
0x1338   :  { %v1846_v33 = vmul.f32 %v1844_v54, %v1839_v49 }
0x1339   :  { %1783 = vrot.lane.b32.xlu1 %v1781_v23, %s5637_s6 }
0x133a   :  { %1848 = vrot.lane.b32.xlu2 %v1846_v33, %s5637_s6 }
0x1363   :  { %611 = vadd.xlane.f32.xlu2 %v610_v55 }
0x1394   :  { %v1849_v0 = vpop.permute.xlu2 %1848 }
0x1395   :  { %v6786_v34 = vadd.f32 %v1849_v0, %v1841_v19 }
0x1397   :  { %5014 = vtanh.f32 %v6786_v34 }
0x139d   :  { %v5015_v35 = vpop.eup %5014 }
0x139e   :  { %1854 = vrot.lane.b32.xlu0 %v5015_v35, %s5629_s27 }
0x13ab   :  { %v1784_v40 = vpop.permute.xlu1 %1783 }
0x13ac   :  { %v6791_v56 = vadd.f32 %v1784_v40, %v1776_v58 }
0x13ae   :  { %5016 = vtanh.f32 %v6791_v56 }
0x13b4   :  { %v5017_v4 = vpop.eup %5016 }
0x13b5   :  { %1789 = vrot.lane.b32.xlu1 %v5017_v4, %s5629_s27 }
0x13d6   :  { %v612_v24 = vpop.xlane.xlu2 %611 }
0x13d7   :  { %v621_v8 = vmul.f32 %v6513_v2, %v612_v24 }
0x13d9   :  { %v623_v21 = vsub.f32 %v6612_v57, %v621_v8 }
0x13db   :  { %v625_v51 = vmul.f32 %v623_v21, %v623_v21 }
0x13dd   :  { %v629_v38 = vsel %vm606_vm1, %v625_v51, 0.0 }
0x13df   :  { %630 = vadd.xlane.f32.xlu1 %v629_v38 }
0x1410   :  { %v1855_v26 = vpop.permute.xlu0 %1854 }
0x1411   :  { %v1857_v6 = vmul.f32 %v1855_v26, %v1839_v49 }
0x1413   :  { %1859 = vrot.lane.b32.xlu0 %v1857_v6, %s5638_s12 }
0x1427   :  { %v1790_v3 = vpop.permute.xlu1 %1789 }
0x1428   :  { %v1792_v52 = vmul.f32 %v1790_v3, %v1774_v5 }
0x142a   :  { %1863 = vrot.lane.b32.xlu0 %v1792_v52, %s5636_s1 }
0x1452   :  { %v631_v32 = vpop.xlane.xlu1 %630 }
0x1453   :  { %v633_v17 = vmul.f32 %v631_v32, %v6513_v2 }
0x1455   :  { %v635_v9 = vadd.f32 1e-05, %v633_v17 }
0x1457   :  { %5018 = vrsqrt.f32 %v635_v9  ;;  %vm652_vm2 = vweird.f32 %v635_v9 }
0x145d   :  { %v5019_v16 = vpop.eup %5018 }
0x145e   :  { %v647_v48 = vmul.f32 %v5019_v16, %v635_v9  ;;  %vm653_vm1 = vweird.f32 %v5019_v16 }
0x145f   :  { %vm654_vm4 = vmor %vm652_vm2, %vm653_vm1 }
0x1460   :  { %v648_v57 = vmul.f32 %v5019_v16, %v647_v48 }
0x1462   :  { %v649_v37 = vmul.f32 0.5, %v648_v57 }
0x1464   :  { %v650_v23 = vsub.f32 1.5, %v649_v37 }
0x1466   :  { %v651_v54 = vmul.f32 %v5019_v16, %v650_v23 }
0x1468   :  { %v655_v49 = vsel %vm654_vm4, %v5019_v16, %v651_v54 }
0x1469   :  { %v657_v33 = vmul.f32 %v655_v49, %v623_v21  ;;  %v5178_v49 = vld [vmem:[#allocation11] ss:$0 sm:$0xff] }
0x146b   :  { %v659_v55 = vand.u32 2147483647, %v657_v33  ;;  %vm667_vm0 = vcmp.ge.f32.partialorder %v657_v33, 0.0 }
0x146d   :  { %v661_v5 = vsub.f32 0.0, %v659_v55 }
0x146f   :  { %v664_v19 = vmul.f32 1.442695, %v661_v5 }
0x1471   :  { %5020 = vpow2.f32 %v664_v19 }
0x1477   :  { %v5021_v0 = vpop.eup %5020 }
0x1478   :  { %v671_v35 = vadd.f32 1.0, %v5021_v0  ;;  %v669_v6 = vsel %vm667_vm0, 1.0, %v5021_v0 }
0x147a   :  { %5022 = vrcp.f32 %v671_v35  ;;  %v698_v4 = vand.u32 2147483648, %v671_v35  ;;  %v696_v51 = vand.u32 2147483647, %v671_v35  ;;  %vm692_vm8 = vweird.f32 %v671_v35 }
0x147c   :  { %v699_v21 = vor.u32 1.1754944e-38, %v698_v4  ;;  %vm697_vm9 = vcmp.eq.f32.partialorder %v696_v51, 8.507059e+37 }
0x1480   :  { %v5023_v2 = vpop.eup %5022 }
0x1481   :  { %v688_v58 = vmul.f32 %v5023_v2, %v671_v35  ;;  %vm693_vm5 = vweird.f32 %v5023_v2 }
0x1482   :  { %vm694_vm3 = vmor %vm692_vm8, %vm693_vm5 }
0x1483   :  { %v689_v40 = vsub.f32 1.0, %v688_v58 }
0x1485   :  { %v1860_v24 = vpop.permute.xlu0 %1859  ;;  %v690_v8 = vmul.f32 %v5023_v2, %v689_v40 }
0x1486   :  { %4831 = vmatmul.msk.f32.vlgmr.msra.gmra.mxu3 %vm836_vm6, %v1860_v24 }
0x1487   :  { %v691_v38 = vadd.f32 %v5023_v2, %v690_v8  ;;  %2495 = vmatpush.msra.mxu3 %v6700_v7 }
0x1489   :  { %v695_v26 = vsel %vm694_vm3, %v5023_v2, %v691_v38  ;;  %2496 = vmatpush.msra.mxu3 %v6704_v22 }
0x148a   :  { %v700_v3 = vsel %vm697_vm9, %v699_v21, %v695_v26 }
0x148b   :  { %v701_v52 = vmul.f32 %v700_v3, %v669_v6 }
0x148d   :  { %v703_v32 = vadd.f32 1.0, %v701_v52 }
0x148f   :  { %5024 = vlog2.f32 %v703_v32 }
0x1495   :  { %v5025_v17 = vpop.eup %5024 }
0x1496   :  { %v707_v9 = vmul.f32 0.6931472, %v5025_v17 }
0x1498   :  { %v709_v16 = vmul.f32 %v707_v9, %v657_v33 }
0x149a   :  { %v714_v48 = vsel %vm710_vm12, %v709_v16, 0.0 }
0x149b   :  { %715 = vadd.xlane.f32.xlu0 %v714_v48 }
0x149c   :  { %v1864_v57 = vpop.permute.xlu0 %1863 }
0x149d   :  { %v1866_v37 = vsel %vm836_vm6, %v1860_v24, %v1864_v57 }
0x149e   :  { %4830 = vmatmul.msk.f32.vlgmr.msrb.gmra.mxu2 %vm907_vm7, %v1866_v37 }
0x149f   :  { %2430 = vmatpush.msrb.mxu2 %v6734_v50 }
0x14a1   :  { %2431 = vmatpush.msrb.mxu2 %v6737_v39 }
0x14a3   :  { %2432 = vmatpush.msrb.mxu2 %v6740_v41 }
0x14a5   :  { %2433 = vmatpush.msrb.mxu2 %v6772_v1 }
0x1509   :  { %v1950_v55 = vpop.f32.mrf.mxu3 }
0x150e   :  { %v716_v23 = vpop.xlane.xlu0 %715 }
0x150f   :  { %v718_v54 = vmul.f32 0.125, %v716_v23 }
0x1511   :  { %v724_v33 = vmul.f32 %v5178_v49, %v718_v54 }
0x1513   :  { %727 = vst.msk [vmem:[#allocation4 + $0x8] sm:$0xff] %vm725_vm13, %v724_v33 }
0x151a   :  { %v1930_v5 = vld [vmem:[#allocation4 + $0x8] sm:$0x1] }
0x151b   :  { %v1953_v19 = vadd.f32 %v1950_v55, %v1930_v5 }
0x151d   :  { %v1954_v0 = vadd.f32 %v6744_v25, %v1953_v19 }
0x151f   :  { %5026 = vtanh.f32 %v1954_v0  ;;  %v1955_v4 = vand.u32 2147483647, %v1954_v0  ;;  %vm1959_vm14 = vcmp.ge.f32.partialorder %v1954_v0, 0.0 }
0x1521   :  { %v1887_v35 = vpop.f32.mrf.mxu2  ;;  %v1956_v24 = vsub.f32 0.0, %v1955_v4 }
0x1522   :  { %v1888_v2 = vadd.f32 %v6775_v42, %v1887_v35 }
0x1523   :  { %v1957_v8 = vmul.f32 1.442695, %v1956_v24 }
0x1524   :  { %5028 = vtanh.f32 %v1888_v2  ;;  %v1890_v21 = vand.u32 2147483647, %v1888_v2  ;;  %vm1894_vm5 = vcmp.ge.f32.partialorder %v1888_v2, 0.0 }
0x1525   :  { %v5027_v58 = vpop.eup %5026  ;;  %5030 = vpow2.f32 %v1957_v8 }
0x1526   :  { %1980 = vrot.lane.b32.xlu2 %v5027_v58, %s5636_s1  ;;  %v1891_v6 = vsub.f32 0.0, %v1890_v21 }
0x1528   :  { %v1892_v52 = vmul.f32 1.442695, %v1891_v6 }
0x152a   :  { %v5029_v40 = vpop.eup %5028 }
0x152b   :  { %1915 = vrot.lane.b32.xlu1 %v5029_v40, %s5636_s1  ;;  %v5031_v51 = vpop.eup %5030 }
0x152c   :  { %v1961_v38 = vadd.f32 1.0, %v5031_v51  ;;  %v1960_v33 = vsel %vm1959_vm14, 1.0, %v5031_v51 }
0x152e   :  { %5032 = vrcp.f32 %v1961_v38  ;;  %v1973_v48 = vand.u32 2147483648, %v1961_v38  ;;  %vm1967_vm13 = vweird.f32 %v1961_v38  ;;  %v1971_v57 = vand.u32 2147483647, %v1961_v38 }
0x152f   :  { %5034 = vpow2.f32 %v1892_v52 }
0x1530   :  { %v1974_v54 = vor.u32 1.1754944e-38, %v1973_v48  ;;  %vm1972_vm11 = vcmp.eq.f32.partialorder %v1971_v57, 8.507059e+37 }
0x1534   :  { %v5033_v26 = vpop.eup %5032 }
0x1535   :  { %v1963_v3 = vmul.f32 %v5033_v26, %v1961_v38  ;;  %vm1968_vm12 = vweird.f32 %v5033_v26  ;;  %v5035_v16 = vpop.eup %5034 }
0x1536   :  { %vm1969_vm10 = vmor %vm1967_vm13, %vm1968_vm12  ;;  %v1896_v37 = vadd.f32 1.0, %v5035_v16  ;;  %v1895_v51 = vsel %vm1894_vm5, 1.0, %v5035_v16 }
0x1537   :  { %v1964_v32 = vsub.f32 1.0, %v1963_v3 }
0x1538   :  { %5036 = vrcp.f32 %v1896_v37  ;;  %v1908_v8 = vand.u32 2147483648, %v1896_v37  ;;  %vm1902_vm1 = vweird.f32 %v1896_v37  ;;  %v1906_v38 = vand.u32 2147483647, %v1896_v37 }
0x1539   :  { %v1965_v17 = vmul.f32 %v5033_v26, %v1964_v32 }
0x153a   :  { %vm1907_vm4 = vcmp.eq.f32.partialorder %v1906_v38, 8.507059e+37 }
0x153b   :  { %v1966_v9 = vadd.f32 %v5033_v26, %v1965_v17 }
0x153d   :  { %v1970_v23 = vsel %vm1969_vm10, %v5033_v26, %v1966_v9  ;;  %v1909_v26 = vor.u32 1.1754944e-38, %v1908_v8 }
0x153e   :  { %v1975_v49 = vsel %vm1972_vm11, %v1974_v54, %v1970_v23  ;;  %v5037_v35 = vpop.eup %5036 }
0x153f   :  { %v1976_v55 = vmul.f32 %v1975_v49, %v1960_v33  ;;  %v1898_v58 = vmul.f32 %v5037_v35, %v1896_v37  ;;  %vm1903_vm15 = vweird.f32 %v5037_v35 }
0x1540   :  { %vm1904_vm2 = vmor %vm1902_vm1, %vm1903_vm15 }
0x1541   :  { %v1899_v40 = vsub.f32 1.0, %v1898_v58  ;;  %v1978_v32 = vmul.f32 %v1976_v55, %v6786_v34 }
0x1543   :  { %v1900_v4 = vmul.f32 %v5037_v35, %v1899_v40 }
0x1545   :  { %v1901_v24 = vadd.f32 %v5037_v35, %v1900_v4 }
0x1547   :  { %v1905_v21 = vsel %vm1904_vm2, %v5037_v35, %v1901_v24 }
0x1548   :  { %v1910_v0 = vsel %vm1907_vm4, %v1909_v26, %v1905_v21 }
0x1549   :  { %v1911_v6 = vmul.f32 %v1910_v0, %v1895_v51 }
0x154b   :  { %v1913_v48 = vmul.f32 %v1911_v6, %v6791_v56 }
0x1580   :  { %v1981_v5 = vpop.permute.xlu2 %1980 }
0x1581   :  { %v1983_v19 = vmul.f32 %v1981_v5, %v1976_v55 }
0x1583   :  { %1985 = vrot.lane.b32.xlu0 %v1983_v19, %s5637_s6 }
0x159d   :  { %v1916_v3 = vpop.permute.xlu1 %1915 }
0x159e   :  { %v1918_v52 = vmul.f32 %v1916_v3, %v1911_v6 }
0x15a0   :  { %1920 = vrot.lane.b32.xlu2 %v1918_v52, %s5637_s6 }
0x15f5   :  { %v1986_v17 = vpop.permute.xlu0 %1985 }
0x15f6   :  { %v6819_v9 = vadd.f32 %v1986_v17, %v1978_v32 }
0x15f8   :  { %5038 = vtanh.f32 %v6819_v9 }
0x15fa   :  { %v1921_v57 = vpop.permute.xlu2 %1920 }
0x15fb   :  { %v6823_v37 = vadd.f32 %v1921_v57, %v1913_v48 }
0x15fd   :  { %5040 = vtanh.f32 %v6823_v37 }
0x15fe   :  { %v5039_v2 = vpop.eup %5038 }
0x15ff   :  { %1991 = vrot.lane.b32.xlu2 %v5039_v2, %s5629_s27 }
0x1603   :  { %v5041_v16 = vpop.eup %5040 }
0x1604   :  { %1926 = vrot.lane.b32.xlu1 %v5041_v16, %s5629_s27 }
0x1659   :  { %v1992_v23 = vpop.permute.xlu2 %1991 }
0x165a   :  { %v1994_v34 = vmul.f32 %v1992_v23, %v1976_v55  ;;  %v2067_v55 = vld [vmem:[#allocation4 + $0x9] sm:$0x1] }
0x165c   :  { %1996 = vrot.lane.b32.xlu2 %v1994_v34, %s5638_s12 }
0x1676   :  { %v1927_v54 = vpop.permute.xlu1 %1926 }
0x1677   :  { %v1929_v49 = vmul.f32 %v1927_v54, %v1911_v6 }
0x1679   :  { %2000 = vrot.lane.b32.xlu0 %v1929_v49, %s5636_s1 }
0x16b6   :  { %v1997_v56 = vpop.permute.xlu2 %1996 }
0x16b7   :  { %4833 = vmatmul.msk.f32.vlgmr.msra.gmra.mxu1 %vm836_vm6, %v1997_v56 }
0x16b8   :  { %2632 = vmatpush.msra.mxu1 %v6700_v7 }
0x16ba   :  { %2633 = vmatpush.msra.mxu1 %v6704_v22 }
0x16eb   :  { %v2001_v33 = vpop.permute.xlu0 %2000 }
0x16ec   :  { %v2003_v5 = vsel %vm836_vm6, %v1997_v56, %v2001_v33 }
0x16ed   :  { %4832 = vmatmul.msk.f32.vlgmr.msrb.gmra.mxu0 %vm907_vm7, %v2003_v5 }
0x16ee   :  { %2567 = vmatpush.msrb.mxu0 %v6734_v50 }
0x16f0   :  { %2568 = vmatpush.msrb.mxu0 %v6737_v39 }
0x16f2   :  { %2569 = vmatpush.msrb.mxu0 %v6740_v41 }
0x16f4   :  { %2570 = vmatpush.msrb.mxu0 %v6772_v1 }
0x1734   :  { %v2087_v19 = vpop.f32.mrf.mxu1 }
0x1735   :  { %v2090_v35 = vadd.f32 %v2087_v19, %v2067_v55 }
0x1737   :  { %v2091_v7 = vadd.f32 %v6744_v25, %v2090_v35 }
0x1739   :  { %5042 = vtanh.f32 %v2091_v7  ;;  %v2092_v24 = vand.u32 2147483647, %v2091_v7  ;;  %vm2096_vm12 = vcmp.ge.f32.partialorder %v2091_v7, 0.0 }
0x173b   :  { %v2093_v8 = vsub.f32 0.0, %v2092_v24 }
0x173d   :  { %v2094_v38 = vmul.f32 1.442695, %v2093_v8 }
0x173f   :  { %v5043_v22 = vpop.eup %5042 }
0x1740   :  { %2117 = vrot.lane.b32.xlu1 %v5043_v22, %s5636_s1 }
0x176a   :  { %v2024_v58 = vpop.f32.mrf.mxu0 }
0x176b   :  { %v2025_v40 = vadd.f32 %v6775_v42, %v2024_v58 }
0x176d   :  { %5044 = vtanh.f32 %v2025_v40  ;;  %v2027_v0 = vand.u32 2147483647, %v2025_v40  ;;  %vm2031_vm15 = vcmp.ge.f32.partialorder %v2025_v40, 0.0 }
0x176e   :  { %5046 = vpow2.f32 %v2094_v38 }
0x176f   :  { %v2028_v6 = vsub.f32 0.0, %v2027_v0 }
0x1771   :  { %v2029_v52 = vmul.f32 1.442695, %v2028_v6 }
0x1773   :  { %v5045_v4 = vpop.eup %5044 }
0x1774   :  { %2052 = vrot.lane.b32.xlu2 %v5045_v4, %s5636_s1  ;;  %v5047_v21 = vpop.eup %5046 }
0x1775   :  { %v2098_v26 = vadd.f32 1.0, %v5047_v21  ;;  %v2097_v56 = vsel %vm2096_vm12, 1.0, %v5047_v21 }
0x1777   :  { %5048 = vrcp.f32 %v2098_v26  ;;  %v2110_v2 = vand.u32 2147483648, %v2098_v26  ;;  %vm2104_vm3 = vweird.f32 %v2098_v26  ;;  %v2108_v16 = vand.u32 2147483647, %v2098_v26 }
0x1778   :  { %5050 = vpow2.f32 %v2029_v52 }
0x1779   :  { %v2111_v54 = vor.u32 1.1754944e-38, %v2110_v2  ;;  %vm2109_vm9 = vcmp.eq.f32.partialorder %v2108_v16, 8.507059e+37 }
0x177d   :  { %v5049_v51 = vpop.eup %5048 }
0x177e   :  { %v2100_v3 = vmul.f32 %v5049_v51, %v2098_v26  ;;  %v5051_v48 = vpop.eup %5050  ;;  %vm2105_vm8 = vweird.f32 %v5049_v51 }
0x177f   :  { %v2033_v23 = vadd.f32 1.0, %v5051_v48  ;;  %vm2106_vm0 = vmor %vm2104_vm3, %vm2105_vm8  ;;  %v2032_v21 = vsel %vm2031_vm15, 1.0, %v5051_v48 }
0x1780   :  { %v2101_v32 = vsub.f32 1.0, %v2100_v3 }
0x1781   :  { %5052 = vrcp.f32 %v2033_v23  ;;  %v2045_v24 = vand.u32 2147483648, %v2033_v23  ;;  %vm2039_vm10 = vweird.f32 %v2033_v23  ;;  %v2043_v8 = vand.u32 2147483647, %v2033_v23 }
0x1782   :  { %v2102_v17 = vmul.f32 %v5049_v51, %v2101_v32 }
0x1783   :  { %v2046_v26 = vor.u32 1.1754944e-38, %v2045_v24  ;;  %vm2044_vm14 = vcmp.eq.f32.partialorder %v2043_v8, 8.507059e+37 }
0x1784   :  { %v2103_v57 = vadd.f32 %v5049_v51, %v2102_v17 }
0x1786   :  { %v2107_v34 = vsel %vm2106_vm0, %v5049_v51, %v2103_v57 }
0x1787   :  { %v2112_v49 = vsel %vm2109_vm9, %v2111_v54, %v2107_v34  ;;  %v5053_v19 = vpop.eup %5052 }
0x1788   :  { %v2113_v33 = vmul.f32 %v2112_v49, %v2097_v56  ;;  %v2035_v35 = vmul.f32 %v5053_v19, %v2033_v23  ;;  %vm2040_vm13 = vweird.f32 %v5053_v19  ;;  %v6861_v49 = vld [vmem:[#allocation12] sm:$0xff] }
0x1789   :  { %vm2041_vm11 = vmor %vm2039_vm10, %vm2040_vm13 }
0x178a   :  { %v2036_v22 = vsub.f32 1.0, %v2035_v35  ;;  %v2115_v3 = vmul.f32 %v2113_v33, %v6819_v9 }
0x178c   :  { %v2037_v58 = vmul.f32 %v5053_v19, %v2036_v22 }
0x178e   :  { %v2038_v4 = vadd.f32 %v5053_v19, %v2037_v58 }
0x1790   :  { %v2042_v38 = vsel %vm2041_vm11, %v5053_v19, %v2038_v4 }
0x1791   :  { %v2047_v7 = vsel %vm2044_vm14, %v2046_v26, %v2042_v38 }
0x1792   :  { %v2048_v0 = vmul.f32 %v2047_v7, %v2032_v21 }
0x1794   :  { %v2050_v57 = vmul.f32 %v2048_v0, %v6823_v37  ;;  %v6858_v37 = vld [vmem:[#allocation12 + $0x8] sm:$0xff] }
0x17b2   :  { %v2118_v5 = vpop.permute.xlu1 %2117 }
0x17b3   :  { %v2120_v55 = vmul.f32 %v2118_v5, %v2113_v33  ;;  %v2204_v5 = vld [vmem:[#allocation4 + $0xa] sm:$0x1] }
0x17b5   :  { %2122 = vrot.lane.b32.xlu0 %v2120_v55, %s5637_s6 }
0x17ce   :  { %v2053_v51 = vpop.permute.xlu2 %2052 }
0x17cf   :  { %v2055_v6 = vmul.f32 %v2053_v51, %v2048_v0 }
0x17d1   :  { %2057 = vrot.lane.b32.xlu1 %v2055_v6, %s5637_s6 }
0x1827   :  { %v2123_v52 = vpop.permute.xlu0 %2122 }
0x1828   :  { %v6846_v32 = vadd.f32 %v2123_v52, %v2115_v3 }
0x182a   :  { %5054 = vtanh.f32 %v6846_v32 }
0x1830   :  { %v5055_v17 = vpop.eup %5054 }
0x1831   :  { %2128 = vrot.lane.b32.xlu2 %v5055_v17, %s5629_s27 }
0x1843   :  { %v2058_v2 = vpop.permute.xlu1 %2057 }
0x1844   :  { %v6851_v40 = vadd.f32 %v2058_v2, %v2050_v57 }
0x1846   :  { %5056 = vtanh.f32 %v6851_v40 }
0x184c   :  { %v5057_v48 = vpop.eup %5056 }
0x184d   :  { %2063 = vrot.lane.b32.xlu0 %v5057_v48, %s5629_s27 }
0x188b   :  { %v2129_v16 = vpop.permute.xlu2 %2128 }
0x188c   :  { %v2131_v9 = vmul.f32 %v2129_v16, %v2113_v33 }
0x188e   :  { %2133 = vrot.lane.b32.xlu1 %v2131_v9, %s5638_s12 }
0x18bf   :  { %v2064_v23 = vpop.permute.xlu0 %2063 }
0x18c0   :  { %v2066_v34 = vmul.f32 %v2064_v23, %v2048_v0 }
0x18c2   :  { %2137 = vrot.lane.b32.xlu2 %v2066_v34, %s5636_s1 }
0x1900   :  { %v2134_v54 = vpop.permute.xlu1 %2133 }
0x1901   :  { %4835 = vmatmul.msk.f32.vlgmr.msrb.gmra.mxu3 %vm836_vm6, %v2134_v54 }
0x1902   :  { %2769 = vmatpush.msrb.mxu3 %v6858_v37 }
0x1904   :  { %2770 = vmatpush.msrb.mxu3 %v6861_v49 }
0x191c   :  { %v2138_v56 = vpop.permute.xlu2 %2137 }
0x191d   :  { %v2140_v33 = vsel %vm836_vm6, %v2134_v54, %v2138_v56 }
0x191e   :  { %4834 = vmatmul.msk.f32.vlgmr.msra.gmra.mxu2 %vm907_vm7, %v2140_v33 }
0x191f   :  { %2704 = vmatpush.msra.mxu2 %v6734_v50 }
0x1921   :  { %2705 = vmatpush.msra.mxu2 %v6737_v39 }
0x1923   :  { %2706 = vmatpush.msra.mxu2 %v6740_v41 }
0x1925   :  { %2707 = vmatpush.msra.mxu2 %v6772_v1 }
0x1984   :  { %v2224_v55 = vpop.f32.mrf.mxu3 }
0x1985   :  { %v2227_v19 = vadd.f32 %v2224_v55, %v2204_v5 }
0x1987   :  { %v2228_v35 = vadd.f32 %v6744_v25, %v2227_v19 }
0x1989   :  { %5058 = vtanh.f32 %v2228_v35  ;;  %v2229_v39 = vand.u32 2147483647, %v2228_v35  ;;  %vm2233_vm8 = vcmp.ge.f32.partialorder %v2228_v35, 0.0 }
0x198b   :  { %v2230_v41 = vsub.f32 0.0, %v2229_v39 }
0x198d   :  { %v2231_v24 = vmul.f32 1.442695, %v2230_v41 }
0x198f   :  { %v5059_v22 = vpop.eup %5058 }
0x1990   :  { %2254 = vrot.lane.b32.xlu0 %v5059_v22, %s5636_s1 }
0x19a1   :  { %v2161_v58 = vpop.f32.mrf.mxu2 }
0x19a2   :  { %v2162_v4 = vadd.f32 %v6775_v42, %v2161_v58 }
0x19a4   :  { %5060 = vtanh.f32 %v2162_v4  ;;  %v2164_v26 = vand.u32 2147483647, %v2162_v4  ;;  %vm2168_vm13 = vcmp.ge.f32.partialorder %v2162_v4, 0.0 }
0x19a5   :  { %5062 = vpow2.f32 %v2231_v24 }
0x19a6   :  { %v2165_v7 = vsub.f32 0.0, %v2164_v26 }
0x19a8   :  { %v2166_v0 = vmul.f32 1.442695, %v2165_v7 }
0x19aa   :  { %v5061_v50 = vpop.eup %5060 }
0x19ab   :  { %2189 = vrot.lane.b32.xlu1 %v5061_v50, %s5636_s1  ;;  %v5063_v8 = vpop.eup %5062 }
0x19ac   :  { %v2235_v38 = vadd.f32 1.0, %v5063_v8  ;;  %v2234_v23 = vsel %vm2233_vm8, 1.0, %v5063_v8 }
0x19ae   :  { %5064 = vrcp.f32 %v2235_v38  ;;  %v2247_v17 = vand.u32 2147483648, %v2235_v38  ;;  %vm2241_vm2 = vweird.f32 %v2235_v38  ;;  %v2245_v2 = vand.u32 2147483647, %v2235_v38 }
0x19af   :  { %5066 = vpow2.f32 %v2166_v0 }
0x19b0   :  { %v2248_v16 = vor.u32 1.1754944e-38, %v2247_v17  ;;  %vm2246_vm5 = vcmp.eq.f32.partialorder %v2245_v2, 8.507059e+37 }
0x19b4   :  { %v5065_v25 = vpop.eup %5064 }
0x19b5   :  { %v2237_v21 = vmul.f32 %v5065_v25, %v2235_v38  ;;  %v5067_v3 = vpop.eup %5066  ;;  %vm2242_vm1 = vweird.f32 %v5065_v25 }
0x19b6   :  { %v2170_v57 = vadd.f32 1.0, %v5067_v3  ;;  %vm2243_vm4 = vmor %vm2241_vm2, %vm2242_vm1  ;;  %v2169_v24 = vsel %vm2168_vm13, 1.0, %v5067_v3 }
0x19b7   :  { %v2238_v51 = vsub.f32 1.0, %v2237_v21 }
0x19b8   :  { %5068 = vrcp.f32 %v2170_v57  ;;  %v2182_v58 = vand.u32 2147483648, %v2170_v57  ;;  %vm2176_vm0 = vweird.f32 %v2170_v57  ;;  %v2180_v50 = vand.u32 2147483647, %v2170_v57 }
0x19b9   :  { %v2239_v6 = vmul.f32 %v5065_v25, %v2238_v51 }
0x19ba   :  { %v2183_v41 = vor.u32 1.1754944e-38, %v2182_v58  ;;  %vm2181_vm12 = vcmp.eq.f32.partialorder %v2180_v50, 8.507059e+37 }
0x19bb   :  { %v2240_v52 = vadd.f32 %v5065_v25, %v2239_v6 }
0x19bd   :  { %v2244_v48 = vsel %vm2243_vm4, %v5065_v25, %v2240_v52 }
0x19be   :  { %v2249_v9 = vsel %vm2246_vm5, %v2248_v16, %v2244_v48  ;;  %v5069_v56 = vpop.eup %5068  ;;  %v6893_v16 = vld [vmem:[#allocation15 + $0x18] sm:$0xff] }
0x19bf   :  { %v2250_v34 = vmul.f32 %v2249_v9, %v2234_v23  ;;  %v2172_v5 = vmul.f32 %v5069_v56, %v2170_v57  ;;  %vm2177_vm3 = vweird.f32 %v5069_v56  ;;  %v6896_v9 = vld [vmem:[#allocation15 + $0x10] sm:$0xff]  ;;  %v6899_v23 = vld [vmem:[#allocation15 + $0x8] sm:$0xff] }
0x19c0   :  { %vm2178_vm9 = vmor %vm2176_vm0, %vm2177_vm3 }
0x19c1   :  { %v2173_v55 = vsub.f32 1.0, %v2172_v5  ;;  %v2252_v25 = vmul.f32 %v2250_v34, %v6846_v32 }
0x19c3   :  { %v2174_v19 = vmul.f32 %v5069_v56, %v2173_v55 }
0x19c5   :  { %v2175_v22 = vadd.f32 %v5069_v56, %v2174_v19 }
0x19c7   :  { %v2179_v39 = vsel %vm2178_vm9, %v5069_v56, %v2175_v22 }
0x19c8   :  { %v2184_v35 = vsel %vm2181_vm12, %v2183_v41, %v2179_v39 }
0x19c9   :  { %v2185_v8 = vmul.f32 %v2184_v35, %v2169_v24 }
0x19cb   :  { %v2187_v51 = vmul.f32 %v2185_v8, %v6851_v40 }
0x1a02   :  { %v2255_v54 = vpop.permute.xlu0 %2254 }
0x1a03   :  { %v2257_v33 = vmul.f32 %v2255_v54, %v2250_v34  ;;  %v6903_v54 = vld [vmem:[#allocation14] sm:$0x1] }
0x1a05   :  { %2259 = vrot.lane.b32.xlu2 %v2257_v33, %s5637_s6 }
0x1a1d   :  { %v2190_v38 = vpop.permute.xlu1 %2189 }
0x1a1e   :  { %v2192_v26 = vmul.f32 %v2190_v38, %v2185_v8 }
0x1a20   :  { %2194 = vrot.lane.b32.xlu0 %v2192_v26, %s5637_s6 }
0x1a5f   :  { %v2260_v7 = vpop.permute.xlu2 %2259 }
0x1a60   :  { %v6877_v21 = vadd.f32 %v2260_v7, %v2252_v25 }
0x1a62   :  { %5070 = vtanh.f32 %v6877_v21 }
0x1a68   :  { %v5071_v0 = vpop.eup %5070 }
0x1a69   :  { %2265 = vrot.lane.b32.xlu1 %v5071_v0, %s5629_s27 }
0x1a92   :  { %v2195_v6 = vpop.permute.xlu0 %2194 }
0x1a93   :  { %v6882_v4 = vadd.f32 %v2195_v6, %v2187_v51 }
0x1a95   :  { %5072 = vtanh.f32 %v6882_v4 }
0x1a9b   :  { %v5073_v3 = vpop.eup %5072 }
0x1a9c   :  { %2200 = vrot.lane.b32.xlu2 %v5073_v3, %s5629_s27 }
0x1adb   :  { %v2266_v52 = vpop.permute.xlu1 %2265 }
0x1adc   :  { %v2268_v32 = vmul.f32 %v2266_v52, %v2250_v34 }
0x1ade   :  { %2270 = vrot.lane.b32.xlu0 %v2268_v32, %s5638_s12 }
0x1af6   :  { %v2201_v17 = vpop.permute.xlu2 %2200 }
0x1af7   :  { %v2203_v57 = vmul.f32 %v2201_v17, %v2185_v8 }
0x1af9   :  { %2274 = vrot.lane.b32.xlu1 %v2203_v57, %s5636_s1 }
0x1b50   :  { %v2271_v2 = vpop.permute.xlu0 %2270 }
0x1b51   :  { %4837 = vmatmul.msk.f32.vlgmr.msrb.gmra.mxu1 %vm836_vm6, %v2271_v2 }
0x1b52   :  { %2906 = vmatpush.msrb.mxu1 %v6858_v37  ;;  %v2341_v37 = vld [vmem:[#allocation4 + $0xb] sm:$0x1] }
0x1b54   :  { %2907 = vmatpush.msrb.mxu1 %v6861_v49 }
0x1b6b   :  { %v2275_v40 = vpop.permute.xlu1 %2274 }
0x1b6c   :  { %v2277_v48 = vsel %vm836_vm6, %v2271_v2, %v2275_v40 }
0x1b6d   :  { %4836 = vmatmul.msk.f32.vlgmr.msra.gmra.mxu0 %vm907_vm7, %v2277_v48 }
0x1b6e   :  { %2841 = vmatpush.msra.mxu0 %v6893_v16 }
0x1b70   :  { %2842 = vmatpush.msra.mxu0 %v6896_v9 }
0x1b72   :  { %2843 = vmatpush.msra.mxu0 %v6899_v23 }
0x1b74   :  { %2844 = vmatpush.msra.mxu0 %v6772_v1 }
0x1bce   :  { %v2361_v49 = vpop.f32.mrf.mxu1 }
0x1bcf   :  { %v2364_v34 = vadd.f32 %v2361_v49, %v2341_v37 }
0x1bd1   :  { %v2365_v56 = vadd.f32 %v6903_v54, %v2364_v34 }
0x1bd3   :  { %5074 = vtanh.f32 %v2365_v56  ;;  %v2366_v22 = vand.u32 2147483647, %v2365_v56  ;;  %vm2370_vm1 = vcmp.ge.f32.partialorder %v2365_v56, 0.0 }
0x1bd5   :  { %v2367_v1 = vsub.f32 0.0, %v2366_v22 }
0x1bd7   :  { %v2368_v58 = vmul.f32 1.442695, %v2367_v1 }
0x1bd9   :  { %v5075_v33 = vpop.eup %5074 }
0x1bda   :  { %2391 = vrot.lane.b32.xlu2 %v5075_v33, %s5636_s1 }
0x1bea   :  { %v2298_v5 = vpop.f32.mrf.mxu0 }
0x1beb   :  { %v2299_v55 = vadd.f32 %v6775_v42, %v2298_v5 }
0x1bed   :  { %5076 = vtanh.f32 %v2299_v55  ;;  %v2301_v25 = vand.u32 2147483647, %v2299_v55  ;;  %vm2305_vm3 = vcmp.ge.f32.partialorder %v2299_v55, 0.0 }
0x1bee   :  { %5078 = vpow2.f32 %v2368_v58 }
0x1bef   :  { %v2302_v6 = vsub.f32 0.0, %v2301_v25 }
0x1bf1   :  { %v2303_v17 = vmul.f32 1.442695, %v2302_v6 }
0x1bf3   :  { %v5077_v19 = vpop.eup %5076 }
0x1bf4   :  { %2326 = vrot.lane.b32.xlu0 %v5077_v19, %s5636_s1  ;;  %v5079_v50 = vpop.eup %5078 }
0x1bf5   :  { %v2372_v39 = vadd.f32 1.0, %v5079_v50  ;;  %v2371_v3 = vsel %vm2370_vm1, 1.0, %v5079_v50 }
0x1bf7   :  { %5080 = vrcp.f32 %v2372_v39  ;;  %v2384_v26 = vand.u32 2147483648, %v2372_v39  ;;  %vm2378_vm11 = vweird.f32 %v2372_v39  ;;  %v2382_v42 = vand.u32 2147483647, %v2372_v39 }
0x1bf8   :  { %5082 = vpow2.f32 %v2303_v17 }
0x1bf9   :  { %v2385_v0 = vor.u32 1.1754944e-38, %v2384_v26  ;;  %vm2383_vm15 = vcmp.eq.f32.partialorder %v2382_v42, 8.507059e+37 }
0x1bfd   :  { %v5081_v41 = vpop.eup %5080 }
0x1bfe   :  { %v2374_v35 = vmul.f32 %v5081_v41, %v2372_v39  ;;  %vm2379_vm10 = vweird.f32 %v5081_v41  ;;  %v5083_v2 = vpop.eup %5082 }
0x1bff   :  { %vm2380_vm14 = vmor %vm2378_vm11, %vm2379_vm10  ;;  %v2307_v40 = vadd.f32 1.0, %v5083_v2  ;;  %v2306_v58 = vsel %vm2305_vm3, 1.0, %v5083_v2 }
0x1c00   :  { %v2375_v24 = vsub.f32 1.0, %v2374_v35 }
0x1c01   :  { %5084 = vrcp.f32 %v2307_v40  ;;  %v2319_v5 = vand.u32 2147483648, %v2307_v40  ;;  %vm2313_vm4 = vweird.f32 %v2307_v40  ;;  %v2317_v56 = vand.u32 2147483647, %v2307_v40 }
0x1c02   :  { %v2376_v8 = vmul.f32 %v5081_v41, %v2375_v24 }
0x1c03   :  { %v2320_v22 = vor.u32 1.1754944e-38, %v2319_v5  ;;  %vm2318_vm8 = vcmp.eq.f32.partialorder %v2317_v56, 8.507059e+37 }
0x1c04   :  { %v2377_v38 = vadd.f32 %v5081_v41, %v2376_v8 }
0x1c06   :  { %v2381_v7 = vsel %vm2380_vm14, %v5081_v41, %v2377_v38 }
0x1c07   :  { %v2386_v51 = vsel %vm2383_vm15, %v2385_v0, %v2381_v7  ;;  %v5085_v48 = vpop.eup %5084 }
0x1c08   :  { %v2387_v52 = vmul.f32 %v2386_v51, %v2371_v3  ;;  %v2309_v37 = vmul.f32 %v5085_v48, %v2307_v40  ;;  %vm2314_vm2 = vweird.f32 %v5085_v48 }
0x1c09   :  { %vm2315_vm5 = vmor %vm2313_vm4, %vm2314_vm2 }
0x1c0a   :  { %v2310_v49 = vsub.f32 1.0, %v2309_v37  ;;  %v2389_v35 = vmul.f32 %v2387_v52, %v6877_v21  ;;  %v6931_v37 = vld [vmem:[#allocation17] sm:$0x1] }
0x1c0c   :  { %v2311_v34 = vmul.f32 %v5085_v48, %v2310_v49 }
0x1c0e   :  { %v2312_v33 = vadd.f32 %v5085_v48, %v2311_v34 }
0x1c10   :  { %v2316_v19 = vsel %vm2315_vm5, %v5085_v48, %v2312_v33 }
0x1c11   :  { %v2321_v1 = vsel %vm2318_vm8, %v2320_v22, %v2316_v19 }
0x1c12   :  { %v2322_v50 = vmul.f32 %v2321_v1, %v2306_v58 }
0x1c14   :  { %v2324_v26 = vmul.f32 %v2322_v50, %v6882_v4 }
0x1c34   :  { %v2392_v32 = vpop.permute.xlu2 %2391 }
0x1c35   :  { %v2394_v57 = vmul.f32 %v2392_v32, %v2387_v52  ;;  %v2478_v32 = vld [vmem:[#allocation4 + $0xc] sm:$0x1] }
0x1c37   :  { %2396 = vrot.lane.b32.xlu1 %v2394_v57, %s5637_s6 }
0x1c66   :  { %v2327_v39 = vpop.permute.xlu0 %2326 }
0x1c67   :  { %v2329_v41 = vmul.f32 %v2327_v39, %v2322_v50 }
0x1c69   :  { %2331 = vrot.lane.b32.xlu2 %v2329_v41, %s5637_s6 }
0x1ca9   :  { %v2397_v24 = vpop.permute.xlu1 %2396 }
0x1caa   :  { %v6912_v8 = vadd.f32 %v2397_v24, %v2389_v35 }
0x1cac   :  { %5086 = vtanh.f32 %v6912_v8 }
0x1cb2   :  { %v5087_v38 = vpop.eup %5086 }
0x1cb3   :  { %2402 = vrot.lane.b32.xlu0 %v5087_v38, %s5629_s27 }
0x1cc3   :  { %v2332_v42 = vpop.permute.xlu2 %2331 }
0x1cc4   :  { %v6917_v55 = vadd.f32 %v2332_v42, %v2324_v26 }
0x1cc6   :  { %5088 = vtanh.f32 %v6917_v55 }
0x1ccc   :  { %v5089_v25 = vpop.eup %5088 }
0x1ccd   :  { %2337 = vrot.lane.b32.xlu1 %v5089_v25, %s5629_s27 }
0x1d25   :  { %v2403_v7 = vpop.permute.xlu0 %2402 }
0x1d26   :  { %v2405_v21 = vmul.f32 %v2403_v7, %v2387_v52  ;;  %v5185_v52 = vld [vmem:[#allocation15] sm:$0xff] }
0x1d28   :  { %2407 = vrot.lane.b32.xlu2 %v2405_v21, %s5638_s12 }
0x1d3f   :  { %v2338_v0 = vpop.permute.xlu1 %2337 }
0x1d40   :  { %v2340_v51 = vmul.f32 %v2338_v0, %v2322_v50 }
0x1d42   :  { %2411 = vrot.lane.b32.xlu0 %v2340_v51, %s5636_s1 }
0x1d82   :  { %v2408_v6 = vpop.permute.xlu2 %2407 }
0x1d83   :  { %4839 = vmatmul.msk.f32.vlgmr.msra.gmra.mxu3 %vm836_vm6, %v2408_v6 }
0x1db4   :  { %v2412_v4 = vpop.permute.xlu0 %2411 }
0x1db5   :  { %v2414_v3 = vsel %vm836_vm6, %v2408_v6, %v2412_v4 }
0x1db6   :  { %4838 = vmatmul.msk.f32.vlgmr.msrb.gmra.mxu2 %vm907_vm7, %v2414_v3 }
0x1db7   :  { %2978 = vmatpush.msrb.mxu2 %v6893_v16 }
0x1db9   :  { %2979 = vmatpush.msrb.mxu2 %v6896_v9 }
0x1dbb   :  { %2980 = vmatpush.msrb.mxu2 %v6899_v23 }
0x1dbd   :  { %2981 = vmatpush.msrb.mxu2 %v5185_v52 }
0x1e06   :  { %v2498_v17 = vpop.f32.mrf.mxu3 }
0x1e07   :  { %v2501_v57 = vadd.f32 %v2498_v17, %v2478_v32 }
0x1e09   :  { %v2502_v2 = vadd.f32 %v6903_v54, %v2501_v57 }
0x1e0b   :  { %5090 = vtanh.f32 %v2502_v2  ;;  %v2503_v23 = vand.u32 2147483647, %v2502_v2  ;;  %vm2507_vm10 = vcmp.ge.f32.partialorder %v2502_v2, 0.0 }
0x1e0d   :  { %v2504_v49 = vsub.f32 0.0, %v2503_v23 }
0x1e0f   :  { %v2505_v34 = vmul.f32 1.442695, %v2504_v49 }
0x1e11   :  { %v5091_v40 = vpop.eup %5090 }
0x1e12   :  { %2528 = vrot.lane.b32.xlu1 %v5091_v40, %s5636_s1 }
0x1e39   :  { %v2435_v48 = vpop.f32.mrf.mxu2 }
0x1e3a   :  { %v2436_v16 = vadd.f32 %v6931_v37, %v2435_v48 }
0x1e3c   :  { %5092 = vtanh.f32 %v2436_v16  ;;  %v2438_v56 = vand.u32 2147483647, %v2436_v16  ;;  %vm2442_vm2 = vcmp.ge.f32.partialorder %v2436_v16, 0.0 }
0x1e3d   :  { %5094 = vpow2.f32 %v2505_v34 }
0x1e3e   :  { %v2439_v19 = vsub.f32 0.0, %v2438_v56 }
0x1e40   :  { %v2440_v1 = vmul.f32 1.442695, %v2439_v19 }
0x1e42   :  { %v5093_v9 = vpop.eup %5092 }
0x1e43   :  { %2463 = vrot.lane.b32.xlu2 %v5093_v9, %s5636_s1  ;;  %v5095_v33 = vpop.eup %5094 }
0x1e44   :  { %v2509_v5 = vadd.f32 1.0, %v5095_v33  ;;  %v2508_v21 = vsel %vm2507_vm10, 1.0, %v5095_v33 }
0x1e46   :  { %5096 = vrcp.f32 %v2509_v5  ;;  %v2521_v38 = vand.u32 2147483648, %v2509_v5  ;;  %vm2515_vm9 = vweird.f32 %v2509_v5  ;;  %v2519_v26 = vand.u32 2147483647, %v2509_v5 }
0x1e47   :  { %5098 = vpow2.f32 %v2440_v1 }
0x1e48   :  { %v2522_v25 = vor.u32 1.1754944e-38, %v2521_v38  ;;  %vm2520_vm13 = vcmp.eq.f32.partialorder %v2519_v26, 8.507059e+37  ;;  %v2615_v26 = vld [vmem:[#allocation4 + $0xd] sm:$0x1] }
0x1e4c   :  { %v5097_v22 = vpop.eup %5096 }
0x1e4d   :  { %v2511_v58 = vmul.f32 %v5097_v22, %v2509_v5  ;;  %v5099_v41 = vpop.eup %5098  ;;  %vm2516_vm0 = vweird.f32 %v5097_v22 }
0x1e4e   :  { %v2444_v35 = vadd.f32 1.0, %v5099_v41  ;;  %vm2517_vm12 = vmor %vm2515_vm9, %vm2516_vm0  ;;  %v2443_v23 = vsel %vm2442_vm2, 1.0, %v5099_v41 }
0x1e4f   :  { %v2512_v50 = vsub.f32 1.0, %v2511_v58 }
0x1e50   :  { %5100 = vrcp.f32 %v2444_v35  ;;  %v2456_v57 = vand.u32 2147483648, %v2444_v35  ;;  %vm2450_vm14 = vweird.f32 %v2444_v35  ;;  %v2454_v40 = vand.u32 2147483647, %v2444_v35 }
0x1e51   :  { %v2513_v39 = vmul.f32 %v5097_v22, %v2512_v50 }
0x1e52   :  { %v2457_v9 = vor.u32 1.1754944e-38, %v2456_v57  ;;  %vm2455_vm1 = vcmp.eq.f32.partialorder %v2454_v40, 8.507059e+37 }
0x1e53   :  { %v2514_v24 = vadd.f32 %v5097_v22, %v2513_v39 }
0x1e55   :  { %v2518_v42 = vsel %vm2517_vm12, %v5097_v22, %v2514_v24 }
0x1e56   :  { %v2523_v7 = vsel %vm2520_vm13, %v2522_v25, %v2518_v42  ;;  %v5101_v0 = vpop.eup %5100 }
0x1e57   :  { %v2524_v51 = vmul.f32 %v2523_v7, %v2508_v21  ;;  %v2446_v3 = vmul.f32 %v5101_v0, %v2444_v35  ;;  %vm2451_vm11 = vweird.f32 %v5101_v0 }
0x1e58   :  { %vm2452_vm15 = vmor %vm2450_vm14, %vm2451_vm11 }
0x1e59   :  { %v2447_v52 = vsub.f32 1.0, %v2446_v3  ;;  %v2526_v5 = vmul.f32 %v2524_v51, %v6912_v8 }
0x1e5b   :  { %v2448_v32 = vmul.f32 %v5101_v0, %v2447_v52 }
0x1e5d   :  { %v2449_v17 = vadd.f32 %v5101_v0, %v2448_v32 }
0x1e5f   :  { %v2453_v48 = vsel %vm2452_vm15, %v5101_v0, %v2449_v17 }
0x1e60   :  { %v2458_v2 = vsel %vm2455_vm1, %v2457_v9, %v2453_v48 }
0x1e61   :  { %v2459_v49 = vmul.f32 %v2458_v2, %v2443_v23 }
0x1e63   :  { %v2461_v1 = vmul.f32 %v2459_v49, %v6917_v55 }
0x1e84   :  { %v2529_v6 = vpop.permute.xlu1 %2528 }
0x1e85   :  { %v2531_v4 = vmul.f32 %v2529_v6, %v2524_v51 }
0x1e87   :  { %2533 = vrot.lane.b32.xlu0 %v2531_v4, %s5637_s6 }
0x1e9d   :  { %v2464_v34 = vpop.permute.xlu2 %2463 }
0x1e9e   :  { %v2466_v33 = vmul.f32 %v2464_v34, %v2459_v49 }
0x1ea0   :  { %2468 = vrot.lane.b32.xlu1 %v2466_v33, %s5637_s6 }
0x1ef9   :  { %v2534_v56 = vpop.permute.xlu0 %2533 }
0x1efa   :  { %v6938_v19 = vadd.f32 %v2534_v56, %v2526_v5 }
0x1efc   :  { %5102 = vtanh.f32 %v6938_v19 }
0x1f02   :  { %v5103_v22 = vpop.eup %5102 }
0x1f03   :  { %2539 = vrot.lane.b32.xlu2 %v5103_v22, %s5629_s27 }
0x1f12   :  { %v2469_v58 = vpop.permute.xlu1 %2468 }
0x1f13   :  { %v6943_v16 = vadd.f32 %v2469_v58, %v2461_v1 }
0x1f15   :  { %5104 = vtanh.f32 %v6943_v16 }
0x1f1b   :  { %v5105_v50 = vpop.eup %5104 }
0x1f1c   :  { %2474 = vrot.lane.b32.xlu0 %v5105_v50, %s5629_s27 }
0x1f5d   :  { %v2540_v39 = vpop.permute.xlu2 %2539 }
0x1f5e   :  { %v2542_v8 = vmul.f32 %v2540_v39, %v2524_v51 }
0x1f60   :  { %2544 = vrot.lane.b32.xlu1 %v2542_v8, %s5638_s12 }
0x1f8e   :  { %v2475_v41 = vpop.permute.xlu0 %2474 }
0x1f8f   :  { %v2477_v35 = vmul.f32 %v2475_v41, %v2459_v49 }
0x1f91   :  { %2548 = vrot.lane.b32.xlu2 %v2477_v35, %s5636_s1 }
0x1fd2   :  { %v2545_v24 = vpop.permute.xlu1 %2544 }
0x1fd3   :  { %4841 = vmatmul.msk.f32.vlgmr.msra.gmra.mxu1 %vm836_vm6, %v2545_v24 }
0x1feb   :  { %v2549_v55 = vpop.permute.xlu2 %2548 }
0x1fec   :  { %v2551_v38 = vsel %vm836_vm6, %v2545_v24, %v2549_v55 }
0x1fed   :  { %4840 = vmatmul.msk.f32.vlgmr.msrb.gmra.mxu0 %vm907_vm7, %v2551_v38 }
0x2050   :  { %v2635_v42 = vpop.f32.mrf.mxu1 }
0x2051   :  { %v2638_v25 = vadd.f32 %v2635_v42, %v2615_v26 }
0x2053   :  { %v2639_v7 = vadd.f32 %v6903_v54, %v2638_v25 }
0x2055   :  { %5106 = vtanh.f32 %v2639_v7  ;;  %v2640_v4 = vand.u32 2147483647, %v2639_v7  ;;  %vm2644_vm0 = vcmp.ge.f32.partialorder %v2639_v7, 0.0 }
0x2057   :  { %v2641_v3 = vsub.f32 0.0, %v2640_v4 }
0x2059   :  { %v2642_v52 = vmul.f32 1.442695, %v2641_v3 }
0x205b   :  { %v5107_v21 = vpop.eup %5106 }
0x205c   :  { %2665 = vrot.lane.b32.xlu0 %v5107_v21, %s5636_s1 }
0x206a   :  { %v2572_v0 = vpop.f32.mrf.mxu0 }
0x206b   :  { %v2573_v51 = vadd.f32 %v6931_v37, %v2572_v0 }
0x206d   :  { %5108 = vtanh.f32 %v2573_v51  ;;  %v2575_v57 = vand.u32 2147483647, %v2573_v51  ;;  %vm2579_vm11 = vcmp.ge.f32.partialorder %v2573_v51, 0.0 }
0x206e   :  { %5110 = vpow2.f32 %v2642_v52 }
0x206f   :  { %v2576_v40 = vsub.f32 0.0, %v2575_v57 }
0x2071   :  { %v2577_v9 = vmul.f32 1.442695, %v2576_v40 }
0x2073   :  { %v5109_v6 = vpop.eup %5108 }
0x2074   :  { %2600 = vrot.lane.b32.xlu1 %v5109_v6, %s5636_s1  ;;  %v5111_v32 = vpop.eup %5110 }
0x2075   :  { %v2646_v17 = vadd.f32 1.0, %v5111_v32  ;;  %v2645_v8 = vsel %vm2644_vm0, 1.0, %v5111_v32 }
0x2077   :  { %5112 = vrcp.f32 %v2646_v17  ;;  %v2658_v56 = vand.u32 2147483648, %v2646_v17  ;;  %vm2652_vm5 = vweird.f32 %v2646_v17  ;;  %v2656_v22 = vand.u32 2147483647, %v2646_v17 }
0x2078   :  { %5114 = vpow2.f32 %v2577_v9 }
0x2079   :  { %v2659_v58 = vor.u32 1.1754944e-38, %v2658_v56  ;;  %vm2657_vm3 = vcmp.eq.f32.partialorder %v2656_v22, 8.507059e+37  ;;  %v2752_v22 = vld [vmem:[#allocation4 + $0xe] sm:$0x1] }
0x207d   :  { %v5113_v48 = vpop.eup %5112 }
0x207e   :  { %v2648_v2 = vmul.f32 %v5113_v48, %v2646_v17  ;;  %v5115_v49 = vpop.eup %5114  ;;  %vm2653_vm4 = vweird.f32 %v5113_v48 }
0x207f   :  { %v2581_v33 = vadd.f32 1.0, %v5115_v49  ;;  %vm2654_vm8 = vmor %vm2652_vm5, %vm2653_vm4  ;;  %v2580_v4 = vsel %vm2579_vm11, 1.0, %v5115_v49 }
0x2080   :  { %v2649_v23 = vsub.f32 1.0, %v2648_v2 }
0x2081   :  { %5116 = vrcp.f32 %v2581_v33  ;;  %v2593_v25 = vand.u32 2147483648, %v2581_v33  ;;  %vm2587_vm12 = vweird.f32 %v2581_v33  ;;  %v2591_v21 = vand.u32 2147483647, %v2581_v33 }
0x2082   :  { %v2650_v34 = vmul.f32 %v5113_v48, %v2649_v23 }
0x2083   :  { %v2594_v6 = vor.u32 1.1754944e-38, %v2593_v25  ;;  %vm2592_vm10 = vcmp.eq.f32.partialorder %v2591_v21, 8.507059e+37 }
0x2084   :  { %v2651_v5 = vadd.f32 %v5113_v48, %v2650_v34 }
0x2086   :  { %v2655_v1 = vsel %vm2654_vm8, %v5113_v48, %v2651_v5 }
0x2087   :  { %v2660_v50 = vsel %vm2657_vm3, %v2659_v58, %v2655_v1  ;;  %v5117_v39 = vpop.eup %5116 }
0x2088   :  { %v2661_v41 = vmul.f32 %v2660_v50, %v2645_v8  ;;  %v2583_v55 = vmul.f32 %v5117_v39, %v2581_v33  ;;  %vm2588_vm9 = vweird.f32 %v5117_v39 }
0x2089   :  { %vm2589_vm13 = vmor %vm2587_vm12, %vm2588_vm9 }
0x208a   :  { %v2584_v38 = vsub.f32 1.0, %v2583_v55  ;;  %v2663_v17 = vmul.f32 %v2661_v41, %v6938_v19 }
0x208c   :  { %v2585_v26 = vmul.f32 %v5117_v39, %v2584_v38 }
0x208e   :  { %v2586_v42 = vadd.f32 %v5117_v39, %v2585_v26 }
0x2090   :  { %v2590_v0 = vsel %vm2589_vm13, %v5117_v39, %v2586_v42 }
0x2091   :  { %v2595_v7 = vsel %vm2592_vm10, %v2594_v6, %v2590_v0 }
0x2092   :  { %v2596_v3 = vmul.f32 %v2595_v7, %v2580_v4 }
0x2094   :  { %v2598_v9 = vmul.f32 %v2596_v3, %v6943_v16 }
0x20ce   :  { %v2666_v35 = vpop.permute.xlu0 %2665 }
0x20cf   :  { %v2668_v24 = vmul.f32 %v2666_v35, %v2661_v41 }
0x20d1   :  { %2670 = vrot.lane.b32.xlu2 %v2668_v24, %s5637_s6 }
0x20e6   :  { %v2601_v52 = vpop.permute.xlu1 %2600 }
0x20e7   :  { %v2603_v32 = vmul.f32 %v2601_v52, %v2596_v3 }
0x20e9   :  { %2605 = vrot.lane.b32.xlu0 %v2603_v32, %s5637_s6 }
0x212b   :  { %v2671_v57 = vpop.permute.xlu2 %2670 }
0x212c   :  { %v6959_v40 = vadd.f32 %v2671_v57, %v2663_v17 }
0x212e   :  { %5118 = vtanh.f32 %v6959_v40 }
0x2134   :  { %v5119_v48 = vpop.eup %5118 }
0x2135   :  { %2676 = vrot.lane.b32.xlu1 %v5119_v48, %s5629_s27 }
0x215b   :  { %v2606_v2 = vpop.permute.xlu0 %2605 }
0x215c   :  { %v6964_v51 = vadd.f32 %v2606_v2, %v2598_v9 }
0x215e   :  { %5120 = vtanh.f32 %v6964_v51 }
0x2164   :  { %v5121_v23 = vpop.eup %5120 }
0x2165   :  { %2611 = vrot.lane.b32.xlu2 %v5121_v23, %s5629_s27 }
0x21a7   :  { %v2677_v49 = vpop.permute.xlu1 %2676 }
0x21a8   :  { %v2679_v19 = vmul.f32 %v2677_v49, %v2661_v41 }
0x21aa   :  { %2681 = vrot.lane.b32.xlu0 %v2679_v19, %s5638_s12 }
0x21bf   :  { %v2612_v34 = vpop.permute.xlu2 %2611 }
0x21c0   :  { %v2614_v33 = vmul.f32 %v2612_v34, %v2596_v3 }
0x21c2   :  { %2685 = vrot.lane.b32.xlu1 %v2614_v33, %s5636_s1 }
0x221c   :  { %v2682_v5 = vpop.permute.xlu0 %2681 }
0x221d   :  { %4843 = vmatmul.msk.f32.vlgmr.msrb.gmra.mxu3 %vm836_vm6, %v2682_v5 }
0x2234   :  { %v2686_v16 = vpop.permute.xlu1 %2685 }
0x2235   :  { %v2688_v56 = vsel %vm836_vm6, %v2682_v5, %v2686_v16 }
0x2236   :  { %4842 = vmatmul.msk.f32.vlgmr.msra.gmra.mxu2 %vm907_vm7, %v2688_v56 }
0x22a0   :  { %v2772_v1 = vpop.f32.mrf.mxu3 }
0x22a1   :  { %v2775_v58 = vadd.f32 %v2772_v1, %v2752_v22 }
0x22a3   :  { %v2776_v50 = vadd.f32 %v6903_v54, %v2775_v58 }
0x22a5   :  { %5122 = vtanh.f32 %v2776_v50  ;;  %v2777_v24 = vand.u32 2147483647, %v2776_v50  ;;  %vm2781_vm4 = vcmp.ge.f32.partialorder %v2776_v50, 0.0 }
0x22a7   :  { %v2778_v55 = vsub.f32 0.0, %v2777_v24 }
0x22a9   :  { %v2779_v38 = vmul.f32 1.442695, %v2778_v55 }
0x22ab   :  { %v5123_v39 = vpop.eup %5122 }
0x22ac   :  { %2802 = vrot.lane.b32.xlu2 %v5123_v39, %s5636_s1 }
0x22b9   :  { %v2709_v8 = vpop.f32.mrf.mxu2 }
0x22ba   :  { %v2710_v41 = vadd.f32 %v6931_v37, %v2709_v8 }
0x22bc   :  { %5124 = vtanh.f32 %v2710_v41  ;;  %v2712_v4 = vand.u32 2147483647, %v2710_v41  ;;  %vm2716_vm9 = vcmp.ge.f32.partialorder %v2710_v41, 0.0 }
0x22bd   :  { %5126 = vpow2.f32 %v2779_v38 }
0x22be   :  { %v2713_v17 = vsub.f32 0.0, %v2712_v4 }
0x22c0   :  { %v2714_v9 = vmul.f32 1.442695, %v2713_v17 }
0x22c2   :  { %v5125_v35 = vpop.eup %5124 }
0x22c3   :  { %2737 = vrot.lane.b32.xlu0 %v5125_v35, %s5636_s1  ;;  %v5127_v26 = vpop.eup %5126 }
0x22c4   :  { %v2783_v42 = vadd.f32 1.0, %v5127_v26  ;;  %v2782_v2 = vsel %vm2781_vm4, 1.0, %v5127_v26 }
0x22c6   :  { %5128 = vrcp.f32 %v2783_v42  ;;  %v2795_v3 = vand.u32 2147483648, %v2783_v42  ;;  %vm2789_vm15 = vweird.f32 %v2783_v42  ;;  %v2793_v52 = vand.u32 2147483647, %v2783_v42 }
0x22c7   :  { %5130 = vpow2.f32 %v2714_v9 }
0x22c8   :  { %v2796_v57 = vor.u32 1.1754944e-38, %v2795_v3  ;;  %vm2794_vm2 = vcmp.eq.f32.partialorder %v2793_v52, 8.507059e+37 }
0x22cc   :  { %v5129_v25 = vpop.eup %5128 }
0x22cd   :  { %v2785_v21 = vmul.f32 %v5129_v25, %v2783_v42  ;;  %vm2790_vm14 = vweird.f32 %v5129_v25  ;;  %v5131_v34 = vpop.eup %5130 }
0x22ce   :  { %vm2791_vm1 = vmor %vm2789_vm15, %vm2790_vm14  ;;  %v2718_v33 = vadd.f32 1.0, %v5131_v34  ;;  %v2717_v24 = vsel %vm2716_vm9, 1.0, %v5131_v34 }
0x22cf   :  { %v2786_v0 = vsub.f32 1.0, %v2785_v21 }
0x22d0   :  { %5132 = vrcp.f32 %v2718_v33  ;;  %v2730_v58 = vand.u32 2147483648, %v2718_v33  ;;  %vm2724_vm8 = vweird.f32 %v2718_v33  ;;  %v2728_v50 = vand.u32 2147483647, %v2718_v33 }
0x22d1   :  { %v2787_v6 = vmul.f32 %v5129_v25, %v2786_v0 }
0x22d2   :  { %v2731_v8 = vor.u32 1.1754944e-38, %v2730_v58  ;;  %vm2729_vm0 = vcmp.eq.f32.partialorder %v2728_v50, 8.507059e+37 }
0x22d3   :  { %v2788_v7 = vadd.f32 %v5129_v25, %v2787_v6 }
0x22d5   :  { %v2792_v32 = vsel %vm2791_vm1, %v5129_v25, %v2788_v7 }
0x22d6   :  { %v2797_v48 = vsel %vm2794_vm2, %v2796_v57, %v2792_v32  ;;  %v5133_v5 = vpop.eup %5132 }
0x22d7   :  { %v2798_v23 = vmul.f32 %v2797_v48, %v2782_v2  ;;  %v2720_v16 = vmul.f32 %v5133_v5, %v2718_v33  ;;  %vm2725_vm5 = vweird.f32 %v5133_v5  ;;  %v2889_v48 = vld [vmem:[#allocation4 + $0xf] sm:$0x1] }
0x22d8   :  { %vm2726_vm3 = vmor %vm2724_vm8, %vm2725_vm5 }
0x22d9   :  { %v2721_v56 = vsub.f32 1.0, %v2720_v16  ;;  %v2800_v42 = vmul.f32 %v2798_v23, %v6959_v40 }
0x22db   :  { %v2722_v22 = vmul.f32 %v5133_v5, %v2721_v56 }
0x22dd   :  { %v2723_v1 = vadd.f32 %v5133_v5, %v2722_v22 }
0x22df   :  { %v2727_v39 = vsel %vm2726_vm3, %v5133_v5, %v2723_v1 }
0x22e0   :  { %v2732_v35 = vsel %vm2729_vm0, %v2731_v8, %v2727_v39 }
0x22e1   :  { %v2733_v55 = vmul.f32 %v2732_v35, %v2717_v24 }
0x22e3   :  { %v2735_v6 = vmul.f32 %v2733_v55, %v6964_v51 }
0x2306   :  { %v2803_v49 = vpop.permute.xlu2 %2802 }
0x2307   :  { %v2805_v19 = vmul.f32 %v2803_v49, %v2798_v23 }
0x2309   :  { %2807 = vrot.lane.b32.xlu1 %v2805_v19, %s5637_s6 }
0x2335   :  { %v2738_v38 = vpop.permute.xlu0 %2737 }
0x2336   :  { %v2740_v26 = vmul.f32 %v2738_v38, %v2733_v55 }
0x2338   :  { %2742 = vrot.lane.b32.xlu2 %v2740_v26, %s5637_s6 }
0x237b   :  { %v2808_v25 = vpop.permute.xlu1 %2807 }
0x237c   :  { %v6980_v21 = vadd.f32 %v2808_v25, %v2800_v42 }
0x237e   :  { %5134 = vtanh.f32 %v6980_v21 }
0x2384   :  { %v5135_v0 = vpop.eup %5134 }
0x2385   :  { %2813 = vrot.lane.b32.xlu0 %v5135_v0, %s5629_s27 }
0x2392   :  { %v2743_v7 = vpop.permute.xlu2 %2742 }
0x2393   :  { %v6985_v41 = vadd.f32 %v2743_v7, %v2735_v6 }
0x2395   :  { %5136 = vtanh.f32 %v6985_v41 }
0x239b   :  { %v5137_v4 = vpop.eup %5136 }
0x239c   :  { %2748 = vrot.lane.b32.xlu1 %v5137_v4, %s5629_s27 }
0x23f7   :  { %v2814_v3 = vpop.permute.xlu0 %2813 }
0x23f8   :  { %v2816_v40 = vmul.f32 %v2814_v3, %v2798_v23 }
0x23fa   :  { %2818 = vrot.lane.b32.xlu2 %v2816_v40, %s5638_s12 }
0x240e   :  { %v2749_v52 = vpop.permute.xlu1 %2748 }
0x240f   :  { %v2751_v32 = vmul.f32 %v2749_v52, %v2733_v55 }
0x2411   :  { %2822 = vrot.lane.b32.xlu0 %v2751_v32, %s5636_s1 }
0x2454   :  { %v2819_v17 = vpop.permute.xlu2 %2818 }
0x2455   :  { %4845 = vmatmul.msk.f32.vlgmr.msrb.gmra.mxu1 %vm836_vm6, %v2819_v17 }
0x2483   :  { %v2823_v51 = vpop.permute.xlu0 %2822 }
0x2484   :  { %v2825_v57 = vsel %vm836_vm6, %v2819_v17, %v2823_v51 }
0x2485   :  { %4844 = vmatmul.msk.f32.vlgmr.msra.gmra.mxu0 %vm907_vm7, %v2825_v57 }
0x24d2   :  { %v2909_v9 = vpop.f32.mrf.mxu1 }
0x24d3   :  { %v2912_v2 = vadd.f32 %v2909_v9, %v2889_v48 }
0x24d5   :  { %v2913_v49 = vadd.f32 %v6903_v54, %v2912_v2 }
0x24d7   :  { %5138 = vtanh.f32 %v2913_v49  ;;  %v2914_v19 = vand.u32 2147483647, %v2913_v49  ;;  %vm2918_vm14 = vcmp.ge.f32.partialorder %v2913_v49, 0.0 }
0x24d9   :  { %v2915_v33 = vsub.f32 0.0, %v2914_v19 }
0x24db   :  { %v2916_v16 = vmul.f32 1.442695, %v2915_v33 }
0x24dd   :  { %v5139_v23 = vpop.eup %5138 }
0x24de   :  { %2939 = vrot.lane.b32.xlu2 %v5139_v23, %s5636_s1 }
0x2502   :  { %v2846_v34 = vpop.f32.mrf.mxu0 }
0x2503   :  { %v2847_v5 = vadd.f32 %v6931_v37, %v2846_v34 }
0x2505   :  { %5140 = vtanh.f32 %v2847_v5  ;;  %v2849_v7 = vand.u32 2147483647, %v2847_v5  ;;  %vm2853_vm5 = vcmp.ge.f32.partialorder %v2847_v5, 0.0 }
0x2506   :  { %5142 = vpow2.f32 %v2916_v16 }
0x2507   :  { %v2850_v4 = vsub.f32 0.0, %v2849_v7 }
0x2509   :  { %v2851_v3 = vmul.f32 1.442695, %v2850_v4 }
0x250b   :  { %v5141_v56 = vpop.eup %5140 }
0x250c   :  { %2874 = vrot.lane.b32.xlu1 %v5141_v56, %s5636_s1  ;;  %v5143_v22 = vpop.eup %5142 }
0x250d   :  { %v2920_v1 = vadd.f32 1.0, %v5143_v22  ;;  %v2919_v42 = vsel %vm2918_vm14, 1.0, %v5143_v22 }
0x250f   :  { %5144 = vrcp.f32 %v2920_v1  ;;  %v2932_v35 = vand.u32 2147483648, %v2920_v1  ;;  %vm2926_vm13 = vweird.f32 %v2920_v1  ;;  %v2930_v24 = vand.u32 2147483647, %v2920_v1 }
0x2510   :  { %5146 = vpow2.f32 %v2851_v3 }
0x2511   :  { %v2933_v38 = vor.u32 1.1754944e-38, %v2932_v35  ;;  %vm2931_vm11 = vcmp.eq.f32.partialorder %v2930_v24, 8.507059e+37 }
0x2515   :  { %v5145_v58 = vpop.eup %5144 }
0x2516   :  { %v2922_v54 = vmul.f32 %v5145_v58, %v2920_v1  ;;  %vm2927_vm12 = vweird.f32 %v5145_v58  ;;  %v5147_v40 = vpop.eup %5146 }
0x2517   :  { %vm2928_vm10 = vmor %vm2926_vm13, %vm2927_vm12  ;;  %v2855_v52 = vadd.f32 1.0, %v5147_v40  ;;  %v2854_v34 = vsel %vm2853_vm5, 1.0, %v5147_v40 }
0x2518   :  { %v2923_v50 = vsub.f32 1.0, %v2922_v54 }
0x2519   :  { %5148 = vrcp.f32 %v2855_v52  ;;  %v2867_v9 = vand.u32 2147483648, %v2855_v52  ;;  %vm2861_vm1 = vweird.f32 %v2855_v52  ;;  %v2865_v2 = vand.u32 2147483647, %v2855_v52 }
0x251a   :  { %v2924_v39 = vmul.f32 %v5145_v58, %v2923_v50 }
0x251b   :  { %v2868_v23 = vor.u32 1.1754944e-38, %v2867_v9  ;;  %vm2866_vm4 = vcmp.eq.f32.partialorder %v2865_v2, 8.507059e+37 }
0x251c   :  { %v2925_v8 = vadd.f32 %v5145_v58, %v2924_v39 }
0x251e   :  { %v2929_v55 = vsel %vm2928_vm10, %v5145_v58, %v2925_v8 }
0x251f   :  { %v2934_v26 = vsel %vm2931_vm11, %v2933_v38, %v2929_v55  ;;  %v5149_v32 = vpop.eup %5148 }
0x2520   :  { %v2935_v25 = vmul.f32 %v2934_v26, %v2919_v42  ;;  %v2857_v17 = vmul.f32 %v5149_v32, %v2855_v52  ;;  %vm2862_vm15 = vweird.f32 %v5149_v32 }
0x2521   :  { %vm2863_vm2 = vmor %vm2861_vm1, %vm2862_vm15 }
0x2522   :  { %v2858_v51 = vsub.f32 1.0, %v2857_v17  ;;  %v2937_v22 = vmul.f32 %v2935_v25, %v6980_v21 }
0x2524   :  { %v2859_v57 = vmul.f32 %v5149_v32, %v2858_v51 }
0x2526   :  { %v2860_v48 = vadd.f32 %v5149_v32, %v2859_v57 }
0x2528   :  { %v2864_v49 = vsel %vm2863_vm2, %v5149_v32, %v2860_v48 }
0x2529   :  { %v2869_v19 = vsel %vm2866_vm4, %v2868_v23, %v2864_v49 }
0x252a   :  { %v2870_v33 = vmul.f32 %v2869_v19, %v2854_v34 }
0x252c   :  { %v2872_v50 = vmul.f32 %v2870_v33, %v6985_v41 }
0x2538   :  { %v2940_v0 = vpop.permute.xlu2 %2939 }
0x2539   :  { %v2942_v6 = vmul.f32 %v2940_v0, %v2935_v25 }
0x253b   :  { %2944 = vrot.lane.b32.xlu1 %v2942_v6, %s5637_s6 }
0x257e   :  { %v2875_v16 = vpop.permute.xlu1 %2874 }
0x257f   :  { %v2877_v56 = vmul.f32 %v2875_v16, %v2870_v33 }
0x2581   :  { %2879 = vrot.lane.b32.xlu0 %v2877_v56, %s5637_s6 }
0x25ad   :  { %v2945_v1 = vpop.permute.xlu1 %2944 }
0x25ae   :  { %v2947_v58 = vadd.f32 %v2945_v1, %v2937_v22 }
0x25b0   :  { %5150 = vtanh.f32 %v2947_v58  ;;  %v3030_v58 = vld [vmem:[#allocation20 + $0x20] sm:$0xff] }
0x25b1   :  { %3053 = vmatpush.msra.mxu3 %v3030_v58 }
0x25b6   :  { %v5151_v54 = vpop.eup %5150 }
0x25b7   :  { %2950 = vrot.lane.b32.xlu0 %v5151_v54, %s5629_s27  ;;  %v3033_v54 = vld [vmem:[#allocation20 + $0x38] sm:$0xff] }
0x25b8   :  { %3113 = vmatpush.msra.mxu2 %v3033_v54 }
0x25f3   :  { %v2880_v39 = vpop.permute.xlu0 %2879 }
0x25f4   :  { %v2882_v8 = vadd.f32 %v2880_v39, %v2872_v50  ;;  %v3026_v50 = vld [vmem:[#allocation20] sm:$0xff]  ;;  %v3029_v39 = vld [vmem:[#allocation20 + $0x18] sm:$0xff] }
0x25f5   :  { %3054 = vmatpush.msra.mxu3 %v3026_v50  ;;  %3114 = vmatpush.msra.mxu2 %v3029_v39 }
0x25f6   :  { %5152 = vtanh.f32 %v2882_v8 }
0x25fc   :  { %v5153_v5 = vpop.eup %5152 }
0x25fd   :  { %2885 = vrot.lane.b32.xlu2 %v5153_v5, %s5629_s27  ;;  %v3031_v5 = vld [vmem:[#allocation20 + $0x28] sm:$0xff] }
0x25fe   :  { %3073 = vmatpush.msrb.mxu0 %v3031_v5 }
0x2629   :  { %v2951_v35 = vpop.permute.xlu0 %2950 }
0x262a   :  { %v2953_v24 = vmul.f32 %v2951_v35, %v2935_v25  ;;  %v3032_v35 = vld [vmem:[#allocation20 + $0x30] sm:$0xff] }
0x262b   :  { %3093 = vmatpush.msra.mxu1 %v3032_v35 }
0x262c   :  { %2955 = vrot.lane.b32.xlu1 %v2953_v24, %s5638_s12  ;;  %v3027_v24 = vld [vmem:[#allocation20 + $0x8] sm:$0xff] }
0x262d   :  { %3074 = vmatpush.msrb.mxu0 %v3027_v24 }
0x2657   :  { %v2886_v55 = vpop.permute.xlu2 %2885 }
0x2658   :  { %v2888_v21 = vmul.f32 %v2886_v55, %v2870_v33  ;;  %v3028_v55 = vld [vmem:[#allocation20 + $0x10] sm:$0xff] }
0x2659   :  { %3094 = vmatpush.msra.mxu1 %v3028_v55 }
0x265a   :  { %2959 = vrot.lane.b32.xlu2 %v2888_v21, %s5636_s1 }
0x269e   :  { %v2956_v38 = vpop.permute.xlu1 %2955 }
0x26b4   :  { %v2960_v26 = vpop.permute.xlu2 %2959 }
0x26b5   :  { %v2962_v42 = vsel %vm836_vm6, %v2956_v38, %v2960_v26  ;;  %v733_v26 = vld [vmem:[#allocation21] sm:$0xf] }
0x26b6   :  { %4846 = vmatmul.msk.f32.vlgmr.msrb.gmra.mxu2 %vm907_vm7, %v2962_v42  ;;  %v736_v42 = vperm.slane %v733_v26, 1 }
0x2739   :  { %v2983_v41 = vpop.f32.mrf.mxu2 }
0x273a   :  { %v2984_v0 = vadd.f32 %v6931_v37, %v2983_v41  ;;  %v737_v41 = vperm.slane %v733_v26, 2 }
0x273c   :  { %5154 = vtanh.f32 %v2984_v0  ;;  %v2986_v25 = vand.u32 2147483647, %v2984_v0  ;;  %vm2990_vm12 = vcmp.ge.f32.partialorder %v2984_v0, 0.0 }
0x273e   :  { %v2987_v7 = vsub.f32 0.0, %v2986_v25 }
0x2740   :  { %v2988_v4 = vmul.f32 1.442695, %v2987_v7 }
0x2742   :  { %v5155_v6 = vpop.eup %5154  ;;  %5156 = vpow2.f32 %v2988_v4  ;;  %v805_v4 = vadd.f32 %v6529_v53, %v737_v41 }
0x2743   :  { %3011 = vrot.lane.b32.xlu0 %v5155_v6, %s5636_s1  ;;  %v785_v6 = vadd.f32 %v6678_v18, %v736_v42 }
0x2748   :  { %v5157_v3 = vpop.eup %5156 }
0x2749   :  { %v2992_v40 = vadd.f32 1.0, %v5157_v3  ;;  %v2991_v23 = vsel %vm2990_vm12, 1.0, %v5157_v3 }
0x274b   :  { %5158 = vrcp.f32 %v2992_v40  ;;  %v3004_v48 = vand.u32 2147483648, %v2992_v40  ;;  %vm2998_vm3 = vweird.f32 %v2992_v40  ;;  %v3002_v37 = vand.u32 2147483647, %v2992_v40 }
0x274d   :  { %v3005_v2 = vor.u32 1.1754944e-38, %v3004_v48  ;;  %vm3003_vm9 = vcmp.eq.f32.partialorder %v3002_v37, 8.507059e+37 }
0x2751   :  { %v5159_v52 = vpop.eup %5158 }
0x2752   :  { %v2994_v32 = vmul.f32 %v5159_v52, %v2992_v40  ;;  %vm2999_vm8 = vweird.f32 %v5159_v52  ;;  %v735_v40 = vperm.slane %v733_v26, 0 }
0x2753   :  { %vm3000_vm0 = vmor %vm2998_vm3, %vm2999_vm8 }
0x2754   :  { %v2995_v17 = vsub.f32 1.0, %v2994_v32  ;;  %v738_v32 = vperm.slane %v733_v26, 3 }
0x2756   :  { %v2996_v51 = vmul.f32 %v5159_v52, %v2995_v17 }
0x2758   :  { %v2997_v57 = vadd.f32 %v5159_v52, %v2996_v51 }
0x275a   :  { %v3001_v9 = vsel %vm3000_vm0, %v5159_v52, %v2997_v57  ;;  %v765_v57 = vadd.f32 %v6579_v36, %v735_v40 }
0x275b   :  { %v3006_v49 = vsel %vm3003_vm9, %v3005_v2, %v3001_v9  ;;  %v825_v9 = vadd.f32 %v6581_v20, %v738_v32 }
0x275c   :  { %v3007_v19 = vmul.f32 %v3006_v49, %v2991_v23 }
0x275e   :  { %v3009_v16 = vmul.f32 %v3007_v19, %v2882_v8 }
0x27b5   :  { %v3012_v34 = vpop.permute.xlu0 %3011 }
0x27b6   :  { %v3014_v33 = vmul.f32 %v3012_v34, %v3007_v19 }
0x27b8   :  { %3016 = vrot.lane.b32.xlu1 %v3014_v33, %s5637_s6 }
0x282a   :  { %v3017_v56 = vpop.permute.xlu1 %3016 }
0x282b   :  { %v3019_v22 = vadd.f32 %v3017_v56, %v3009_v16 }
0x282d   :  { %5160 = vtanh.f32 %v3019_v22 }
0x2833   :  { %v5161_v1 = vpop.eup %5160 }
0x2834   :  { %3022 = vrot.lane.b32.xlu2 %v5161_v1, %s5629_s27 }
0x288e   :  { %v3023_v8 = vpop.permute.xlu2 %3022 }
0x288f   :  { %v3025_v21 = vmul.f32 %v3023_v8, %v3007_v19 }
0x2891   :  { %3035 = vrot.lane.b32.xlu0 %v3025_v21, %s5638_s12 }
0x2903   :  { %v3036_v38 = vpop.permute.xlu0 %3035 }
0x2904   :  { %4847 = vmatmul.msk.f32.vlgmr.msra.gmra.mxu3 %vm836_vm6, %v3036_v38  ;;  %4848 = vmatmul.msk.f32.vlgmr.msrb.gmra.mxu0 %vm836_vm6, %v3036_v38 }
0x2905   :  { %4849 = vmatmul.msk.f32.vlgmr.msra.gmra.mxu1 %vm836_vm6, %v3036_v38  ;;  %4850 = vmatmul.msk.f32.vlgmr.msra.gmra.mxu2 %vm836_vm6, %v3036_v38 }
0x2981   :  { %v3076_v0 = vpop.f32.mrf.mxu0 }
0x2982   :  { %v3120_v25 = vperm.slane %v3076_v0, 0  ;;  %v3096_v7 = vpop.f32.mrf.mxu1 }
0x2983   :  { %v3121_v3 = vperm.slane %v3096_v7, 0 }
0x2984   :  { %v3124_v52 = vadd.f32 %v3120_v25, %v785_v6 }
0x2985   :  { %v3125_v17 = vadd.f32 %v3121_v3, %v805_v4 }
0x2986   :  { %5162 = vtanh.f32 %v3124_v52 }
0x2987   :  { %5164 = vtanh.f32 %v3125_v17  ;;  %v3056_v51 = vpop.f32.mrf.mxu3 }
0x2988   :  { %v3119_v48 = vperm.slane %v3056_v51, 0  ;;  %v3116_v37 = vpop.f32.mrf.mxu2 }
0x2989   :  { %v3122_v2 = vperm.slane %v3116_v37, 0 }
0x298a   :  { %v3123_v18 = vadd.f32 %v3119_v48, %v765_v57 }
0x298b   :  { %v3126_v49 = vadd.f32 %v3122_v2, %v825_v9 }
0x298c   :  { %v7021_v23 = vpop.eup %5162  ;;  %5166 = vtanh.f32 %v3123_v18 }
0x298d   :  { %v7023_v53 = vpop.eup %5164  ;;  %5168 = vtanh.f32 %v3126_v49 }
0x2992   :  { %v7025_v19 = vpop.eup %5166 }
0x2993   :  { %v7027_v34 = vpop.eup %5168 }
0x2994   :  { %5609 = dma.done.wait [#allocation5], 69120 }
0x2995   :  { %5610 = vsyncadd [#allocation5], 4294898176  ;;  %v3270_v36 = vld [vmem:[#allocation2 + $0x438] sm:$0xff]  ;;  %v3261_v33 = vld [vmem:[#allocation2 + $0x3f0] sm:$0xff]  ;;  %vm3697_vm6 = vcmask 785408  }
0x2996   :  { %3701 = vmatpush.msrb.mxu3 %v3270_v36  ;;  %v3414_v16 = vld [vmem:[#allocation2 + $0x8b8] sm:$0xff]  ;;  %v3252_v20 = vld [vmem:[#allocation2 + $0x3a8] sm:$0xff]  ;;  %v3405_v56 = vld [vmem:[#allocation2 + $0x870] sm:$0xff] }
0x2997   :  { %3721 = vmatpush.msra.mxu0 %v3414_v16  ;;  %v3558_v22 = vld [vmem:[#allocation2 + $0xd38] sm:$0xff]  ;;  %v3396_v1 = vld [vmem:[#allocation2 + $0x828] sm:$0xff]  ;;  %v3549_v58 = vld [vmem:[#allocation2 + $0xcf0] sm:$0xff] }
0x2998   :  { %3702 = vmatpush.msrb.mxu3 %v3261_v33  ;;  %3741 = vmatpush.msrb.mxu1 %v3558_v22  ;;  %v3243_v54 = vld [vmem:[#allocation2 + $0x360] sm:$0xff]  ;;  %v3540_v50 = vld [vmem:[#allocation2 + $0xca8] sm:$0xff]  ;;  %v3666_v5 = vld [vmem:[#allocation2 + $0x1098] sm:$0xff] }
0x2999   :  { %3722 = vmatpush.msra.mxu0 %v3405_v56  ;;  %v3387_v39 = vld [vmem:[#allocation2 + $0x7e0] sm:$0xff]  ;;  %v3234_v35 = vld [vmem:[#allocation2 + $0x318] sm:$0xff]  ;;  %3765 = vmatpush.msrb.mxu2 %v3666_v5  ;;  %v3657_v55 = vld [vmem:[#allocation2 + $0x1050] sm:$0xff] }
0x299a   :  { %3703 = vmatpush.msrb.mxu3 %v3252_v20  ;;  %3742 = vmatpush.msrb.mxu1 %v3549_v58  ;;  %v3531_v24 = vld [vmem:[#allocation2 + $0xc60] sm:$0xff]  ;;  %v3378_v8 = vld [vmem:[#allocation2 + $0x798] sm:$0xff]  ;;  %v3648_v21 = vld [vmem:[#allocation2 + $0x1008] sm:$0xff] }
0x299b   :  { %3723 = vmatpush.msra.mxu0 %v3396_v1  ;;  %v3225_v38 = vld [vmem:[#allocation2 + $0x2d0] sm:$0xff]  ;;  %3766 = vmatpush.msrb.mxu2 %v3657_v55  ;;  %v3522_v26 = vld [vmem:[#allocation2 + $0xc18] sm:$0xff]  ;;  %v3639_v41 = vld [vmem:[#allocation2 + $0xfc0] sm:$0xff] }
0x299c   :  { %3704 = vmatpush.msrb.mxu3 %v3243_v54  ;;  %3743 = vmatpush.msrb.mxu1 %v3540_v50  ;;  %v3369_v42 = vld [vmem:[#allocation2 + $0x750] sm:$0xff]  ;;  %v3216_v0 = vld [vmem:[#allocation2 + $0x288] sm:$0xff]  ;;  %v3630_v7 = vld [vmem:[#allocation2 + $0xf78] sm:$0xff] }
0x299d   :  { %3724 = vmatpush.msra.mxu0 %v3387_v39  ;;  %3767 = vmatpush.msrb.mxu2 %v3648_v21  ;;  %v3513_v6 = vld [vmem:[#allocation2 + $0xbd0] sm:$0xff]  ;;  %v3360_v25 = vld [vmem:[#allocation2 + $0x708] sm:$0xff]  ;;  %v3207_v4 = vld [vmem:[#allocation2 + $0x240] sm:$0xff] }
0x299e   :  { %3705 = vmatpush.msrb.mxu3 %v3234_v35  ;;  %3744 = vmatpush.msrb.mxu1 %v3531_v24  ;;  %v3504_v3 = vld [vmem:[#allocation2 + $0xb88] sm:$0xff]  ;;  %v3351_v40 = vld [vmem:[#allocation2 + $0x6c0] sm:$0xff]  ;;  %v3621_v52 = vld [vmem:[#allocation2 + $0xf30] sm:$0xff] }
0x299f   :  { %3725 = vmatpush.msra.mxu0 %v3378_v8  ;;  %3768 = vmatpush.msrb.mxu2 %v3639_v41  ;;  %v3198_v32 = vld [vmem:[#allocation2 + $0x1f8] sm:$0xff]  ;;  %v3495_v17 = vld [vmem:[#allocation2 + $0xb40] sm:$0xff]  ;;  %v3612_v57 = vld [vmem:[#allocation2 + $0xee8] sm:$0xff] }
0x29a0   :  { %3706 = vmatpush.msrb.mxu3 %v3225_v38  ;;  %3745 = vmatpush.msrb.mxu1 %v3522_v26  ;;  %v3342_v51 = vld [vmem:[#allocation2 + $0x678] sm:$0xff]  ;;  %v3189_v48 = vld [vmem:[#allocation2 + $0x1b0] sm:$0xff]  ;;  %v3603_v2 = vld [vmem:[#allocation2 + $0xea0] sm:$0xff] }
0x29a1   :  { %3726 = vmatpush.msra.mxu0 %v3369_v42  ;;  %3769 = vmatpush.msrb.mxu2 %v3630_v7  ;;  %v3486_v37 = vld [vmem:[#allocation2 + $0xaf8] sm:$0xff]  ;;  %v3333_v9 = vld [vmem:[#allocation2 + $0x630] sm:$0xff]  ;;  %v3180_v18 = vld [vmem:[#allocation2 + $0x168] sm:$0xff] }
0x29a2   :  { %3707 = vmatpush.msrb.mxu3 %v3216_v0  ;;  %3746 = vmatpush.msrb.mxu1 %v3513_v6  ;;  %v3477_v49 = vld [vmem:[#allocation2 + $0xab0] sm:$0xff]  ;;  %v3324_v36 = vld [vmem:[#allocation2 + $0x5e8] sm:$0xff]  ;;  %v3594_v33 = vld [vmem:[#allocation2 + $0xe58] sm:$0xff] }
0x29a3   :  { %3727 = vmatpush.msra.mxu0 %v3360_v25  ;;  %3770 = vmatpush.msrb.mxu2 %v3621_v52  ;;  %v3171_v16 = vld [vmem:[#allocation2 + $0x120] sm:$0xff]  ;;  %v3468_v20 = vld [vmem:[#allocation2 + $0xa68] sm:$0xff]  ;;  %v3585_v22 = vld [vmem:[#allocation2 + $0xe10] sm:$0xff] }
0x29a4   :  { %3708 = vmatpush.msrb.mxu3 %v3207_v4  ;;  %3747 = vmatpush.msrb.mxu1 %v3504_v3  ;;  %v3315_v56 = vld [vmem:[#allocation2 + $0x5a0] sm:$0xff]  ;;  %v3162_v1 = vld [vmem:[#allocation2 + $0xd8] sm:$0xff]  ;;  %v3576_v50 = vld [vmem:[#allocation2 + $0xdc8] sm:$0xff] }
0x29a5   :  { %3728 = vmatpush.msra.mxu0 %v3351_v40  ;;  %3771 = vmatpush.msrb.mxu2 %v3612_v57  ;;  %v3459_v58 = vld [vmem:[#allocation2 + $0xa20] sm:$0xff]  ;;  %v3306_v54 = vld [vmem:[#allocation2 + $0x558] sm:$0xff]  ;;  %v3153_v39 = vld [vmem:[#allocation2 + $0x90] sm:$0xff] }
0x29a6   :  { %3709 = vmatpush.msrb.mxu3 %v3198_v32  ;;  %3748 = vmatpush.msrb.mxu1 %v3495_v17  ;;  %v3450_v5 = vld [vmem:[#allocation2 + $0x9d8] sm:$0xff]  ;;  %v3297_v35 = vld [vmem:[#allocation2 + $0x510] sm:$0xff]  ;;  %v3567_v24 = vld [vmem:[#allocation2 + $0xd80] sm:$0xff] }
0x29a7   :  { %3729 = vmatpush.msra.mxu0 %v3342_v51  ;;  %3772 = vmatpush.msrb.mxu2 %v3603_v2  ;;  %v3144_v55 = vld [vmem:[#allocation2 + $0x48] sm:$0xff]  ;;  %v3441_v8 = vld [vmem:[#allocation2 + $0x990] sm:$0xff]  ;;  %v3271_v38 = vld [vmem:[#allocation2 + $0x440] sm:$0xff] }
0x29a8   :  { %3710 = vmatpush.msrb.mxu3 %v3189_v48  ;;  %3749 = vmatpush.msrb.mxu1 %v3486_v37  ;;  %v3288_v21 = vld [vmem:[#allocation2 + $0x4c8] sm:$0xff]  ;;  %v3135_v26 = vld [vmem:[#allocation2] sm:$0xff]  ;;  %v3262_v6 = vld [vmem:[#allocation2 + $0x3f8] sm:$0xff] }
0x29a9   :  { %3730 = vmatpush.msra.mxu0 %v3333_v9  ;;  %3773 = vmatpush.msrb.mxu2 %v3594_v33  ;;  %v3432_v42 = vld [vmem:[#allocation2 + $0x948] sm:$0xff]  ;;  %v3415_v41 = vld [vmem:[#allocation2 + $0x8c0] sm:$0xff]  ;;  %v3406_v7 = vld [vmem:[#allocation2 + $0x878] sm:$0xff] }
0x29aa   :  { %3711 = vmatpush.msrb.mxu3 %v3180_v18  ;;  %3750 = vmatpush.msrb.mxu1 %v3477_v49  ;;  %v3279_v0 = vld [vmem:[#allocation2 + $0x480] sm:$0xff]  ;;  %v3253_v3 = vld [vmem:[#allocation2 + $0x3b0] sm:$0xff]  ;;  %v3550_v40 = vld [vmem:[#allocation2 + $0xcf8] sm:$0xff] }
0x29ab   :  { %3731 = vmatpush.msra.mxu0 %v3324_v36  ;;  %3774 = vmatpush.msrb.mxu2 %v3585_v22  ;;  %v3559_v25 = vld [vmem:[#allocation2 + $0xd40] sm:$0xff]  ;;  %v3397_v52 = vld [vmem:[#allocation2 + $0x830] sm:$0xff]  ;;  %v3244_v17 = vld [vmem:[#allocation2 + $0x368] sm:$0xff] }
0x29ac   :  { %3712 = vmatpush.msrb.mxu3 %v3171_v16  ;;  %3751 = vmatpush.msrb.mxu1 %v3468_v20  ;;  %v3423_v4 = vld [vmem:[#allocation2 + $0x900] sm:$0xff]  ;;  %v3541_v51 = vld [vmem:[#allocation2 + $0xcb0] sm:$0xff]  ;;  %v3388_v57 = vld [vmem:[#allocation2 + $0x7e8] sm:$0xff] }
0x29ad   :  { %3732 = vmatpush.msra.mxu0 %v3315_v56  ;;  %3775 = vmatpush.msrb.mxu2 %v3576_v50  ;;  %v3667_v32 = vld [vmem:[#allocation2 + $0x10a0] sm:$0xff]  ;;  %v3658_v48 = vld [vmem:[#allocation2 + $0x1058] sm:$0xff]  ;;  %v3532_v9 = vld [vmem:[#allocation2 + $0xc68] sm:$0xff] }
0x29ae   :  { %3713 = vmatpush.msrb.mxu3 %v3162_v1  ;;  %3752 = vmatpush.msrb.mxu1 %v3459_v58  ;;  %v3235_v37 = vld [vmem:[#allocation2 + $0x320] sm:$0xff]  ;;  %v3649_v18 = vld [vmem:[#allocation2 + $0x1010] sm:$0xff]  ;;  %v3226_v49 = vld [vmem:[#allocation2 + $0x2d8] sm:$0xff] }
0x29af   :  { %3733 = vmatpush.msra.mxu0 %v3306_v54  ;;  %3776 = vmatpush.msrb.mxu2 %v3567_v24  ;;  %v3379_v2 = vld [vmem:[#allocation2 + $0x7a0] sm:$0xff]  ;;  %v3370_v33 = vld [vmem:[#allocation2 + $0x758] sm:$0xff]  ;;  %v3640_v16 = vld [vmem:[#allocation2 + $0xfc8] sm:$0xff] }
0x29b0   :  { %3714 = vmatpush.msrb.mxu3 %v3153_v39  ;;  %3753 = vmatpush.msrb.mxu1 %v3450_v5  ;;  %v3523_v36 = vld [vmem:[#allocation2 + $0xc20] sm:$0xff]  ;;  %v3217_v20 = vld [vmem:[#allocation2 + $0x290] sm:$0xff]  ;;  %v3514_v56 = vld [vmem:[#allocation2 + $0xbd8] sm:$0xff] }
0x29b1   :  { %3734 = vmatpush.msra.mxu0 %v3297_v35  ;;  %3781 = vmatpush.msra.mxu2 %v3271_v38  ;;  %v3361_v22 = vld [vmem:[#allocation2 + $0x710] sm:$0xff]  ;;  %v3631_v1 = vld [vmem:[#allocation2 + $0xf80] sm:$0xff]  ;;  %v3208_v58 = vld [vmem:[#allocation2 + $0x248] sm:$0xff] }
0x29b2   :  { %3715 = vmatpush.msrb.mxu3 %v3144_v55  ;;  %3754 = vmatpush.msrb.mxu1 %v3441_v8  ;;  %v3505_v54 = vld [vmem:[#allocation2 + $0xb90] sm:$0xff]  ;;  %v3352_v50 = vld [vmem:[#allocation2 + $0x6c8] sm:$0xff]  ;;  %v3622_v39 = vld [vmem:[#allocation2 + $0xf38] sm:$0xff] }
0x29b3   :  { %3735 = vmatpush.msra.mxu0 %v3288_v21  ;;  %3782 = vmatpush.msra.mxu2 %v3262_v6  ;;  %v3199_v5 = vld [vmem:[#allocation2 + $0x200] sm:$0xff]  ;;  %v3496_v35 = vld [vmem:[#allocation2 + $0xb48] sm:$0xff]  ;;  %v3613_v55 = vld [vmem:[#allocation2 + $0xef0] sm:$0xff] }
0x29b4   :  { %3716 = vmatpush.msrb.mxu3 %v3135_v26  ;;  %3755 = vmatpush.msrb.mxu1 %v3432_v42  ;;  %v3343_v24 = vld [vmem:[#allocation2 + $0x680] sm:$0xff]  ;;  %v3190_v8 = vld [vmem:[#allocation2 + $0x1b8] sm:$0xff]  ;;  %v3604_v26 = vld [vmem:[#allocation2 + $0xea8] sm:$0xff] }
0x29b5   :  { %3736 = vmatpush.msra.mxu0 %v3279_v0  ;;  %3783 = vmatpush.msra.mxu2 %v3253_v3  ;;  %v3334_v21 = vld [vmem:[#allocation2 + $0x638] sm:$0xff]  ;;  %v3487_v38 = vld [vmem:[#allocation2 + $0xb00] sm:$0xff]  ;;  %v3181_v42 = vld [vmem:[#allocation2 + $0x170] sm:$0xff] }
0x29b6   :  { %3801 = vmatpush.msra.mxu3 %v3415_v41  ;;  %3756 = vmatpush.msrb.mxu1 %v3423_v4  ;;  %v3325_v41 = vld [vmem:[#allocation2 + $0x5f0] sm:$0xff]  ;;  %v3478_v0 = vld [vmem:[#allocation2 + $0xab8] sm:$0xff]  ;;  %v3595_v6 = vld [vmem:[#allocation2 + $0xe60] sm:$0xff] }
0x29b7   :  { %3821 = vmatpush.msrb.mxu0 %v3559_v25  ;;  %3784 = vmatpush.msra.mxu2 %v3244_v17  ;;  %v3172_v25 = vld [vmem:[#allocation2 + $0x128] sm:$0xff]  ;;  %v3469_v4 = vld [vmem:[#allocation2 + $0xa70] sm:$0xff]  ;;  %v3586_v3 = vld [vmem:[#allocation2 + $0xe18] sm:$0xff] }
0x29b8   :  { %3802 = vmatpush.msra.mxu3 %v3406_v7  ;;  %3845 = vmatpush.msra.mxu1 %v3667_v32  ;;  %v3316_v7 = vld [vmem:[#allocation2 + $0x5a8] sm:$0xff]  ;;  %v3577_v17 = vld [vmem:[#allocation2 + $0xdd0] sm:$0xff] }
0x29b9   :  { %3822 = vmatpush.msrb.mxu0 %v3550_v40  ;;  %3785 = vmatpush.msra.mxu2 %v3235_v37  ;;  %v3307_v40 = vld [vmem:[#allocation2 + $0x560] sm:$0xff]  ;;  %v3460_v32 = vld [vmem:[#allocation2 + $0xa28] sm:$0xff]  ;;  %v3289_v37 = vld [vmem:[#allocation2 + $0x4d0] sm:$0xff] }
0x29ba   :  { %3803 = vmatpush.msra.mxu3 %v3397_v52  ;;  %3846 = vmatpush.msra.mxu1 %v3658_v48  ;;  %v3163_v52 = vld [vmem:[#allocation2 + $0xe0] sm:$0xff] }
0x29bb   :  { %3823 = vmatpush.msrb.mxu0 %v3541_v51  ;;  %3786 = vmatpush.msra.mxu2 %v3226_v49  ;;  %v3298_v51 = vld [vmem:[#allocation2 + $0x518] sm:$0xff]  ;;  %v3451_v48 = vld [vmem:[#allocation2 + $0x9e0] sm:$0xff]  ;;  %v3272_v49 = vld [vmem:[#allocation2 + $0x448] sm:$0xff] }
0x29bc   :  { %3804 = vmatpush.msra.mxu3 %v3388_v57  ;;  %3847 = vmatpush.msra.mxu1 %v3649_v18  ;;  %v3154_v57 = vld [vmem:[#allocation2 + $0x98] sm:$0xff]  ;;  %v3280_v18 = vld [vmem:[#allocation2 + $0x488] sm:$0xff] }
0x29bd   :  { %3824 = vmatpush.msrb.mxu0 %v3532_v9  ;;  %3787 = vmatpush.msra.mxu2 %v3217_v20  ;;  %v3568_v9 = vld [vmem:[#allocation2 + $0xd88] sm:$0xff] }
0x29be   :  { %3805 = vmatpush.msra.mxu3 %v3379_v2  ;;  %3848 = vmatpush.msra.mxu1 %v3640_v16  ;;  %v3145_v2 = vld [vmem:[#allocation2 + $0x50] sm:$0xff]  ;;  %v3263_v16 = vld [vmem:[#allocation2 + $0x400] sm:$0xff]  ;;  %v3136_v20 = vld [vmem:[#allocation2 + $0x8] sm:$0xff] }
0x29bf   :  { %3825 = vmatpush.msrb.mxu0 %v3523_v36  ;;  %3788 = vmatpush.msra.mxu2 %v3208_v58  ;;  %v3560_v36 = vld [vmem:[#allocation2 + $0xd48] sm:$0xff] }
0x29c0   :  { %3806 = vmatpush.msra.mxu3 %v3370_v33  ;;  %3849 = vmatpush.msra.mxu1 %v3631_v1  ;;  %v3442_v33 = vld [vmem:[#allocation2 + $0x998] sm:$0xff]  ;;  %v3416_v58 = vld [vmem:[#allocation2 + $0x8c8] sm:$0xff] }
0x29c1   :  { %3826 = vmatpush.msrb.mxu0 %v3514_v56  ;;  %3789 = vmatpush.msra.mxu2 %v3199_v5  ;;  %v3551_v56 = vld [vmem:[#allocation2 + $0xd00] sm:$0xff]  ;;  %v3254_v1 = vld [vmem:[#allocation2 + $0x3b8] sm:$0xff] }
0x29c2   :  { %3807 = vmatpush.msra.mxu3 %v3361_v22  ;;  %3850 = vmatpush.msra.mxu1 %v3622_v39  ;;  %v3433_v22 = vld [vmem:[#allocation2 + $0x950] sm:$0xff]  ;;  %v3407_v5 = vld [vmem:[#allocation2 + $0x880] sm:$0xff] }
0x29c3   :  { %3827 = vmatpush.msrb.mxu0 %v3505_v54  ;;  %3717 = vmatmul.f32.vlgmr.msrb.gmra.mxu3 %v7025_v19  ;;  %v3542_v54 = vld [vmem:[#allocation2 + $0xcb8] sm:$0xff]  ;;  %v3245_v39 = vld [vmem:[#allocation2 + $0x370] sm:$0xff] }
0x29c4   :  { %3808 = vmatpush.msra.mxu3 %v3352_v50  ;;  %3851 = vmatpush.msra.mxu1 %v3613_v55  ;;  %v3424_v50 = vld [vmem:[#allocation2 + $0x908] sm:$0xff] }
0x29c5   :  { %3828 = vmatpush.msrb.mxu0 %v3496_v35  ;;  %3790 = vmatpush.msra.mxu2 %v3190_v8  ;;  %v3533_v35 = vld [vmem:[#allocation2 + $0xc70] sm:$0xff]  ;;  %v3236_v55 = vld [vmem:[#allocation2 + $0x328] sm:$0xff]  ;;  %v3398_v8 = vld [vmem:[#allocation2 + $0x838] sm:$0xff] }
0x29c6   :  { %3809 = vmatpush.msra.mxu3 %v3343_v24  ;;  %3852 = vmatpush.msra.mxu1 %v3604_v26  ;;  %v3668_v24 = vld [vmem:[#allocation2 + $0x10a8] sm:$0xff]  ;;  %v3227_v26 = vld [vmem:[#allocation2 + $0x2e0] sm:$0xff] }
0x29c7   :  { %3829 = vmatpush.msrb.mxu0 %v3487_v38  ;;  %3791 = vmatpush.msra.mxu2 %v3181_v42  ;;  %v3659_v38 = vld [vmem:[#allocation2 + $0x1060] sm:$0xff]  ;;  %v3389_v42 = vld [vmem:[#allocation2 + $0x7f0] sm:$0xff] }
0x29c8   :  { %3810 = vmatpush.msra.mxu3 %v3334_v21  ;;  %3853 = vmatpush.msra.mxu1 %v3595_v6  ;;  %v3524_v21 = vld [vmem:[#allocation2 + $0xc28] sm:$0xff]  ;;  %v3218_v6 = vld [vmem:[#allocation2 + $0x298] sm:$0xff] }
0x29c9   :  { %3830 = vmatpush.msrb.mxu0 %v3478_v0  ;;  %3792 = vmatpush.msra.mxu2 %v3172_v25  ;;  %v3650_v0 = vld [vmem:[#allocation2 + $0x1018] sm:$0xff]  ;;  %v3380_v25 = vld [vmem:[#allocation2 + $0x7a8] sm:$0xff] }
0x29ca   :  { %3811 = vmatpush.msra.mxu3 %v3325_v41  ;;  %3854 = vmatpush.msra.mxu1 %v3586_v3  ;;  %v3515_v41 = vld [vmem:[#allocation2 + $0xbe0] sm:$0xff]  ;;  %v3209_v3 = vld [vmem:[#allocation2 + $0x250] sm:$0xff] }
0x29cb   :  { %3831 = vmatpush.msrb.mxu0 %v3469_v4  ;;  %4851 = vmatmul.msk.f32.vlgmr.msrb.gmra.mxu2 %vm3697_vm6, %v7027_v34  ;;  %v3641_v4 = vld [vmem:[#allocation2 + $0xfd0] sm:$0xff] }
0x29cc   :  { %3812 = vmatpush.msra.mxu3 %v3316_v7  ;;  %3793 = vmatpush.msra.mxu2 %v3163_v52  ;;  %v3506_v7 = vld [vmem:[#allocation2 + $0xb98] sm:$0xff]  ;;  %v3497_v52 = vld [vmem:[#allocation2 + $0xb50] sm:$0xff] }
0x29cd   :  { %3832 = vmatpush.msrb.mxu0 %v3460_v32  ;;  %3855 = vmatpush.msra.mxu1 %v3577_v17  ;;  %v3632_v32 = vld [vmem:[#allocation2 + $0xf88] sm:$0xff] }
0x29ce   :  { %3813 = vmatpush.msra.mxu3 %v3307_v40  ;;  %3737 = vmatmul.f32.vlgmr.msra.gmra.mxu0 %v7021_v23  ;;  %v3371_v40 = vld [vmem:[#allocation2 + $0x760] sm:$0xff]  ;;  %v3200_v17 = vld [vmem:[#allocation2 + $0x208] sm:$0xff] }
0x29cf   :  { %3794 = vmatpush.msra.mxu2 %v3154_v57  ;;  %3833 = vmatpush.msrb.mxu0 %v3451_v48  ;;  %v3488_v57 = vld [vmem:[#allocation2 + $0xb08] sm:$0xff]  ;;  %v3623_v48 = vld [vmem:[#allocation2 + $0xf40] sm:$0xff] }
0x29d0   :  { %3814 = vmatpush.msra.mxu3 %v3298_v51  ;;  %3856 = vmatpush.msra.mxu1 %v3568_v9  ;;  %v3362_v51 = vld [vmem:[#allocation2 + $0x718] sm:$0xff]  ;;  %v3353_v9 = vld [vmem:[#allocation2 + $0x6d0] sm:$0xff] }
0x29d1   :  { %3757 = vmatmul.f32.vlgmr.msrb.gmra.mxu1 %v7023_v53  ;;  %3795 = vmatpush.msra.mxu2 %v3145_v2  ;;  %v3479_v2 = vld [vmem:[#allocation2 + $0xac0] sm:$0xff] }
0x29d2   :  { %3815 = vmatpush.msra.mxu3 %v3289_v37  ;;  %3861 = vmatpush.msrb.mxu1 %v3272_v49  ;;  %v3191_v37 = vld [vmem:[#allocation2 + $0x1c0] sm:$0xff]  ;;  %v3182_v49 = vld [vmem:[#allocation2 + $0x178] sm:$0xff] }
0x29d3   :  { %3834 = vmatpush.msrb.mxu0 %v3442_v33  ;;  %3796 = vmatpush.msra.mxu2 %v3136_v20  ;;  %v3344_v33 = vld [vmem:[#allocation2 + $0x688] sm:$0xff]  ;;  %v3461_v20 = vld [vmem:[#allocation2 + $0xa30] sm:$0xff] }
0x29d4   :  { %3816 = vmatpush.msra.mxu3 %v3280_v18  ;;  %3862 = vmatpush.msrb.mxu1 %v3263_v16  ;;  %v3614_v18 = vld [vmem:[#allocation2 + $0xef8] sm:$0xff]  ;;  %v3605_v16 = vld [vmem:[#allocation2 + $0xeb0] sm:$0xff] }
0x29d5   :  { %3835 = vmatpush.msrb.mxu0 %v3433_v22  ;;  %3881 = vmatpush.msrb.mxu2 %v3416_v58  ;;  %v3335_v22 = vld [vmem:[#allocation2 + $0x640] sm:$0xff]  ;;  %v3452_v58 = vld [vmem:[#allocation2 + $0x9e8] sm:$0xff] }
0x29d6   :  { %3901 = vmatpush.msrb.mxu3 %v3560_v36  ;;  %3863 = vmatpush.msrb.mxu1 %v3254_v1  ;;  %v3470_v36 = vld [vmem:[#allocation2 + $0xa78] sm:$0xff]  ;;  %v3596_v1 = vld [vmem:[#allocation2 + $0xe68] sm:$0xff] }
0x29d7   :  { %3836 = vmatpush.msrb.mxu0 %v3424_v50  ;;  %3882 = vmatpush.msrb.mxu2 %v3407_v5  ;;  %v3326_v50 = vld [vmem:[#allocation2 + $0x5f8] sm:$0xff]  ;;  %v3443_v5 = vld [vmem:[#allocation2 + $0x9a0] sm:$0xff] }
0x29d8   :  { %3902 = vmatpush.msrb.mxu3 %v3551_v56  ;;  %3864 = vmatpush.msrb.mxu1 %v3245_v39  ;;  %v3173_v56 = vld [vmem:[#allocation2 + $0x130] sm:$0xff]  ;;  %v3587_v39 = vld [vmem:[#allocation2 + $0xe20] sm:$0xff] }
0x29d9   :  { %3925 = vmatpush.msra.mxu0 %v3668_v24  ;;  %3883 = vmatpush.msrb.mxu2 %v3398_v8  ;;  %v3317_v24 = vld [vmem:[#allocation2 + $0x5b0] sm:$0xff]  ;;  %v3434_v8 = vld [vmem:[#allocation2 + $0x958] sm:$0xff] }
0x29da   :  { %3903 = vmatpush.msrb.mxu3 %v3542_v54  ;;  %3865 = vmatpush.msrb.mxu1 %v3236_v55  ;;  %v3164_v54 = vld [vmem:[#allocation2 + $0xe8] sm:$0xff]  ;;  %v3578_v55 = vld [vmem:[#allocation2 + $0xdd8] sm:$0xff] }
0x29db   :  { %3926 = vmatpush.msra.mxu0 %v3659_v38  ;;  %3884 = vmatpush.msrb.mxu2 %v3389_v42  ;;  %v3308_v38 = vld [vmem:[#allocation2 + $0x568] sm:$0xff]  ;;  %v3425_v42 = vld [vmem:[#allocation2 + $0x910] sm:$0xff] }
0x29dc   :  { %3904 = vmatpush.msrb.mxu3 %v3533_v35  ;;  %3866 = vmatpush.msrb.mxu1 %v3227_v26  ;;  %v3155_v35 = vld [vmem:[#allocation2 + $0xa0] sm:$0xff]  ;;  %v3569_v26 = vld [vmem:[#allocation2 + $0xd90] sm:$0xff] }
0x29dd   :  { %3927 = vmatpush.msra.mxu0 %v3650_v0  ;;  %3885 = vmatpush.msrb.mxu2 %v3380_v25  ;;  %v3669_v0 = vld [vmem:[#allocation2 + $0x10b0] sm:$0xff]  ;;  %v3299_v25 = vld [vmem:[#allocation2 + $0x520] sm:$0xff] }
0x29de   :  { %3905 = vmatpush.msrb.mxu3 %v3524_v21  ;;  %3867 = vmatpush.msrb.mxu1 %v3218_v6  ;;  %v3146_v21 = vld [vmem:[#allocation2 + $0x58] sm:$0xff]  ;;  %v3137_v6 = vld [vmem:[#allocation2 + $0x10] sm:$0xff] }
0x29df   :  { %3928 = vmatpush.msra.mxu0 %v3641_v4  ;;  %3886 = vmatpush.msrb.mxu2 %v3371_v40  ;;  %v3417_v4 = vld [vmem:[#allocation2 + $0x8d0] sm:$0xff]  ;;  %v3290_v40 = vld [vmem:[#allocation2 + $0x4d8] sm:$0xff] }
0x29e0   :  { %3906 = vmatpush.msrb.mxu3 %v3515_v41  ;;  %3868 = vmatpush.msrb.mxu1 %v3209_v3  ;;  %v3273_v41 = vld [vmem:[#allocation2 + $0x450] sm:$0xff]  ;;  %v3660_v3 = vld [vmem:[#allocation2 + $0x1068] sm:$0xff] }
0x29e1   :  { %3929 = vmatpush.msra.mxu0 %v3632_v32  ;;  %3887 = vmatpush.msrb.mxu2 %v3362_v51  ;;  %v3408_v32 = vld [vmem:[#allocation2 + $0x888] sm:$0xff]  ;;  %v3281_v51 = vld [vmem:[#allocation2 + $0x490] sm:$0xff] }
0x29e2   :  { %3907 = vmatpush.msrb.mxu3 %v3506_v7  ;;  %3869 = vmatpush.msrb.mxu1 %v3200_v17  ;;  %v3264_v7 = vld [vmem:[#allocation2 + $0x408] sm:$0xff]  ;;  %v3651_v17 = vld [vmem:[#allocation2 + $0x1020] sm:$0xff] }
0x29e3   :  { %3930 = vmatpush.msra.mxu0 %v3623_v48  ;;  %3888 = vmatpush.msrb.mxu2 %v3353_v9  ;;  %v3399_v48 = vld [vmem:[#allocation2 + $0x840] sm:$0xff]  ;;  %v3642_v9 = vld [vmem:[#allocation2 + $0xfd8] sm:$0xff] }
0x29e4   :  { %3908 = vmatpush.msrb.mxu3 %v3497_v52  ;;  %3870 = vmatpush.msrb.mxu1 %v3191_v37  ;;  %v3255_v52 = vld [vmem:[#allocation2 + $0x3c0] sm:$0xff]  ;;  %v3561_v37 = vld [vmem:[#allocation2 + $0xd50] sm:$0xff] }
0x29e5   :  { %3931 = vmatpush.msra.mxu0 %v3614_v18  ;;  %3797 = vmatmul.f32.vlgmr.msra.gmra.mxu2 %v7025_v19  ;;  %v3390_v18 = vld [vmem:[#allocation2 + $0x7f8] sm:$0xff] }
0x29e6   :  { %3909 = vmatpush.msrb.mxu3 %v3488_v57  ;;  %3871 = vmatpush.msrb.mxu1 %v3182_v49  ;;  %v3246_v57 = vld [vmem:[#allocation2 + $0x378] sm:$0xff]  ;;  %v3552_v49 = vld [vmem:[#allocation2 + $0xd08] sm:$0xff] }
0x29e7   :  { %3889 = vmatpush.msrb.mxu2 %v3344_v33  ;;  %3932 = vmatpush.msra.mxu0 %v3605_v16  ;;  %v3228_v33 = vld [vmem:[#allocation2 + $0x2e8] sm:$0xff]  ;;  %v3381_v16 = vld [vmem:[#allocation2 + $0x7b0] sm:$0xff] }
0x29e8   :  { %3910 = vmatpush.msrb.mxu3 %v3479_v2  ;;  %3872 = vmatpush.msrb.mxu1 %v3173_v56  ;;  %v3237_v2 = vld [vmem:[#allocation2 + $0x330] sm:$0xff]  ;;  %v3624_v56 = vld [vmem:[#allocation2 + $0xf48] sm:$0xff] }
0x29e9   :  { %3817 = vmatmul.f32.vlgmr.msra.gmra.mxu3 %v7021_v23  ;;  %3890 = vmatpush.msrb.mxu2 %v3335_v22  ;;  %v3219_v22 = vld [vmem:[#allocation2 + $0x2a0] sm:$0xff] }
0x29ea   :  { %3911 = vmatpush.msrb.mxu3 %v3470_v36  ;;  %3933 = vmatpush.msra.mxu0 %v3596_v1  ;;  %v3633_v36 = vld [vmem:[#allocation2 + $0xf90] sm:$0xff]  ;;  %v3372_v1 = vld [vmem:[#allocation2 + $0x768] sm:$0xff] }
0x29eb   :  { %3873 = vmatpush.msrb.mxu1 %v3164_v54  ;;  %3891 = vmatpush.msrb.mxu2 %v3326_v50  ;;  %v3615_v54 = vld [vmem:[#allocation2 + $0xf00] sm:$0xff]  ;;  %v3210_v50 = vld [vmem:[#allocation2 + $0x258] sm:$0xff] }
0x29ec   :  { %3912 = vmatpush.msrb.mxu3 %v3461_v20  ;;  %3934 = vmatpush.msra.mxu0 %v3587_v39  ;;  %v3543_v20 = vld [vmem:[#allocation2 + $0xcc0] sm:$0xff] }
0x29ed   :  { %3874 = vmatpush.msrb.mxu1 %v3155_v35  ;;  %3892 = vmatpush.msrb.mxu2 %v3317_v24  ;;  %v3363_v39 = vld [vmem:[#allocation2 + $0x720] sm:$0xff]  ;;  %v3606_v35 = vld [vmem:[#allocation2 + $0xeb8] sm:$0xff]  ;;  %v3201_v24 = vld [vmem:[#allocation2 + $0x210] sm:$0xff] }
0x29ee   :  { %3913 = vmatpush.msrb.mxu3 %v3452_v58  ;;  %3935 = vmatpush.msra.mxu0 %v3578_v55  ;;  %v3534_v58 = vld [vmem:[#allocation2 + $0xc78] sm:$0xff] }
0x29ef   :  { %3875 = vmatpush.msrb.mxu1 %v3146_v21  ;;  %3893 = vmatpush.msrb.mxu2 %v3308_v38  ;;  %v3354_v55 = vld [vmem:[#allocation2 + $0x6d8] sm:$0xff]  ;;  %v3597_v21 = vld [vmem:[#allocation2 + $0xe70] sm:$0xff]  ;;  %v3192_v38 = vld [vmem:[#allocation2 + $0x1c8] sm:$0xff] }
0x29f0   :  { %3914 = vmatpush.msrb.mxu3 %v3443_v5  ;;  %3936 = vmatpush.msra.mxu0 %v3569_v26  ;;  %v3525_v5 = vld [vmem:[#allocation2 + $0xc30] sm:$0xff] }
0x29f1   :  { %3837 = vmatmul.f32.vlgmr.msrb.gmra.mxu0 %v7023_v53  ;;  %3876 = vmatpush.msrb.mxu1 %v3137_v6  ;;  %v3345_v26 = vld [vmem:[#allocation2 + $0x690] sm:$0xff]  ;;  %v3336_v6 = vld [vmem:[#allocation2 + $0x648] sm:$0xff] }
0x29f2   :  { %3915 = vmatpush.msrb.mxu3 %v3434_v8  ;;  %3941 = vmatpush.msrb.mxu0 %v3273_v41  ;;  %v3516_v8 = vld [vmem:[#allocation2 + $0xbe8] sm:$0xff] }
0x29f3   :  { %3894 = vmatpush.msrb.mxu2 %v3299_v25  ;;  %4852 = vmatmul.msk.f32.vlgmr.msra.gmra.mxu1 %vm3697_vm6, %v7027_v34  ;;  %v3588_v41 = vld [vmem:[#allocation2 + $0xe28] sm:$0xff]  ;;  %v3498_v25 = vld [vmem:[#allocation2 + $0xb58] sm:$0xff] }
0x29f4   :  { %3916 = vmatpush.msrb.mxu3 %v3425_v42  ;;  %3942 = vmatpush.msrb.mxu0 %v3264_v7  ;;  %v3507_v42 = vld [vmem:[#allocation2 + $0xba0] sm:$0xff] }
0x29f5   :  { %3961 = vmatpush.msra.mxu1 %v3417_v4  ;;  %3895 = vmatpush.msrb.mxu2 %v3290_v40  ;;  %v3579_v7 = vld [vmem:[#allocation2 + $0xde0] sm:$0xff]  ;;  %v3174_v4 = vld [vmem:[#allocation2 + $0x138] sm:$0xff]  ;;  %v3489_v40 = vld [vmem:[#allocation2 + $0xb10] sm:$0xff] }
0x29f6   :  { %4005 = vmatpush.msra.mxu3 %v3669_v0  ;;  %3943 = vmatpush.msrb.mxu0 %v3255_v52  ;;  %v3183_v0 = vld [vmem:[#allocation2 + $0x180] sm:$0xff]  ;;  %v3570_v52 = vld [vmem:[#allocation2 + $0xd98] sm:$0xff] }
0x29f7   :  { %3962 = vmatpush.msra.mxu1 %v3408_v32  ;;  %3896 = vmatpush.msrb.mxu2 %v3281_v51  ;;  %v3165_v32 = vld [vmem:[#allocation2 + $0xf0] sm:$0xff]  ;;  %v3318_v51 = vld [vmem:[#allocation2 + $0x5b8] sm:$0xff] }
0x29f8   :  { %4006 = vmatpush.msra.mxu3 %v3660_v3  ;;  %3944 = vmatpush.msrb.mxu0 %v3246_v57  ;;  %v3327_v3 = vld [vmem:[#allocation2 + $0x600] sm:$0xff]  ;;  %v3480_v57 = vld [vmem:[#allocation2 + $0xac8] sm:$0xff] }
0x29f9   :  { %3963 = vmatpush.msra.mxu1 %v3399_v48  ;;  %3981 = vmatpush.msra.mxu2 %v3561_v37  ;;  %v3265_v48 = vld [vmem:[#allocation2 + $0x410] sm:$0xff]  ;;  %v3156_v37 = vld [vmem:[#allocation2 + $0xa8] sm:$0xff] }
0x29fa   :  { %4007 = vmatpush.msra.mxu3 %v3651_v17  ;;  %3945 = vmatpush.msrb.mxu0 %v3237_v2  ;;  %v3274_v17 = vld [vmem:[#allocation2 + $0x458] sm:$0xff]  ;;  %v3471_v2 = vld [vmem:[#allocation2 + $0xa80] sm:$0xff] }
0x29fb   :  { %3964 = vmatpush.msra.mxu1 %v3390_v18  ;;  %3982 = vmatpush.msra.mxu2 %v3552_v49  ;;  %v3256_v18 = vld [vmem:[#allocation2 + $0x3c8] sm:$0xff]  ;;  %v3147_v49 = vld [vmem:[#allocation2 + $0x60] sm:$0xff] }
0x29fc   :  { %4008 = vmatpush.msra.mxu3 %v3642_v9  ;;  %3946 = vmatpush.msrb.mxu0 %v3228_v33  ;;  %v3309_v9 = vld [vmem:[#allocation2 + $0x570] sm:$0xff]  ;;  %v3462_v33 = vld [vmem:[#allocation2 + $0xa38] sm:$0xff] }
0x29fd   :  { %3965 = vmatpush.msra.mxu1 %v3381_v16  ;;  %3983 = vmatpush.msra.mxu2 %v3543_v20  ;;  %v3247_v16 = vld [vmem:[#allocation2 + $0x380] sm:$0xff]  ;;  %v3138_v20 = vld [vmem:[#allocation2 + $0x18] sm:$0xff] }
0x29fe   :  { %4009 = vmatpush.msra.mxu3 %v3633_v36  ;;  %3947 = vmatpush.msrb.mxu0 %v3219_v22  ;;  %v3300_v36 = vld [vmem:[#allocation2 + $0x528] sm:$0xff]  ;;  %v3453_v22 = vld [vmem:[#allocation2 + $0x9f0] sm:$0xff] }
0x29ff   :  { %3966 = vmatpush.msra.mxu1 %v3372_v1  ;;  %3984 = vmatpush.msra.mxu2 %v3534_v58  ;;  %v3238_v1 = vld [vmem:[#allocation2 + $0x338] sm:$0xff] }
0x2a00   :  { %4010 = vmatpush.msra.mxu3 %v3624_v56  ;;  %3948 = vmatpush.msrb.mxu0 %v3210_v50  ;;  %v3291_v56 = vld [vmem:[#allocation2 + $0x4e0] sm:$0xff]  ;;  %v3418_v58 = vld [vmem:[#allocation2 + $0x8d8] sm:$0xff]  ;;  %v3444_v50 = vld [vmem:[#allocation2 + $0x9a8] sm:$0xff] }
0x2a01   :  { %3967 = vmatpush.msra.mxu1 %v3363_v39  ;;  %3985 = vmatpush.msra.mxu2 %v3525_v5  ;;  %v3229_v39 = vld [vmem:[#allocation2 + $0x2f0] sm:$0xff] }
0x2a02   :  { %4011 = vmatpush.msra.mxu3 %v3615_v54  ;;  %3949 = vmatpush.msrb.mxu0 %v3201_v24  ;;  %v3282_v54 = vld [vmem:[#allocation2 + $0x498] sm:$0xff]  ;;  %v3409_v5 = vld [vmem:[#allocation2 + $0x890] sm:$0xff]  ;;  %v3435_v24 = vld [vmem:[#allocation2 + $0x960] sm:$0xff] }
0x2a03   :  { %3968 = vmatpush.msra.mxu1 %v3354_v55  ;;  %3986 = vmatpush.msra.mxu2 %v3516_v8  ;;  %v3220_v55 = vld [vmem:[#allocation2 + $0x2a8] sm:$0xff] }
0x2a04   :  { %4012 = vmatpush.msra.mxu3 %v3606_v35  ;;  %3950 = vmatpush.msrb.mxu0 %v3192_v38  ;;  %v3562_v35 = vld [vmem:[#allocation2 + $0xd58] sm:$0xff]  ;;  %v3400_v8 = vld [vmem:[#allocation2 + $0x848] sm:$0xff] }
0x2a05   :  { %3969 = vmatpush.msra.mxu1 %v3345_v26  ;;  %3987 = vmatpush.msra.mxu2 %v3507_v42  ;;  %v3426_v38 = vld [vmem:[#allocation2 + $0x918] sm:$0xff]  ;;  %v3211_v26 = vld [vmem:[#allocation2 + $0x260] sm:$0xff] }
0x2a06   :  { %4013 = vmatpush.msra.mxu3 %v3597_v21  ;;  %3951 = vmatpush.msrb.mxu0 %v3183_v0  ;;  %v3553_v21 = vld [vmem:[#allocation2 + $0xd10] sm:$0xff]  ;;  %v3391_v42 = vld [vmem:[#allocation2 + $0x800] sm:$0xff]  ;;  %v3670_v0 = vld [vmem:[#allocation2 + $0x10b8] sm:$0xff] }
0x2a07   :  { %3970 = vmatpush.msra.mxu1 %v3336_v6  ;;  %3988 = vmatpush.msra.mxu2 %v3498_v25  ;;  %v3202_v6 = vld [vmem:[#allocation2 + $0x218] sm:$0xff] }
0x2a08   :  { %4014 = vmatpush.msra.mxu3 %v3588_v41  ;;  %3897 = vmatmul.f32.vlgmr.msrb.gmra.mxu2 %v7021_v23  ;;  %v3544_v41 = vld [vmem:[#allocation2 + $0xcc8] sm:$0xff]  ;;  %v3382_v25 = vld [vmem:[#allocation2 + $0x7b8] sm:$0xff] }
0x2a09   :  { %3952 = vmatpush.msrb.mxu0 %v3174_v4  ;;  %3971 = vmatpush.msra.mxu1 %v3327_v3  ;;  %v3661_v4 = vld [vmem:[#allocation2 + $0x1070] sm:$0xff] }
0x2a0a   :  { %4015 = vmatpush.msra.mxu3 %v3579_v7  ;;  %3989 = vmatpush.msra.mxu2 %v3489_v40  ;;  %v3535_v7 = vld [vmem:[#allocation2 + $0xc80] sm:$0xff]  ;;  %v3193_v3 = vld [vmem:[#allocation2 + $0x1d0] sm:$0xff] }
0x2a0b   :  { %3917 = vmatmul.f32.vlgmr.msrb.gmra.mxu3 %v7023_v53  ;;  %3953 = vmatpush.msrb.mxu0 %v3165_v32  ;;  %v3373_v40 = vld [vmem:[#allocation2 + $0x770] sm:$0xff]  ;;  %v3652_v32 = vld [vmem:[#allocation2 + $0x1028] sm:$0xff] }
0x2a0c   :  { %4016 = vmatpush.msra.mxu3 %v3570_v52  ;;  %3972 = vmatpush.msra.mxu1 %v3318_v51  ;;  %v3526_v52 = vld [vmem:[#allocation2 + $0xc38] sm:$0xff]  ;;  %v3364_v51 = vld [vmem:[#allocation2 + $0x728] sm:$0xff] }
0x2a0d   :  { %3990 = vmatpush.msra.mxu2 %v3480_v57  ;;  %3877 = vmatmul.f32.vlgmr.msrb.gmra.mxu1 %v7025_v19  ;;  %v3517_v57 = vld [vmem:[#allocation2 + $0xbf0] sm:$0xff] }
0x2a0e   :  { %4021 = vmatpush.msrb.mxu3 %v3274_v17  ;;  %3954 = vmatpush.msrb.mxu0 %v3156_v37  ;;  %v3184_v17 = vld [vmem:[#allocation2 + $0x188] sm:$0xff]  ;;  %v3175_v37 = vld [vmem:[#allocation2 + $0x140] sm:$0xff] }
0x2a0f   :  { %3973 = vmatpush.msra.mxu1 %v3309_v9  ;;  %3991 = vmatpush.msra.mxu2 %v3471_v2  ;;  %v3355_v9 = vld [vmem:[#allocation2 + $0x6e0] sm:$0xff]  ;;  %v3508_v2 = vld [vmem:[#allocation2 + $0xba8] sm:$0xff] }
0x2a10   :  { %4022 = vmatpush.msrb.mxu3 %v3265_v48  ;;  %3955 = vmatpush.msrb.mxu0 %v3147_v49  ;;  %v3643_v48 = vld [vmem:[#allocation2 + $0xfe0] sm:$0xff]  ;;  %v3166_v49 = vld [vmem:[#allocation2 + $0xf8] sm:$0xff] }
0x2a11   :  { %3974 = vmatpush.msra.mxu1 %v3300_v36  ;;  %3992 = vmatpush.msra.mxu2 %v3462_v33  ;;  %v3346_v36 = vld [vmem:[#allocation2 + $0x698] sm:$0xff]  ;;  %v3499_v33 = vld [vmem:[#allocation2 + $0xb60] sm:$0xff] }
0x2a12   :  { %4023 = vmatpush.msrb.mxu3 %v3256_v18  ;;  %3956 = vmatpush.msrb.mxu0 %v3138_v20  ;;  %v3634_v18 = vld [vmem:[#allocation2 + $0xf98] sm:$0xff]  ;;  %v3157_v20 = vld [vmem:[#allocation2 + $0xb0] sm:$0xff] }
0x2a13   :  { %3975 = vmatpush.msra.mxu1 %v3291_v56  ;;  %3993 = vmatpush.msra.mxu2 %v3453_v22  ;;  %v3337_v56 = vld [vmem:[#allocation2 + $0x650] sm:$0xff]  ;;  %v3490_v22 = vld [vmem:[#allocation2 + $0xb18] sm:$0xff] }
0x2a14   :  { %4024 = vmatpush.msrb.mxu3 %v3247_v16  ;;  %4853 = vmatmul.msk.f32.vlgmr.msra.gmra.mxu0 %vm3697_vm6, %v7027_v34  ;;  %v3625_v16 = vld [vmem:[#allocation2 + $0xf50] sm:$0xff] }
0x2a15   :  { %4041 = vmatpush.msra.mxu0 %v3418_v58  ;;  %3976 = vmatpush.msra.mxu1 %v3282_v54  ;;  %v3148_v58 = vld [vmem:[#allocation2 + $0x68] sm:$0xff] }
0x2a16   :  { %4025 = vmatpush.msrb.mxu3 %v3238_v1  ;;  %3994 = vmatpush.msra.mxu2 %v3444_v50  ;;  %v3616_v1 = vld [vmem:[#allocation2 + $0xf08] sm:$0xff]  ;;  %v3481_v50 = vld [vmem:[#allocation2 + $0xad0] sm:$0xff] }
0x2a17   :  { %4042 = vmatpush.msra.mxu0 %v3409_v5  ;;  %4061 = vmatpush.msrb.mxu1 %v3562_v35  ;;  %v3328_v54 = vld [vmem:[#allocation2 + $0x608] sm:$0xff]  ;;  %v3139_v5 = vld [vmem:[#allocation2 + $0x20] sm:$0xff] }
0x2a18   :  { %4026 = vmatpush.msrb.mxu3 %v3229_v39  ;;  %3995 = vmatpush.msra.mxu2 %v3435_v24  ;;  %v3607_v39 = vld [vmem:[#allocation2 + $0xec0] sm:$0xff]  ;;  %v3472_v24 = vld [vmem:[#allocation2 + $0xa88] sm:$0xff] }
0x2a19   :  { %4043 = vmatpush.msra.mxu0 %v3400_v8  ;;  %4062 = vmatpush.msrb.mxu1 %v3553_v21  ;;  %v3319_v35 = vld [vmem:[#allocation2 + $0x5c0] sm:$0xff]  ;;  %v3310_v21 = vld [vmem:[#allocation2 + $0x578] sm:$0xff] }
0x2a1a   :  { %4027 = vmatpush.msrb.mxu3 %v3220_v55  ;;  %3996 = vmatpush.msra.mxu2 %v3426_v38  ;;  %v3598_v55 = vld [vmem:[#allocation2 + $0xe78] sm:$0xff]  ;;  %v3419_v8 = vld [vmem:[#allocation2 + $0x8e0] sm:$0xff] }
0x2a1b   :  { %4044 = vmatpush.msra.mxu0 %v3391_v42  ;;  %4063 = vmatpush.msrb.mxu1 %v3544_v41  ;;  %v3463_v38 = vld [vmem:[#allocation2 + $0xa40] sm:$0xff]  ;;  %v3410_v42 = vld [vmem:[#allocation2 + $0x898] sm:$0xff]  ;;  %v3301_v41 = vld [vmem:[#allocation2 + $0x530] sm:$0xff] }
0x2a1c   :  { %4028 = vmatpush.msrb.mxu3 %v3211_v26  ;;  %4085 = vmatpush.msrb.mxu2 %v3670_v0  ;;  %v3589_v26 = vld [vmem:[#allocation2 + $0xe30] sm:$0xff]  ;;  %v3454_v0 = vld [vmem:[#allocation2 + $0x9f8] sm:$0xff] }
0x2a1d   :  { %4045 = vmatpush.msra.mxu0 %v3382_v25  ;;  %4064 = vmatpush.msrb.mxu1 %v3535_v7  ;;  %v3401_v25 = vld [vmem:[#allocation2 + $0x850] sm:$0xff]  ;;  %v3292_v7 = vld [vmem:[#allocation2 + $0x4e8] sm:$0xff] }
0x2a1e   :  { %4029 = vmatpush.msrb.mxu3 %v3202_v6  ;;  %4086 = vmatpush.msrb.mxu2 %v3661_v4  ;;  %v3580_v6 = vld [vmem:[#allocation2 + $0xde8] sm:$0xff]  ;;  %v3445_v4 = vld [vmem:[#allocation2 + $0x9b0] sm:$0xff] }
0x2a1f   :  { %4046 = vmatpush.msra.mxu0 %v3373_v40  ;;  %4065 = vmatpush.msrb.mxu1 %v3526_v52  ;;  %v3392_v40 = vld [vmem:[#allocation2 + $0x808] sm:$0xff]  ;;  %v3275_v52 = vld [vmem:[#allocation2 + $0x460] sm:$0xff] }
0x2a20   :  { %4030 = vmatpush.msrb.mxu3 %v3193_v3  ;;  %4087 = vmatpush.msrb.mxu2 %v3652_v32  ;;  %v3571_v3 = vld [vmem:[#allocation2 + $0xda0] sm:$0xff] }
0x2a21   :  { %4047 = vmatpush.msra.mxu0 %v3364_v51  ;;  %4066 = vmatpush.msrb.mxu1 %v3517_v57  ;;  %v3283_v32 = vld [vmem:[#allocation2 + $0x4a0] sm:$0xff]  ;;  %v3266_v57 = vld [vmem:[#allocation2 + $0x418] sm:$0xff] }
0x2a22   :  { %4031 = vmatpush.msrb.mxu3 %v3184_v17  ;;  %4088 = vmatpush.msrb.mxu2 %v3643_v48  ;;  %v3436_v17 = vld [vmem:[#allocation2 + $0x968] sm:$0xff]  ;;  %v3383_v51 = vld [vmem:[#allocation2 + $0x7c0] sm:$0xff] }
0x2a23   :  { %4048 = vmatpush.msra.mxu0 %v3355_v9  ;;  %4067 = vmatpush.msrb.mxu1 %v3508_v2  ;;  %v3563_v48 = vld [vmem:[#allocation2 + $0xd60] sm:$0xff]  ;;  %v3374_v9 = vld [vmem:[#allocation2 + $0x778] sm:$0xff]  ;;  %v3257_v2 = vld [vmem:[#allocation2 + $0x3d0] sm:$0xff] }
0x2a24   :  { %4032 = vmatpush.msrb.mxu3 %v3175_v37  ;;  %4089 = vmatpush.msrb.mxu2 %v3634_v18  ;;  %v3427_v37 = vld [vmem:[#allocation2 + $0x920] sm:$0xff]  ;;  %v3554_v18 = vld [vmem:[#allocation2 + $0xd18] sm:$0xff] }
0x2a25   :  { %4049 = vmatpush.msra.mxu0 %v3346_v36  ;;  %4068 = vmatpush.msrb.mxu1 %v3499_v33  ;;  %v3365_v36 = vld [vmem:[#allocation2 + $0x730] sm:$0xff]  ;;  %v3248_v33 = vld [vmem:[#allocation2 + $0x388] sm:$0xff] }
0x2a26   :  { %4033 = vmatpush.msrb.mxu3 %v3166_v49  ;;  %4090 = vmatpush.msrb.mxu2 %v3625_v16  ;;  %v3671_v49 = vld [vmem:[#allocation2 + $0x10c0] sm:$0xff]  ;;  %v3545_v16 = vld [vmem:[#allocation2 + $0xcd0] sm:$0xff] }
0x2a27   :  { %4050 = vmatpush.msra.mxu0 %v3337_v56  ;;  %4069 = vmatpush.msrb.mxu1 %v3490_v22  ;;  %v3356_v56 = vld [vmem:[#allocation2 + $0x6e8] sm:$0xff]  ;;  %v3239_v22 = vld [vmem:[#allocation2 + $0x340] sm:$0xff] }
0x2a28   :  { %4034 = vmatpush.msrb.mxu3 %v3157_v20  ;;  %4091 = vmatpush.msrb.mxu2 %v3616_v1  ;;  %v3662_v20 = vld [vmem:[#allocation2 + $0x1078] sm:$0xff]  ;;  %v3536_v1 = vld [vmem:[#allocation2 + $0xc88] sm:$0xff] }
0x2a29   :  { %4051 = vmatpush.msra.mxu0 %v3328_v54  ;;  %4070 = vmatpush.msrb.mxu1 %v3481_v50  ;;  %v3347_v54 = vld [vmem:[#allocation2 + $0x6a0] sm:$0xff]  ;;  %v3230_v50 = vld [vmem:[#allocation2 + $0x2f8] sm:$0xff] }
0x2a2a   :  { %4035 = vmatpush.msrb.mxu3 %v3148_v58  ;;  %4092 = vmatpush.msrb.mxu2 %v3607_v39  ;;  %v3653_v58 = vld [vmem:[#allocation2 + $0x1030] sm:$0xff]  ;;  %v3527_v39 = vld [vmem:[#allocation2 + $0xc40] sm:$0xff] }
0x2a2b   :  { %3997 = vmatmul.f32.vlgmr.msra.gmra.mxu2 %v7023_v53  ;;  %4052 = vmatpush.msra.mxu0 %v3319_v35  ;;  %v3338_v35 = vld [vmem:[#allocation2 + $0x658] sm:$0xff] }
0x2a2c   :  { %4036 = vmatpush.msrb.mxu3 %v3139_v5  ;;  %4071 = vmatpush.msrb.mxu1 %v3472_v24  ;;  %v3644_v5 = vld [vmem:[#allocation2 + $0xfe8] sm:$0xff]  ;;  %v3221_v24 = vld [vmem:[#allocation2 + $0x2b0] sm:$0xff] }
0x2a2d   :  { %4093 = vmatpush.msrb.mxu2 %v3598_v55  ;;  %3957 = vmatmul.f32.vlgmr.msrb.gmra.mxu0 %v7025_v19  ;;  %v3518_v55 = vld [vmem:[#allocation2 + $0xbf8] sm:$0xff] }
0x2a2e   :  { %4854 = vmatmul.msk.f32.vlgmr.msra.gmra.mxu3 %vm3697_vm6, %v7027_v34  ;;  %4053 = vmatpush.msra.mxu0 %v3310_v21  ;;  %v3329_v21 = vld [vmem:[#allocation2 + $0x610] sm:$0xff] }
0x2a2f   :  { %4121 = vmatpush.msra.mxu3 %v3419_v8  ;;  %4072 = vmatpush.msrb.mxu1 %v3463_v38  ;;  %v3635_v8 = vld [vmem:[#allocation2 + $0xfa0] sm:$0xff]  ;;  %v3212_v38 = vld [vmem:[#allocation2 + $0x268] sm:$0xff] }
0x2a30   :  { %4094 = vmatpush.msrb.mxu2 %v3589_v26  ;;  %3977 = vmatmul.f32.vlgmr.msra.gmra.mxu1 %v7021_v23  ;;  %v3509_v26 = vld [vmem:[#allocation2 + $0xbb0] sm:$0xff] }
0x2a31   :  { %4122 = vmatpush.msra.mxu3 %v3410_v42  ;;  %4054 = vmatpush.msra.mxu0 %v3301_v41  ;;  %v3626_v42 = vld [vmem:[#allocation2 + $0xf58] sm:$0xff]  ;;  %v3320_v41 = vld [vmem:[#allocation2 + $0x5c8] sm:$0xff] }
0x2a32   :  { %4073 = vmatpush.msrb.mxu1 %v3454_v0  ;;  %4095 = vmatpush.msrb.mxu2 %v3580_v6  ;;  %v3203_v0 = vld [vmem:[#allocation2 + $0x220] sm:$0xff]  ;;  %v3500_v6 = vld [vmem:[#allocation2 + $0xb68] sm:$0xff] }
0x2a33   :  { %4123 = vmatpush.msra.mxu3 %v3401_v25  ;;  %4055 = vmatpush.msra.mxu0 %v3292_v7  ;;  %v7049_v25 = vld [vmem:[#allocation23] sm:$0xff]  ;;  %v3617_v7 = vld [vmem:[#allocation2 + $0xf10] sm:$0xff] }
0x2a34   :  { %4074 = vmatpush.msrb.mxu1 %v3445_v4  ;;  %4096 = vmatpush.msrb.mxu2 %v3571_v3  ;;  %v3194_v4 = vld [vmem:[#allocation2 + $0x1d8] sm:$0xff]  ;;  %v3311_v3 = vld [vmem:[#allocation2 + $0x580] sm:$0xff] }
0x2a35   :  { %4124 = vmatpush.msra.mxu3 %v3392_v40  ;;  %4056 = vmatpush.msra.mxu0 %v3283_v32  ;;  %v3491_v40 = vld [vmem:[#allocation2 + $0xb20] sm:$0xff]  ;;  %v3679_v32 = vperm.slane %v7049_v25, 0 }
0x2a36   :  { %4101 = vmatpush.msra.mxu2 %v3275_v52  ;;  %4075 = vmatpush.msrb.mxu1 %v3436_v17  ;;  %v3608_v52 = vld [vmem:[#allocation2 + $0xec8] sm:$0xff]  ;;  %v3185_v17 = vld [vmem:[#allocation2 + $0x190] sm:$0xff] }
0x2a37   :  { %4125 = vmatpush.msra.mxu3 %v3383_v51  ;;  %4141 = vmatpush.msrb.mxu0 %v3563_v48  ;;  %v3302_v51 = vld [vmem:[#allocation2 + $0x538] sm:$0xff]  ;;  %v3599_v48 = vld [vmem:[#allocation2 + $0xe80] sm:$0xff] }
0x2a38   :  { %4102 = vmatpush.msra.mxu2 %v3266_v57  ;;  %4076 = vmatpush.msrb.mxu1 %v3427_v37  ;;  %v3482_v57 = vld [vmem:[#allocation2 + $0xad8] sm:$0xff]  ;;  %v3176_v37 = vld [vmem:[#allocation2 + $0x148] sm:$0xff] }
0x2a39   :  { %4126 = vmatpush.msra.mxu3 %v3374_v9  ;;  %4142 = vmatpush.msrb.mxu0 %v3554_v18  ;;  %v3293_v9 = vld [vmem:[#allocation2 + $0x4f0] sm:$0xff] }
0x2a3a   :  { %4103 = vmatpush.msra.mxu2 %v3257_v2  ;;  %4165 = vmatpush.msra.mxu1 %v3671_v49  ;;  %v3473_v18 = vld [vmem:[#allocation2 + $0xa90] sm:$0xff]  ;;  %v3590_v49 = vld [vmem:[#allocation2 + $0xe38] sm:$0xff] }
0x2a3b   :  { %4127 = vmatpush.msra.mxu3 %v3365_v36  ;;  %4143 = vmatpush.msrb.mxu0 %v3545_v16  ;;  %v3167_v16 = vld [vmem:[#allocation2 + $0x100] sm:$0xff] }
0x2a3c   :  { %4104 = vmatpush.msra.mxu2 %v3248_v33  ;;  %4166 = vmatpush.msra.mxu1 %v3662_v20  ;;  %v3284_v33 = vld [vmem:[#allocation2 + $0x4a8] sm:$0xff] }
0x2a3d   :  { %4128 = vmatpush.msra.mxu3 %v3356_v56  ;;  %4144 = vmatpush.msrb.mxu0 %v3536_v1  ;;  %v3464_v20 = vld [vmem:[#allocation2 + $0xa48] sm:$0xff] }
0x2a3e   :  { %4105 = vmatpush.msra.mxu2 %v3239_v22  ;;  %4167 = vmatpush.msra.mxu1 %v3653_v58  ;;  %v3581_v22 = vld [vmem:[#allocation2 + $0xdf0] sm:$0xff]  ;;  %v3564_v58 = vld [vmem:[#allocation2 + $0xd68] sm:$0xff] }
0x2a3f   :  { %4129 = vmatpush.msra.mxu3 %v3347_v54  ;;  %4145 = vmatpush.msrb.mxu0 %v3527_v39  ;;  %v3158_v54 = vld [vmem:[#allocation2 + $0xb8] sm:$0xff]  ;;  %v3572_v39 = vld [vmem:[#allocation2 + $0xda8] sm:$0xff] }
0x2a40   :  { %4106 = vmatpush.msra.mxu2 %v3230_v50  ;;  %4168 = vmatpush.msra.mxu1 %v3644_v5  ;;  %v3455_v50 = vld [vmem:[#allocation2 + $0xa00] sm:$0xff] }
0x2a41   :  { %4130 = vmatpush.msra.mxu3 %v3338_v35  ;;  %4146 = vmatpush.msrb.mxu0 %v3518_v55 }
0x2a42   :  { %4107 = vmatpush.msra.mxu2 %v3221_v24  ;;  %4169 = vmatpush.msra.mxu1 %v3635_v8  ;;  %v3555_v24 = vld [vmem:[#allocation2 + $0xd20] sm:$0xff]  ;;  %v3276_v8 = vld [vmem:[#allocation2 + $0x468] sm:$0xff] }
0x2a43   :  { %4131 = vmatpush.msra.mxu3 %v3329_v21  ;;  %4147 = vmatpush.msrb.mxu0 %v3509_v26  ;;  %v3149_v21 = vld [vmem:[#allocation2 + $0x70] sm:$0xff]  ;;  %v3546_v26 = vld [vmem:[#allocation2 + $0xcd8] sm:$0xff] }
0x2a44   :  { %4108 = vmatpush.msra.mxu2 %v3212_v38  ;;  %4170 = vmatpush.msra.mxu1 %v3626_v42  ;;  %v3446_v38 = vld [vmem:[#allocation2 + $0x9b8] sm:$0xff] }
0x2a45   :  { %4132 = vmatpush.msra.mxu3 %v3320_v41  ;;  %4148 = vmatpush.msrb.mxu0 %v3500_v6  ;;  %v3267_v41 = vld [vmem:[#allocation2 + $0x420] sm:$0xff]  ;;  %v3437_v6 = vld [vmem:[#allocation2 + $0x970] sm:$0xff] }
0x2a46   :  { %4109 = vmatpush.msra.mxu2 %v3203_v0  ;;  %4171 = vmatpush.msra.mxu1 %v3617_v7  ;;  %v3718_v2 = vpop.f32.mrf.mxu3  ;;  %v3140_v0 = vld [vmem:[#allocation2 + $0x28] sm:$0xff] }
0x2a47   :  { %4037 = vmatmul.f32.vlgmr.msrb.gmra.mxu3 %v7025_v19  ;;  %4149 = vmatpush.msrb.mxu0 %v3491_v40  ;;  %v3719_v36 = vadd.f32 %v3718_v2, %v3679_v32  ;;  %v3420_v7 = vld [vmem:[#allocation2 + $0x8e8] sm:$0xff]  ;;  %v3249_v32 = vld [vmem:[#allocation2 + $0x390] sm:$0xff]  ;;  %v3663_v2 = vld [vmem:[#allocation2 + $0x1080] sm:$0xff] }
0x2a48   :  { %4110 = vmatpush.msra.mxu2 %v3194_v4  ;;  %4133 = vmatpush.msra.mxu3 %v3311_v3  ;;  %v3258_v4 = vld [vmem:[#allocation2 + $0x3d8] sm:$0xff]  ;;  %v3537_v3 = vld [vmem:[#allocation2 + $0xc90] sm:$0xff]  ;;  %v3428_v40 = vld [vmem:[#allocation2 + $0x928] sm:$0xff] }
0x2a49   :  { %4172 = vmatpush.msra.mxu1 %v3608_v52  ;;  %4150 = vmatpush.msrb.mxu0 %v3482_v57  ;;  %v3411_v52 = vld [vmem:[#allocation2 + $0x8a0] sm:$0xff]  ;;  %v3402_v57 = vld [vmem:[#allocation2 + $0x858] sm:$0xff] }
0x2a4a   :  { %4111 = vmatpush.msra.mxu2 %v3185_v17  ;;  %4134 = vmatpush.msra.mxu3 %v3302_v51  ;;  %v3528_v17 = vld [vmem:[#allocation2 + $0xc48] sm:$0xff] }
0x2a4b   :  { %4173 = vmatpush.msra.mxu1 %v3599_v48  ;;  %v3738_v56 = vpop.f32.mrf.mxu0  ;;  %4151 = vmatpush.msrb.mxu0 %v3473_v18  ;;  %v3672_v51 = vld [vmem:[#allocation2 + $0x10c8] sm:$0xff]  ;;  %v3393_v18 = vld [vmem:[#allocation2 + $0x810] sm:$0xff] }
0x2a4c   :  { %4112 = vmatpush.msra.mxu2 %v3176_v37  ;;  %4135 = vmatpush.msra.mxu3 %v3293_v9  ;;  %v3739_v1 = vadd.f32 %v3738_v56, %v3719_v36  ;;  %v3240_v48 = vld [vmem:[#allocation2 + $0x348] sm:$0xff]  ;;  %v3519_v37 = vld [vmem:[#allocation2 + $0xc00] sm:$0xff]  ;;  %v3510_v36 = vld [vmem:[#allocation2 + $0xbb8] sm:$0xff] }
0x2a4d   :  { %4174 = vmatpush.msra.mxu1 %v3590_v49  ;;  %4855 = vmatmul.msk.f32.vlgmr.msrb.gmra.mxu2 %vm3697_vm6, %v7027_v34  ;;  %v3231_v49 = vld [vmem:[#allocation2 + $0x300] sm:$0xff]  ;;  %v3501_v56 = vld [vmem:[#allocation2 + $0xb70] sm:$0xff] }
0x2a4e   :  { %4136 = vmatpush.msra.mxu3 %v3284_v33  ;;  %4113 = vmatpush.msra.mxu2 %v3167_v16  ;;  %v3758_v5 = vpop.f32.mrf.mxu1  ;;  %v3778_v35 = vpop.f32.mrf.mxu2  ;;  %v3654_v33 = vld [vmem:[#allocation2 + $0x1038] sm:$0xff]  ;;  %v3384_v16 = vld [vmem:[#allocation2 + $0x7c8] sm:$0xff] }
0x2a4f   :  { %4152 = vmatpush.msrb.mxu0 %v3464_v20  ;;  %4175 = vmatpush.msra.mxu1 %v3581_v22  ;;  %v3759_v55 = vadd.f32 %v3758_v5, %v3739_v1  ;;  %v3222_v20 = vld [vmem:[#allocation2 + $0x2b8] sm:$0xff]  ;;  %v3645_v22 = vld [vmem:[#allocation2 + $0xff0] sm:$0xff]  ;;  %v3375_v1 = vld [vmem:[#allocation2 + $0x780] sm:$0xff] }
0x2a50   :  { %4057 = vmatmul.f32.vlgmr.msra.gmra.mxu0 %v7021_v23  ;;  %4221 = vmatpush.msrb.mxu3 %v3564_v58  ;;  %v3213_v58 = vld [vmem:[#allocation2 + $0x270] sm:$0xff]  ;;  %v3204_v5 = vld [vmem:[#allocation2 + $0x228] sm:$0xff] }
0x2a51   :  { %4114 = vmatpush.msra.mxu2 %v3158_v54  ;;  %4153 = vmatpush.msrb.mxu0 %v3455_v50  ;;  %v3779_v42 = vadd.f32 %v3778_v35, %v3759_v55  ;;  %v3492_v54 = vld [vmem:[#allocation2 + $0xb28] sm:$0xff]  ;;  %v3483_v35 = vld [vmem:[#allocation2 + $0xae0] sm:$0xff]  ;;  %v3357_v55 = vld [vmem:[#allocation2 + $0x6f0] sm:$0xff] }
0x2a52   :  { %4176 = vmatpush.msra.mxu1 %v3572_v39  ;;  %4222 = vmatpush.msrb.mxu3 %v3555_v24  ;;  %v3636_v50 = vld [vmem:[#allocation2 + $0xfa8] sm:$0xff]  ;;  %v3366_v39 = vld [vmem:[#allocation2 + $0x738] sm:$0xff]  ;;  %v3627_v24 = vld [vmem:[#allocation2 + $0xf60] sm:$0xff] }
0x2a53   :  { %4077 = vmatmul.f32.vlgmr.msrb.gmra.mxu1 %v7023_v53  ;;  %4115 = vmatpush.msra.mxu2 %v3149_v21  ;;  %5188 = vtanh.f32 %v3779_v42  ;;  %v3474_v21 = vld [vmem:[#allocation2 + $0xa98] sm:$0xff]  ;;  %v3348_v42 = vld [vmem:[#allocation2 + $0x6a8] sm:$0xff] }
0x2a54   :  { %4181 = vmatpush.msrb.mxu1 %v3276_v8  ;;  %4154 = vmatpush.msrb.mxu0 %v3446_v38  ;;  %v3195_v8 = vld [vmem:[#allocation2 + $0x1e0] sm:$0xff]  ;;  %v3618_v38 = vld [vmem:[#allocation2 + $0xf18] sm:$0xff] }
0x2a55   :  { %4223 = vmatpush.msrb.mxu3 %v3546_v26  ;;  %4116 = vmatpush.msra.mxu2 %v3140_v0  ;;  %v3186_v26 = vld [vmem:[#allocation2 + $0x198] sm:$0xff]  ;;  %v3609_v0 = vld [vmem:[#allocation2 + $0xed0] sm:$0xff] }
0x2a56   :  { %4182 = vmatpush.msrb.mxu1 %v3267_v41  ;;  %4155 = vmatpush.msrb.mxu0 %v3437_v6  ;;  %v3465_v41 = vld [vmem:[#allocation2 + $0xa50] sm:$0xff] }
0x2a57   :  { %4201 = vmatpush.msrb.mxu2 %v3420_v7  ;;  %4224 = vmatpush.msrb.mxu3 %v3537_v3  ;;  %v3177_v6 = vld [vmem:[#allocation2 + $0x150] sm:$0xff]  ;;  %v3680_v7 = vperm.slane %v7049_v25, 1  ;;  %v3456_v3 = vld [vmem:[#allocation2 + $0xa08] sm:$0xff] }
0x2a58   :  { %4183 = vmatpush.msrb.mxu1 %v3258_v4  ;;  %4156 = vmatpush.msrb.mxu0 %v3428_v40  ;;  %v3339_v4 = vld [vmem:[#allocation2 + $0x660] sm:$0xff]  ;;  %v3600_v40 = vld [vmem:[#allocation2 + $0xe88] sm:$0xff] }
0x2a59   :  { %4202 = vmatpush.msrb.mxu2 %v3411_v52  ;;  %v7057_v9 = vpop.eup %5188  ;;  %4225 = vmatpush.msrb.mxu3 %v3528_v17  ;;  %v3168_v52 = vld [vmem:[#allocation2 + $0x108] sm:$0xff]  ;;  %v3447_v17 = vld [vmem:[#allocation2 + $0x9c0] sm:$0xff] }
0x2a5a   :  { %4184 = vmatpush.msrb.mxu1 %v3249_v32  ;;  %4245 = vmatpush.msra.mxu0 %v3672_v51  ;;  %v3330_v32 = vld [vmem:[#allocation2 + $0x618] sm:$0xff] }
0x2a5b   :  { %4203 = vmatpush.msrb.mxu2 %v3402_v57  ;;  %4226 = vmatpush.msrb.mxu3 %v3519_v37  ;;  %v3591_v57 = vld [vmem:[#allocation2 + $0xe40] sm:$0xff] }
0x2a5c   :  { %4185 = vmatpush.msrb.mxu1 %v3240_v48  ;;  %4246 = vmatpush.msra.mxu0 %v3663_v2  ;;  %v3159_v48 = vld [vmem:[#allocation2 + $0xc0] sm:$0xff]  ;;  %v3321_v2 = vld [vmem:[#allocation2 + $0x5d0] sm:$0xff] }
0x2a5d   :  { %4204 = vmatpush.msrb.mxu2 %v3393_v18  ;;  %4227 = vmatpush.msrb.mxu3 %v3510_v36  ;;  %v3438_v18 = vld [vmem:[#allocation2 + $0x978] sm:$0xff] }
0x2a5e   :  { %4186 = vmatpush.msrb.mxu1 %v3231_v49  ;;  %4247 = vmatpush.msra.mxu0 %v3654_v33  ;;  %v3582_v36 = vld [vmem:[#allocation2 + $0xdf8] sm:$0xff] }
0x2a5f   :  { %4205 = vmatpush.msrb.mxu2 %v3384_v16  ;;  %4228 = vmatpush.msrb.mxu3 %v3501_v56  ;;  %v3150_v33 = vld [vmem:[#allocation2 + $0x78] sm:$0xff]  ;;  %v3429_v56 = vld [vmem:[#allocation2 + $0x930] sm:$0xff] }
0x2a60   :  { %4187 = vmatpush.msrb.mxu1 %v3222_v20  ;;  %4248 = vmatpush.msra.mxu0 %v3645_v22  ;;  %v3312_v20 = vld [vmem:[#allocation2 + $0x588] sm:$0xff]  ;;  %v3573_v22 = vld [vmem:[#allocation2 + $0xdb0] sm:$0xff] }
0x2a61   :  { %4206 = vmatpush.msrb.mxu2 %v3375_v1  ;;  %4229 = vmatpush.msrb.mxu3 %v3492_v54  ;;  %v3673_v1 = vld [vmem:[#allocation2 + $0x10d0] sm:$0xff] }
0x2a62   :  { %4188 = vmatpush.msrb.mxu1 %v3213_v58  ;;  %4249 = vmatpush.msra.mxu0 %v3636_v50  ;;  %v3141_v54 = vld [vmem:[#allocation2 + $0x30] sm:$0xff] }
0x2a63   :  { %4207 = vmatpush.msrb.mxu2 %v3366_v39  ;;  %4230 = vmatpush.msrb.mxu3 %v3483_v35  ;;  %v3277_v39 = vld [vmem:[#allocation2 + $0x470] sm:$0xff]  ;;  %v3664_v35 = vld [vmem:[#allocation2 + $0x1088] sm:$0xff] }
0x2a64   :  { %4189 = vmatpush.msrb.mxu1 %v3204_v5  ;;  %4250 = vmatpush.msra.mxu0 %v3627_v24  ;;  %v3303_v5 = vld [vmem:[#allocation2 + $0x540] sm:$0xff] }
0x2a65   :  { %4208 = vmatpush.msrb.mxu2 %v3357_v55  ;;  %4231 = vmatpush.msrb.mxu3 %v3474_v21  ;;  %v3268_v55 = vld [vmem:[#allocation2 + $0x428] sm:$0xff] }
0x2a66   :  { %4190 = vmatpush.msrb.mxu1 %v3195_v8  ;;  %4251 = vmatpush.msra.mxu0 %v3618_v38  ;;  %v3421_v8 = vld [vmem:[#allocation2 + $0x8f0] sm:$0xff]  ;;  %v3294_v38 = vld [vmem:[#allocation2 + $0x4f8] sm:$0xff] }
0x2a67   :  { %4117 = vmatmul.f32.vlgmr.msra.gmra.mxu2 %v7025_v19  ;;  %4232 = vmatpush.msrb.mxu3 %v3465_v41  ;;  %v3412_v41 = vld [vmem:[#allocation2 + $0x8a8] sm:$0xff] }
0x2a68   :  { %4191 = vmatpush.msrb.mxu1 %v3186_v26  ;;  %4209 = vmatpush.msrb.mxu2 %v3348_v42  ;;  %v3798_v51 = vpop.f32.mrf.mxu2  ;;  %v3655_v26 = vld [vmem:[#allocation2 + $0x1040] sm:$0xff] }
0x2a69   :  { %4252 = vmatpush.msra.mxu0 %v3609_v0  ;;  %4137 = vmatmul.f32.vlgmr.msra.gmra.mxu3 %v7021_v23  ;;  %v3799_v37 = vadd.f32 %v3798_v51, %v3680_v7  ;;  %v3259_v42 = vld [vmem:[#allocation2 + $0x3e0] sm:$0xff]  ;;  %v3285_v0 = vld [vmem:[#allocation2 + $0x4b0] sm:$0xff]  ;;  %v3250_v7 = vld [vmem:[#allocation2 + $0x398] sm:$0xff] }
0x2a6a   :  { %4192 = vmatpush.msrb.mxu1 %v3177_v6  ;;  %4210 = vmatpush.msrb.mxu2 %v3339_v4  ;;  %v3646_v6 = vld [vmem:[#allocation2 + $0xff8] sm:$0xff]  ;;  %v3403_v4 = vld [vmem:[#allocation2 + $0x860] sm:$0xff]  ;;  %v3628_v51 = vld [vmem:[#allocation2 + $0xf68] sm:$0xff] }
0x2a6b   :  { %4233 = vmatpush.msrb.mxu3 %v3456_v3  ;;  %4253 = vmatpush.msra.mxu0 %v3600_v40  ;;  %v3565_v3 = vld [vmem:[#allocation2 + $0xd70] sm:$0xff] }
0x2a6c   :  { %4193 = vmatpush.msrb.mxu1 %v3168_v52  ;;  %v3818_v49 = vpop.f32.mrf.mxu3  ;;  %4211 = vmatpush.msrb.mxu2 %v3330_v32  ;;  %v3637_v40 = vld [vmem:[#allocation2 + $0xfb0] sm:$0xff]  ;;  %v3394_v32 = vld [vmem:[#allocation2 + $0x818] sm:$0xff] }
0x2a6d   :  { %4234 = vmatpush.msrb.mxu3 %v3447_v17  ;;  %v3819_v16 = vadd.f32 %v3818_v49, %v3799_v37  ;;  %4254 = vmatpush.msra.mxu0 %v3591_v57  ;;  %v3241_v52 = vld [vmem:[#allocation2 + $0x350] sm:$0xff]  ;;  %v3556_v17 = vld [vmem:[#allocation2 + $0xd28] sm:$0xff]  ;;  %v3223_v49 = vld [vmem:[#allocation2 + $0x2c0] sm:$0xff] }
0x2a6e   :  { %4194 = vmatpush.msrb.mxu1 %v3159_v48  ;;  %4212 = vmatpush.msrb.mxu2 %v3321_v2  ;;  %v3838_v58 = vpop.f32.mrf.mxu0  ;;  %v3232_v48 = vld [vmem:[#allocation2 + $0x308] sm:$0xff]  ;;  %v3385_v37 = vld [vmem:[#allocation2 + $0x7d0] sm:$0xff]  ;;  %v3547_v2 = vld [vmem:[#allocation2 + $0xce0] sm:$0xff] }
0x2a6f   :  { %4235 = vmatpush.msrb.mxu3 %v3438_v18  ;;  %4255 = vmatpush.msra.mxu0 %v3582_v36  ;;  %v3839_v50 = vadd.f32 %v3838_v58, %v3819_v16  ;;  %v3619_v18 = vld [vmem:[#allocation2 + $0xf20] sm:$0xff]  ;;  %v3376_v36 = vld [vmem:[#allocation2 + $0x788] sm:$0xff]  ;;  %v3610_v16 = vld [vmem:[#allocation2 + $0xed8] sm:$0xff] }
0x2a70   :  { %4195 = vmatpush.msrb.mxu1 %v3150_v33  ;;  %4213 = vmatpush.msrb.mxu2 %v3312_v20  ;;  %v3858_v24 = vpop.f32.mrf.mxu1  ;;  %v3538_v33 = vld [vmem:[#allocation2 + $0xc98] sm:$0xff]  ;;  %v3205_v58 = vld [vmem:[#allocation2 + $0x230] sm:$0xff] }
0x2a71   :  { %4236 = vmatpush.msrb.mxu3 %v3429_v56  ;;  %4256 = vmatpush.msra.mxu0 %v3573_v22  ;;  %v3859_v21 = vadd.f32 %v3858_v24, %v3839_v50  ;;  %v3214_v20 = vld [vmem:[#allocation2 + $0x278] sm:$0xff]  ;;  %v3367_v56 = vld [vmem:[#allocation2 + $0x740] sm:$0xff]  ;;  %v3529_v22 = vld [vmem:[#allocation2 + $0xc50] sm:$0xff] }
0x2a72   :  { %4157 = vmatmul.f32.vlgmr.msrb.gmra.mxu0 %v7023_v53  ;;  %4196 = vmatpush.msrb.mxu1 %v3141_v54  ;;  %v3358_v54 = vld [vmem:[#allocation2 + $0x6f8] sm:$0xff]  ;;  %v3520_v50 = vld [vmem:[#allocation2 + $0xc08] sm:$0xff]  ;;  %v3511_v24 = vld [vmem:[#allocation2 + $0xbc0] sm:$0xff] }
0x2a73   :  { %4325 = vmatpush.msra.mxu3 %v3673_v1  ;;  %4261 = vmatpush.msrb.mxu0 %v3277_v39  ;;  %5190 = vtanh.f32 %v3859_v21  ;;  %v3601_v1 = vld [vmem:[#allocation2 + $0xe90] sm:$0xff]  ;;  %v3592_v39 = vld [vmem:[#allocation2 + $0xe48] sm:$0xff] }
0x2a74   :  { %4214 = vmatpush.msrb.mxu2 %v3303_v5  ;;  %4856 = vmatmul.msk.f32.vlgmr.msra.gmra.mxu1 %vm3697_vm6, %v7027_v34  ;;  %v3196_v5 = vld [vmem:[#allocation2 + $0x1e8] sm:$0xff] }
0x2a75   :  { %4326 = vmatpush.msra.mxu3 %v3664_v35  ;;  %4262 = vmatpush.msrb.mxu0 %v3268_v55  ;;  %v3349_v35 = vld [vmem:[#allocation2 + $0x6b0] sm:$0xff]  ;;  %v3583_v55 = vld [vmem:[#allocation2 + $0xe00] sm:$0xff]  ;;  %v3340_v21 = vld [vmem:[#allocation2 + $0x668] sm:$0xff] }
0x2a76   :  { %4281 = vmatpush.msra.mxu1 %v3421_v8  ;;  %4215 = vmatpush.msrb.mxu2 %v3294_v38  ;;  %v3187_v8 = vld [vmem:[#allocation2 + $0x1a0] sm:$0xff]  ;;  %v3502_v38 = vld [vmem:[#allocation2 + $0xb78] sm:$0xff] }
0x2a77   :  { %4327 = vmatpush.msra.mxu3 %v3655_v26  ;;  %4263 = vmatpush.msrb.mxu0 %v3259_v42  ;;  %v3574_v26 = vld [vmem:[#allocation2 + $0xdb8] sm:$0xff] }
0x2a78   :  { %4282 = vmatpush.msra.mxu1 %v3412_v41  ;;  %4216 = vmatpush.msrb.mxu2 %v3285_v0  ;;  %v3178_v42 = vld [vmem:[#allocation2 + $0x158] sm:$0xff]  ;;  %v3331_v41 = vld [vmem:[#allocation2 + $0x620] sm:$0xff]  ;;  %v3493_v0 = vld [vmem:[#allocation2 + $0xb30] sm:$0xff] }
0x2a79   :  { %4328 = vmatpush.msra.mxu3 %v3646_v6  ;;  %4264 = vmatpush.msrb.mxu0 %v3250_v7  ;;  %v7065_v57 = vpop.eup %5190  ;;  %v3681_v6 = vperm.slane %v7049_v25, 2  ;;  %v3169_v7 = vld [vmem:[#allocation2 + $0x110] sm:$0xff] }
0x2a7a   :  { %4283 = vmatpush.msra.mxu1 %v3403_v4  ;;  %4301 = vmatpush.msra.mxu2 %v3565_v3  ;;  %v3278_v4 = vld [vmem:[#allocation2 + $0x478] sm:$0xff] }
0x2a7b   :  { %4329 = vmatpush.msra.mxu3 %v3637_v40  ;;  %4265 = vmatpush.msrb.mxu0 %v3241_v52  ;;  %v3322_v3 = vld [vmem:[#allocation2 + $0x5d8] sm:$0xff]  ;;  %v3484_v40 = vld [vmem:[#allocation2 + $0xae8] sm:$0xff] }
0x2a7c   :  { %4284 = vmatpush.msra.mxu1 %v3394_v32  ;;  %4302 = vmatpush.msra.mxu2 %v3556_v17  ;;  %v3269_v32 = vld [vmem:[#allocation2 + $0x430] sm:$0xff]  ;;  %v3160_v17 = vld [vmem:[#allocation2 + $0xc8] sm:$0xff] }
0x2a7d   :  { %4330 = vmatpush.msra.mxu3 %v3628_v51  ;;  %4266 = vmatpush.msrb.mxu0 %v3232_v48 }
0x2a7e   :  { %4285 = vmatpush.msra.mxu1 %v3385_v37  ;;  %4303 = vmatpush.msra.mxu2 %v3547_v2  ;;  %v3313_v37 = vld [vmem:[#allocation2 + $0x590] sm:$0xff]  ;;  %v3475_v2 = vld [vmem:[#allocation2 + $0xaa0] sm:$0xff] }
0x2a7f   :  { %4331 = vmatpush.msra.mxu3 %v3619_v18  ;;  %4267 = vmatpush.msrb.mxu0 %v3223_v49  ;;  %v3260_v18 = vld [vmem:[#allocation2 + $0x3e8] sm:$0xff]  ;;  %v3151_v49 = vld [vmem:[#allocation2 + $0x80] sm:$0xff] }
0x2a80   :  { %4286 = vmatpush.msra.mxu1 %v3376_v36  ;;  %4304 = vmatpush.msra.mxu2 %v3538_v33  ;;  %v3304_v33 = vld [vmem:[#allocation2 + $0x548] sm:$0xff] }
0x2a81   :  { %4332 = vmatpush.msra.mxu3 %v3610_v16  ;;  %4268 = vmatpush.msrb.mxu0 %v3214_v20  ;;  %v3466_v16 = vld [vmem:[#allocation2 + $0xa58] sm:$0xff] }
0x2a82   :  { %4287 = vmatpush.msra.mxu1 %v3367_v56  ;;  %4305 = vmatpush.msra.mxu2 %v3529_v22  ;;  %v3251_v56 = vld [vmem:[#allocation2 + $0x3a0] sm:$0xff]  ;;  %v3142_v22 = vld [vmem:[#allocation2 + $0x38] sm:$0xff] }
0x2a83   :  { %4333 = vmatpush.msra.mxu3 %v3601_v1  ;;  %4269 = vmatpush.msrb.mxu0 %v3205_v58  ;;  %v3295_v58 = vld [vmem:[#allocation2 + $0x500] sm:$0xff] }
0x2a84   :  { %4288 = vmatpush.msra.mxu1 %v3358_v54  ;;  %4306 = vmatpush.msra.mxu2 %v3520_v50  ;;  %v3457_v54 = vld [vmem:[#allocation2 + $0xa10] sm:$0xff]  ;;  %v3242_v50 = vld [vmem:[#allocation2 + $0x358] sm:$0xff] }
0x2a85   :  { %4334 = vmatpush.msra.mxu3 %v3592_v39  ;;  %4270 = vmatpush.msrb.mxu0 %v3196_v5  ;;  %v3422_v5 = vld [vmem:[#allocation2 + $0x8f8] sm:$0xff] }
0x2a86   :  { %4289 = vmatpush.msra.mxu1 %v3349_v35  ;;  %4307 = vmatpush.msra.mxu2 %v3511_v24  ;;  %v3286_v35 = vld [vmem:[#allocation2 + $0x4b8] sm:$0xff] }
0x2a87   :  { %4335 = vmatpush.msra.mxu3 %v3583_v55  ;;  %4271 = vmatpush.msrb.mxu0 %v3187_v8  ;;  %v3448_v55 = vld [vmem:[#allocation2 + $0x9c8] sm:$0xff]  ;;  %v3233_v8 = vld [vmem:[#allocation2 + $0x310] sm:$0xff] }
0x2a88   :  { %4290 = vmatpush.msra.mxu1 %v3340_v21  ;;  %4308 = vmatpush.msra.mxu2 %v3502_v38  ;;  %v3413_v21 = vld [vmem:[#allocation2 + $0x8b0] sm:$0xff]  ;;  %v3566_v38 = vld [vmem:[#allocation2 + $0xd78] sm:$0xff] }
0x2a89   :  { %4336 = vmatpush.msra.mxu3 %v3574_v26  ;;  %4217 = vmatmul.f32.vlgmr.msrb.gmra.mxu2 %v7021_v23  ;;  %v3439_v26 = vld [vmem:[#allocation2 + $0x980] sm:$0xff] }
0x2a8a   :  { %4272 = vmatpush.msrb.mxu0 %v3178_v42  ;;  %4291 = vmatpush.msra.mxu1 %v3331_v41  ;;  %v3878_v52 = vpop.f32.mrf.mxu1  ;;  %v3224_v42 = vld [vmem:[#allocation2 + $0x2c8] sm:$0xff] }
0x2a8b   :  { %4309 = vmatpush.msra.mxu2 %v3493_v0  ;;  %4237 = vmatmul.f32.vlgmr.msrb.gmra.mxu3 %v7023_v53  ;;  %v3879_v51 = vadd.f32 %v3878_v52, %v3681_v6  ;;  %v3898_v48 = vpop.f32.mrf.mxu2  ;;  %v3404_v41 = vld [vmem:[#allocation2 + $0x868] sm:$0xff]  ;;  %v3557_v0 = vld [vmem:[#allocation2 + $0xd30] sm:$0xff]  ;;  %v3430_v6 = vld [vmem:[#allocation2 + $0x938] sm:$0xff] }
0x2a8c   :  { %4273 = vmatpush.msrb.mxu0 %v3169_v7  ;;  %4341 = vmatpush.msrb.mxu3 %v3278_v4  ;;  %v3215_v7 = vld [vmem:[#allocation2 + $0x280] sm:$0xff]  ;;  %v3206_v52 = vld [vmem:[#allocation2 + $0x238] sm:$0xff] }
0x2a8d   :  { %4292 = vmatpush.msra.mxu1 %v3322_v3  ;;  %4310 = vmatpush.msra.mxu2 %v3484_v40  ;;  %v3899_v36 = vadd.f32 %v3898_v48, %v3879_v51  ;;  %v3395_v4 = vld [vmem:[#allocation2 + $0x820] sm:$0xff]  ;;  %v3548_v3 = vld [vmem:[#allocation2 + $0xce8] sm:$0xff]  ;;  %v3674_v40 = vld [vmem:[#allocation2 + $0x10d8] sm:$0xff] }
0x2a8e   :  { %4197 = vmatmul.f32.vlgmr.msrb.gmra.mxu1 %v7025_v19  ;;  %4342 = vmatpush.msrb.mxu3 %v3269_v32  ;;  %v3918_v20 = vpop.f32.mrf.mxu3  ;;  %v3539_v51 = vld [vmem:[#allocation2 + $0xca0] sm:$0xff]  ;;  %v3665_v48 = vld [vmem:[#allocation2 + $0x1090] sm:$0xff] }
0x2a8f   :  { %4274 = vmatpush.msrb.mxu0 %v3160_v17  ;;  %4293 = vmatpush.msra.mxu1 %v3313_v37  ;;  %v3919_v1 = vadd.f32 %v3918_v20, %v3899_v36  ;;  %v3386_v17 = vld [vmem:[#allocation2 + $0x7d8] sm:$0xff]  ;;  %v3197_v37 = vld [vmem:[#allocation2 + $0x1f0] sm:$0xff]  ;;  %v3188_v36 = vld [vmem:[#allocation2 + $0x1a8] sm:$0xff] }
0x2a90   :  { %4311 = vmatpush.msra.mxu2 %v3475_v2  ;;  %4343 = vmatpush.msrb.mxu3 %v3260_v18  ;;  %v3377_v2 = vld [vmem:[#allocation2 + $0x790] sm:$0xff]  ;;  %v3530_v18 = vld [vmem:[#allocation2 + $0xc58] sm:$0xff]  ;;  %v3647_v20 = vld [vmem:[#allocation2 + $0x1000] sm:$0xff] }
0x2a91   :  { %4275 = vmatpush.msrb.mxu0 %v3151_v49  ;;  %4294 = vmatpush.msra.mxu1 %v3304_v33  ;;  %v3938_v39 = vpop.f32.mrf.mxu0  ;;  %v3656_v49 = vld [vmem:[#allocation2 + $0x1048] sm:$0xff] }
0x2a92   :  { %4312 = vmatpush.msra.mxu2 %v3466_v16  ;;  %4344 = vmatpush.msrb.mxu3 %v3251_v56  ;;  %v3939_v24 = vadd.f32 %v3938_v39, %v3919_v1  ;;  %v3368_v33 = vld [vmem:[#allocation2 + $0x748] sm:$0xff]  ;;  %v3521_v16 = vld [vmem:[#allocation2 + $0xc10] sm:$0xff]  ;;  %v3179_v56 = vld [vmem:[#allocation2 + $0x160] sm:$0xff] }
0x2a93   :  { %4276 = vmatpush.msrb.mxu0 %v3142_v22  ;;  %4295 = vmatpush.msra.mxu1 %v3295_v58  ;;  %v3359_v22 = vld [vmem:[#allocation2 + $0x700] sm:$0xff]  ;;  %v3512_v1 = vld [vmem:[#allocation2 + $0xbc8] sm:$0xff]  ;;  %v3638_v58 = vld [vmem:[#allocation2 + $0xfb8] sm:$0xff] }
0x2a94   :  { %4313 = vmatpush.msra.mxu2 %v3457_v54  ;;  %4857 = vmatmul.msk.f32.vlgmr.msra.gmra.mxu0 %vm3697_vm6, %v7027_v34  ;;  %5192 = vtanh.f32 %v3939_v24  ;;  %v3170_v54 = vld [vmem:[#allocation2 + $0x118] sm:$0xff]  ;;  %v3503_v39 = vld [vmem:[#allocation2 + $0xb80] sm:$0xff]  ;;  %v3341_v24 = vld [vmem:[#allocation2 + $0x670] sm:$0xff] }
0x2a95   :  { %4345 = vmatpush.msrb.mxu3 %v3242_v50  ;;  %4361 = vmatpush.msra.mxu0 %v3422_v5  ;;  %v3350_v50 = vld [vmem:[#allocation2 + $0x6b8] sm:$0xff]  ;;  %v3629_v5 = vld [vmem:[#allocation2 + $0xf70] sm:$0xff] }
0x2a96   :  { %4296 = vmatpush.msra.mxu1 %v3286_v35  ;;  %4314 = vmatpush.msra.mxu2 %v3448_v55  ;;  %v3161_v35 = vld [vmem:[#allocation2 + $0xd0] sm:$0xff]  ;;  %v3494_v55 = vld [vmem:[#allocation2 + $0xb38] sm:$0xff] }
0x2a97   :  { %4346 = vmatpush.msrb.mxu3 %v3233_v8  ;;  %4362 = vmatpush.msra.mxu0 %v3413_v21  ;;  %v3620_v8 = vld [vmem:[#allocation2 + $0xf28] sm:$0xff] }
0x2a98   :  { %4381 = vmatpush.msrb.mxu1 %v3566_v38  ;;  %4315 = vmatpush.msra.mxu2 %v3439_v26  ;;  %v3152_v21 = vld [vmem:[#allocation2 + $0x88] sm:$0xff]  ;;  %v3682_v38 = vperm.slane %v7049_v25, 3 }
0x2a99   :  { %4347 = vmatpush.msrb.mxu3 %v3224_v42  ;;  %4363 = vmatpush.msra.mxu0 %v3404_v41  ;;  %v3332_v26 = vld [vmem:[#allocation2 + $0x628] sm:$0xff]  ;;  %v3485_v42 = vld [vmem:[#allocation2 + $0xaf0] sm:$0xff]  ;;  %v3611_v41 = vld [vmem:[#allocation2 + $0xee0] sm:$0xff] }
0x2a9a   :  { %4382 = vmatpush.msrb.mxu1 %v3557_v0  ;;  %v7073_v32 = vpop.eup %5192  ;;  %4316 = vmatpush.msra.mxu2 %v3430_v6  ;;  %v3143_v0 = vld [vmem:[#allocation2 + $0x40] sm:$0xff] }
0x2a9b   :  { %4348 = vmatpush.msrb.mxu3 %v3215_v7  ;;  %4364 = vmatpush.msra.mxu0 %v3395_v4  ;;  %v3323_v6 = vld [vmem:[#allocation2 + $0x5e0] sm:$0xff]  ;;  %v3476_v7 = vld [vmem:[#allocation2 + $0xaa8] sm:$0xff] }
0x2a9c   :  { %4383 = vmatpush.msrb.mxu1 %v3548_v3  ;;  %4405 = vmatpush.msrb.mxu2 %v3674_v40  ;;  %v3602_v3 = vld [vmem:[#allocation2 + $0xe98] sm:$0xff] }
0x2a9d   :  { %4349 = vmatpush.msrb.mxu3 %v3206_v52  ;;  %4365 = vmatpush.msra.mxu0 %v3386_v17  ;;  %v3314_v52 = vld [vmem:[#allocation2 + $0x598] sm:$0xff]  ;;  %v3467_v17 = vld [vmem:[#allocation2 + $0xa60] sm:$0xff] }
0x2a9e   :  { %4384 = vmatpush.msrb.mxu1 %v3539_v51  ;;  %4406 = vmatpush.msrb.mxu2 %v3665_v48  ;;  %v3593_v51 = vld [vmem:[#allocation2 + $0xe50] sm:$0xff] }
0x2a9f   :  { %4350 = vmatpush.msrb.mxu3 %v3197_v37  ;;  %4366 = vmatpush.msra.mxu0 %v3377_v2  ;;  %v3305_v37 = vld [vmem:[#allocation2 + $0x550] sm:$0xff]  ;;  %v3458_v2 = vld [vmem:[#allocation2 + $0xa18] sm:$0xff] }
0x2aa0   :  { %4385 = vmatpush.msrb.mxu1 %v3530_v18  ;;  %4407 = vmatpush.msrb.mxu2 %v3656_v49 }
0x2aa1   :  { %4351 = vmatpush.msrb.mxu3 %v3188_v36  ;;  %4367 = vmatpush.msra.mxu0 %v3368_v33  ;;  %v3584_v36 = vld [vmem:[#allocation2 + $0xe08] sm:$0xff] }
0x2aa2   :  { %4386 = vmatpush.msrb.mxu1 %v3521_v16  ;;  %4408 = vmatpush.msrb.mxu2 %v3647_v20  ;;  %v3296_v33 = vld [vmem:[#allocation2 + $0x508] sm:$0xff]  ;;  %v3449_v16 = vld [vmem:[#allocation2 + $0x9d0] sm:$0xff] }
0x2aa3   :  { %4352 = vmatpush.msrb.mxu3 %v3179_v56  ;;  %4317 = vmatmul.f32.vlgmr.msra.gmra.mxu2 %v7023_v53 }
0x2aa4   :  { %4368 = vmatpush.msra.mxu0 %v3359_v22  ;;  %4387 = vmatpush.msrb.mxu1 %v3512_v1  ;;  %v3575_v22 = vld [vmem:[#allocation2 + $0xdc0] sm:$0xff] }
0x2aa5   :  { %4409 = vmatpush.msrb.mxu2 %v3638_v58  ;;  %4277 = vmatmul.f32.vlgmr.msrb.gmra.mxu0 %v7025_v19  ;;  %v3287_v1 = vld [vmem:[#allocation2 + $0x4c0] sm:$0xff] }
0x2aa6   :  { %4858 = vmatmul.msk.f32.vlgmr.msra.gmra.mxu3 %vm3697_vm6, %v7027_v34  ;;  %4369 = vmatpush.msra.mxu0 %v3350_v50 }
0x2aa7   :  { %4353 = vmatpush.msrb.mxu3 %v3170_v54  ;;  %4388 = vmatpush.msrb.mxu1 %v3503_v39  ;;  %v3431_v54 = vld [vmem:[#allocation2 + $0x940] sm:$0xff]  ;;  %v3683_v39 = vperm.slane %v7049_v25, 4 }
0x2aa8   :  { %4410 = vmatpush.msrb.mxu2 %v3629_v5  ;;  %4297 = vmatmul.f32.vlgmr.msra.gmra.mxu1 %v7021_v23 }
0x2aa9   :  { %4354 = vmatpush.msrb.mxu3 %v3161_v35  ;;  %4370 = vmatpush.msra.mxu0 %v3341_v24 }
0x2aaa   :  { %4389 = vmatpush.msrb.mxu1 %v3494_v55  ;;  %4411 = vmatpush.msrb.mxu2 %v3620_v8  ;;  %v3958_v4 = vpop.f32.mrf.mxu0 }
0x2aab   :  { %4355 = vmatpush.msrb.mxu3 %v3152_v21  ;;  %4371 = vmatpush.msra.mxu0 %v3332_v26  ;;  %v3959_v40 = vadd.f32 %v3958_v4, %v3682_v38 }
0x2aac   :  { %4390 = vmatpush.msrb.mxu1 %v3485_v42  ;;  %4412 = vmatpush.msrb.mxu2 %v3611_v41 }
0x2aad   :  { %4356 = vmatpush.msrb.mxu3 %v3143_v0  ;;  %4372 = vmatpush.msra.mxu0 %v3323_v6  ;;  %v3978_v48 = vpop.f32.mrf.mxu1 }
0x2aae   :  { %4391 = vmatpush.msrb.mxu1 %v3476_v7  ;;  %4413 = vmatpush.msrb.mxu2 %v3602_v3  ;;  %v3979_v18 = vadd.f32 %v3978_v48, %v3959_v40  ;;  %v3998_v49 = vpop.f32.mrf.mxu2 }
0x2aaf   :  { %4357 = vmatmul.f32.vlgmr.msrb.gmra.mxu3 %v7025_v19  ;;  %4373 = vmatpush.msra.mxu0 %v3314_v52  ;;  %v3440_v19 = vld [vmem:[#allocation2 + $0x988] sm:$0xff]  ;;  %v3685_v52 = vperm.slane %v7049_v25, 6 }
0x2ab0   :  { %4392 = vmatpush.msrb.mxu1 %v3467_v17  ;;  %4414 = vmatpush.msrb.mxu2 %v3593_v51  ;;  %v3999_v20 = vadd.f32 %v3998_v49, %v3979_v18 }
0x2ab1   :  { %v4018_v56 = vpop.f32.mrf.mxu3  ;;  %4374 = vmatpush.msra.mxu0 %v3305_v37  ;;  %4601 = vmatpush.msra.mxu3 %v5934_v31 }
0x2ab2   :  { %4393 = vmatpush.msrb.mxu1 %v3458_v2  ;;  %4415 = vmatpush.msrb.mxu2 %v3584_v36  ;;  %v4019_v58 = vadd.f32 %v4018_v56, %v3999_v20 }
0x2ab3   :  { %4375 = vmatpush.msra.mxu0 %v3296_v33 }
0x2ab4   :  { %4394 = vmatpush.msrb.mxu1 %v3449_v16  ;;  %4416 = vmatpush.msrb.mxu2 %v3575_v22  ;;  %5194 = vtanh.f32 %v4019_v58  ;;  %v5206_v16 = vld [vmem:[#allocation23] sm:$0xff] }
0x2ab5   :  { %4859 = vmatmul.msk.f32.vlgmr.msrb.gmra.mxu2 %vm3697_vm6, %v7027_v34  ;;  %4376 = vmatpush.msra.mxu0 %v3287_v1  ;;  %v3686_v20 = vperm.slane %v5206_v16, 7 }
0x2ab6   :  { %4395 = vmatpush.msrb.mxu1 %v3440_v19  ;;  %4377 = vmatmul.f32.vlgmr.msra.gmra.mxu0 %v7021_v23  ;;  %v3684_v23 = vperm.slane %v7049_v25, 5 }
0x2ab7   :  { %4581 = vmatpush.msra.mxu2 %v5854_v15 }
0x2ab8   :  { %4396 = vmatpush.msrb.mxu1 %v3431_v54 }
0x2ab9   :  { %4397 = vmatmul.f32.vlgmr.msrb.gmra.mxu1 %v7023_v53 }
0x2aba   :  { %v7086_v50 = vpop.eup %5194 }
0x2aca   :  { %v4038_v5 = vpop.f32.mrf.mxu3 }
0x2acb   :  { %v4039_v35 = vadd.f32 %v4038_v5, %v3683_v39  ;;  %v5187_v5 = vld [vmem:[#allocation23 + $0x8] ss:$0 sm:$0xff] }
0x2acd   :  { %v4058_v24 = vpop.f32.mrf.mxu0 }
0x2ace   :  { %v4059_v55 = vadd.f32 %v4058_v24, %v4039_v35 }
0x2ad0   :  { %v4078_v8 = vpop.f32.mrf.mxu1  ;;  %v4098_v38 = vpop.f32.mrf.mxu2 }
0x2ad1   :  { %v4079_v21 = vadd.f32 %v4078_v8, %v4059_v55 }
0x2ad3   :  { %v4099_v34 = vadd.f32 %v4098_v38, %v4079_v21 }
0x2ad5   :  { %5196 = vtanh.f32 %v4099_v34 }
0x2adb   :  { %v7089_v26 = vpop.eup %5196 }
0x2aea   :  { %v4118_v42 = vpop.f32.mrf.mxu2 }
0x2aeb   :  { %v4119_v41 = vadd.f32 %v4118_v42, %v3684_v23 }
0x2aec   :  { %v4138_v53 = vpop.f32.mrf.mxu3 }
0x2aed   :  { %v4139_v0 = vadd.f32 %v4138_v53, %v4119_v41 }
0x2aef   :  { %v4158_v6 = vpop.f32.mrf.mxu0 }
0x2af0   :  { %v4159_v7 = vadd.f32 %v4158_v6, %v4139_v0 }
0x2af1   :  { %v4178_v4 = vpop.f32.mrf.mxu1 }
0x2af2   :  { %v4179_v3 = vadd.f32 %v4178_v4, %v4159_v7 }
0x2af4   :  { %5198 = vtanh.f32 %v4179_v3 }
0x2afa   :  { %v7092_v40 = vpop.eup %5198 }
0x2b0b   :  { %v4198_v17 = vpop.f32.mrf.mxu1 }
0x2b0c   :  { %v4199_v51 = vadd.f32 %v4198_v17, %v3685_v52  ;;  %v4218_v48 = vpop.f32.mrf.mxu2 }
0x2b0e   :  { %v4219_v37 = vadd.f32 %v4218_v48, %v4199_v51  ;;  %v4238_v2 = vpop.f32.mrf.mxu3 }
0x2b10   :  { %v4239_v18 = vadd.f32 %v4238_v2, %v4219_v37 }
0x2b11   :  { %v4258_v49 = vpop.f32.mrf.mxu0 }
0x2b12   :  { %v4259_v36 = vadd.f32 %v4258_v49, %v4239_v18 }
0x2b14   :  { %5200 = vtanh.f32 %v4259_v36 }
0x2b1a   :  { %v7095_v33 = vpop.eup %5200 }
0x2b22   :  { %v4278_v56 = vpop.f32.mrf.mxu0 }
0x2b23   :  { %v4279_v22 = vadd.f32 %v4278_v56, %v3686_v20 }
0x2b25   :  { %v4298_v1 = vpop.f32.mrf.mxu1 }
0x2b26   :  { %v4299_v58 = vadd.f32 %v4298_v1, %v4279_v22  ;;  %v4318_v19 = vpop.f32.mrf.mxu2 }
0x2b28   :  { %v4319_v54 = vadd.f32 %v4318_v19, %v4299_v58 }
0x2b29   :  { %v4338_v25 = vpop.f32.mrf.mxu3 }
0x2b2a   :  { %v4339_v39 = vadd.f32 %v4338_v25, %v4319_v54 }
0x2b2c   :  { %5202 = vtanh.f32 %v4339_v39 }
0x2b32   :  { %v4358_v35 = vpop.f32.mrf.mxu3  ;;  %v7097_v24 = vpop.eup %5202 }
0x2b33   :  { %v4359_v55 = vadd.f32 %v5187_v5, %v4358_v35  ;;  %v4378_v8 = vpop.f32.mrf.mxu0 }
0x2b35   :  { %v4379_v21 = vadd.f32 %v4378_v8, %v4359_v55 }
0x2b36   :  { %v4398_v38 = vpop.f32.mrf.mxu1 }
0x2b37   :  { %v4399_v34 = vadd.f32 %v4398_v38, %v4379_v21 }
0x2b38   :  { %v4418_v23 = vpop.f32.mrf.mxu2 }
0x2b39   :  { %v4419_v42 = vadd.f32 %v4418_v23, %v4399_v34 }
0x2b3b   :  { %5204 = vtanh.f32 %v4419_v42 }
0x2b41   :  { %v7099_v41 = vpop.eup %5204 }
0x2b42   :  { %5611 = dma.done.wait [#allocation5 + $0x1], 18432 }
0x2b43   :  { %5612 = vsyncadd [#allocation5 + $0x1], 4294948864  ;;  %4621 = vmatpush.msrb.mxu0 %v6014_v47  ;;  %4641 = vmatpush.msra.mxu1 %v6094_v63  ;;  %v7407_v15 = vld [vmem:[#allocation55_spill] sm:$0xff]  ;;  %v7419_v47 = vld [vmem:[#allocation52_spill] sm:$0xff]  ;;  %s5639_s27 = smov [#allocation29]   ;;  %s4776_s16 = sshll.u32 %s7275_s17, 4  ;;  %s4777_s16 = int_to_ptr.hbm [resolvable:$true] %s4776_s16 }
0x2b44   :  { %4582 = vmatpush.msra.mxu2 %v5849_v14  ;;  %4602 = vmatpush.msra.mxu3 %v5929_v30  ;;  %v7405_v14 = vld [vmem:[#allocation77_spill] sm:$0xff]  ;;  %v7412_v30 = vld [vmem:[#allocation64_spill] sm:$0xff]  ;;  %v7413_v31 = vld [vmem:[#allocation75_spill] sm:$0xff]  ;;  %s4774_s30 = sshll.u32 %s5639_s27, 4  ;;  %s4775_s30 = int_to_ptr.vmem [resolvable:$true] %s4774_s30 }
0x2b45   :  { %4622 = vmatpush.msrb.mxu0 %v6009_v46  ;;  %4642 = vmatpush.msra.mxu1 %v6089_v62  ;;  %v7418_v46 = vld [vmem:[#allocation85_spill] sm:$0xff]  ;;  %v7423_v62 = vld [vmem:[#allocation51_spill] sm:$0xff]  ;;  %v7425_v53 = vld [vmem:[#allocation72_spill] sm:$0xff] }
0x2b46   :  { %4583 = vmatpush.msra.mxu2 %v5844_v13  ;;  %4603 = vmatpush.msra.mxu3 %v5924_v29  ;;  %v7404_v13 = vld [vmem:[#allocation66_spill] sm:$0xff]  ;;  %v7409_v29 = vld [vmem:[#allocation76_spill] sm:$0xff]  ;;  %v7424_v63 = vld [vmem:[#allocation61_spill] sm:$0xff] }
0x2b47   :  { %4623 = vmatpush.msrb.mxu0 %v6004_v45  ;;  %4643 = vmatpush.msra.mxu1 %v6084_v61  ;;  %v7417_v45 = vld [vmem:[#allocation74_spill] sm:$0xff]  ;;  %v7422_v61 = vld [vmem:[#allocation84_spill] sm:$0xff]  ;;  %v7426_v0 = vld [vmem:[#allocation83_spill] sm:$0xff] }
0x2b48   :  { %4584 = vmatpush.msra.mxu2 %v5839_v12  ;;  %4604 = vmatpush.msra.mxu3 %v5919_v28  ;;  %v7406_v12 = vld [vmem:[#allocation88_spill] sm:$0xff]  ;;  %v7408_v28 = vld [vmem:[#allocation65_spill] sm:$0xff]  ;;  %v7427_v6 = vld [vmem:[#allocation50_spill] sm:$0xff] }
0x2b49   :  { %4624 = vmatpush.msrb.mxu0 %v5999_v44  ;;  %4644 = vmatpush.msra.mxu1 %v6079_v60  ;;  %v7416_v44 = vld [vmem:[#allocation63_spill] sm:$0xff]  ;;  %v7421_v60 = vld [vmem:[#allocation73_spill] sm:$0xff]  ;;  %v7428_v7 = vld [vmem:[#allocation60_spill] sm:$0xff] }
0x2b4a   :  { %4585 = vmatpush.msra.mxu2 %v5834_v11  ;;  %4605 = vmatpush.msra.mxu3 %v5914_v27  ;;  %v7410_v11 = vld [vmem:[#allocation87_spill] sm:$0xff]  ;;  %v7411_v27 = vld [vmem:[#allocation54_spill] sm:$0xff]  ;;  %v7431_v52 = vld [vmem:[#allocation49_spill] sm:$0xff] }
0x2b4b   :  { %4625 = vmatpush.msrb.mxu0 %v5994_v43  ;;  %4645 = vmatpush.msra.mxu1 %v6074_v59  ;;  %v7415_v43 = vld [vmem:[#allocation53_spill] sm:$0xff]  ;;  %v7420_v59 = vld [vmem:[#allocation62_spill] sm:$0xff]  ;;  %v7429_v4 = vld [vmem:[#allocation71_spill] sm:$0xff] }
0x2b4c   :  { %4586 = vmatpush.msra.mxu2 %v5829_v10  ;;  %4606 = vmatpush.msra.mxu3 %v7404_v13  ;;  %v7414_v10 = vld [vmem:[#allocation86_spill] sm:$0xff]  ;;  %v7432_v17 = vld [vmem:[#allocation59_spill] sm:$0xff]  ;;  %v7434_v48 = vld [vmem:[#allocation81_spill] sm:$0xff] }
0x2b4d   :  { %4626 = vmatpush.msrb.mxu0 %v7405_v14  ;;  %4646 = vmatpush.msra.mxu1 %v7406_v12  ;;  %v7430_v3 = vld [vmem:[#allocation82_spill] sm:$0xff]  ;;  %v7435_v37 = vld [vmem:[#allocation48_spill] sm:$0xff]  ;;  %v7437_v18 = vld [vmem:[#allocation69_spill] sm:$0xff] }
0x2b4e   :  { %4587 = vmatpush.msra.mxu2 %v7407_v15  ;;  %4607 = vmatpush.msra.mxu3 %v7408_v28  ;;  %v7433_v51 = vld [vmem:[#allocation70_spill] sm:$0xff]  ;;  %v7438_v49 = vld [vmem:[#allocation80_spill] sm:$0xff]  ;;  %v7439_v36 = vld [vmem:[#allocation47_spill] sm:$0xff] }
0x2b4f   :  { %4627 = vmatpush.msrb.mxu0 %v7409_v29  ;;  %4647 = vmatpush.msra.mxu1 %v7410_v11  ;;  %v7436_v2 = vld [vmem:[#allocation58_spill] sm:$0xff]  ;;  %v7440_v16 = vld [vmem:[#allocation57_spill] sm:$0xff]  ;;  %v7441_v20 = vld [vmem:[#allocation68_spill] sm:$0xff] }
0x2b50   :  { %4588 = vmatpush.msra.mxu2 %v7411_v27  ;;  %4608 = vmatpush.msra.mxu3 %v7412_v30  ;;  %v7442_v56 = vld [vmem:[#allocation79_spill] sm:$0xff]  ;;  %v7443_v22 = vld [vmem:[#allocation46_spill] sm:$0xff]  ;;  %v7444_v1 = vld [vmem:[#allocation56_spill] sm:$0xff] }
0x2b51   :  { %4628 = vmatpush.msrb.mxu0 %v7413_v31  ;;  %4648 = vmatpush.msra.mxu1 %v7414_v10  ;;  %v7445_v58 = vld [vmem:[#allocation104_spill] sm:$0xff]  ;;  %v7447_v54 = vld [vmem:[#allocation67_spill] sm:$0xff]  ;;  %v7448_v25 = vld [vmem:[#allocation78_spill] sm:$0xff] }
0x2b52   :  { %4589 = vmatpush.msra.mxu2 %v7415_v43  ;;  %4609 = vmatpush.msra.mxu3 %v7416_v44  ;;  %v7446_v19 = vld [vmem:[#allocation120_spill] sm:$0xff]  ;;  %v7449_v39 = vld [vmem:[#allocation103_spill] sm:$0xff]  ;;  %v7453_v8 = vld [vmem:[#allocation102_spill] sm:$0xff] }
0x2b53   :  { %4629 = vmatpush.msrb.mxu0 %v7417_v45  ;;  %4649 = vmatpush.msra.mxu1 %v7418_v46  ;;  %v7450_v5 = vld [vmem:[#allocation119_spill] sm:$0xff]  ;;  %v7451_v35 = vld [vmem:[#allocation136_spill] sm:$0xff]  ;;  %v7454_v21 = vld [vmem:[#allocation118_spill] sm:$0xff] }
0x2b54   :  { %4590 = vmatpush.msra.mxu2 %v7419_v47  ;;  %4610 = vmatpush.msra.mxu3 %v7420_v59  ;;  %v7452_v55 = vld [vmem:[#allocation152_spill] sm:$0xff]  ;;  %v7455_v38 = vld [vmem:[#allocation135_spill] sm:$0xff]  ;;  %v7457_v23 = vld [vmem:[#allocation101_spill] sm:$0xff] }
0x2b55   :  { %4630 = vmatpush.msrb.mxu0 %v7421_v60  ;;  %4650 = vmatpush.msra.mxu1 %v7422_v61  ;;  %v7456_v34 = vld [vmem:[#allocation151_spill] sm:$0xff]  ;;  %v7458_v42 = vld [vmem:[#allocation117_spill] sm:$0xff]  ;;  %v7459_v13 = vld [vmem:[#allocation134_spill] sm:$0xff] }
0x2b56   :  { %4591 = vmatpush.msra.mxu2 %v7423_v62  ;;  %4611 = vmatpush.msra.mxu3 %v7424_v63  ;;  %v7460_v14 = vld [vmem:[#allocation150_spill] sm:$0xff]  ;;  %v7461_v12 = vld [vmem:[#allocation100_spill] sm:$0xff]  ;;  %v7463_v28 = vld [vmem:[#allocation133_spill] sm:$0xff] }
0x2b57   :  { %4631 = vmatpush.msrb.mxu0 %v7425_v53  ;;  %4651 = vmatpush.msra.mxu1 %v7426_v0  ;;  %v7462_v15 = vld [vmem:[#allocation116_spill] sm:$0xff]  ;;  %v7464_v29 = vld [vmem:[#allocation149_spill] sm:$0xff]  ;;  %v7465_v11 = vld [vmem:[#allocation99_spill] sm:$0xff] }
0x2b58   :  { %4592 = vmatpush.msra.mxu2 %v7427_v6  ;;  %4612 = vmatpush.msra.mxu3 %v7428_v7  ;;  %v7466_v27 = vld [vmem:[#allocation115_spill] sm:$0xff]  ;;  %v7467_v30 = vld [vmem:[#allocation132_spill] sm:$0xff]  ;;  %v7469_v10 = vld [vmem:[#allocation98_spill] sm:$0xff] }
0x2b59   :  { %4632 = vmatpush.msrb.mxu0 %v7429_v4  ;;  %4652 = vmatpush.msra.mxu1 %v7430_v3  ;;  %v7468_v31 = vld [vmem:[#allocation148_spill] sm:$0xff]  ;;  %v7470_v43 = vld [vmem:[#allocation114_spill] sm:$0xff]  ;;  %v7471_v44 = vld [vmem:[#allocation131_spill] sm:$0xff] }
0x2b5a   :  { %4593 = vmatpush.msra.mxu2 %v7431_v52  ;;  %4613 = vmatpush.msra.mxu3 %v7432_v17  ;;  %v7472_v45 = vld [vmem:[#allocation147_spill] sm:$0xff]  ;;  %v7473_v46 = vld [vmem:[#allocation97_spill] sm:$0xff]  ;;  %v7475_v59 = vld [vmem:[#allocation130_spill] sm:$0xff] }
0x2b5b   :  { %4633 = vmatpush.msrb.mxu0 %v7433_v51  ;;  %4653 = vmatpush.msra.mxu1 %v7434_v48  ;;  %v7474_v47 = vld [vmem:[#allocation113_spill] sm:$0xff]  ;;  %v7476_v60 = vld [vmem:[#allocation96_spill] sm:$0xff]  ;;  %v7479_v63 = vld [vmem:[#allocation146_spill] sm:$0xff] }
0x2b5c   :  { %4594 = vmatpush.msra.mxu2 %v7435_v37  ;;  %4614 = vmatpush.msra.mxu3 %v7436_v2  ;;  %v7477_v61 = vld [vmem:[#allocation112_spill] sm:$0xff]  ;;  %v7478_v62 = vld [vmem:[#allocation129_spill] sm:$0xff]  ;;  %v7480_v53 = vld [vmem:[#allocation95_spill] sm:$0xff] }
0x2b5d   :  { %4634 = vmatpush.msrb.mxu0 %v7437_v18  ;;  %4654 = vmatpush.msra.mxu1 %v7438_v49  ;;  %v7481_v0 = vld [vmem:[#allocation111_spill] sm:$0xff]  ;;  %v7482_v6 = vld [vmem:[#allocation128_spill] sm:$0xff]  ;;  %v7483_v7 = vld [vmem:[#allocation94_spill] sm:$0xff] }
0x2b5e   :  { %4595 = vmatpush.msra.mxu2 %v7439_v36  ;;  %4615 = vmatpush.msra.mxu3 %v7440_v16  ;;  %v7484_v4 = vld [vmem:[#allocation110_spill] sm:$0xff]  ;;  %v7486_v3 = vld [vmem:[#allocation127_spill] sm:$0xff]  ;;  %v7487_v52 = vld [vmem:[#allocation93_spill] sm:$0xff] }
0x2b5f   :  { %4635 = vmatpush.msrb.mxu0 %v7441_v20  ;;  %4655 = vmatpush.msra.mxu1 %v7442_v56  ;;  %v7488_v17 = vld [vmem:[#allocation109_spill] sm:$0xff]  ;;  %v7489_v51 = vld [vmem:[#allocation144_spill] sm:$0xff]  ;;  %v7490_v48 = vld [vmem:[#allocation126_spill] sm:$0xff] }
0x2b60   :  { %4596 = vmatpush.msra.mxu2 %v7443_v22  ;;  %4616 = vmatpush.msra.mxu3 %v7444_v1  ;;  %v7491_v37 = vld [vmem:[#allocation92_spill] sm:$0xff]  ;;  %v7493_v2 = vld [vmem:[#allocation143_spill] sm:$0xff]  ;;  %v7494_v18 = vld [vmem:[#allocation125_spill] sm:$0xff] }
0x2b61   :  { %4636 = vmatpush.msrb.mxu0 %v7447_v54  ;;  %4656 = vmatpush.msra.mxu1 %v7448_v25  ;;  %v7495_v49 = vld [vmem:[#allocation91_spill] sm:$0xff]  ;;  %v7497_v16 = vld [vmem:[#allocation142_spill] sm:$0xff]  ;;  %v7500_v22 = vld [vmem:[#allocation124_spill] sm:$0xff] }
0x2b62   :  { %4661 = vmatpush.msrb.mxu2 %v7445_v58  ;;  %4681 = vmatpush.msrb.mxu3 %v7446_v19  ;;  %v7496_v36 = vld [vmem:[#allocation107_spill] sm:$0xff]  ;;  %v7498_v20 = vld [vmem:[#allocation90_spill] sm:$0xff]  ;;  %v7501_v1 = vld [vmem:[#allocation141_spill] sm:$0xff] }
0x2b63   :  { %4701 = vmatpush.msra.mxu0 %v7451_v35  ;;  %4721 = vmatpush.msrb.mxu1 %v7452_v55  ;;  %v7499_v56 = vld [vmem:[#allocation106_spill] sm:$0xff]  ;;  %v7502_v58 = vld [vmem:[#allocation89_spill] sm:$0xff]  ;;  %v7504_v54 = vld [vmem:[#allocation168_spill] sm:$0xff] }
0x2b64   :  { %4662 = vmatpush.msrb.mxu2 %v7449_v39  ;;  %4682 = vmatpush.msrb.mxu3 %v7450_v5  ;;  %v7503_v19 = vld [vmem:[#allocation105_spill] sm:$0xff]  ;;  %v7506_v25 = vld [vmem:[#allocation123_spill] sm:$0xff]  ;;  %v7507_v39 = vld [vmem:[#allocation140_spill] sm:$0xff] }
0x2b65   :  { %4702 = vmatpush.msra.mxu0 %v7455_v38  ;;  %4722 = vmatpush.msrb.mxu1 %v7456_v34  ;;  %v7508_v5 = vld [vmem:[#allocation166_spill] sm:$0xff]  ;;  %v7510_v55 = vld [vmem:[#allocation139_spill] sm:$0xff] }
0x2b66   :  { %4663 = vmatpush.msrb.mxu2 %v7453_v8  ;;  %4683 = vmatpush.msrb.mxu3 %v7454_v21  ;;  %v7509_v35 = vld [vmem:[#allocation122_spill] sm:$0xff]  ;;  %v7511_v8 = vld [vmem:[#allocation165_spill] sm:$0xff]  ;;  %v7516_v38 = vld [vmem:[#allocation163_spill] sm:$0xff] }
0x2b67   :  { %4703 = vmatpush.msra.mxu0 %v7459_v13  ;;  %4723 = vmatpush.msrb.mxu1 %v7460_v14  ;;  %v7512_v21 = vld [vmem:[#allocation121_spill] sm:$0xff]  ;;  %v7517_v34 = vld [vmem:[#allocation162_spill] sm:$0xff]  ;;  %v7520_v13 = vld [vmem:[#allocation159_spill] sm:$0xff] }
0x2b68   :  { %4664 = vmatpush.msrb.mxu2 %v7457_v23  ;;  %4684 = vmatpush.msrb.mxu3 %v7458_v42  ;;  %v7518_v23 = vld [vmem:[#allocation161_spill] sm:$0xff]  ;;  %v7519_v42 = vld [vmem:[#allocation160_spill] sm:$0xff]  ;;  %v7521_v14 = vld [vmem:[#allocation158_spill] sm:$0xff] }
0x2b69   :  { %4704 = vmatpush.msra.mxu0 %v7463_v28  ;;  %4724 = vmatpush.msrb.mxu1 %v7464_v29  ;;  %v7525_v28 = vld [vmem:[#allocation154_spill] sm:$0xff]  ;;  %v7526_v29 = vld [vmem:[#allocation153_spill] sm:$0xff] }
0x2b6a   :  { %4665 = vmatpush.msrb.mxu2 %v7461_v12  ;;  %4685 = vmatpush.msrb.mxu3 %v7462_v15  ;;  %v7522_v12 = vld [vmem:[#allocation157_spill] sm:$0xff]  ;;  %v7524_v15 = vld [vmem:[#allocation155_spill] sm:$0xff] }
0x2b6b   :  { %4705 = vmatpush.msra.mxu0 %v7467_v30  ;;  %4725 = vmatpush.msrb.mxu1 %v7468_v31 }
0x2b6c   :  { %4666 = vmatpush.msrb.mxu2 %v7465_v11  ;;  %4686 = vmatpush.msrb.mxu3 %v7466_v27 }
0x2b6d   :  { %4706 = vmatpush.msra.mxu0 %v7471_v44  ;;  %4726 = vmatpush.msrb.mxu1 %v7472_v45 }
0x2b6e   :  { %4667 = vmatpush.msrb.mxu2 %v7469_v10  ;;  %4687 = vmatpush.msrb.mxu3 %v7470_v43 }
0x2b6f   :  { %4707 = vmatpush.msra.mxu0 %v7475_v59  ;;  %4597 = vmatmul.f32.vlgmr.msra.gmra.mxu2 %v7057_v9  ;;  %v7485_v9 = vld [vmem:[#allocation145_spill] sm:$0xff] }
0x2b70   :  { %4668 = vmatpush.msrb.mxu2 %v7473_v46  ;;  %4688 = vmatpush.msrb.mxu3 %v7474_v47 }
0x2b71   :  { %4708 = vmatpush.msra.mxu0 %v7478_v62  ;;  %4727 = vmatpush.msrb.mxu1 %v7479_v63  ;;  %v5208_v63 = vld [vmem:[#allocation26] ss:$0 sm:$0xff] }
0x2b72   :  { %4669 = vmatpush.msrb.mxu2 %v7476_v60  ;;  %4689 = vmatpush.msrb.mxu3 %v7477_v61 }
0x2b73   :  { %4617 = vmatmul.f32.vlgmr.msra.gmra.mxu3 %v7065_v57  ;;  %4709 = vmatpush.msra.mxu0 %v7482_v6  ;;  %v7492_v57 = vld [vmem:[#allocation108_spill] sm:$0xff] }
0x2b74   :  { %4670 = vmatpush.msrb.mxu2 %v7480_v53  ;;  %4690 = vmatpush.msrb.mxu3 %v7481_v0  ;;  %v4762_v0 = vld [vmem:[#allocation27] sm:$0xff] }
0x2b75   :  { %4728 = vmatpush.msrb.mxu1 %v7485_v9  ;;  %4710 = vmatpush.msra.mxu0 %v7486_v3 }
0x2b76   :  { %4671 = vmatpush.msrb.mxu2 %v7483_v7  ;;  %4691 = vmatpush.msrb.mxu3 %v7484_v4 }
0x2b77   :  { %4729 = vmatpush.msrb.mxu1 %v7489_v51  ;;  %4711 = vmatpush.msra.mxu0 %v7490_v48 }
0x2b78   :  { %4672 = vmatpush.msrb.mxu2 %v7487_v52  ;;  %4692 = vmatpush.msrb.mxu3 %v7488_v17 }
0x2b79   :  { %4730 = vmatpush.msrb.mxu1 %v7493_v2  ;;  %4712 = vmatpush.msra.mxu0 %v7494_v18 }
0x2b7a   :  { %4673 = vmatpush.msrb.mxu2 %v7491_v37  ;;  %4693 = vmatpush.msrb.mxu3 %v7492_v57 }
0x2b7b   :  { %4731 = vmatpush.msrb.mxu1 %v7497_v16  ;;  %4637 = vmatmul.f32.vlgmr.msrb.gmra.mxu0 %v7073_v32  ;;  %v7505_v32 = vld [vmem:[#allocation167_spill] sm:$0xff] }
0x2b7c   :  { %4674 = vmatpush.msrb.mxu2 %v7495_v49  ;;  %4694 = vmatpush.msrb.mxu3 %v7496_v36 }
0x2b7d   :  { %4713 = vmatpush.msra.mxu0 %v7500_v22  ;;  %4732 = vmatpush.msrb.mxu1 %v7501_v1 }
0x2b7e   :  { %4675 = vmatpush.msrb.mxu2 %v7498_v20  ;;  %4695 = vmatpush.msrb.mxu3 %v7499_v56 }
0x2b7f   :  { %4657 = vmatmul.f32.vlgmr.msra.gmra.mxu1 %v7086_v50  ;;  %4714 = vmatpush.msra.mxu0 %v7506_v25  ;;  %v7514_v50 = vld [vmem:[#allocation164_spill] sm:$0xff] }
0x2b80   :  { %4676 = vmatpush.msrb.mxu2 %v7502_v58  ;;  %4696 = vmatpush.msrb.mxu3 %v7503_v19 }
0x2b81   :  { %4697 = vmatmul.f32.vlgmr.msrb.gmra.mxu3 %v7092_v40  ;;  %4677 = vmatmul.f32.vlgmr.msrb.gmra.mxu2 %v7089_v26  ;;  %v7513_v40 = vld [vmem:[#allocation138_spill] sm:$0xff]  ;;  %v7515_v26 = vld [vmem:[#allocation137_spill] sm:$0xff] }
0x2b82   :  { %4741 = vmatpush.msra.mxu2 %v7504_v54  ;;  %4733 = vmatpush.msrb.mxu1 %v7507_v39 }
0x2b83   :  { %4715 = vmatpush.msra.mxu0 %v7509_v35 }
0x2b84   :  { %4742 = vmatpush.msra.mxu2 %v7505_v32  ;;  %4734 = vmatpush.msrb.mxu1 %v7510_v55 }
0x2b85   :  { %4716 = vmatpush.msra.mxu0 %v7512_v21 }
0x2b86   :  { %4743 = vmatpush.msra.mxu2 %v7508_v5  ;;  %4735 = vmatpush.msrb.mxu1 %v7513_v40 }
0x2b87   :  { %4717 = vmatmul.f32.vlgmr.msra.gmra.mxu0 %v7095_v33  ;;  %v7523_v33 = vld [vmem:[#allocation156_spill] sm:$0xff] }
0x2b88   :  { %4744 = vmatpush.msra.mxu2 %v7511_v8  ;;  %4736 = vmatpush.msrb.mxu1 %v7515_v26 }
0x2b89   :  { %4737 = vmatmul.f32.vlgmr.msrb.gmra.mxu1 %v7097_v24  ;;  %v5207_v24 = vld [vmem:[#allocation24] ss:$0 sm:$0xff] }
0x2b8a   :  { %4745 = vmatpush.msra.mxu2 %v7514_v50 }
0x2b8c   :  { %4746 = vmatpush.msra.mxu2 %v7516_v38 }
0x2b8e   :  { %4747 = vmatpush.msra.mxu2 %v7517_v34 }
0x2b90   :  { %4748 = vmatpush.msra.mxu2 %v7518_v23 }
0x2b92   :  { %4749 = vmatpush.msra.mxu2 %v7519_v42 }
0x2b94   :  { %4750 = vmatpush.msra.mxu2 %v7520_v13 }
0x2b96   :  { %4751 = vmatpush.msra.mxu2 %v7521_v14 }
0x2b98   :  { %4752 = vmatpush.msra.mxu2 %v7522_v12 }
0x2b9a   :  { %4753 = vmatpush.msra.mxu2 %v7523_v33 }
0x2b9c   :  { %4754 = vmatpush.msra.mxu2 %v7524_v15 }
0x2b9e   :  { %4755 = vmatpush.msra.mxu2 %v7525_v28 }
0x2ba0   :  { %4756 = vmatpush.msra.mxu2 %v7526_v29 }
0x2ba1   :  { %4757 = vmatmul.f32.vlgmr.msra.gmra.mxu2 %v7099_v41  ;;  %v4766_v41 = vmul.f32 %v5208_v63, %v4762_v0 }
0x2bf2   :  { %v4598_v11 = vpop.f32.mrf.mxu2 }
0x2bf3   :  { %v4599_v27 = vadd.f32 %v5207_v24, %v4598_v11 }
0x2bf6   :  { %v4618_v30 = vpop.f32.mrf.mxu3 }
0x2bf7   :  { %v4619_v31 = vadd.f32 %v4618_v30, %v4599_v27 }
0x2bf8   :  { %v4638_v10 = vpop.f32.mrf.mxu0 }
0x2bf9   :  { %v4639_v43 = vadd.f32 %v4638_v10, %v4619_v31 }
0x2bfc   :  { %v4658_v44 = vpop.f32.mrf.mxu1 }
0x2bfd   :  { %v4659_v45 = vadd.f32 %v4658_v44, %v4639_v43 }
0x2c04   :  { %v4678_v46 = vpop.f32.mrf.mxu2  ;;  %v4698_v59 = vpop.f32.mrf.mxu3 }
0x2c05   :  { %v4679_v47 = vadd.f32 %v4678_v46, %v4659_v45  ;;  %v4718_v61 = vpop.f32.mrf.mxu0 }
0x2c06   :  { %v4738_v53 = vpop.f32.mrf.mxu1 }
0x2c07   :  { %v4699_v60 = vadd.f32 %v4698_v59, %v4679_v47 }
0x2c09   :  { %v4719_v62 = vadd.f32 %v4718_v61, %v4699_v60 }
0x2c0b   :  { %v4739_v6 = vadd.f32 %v4738_v53, %v4719_v62 }
0x2c24   :  { %v4758_v7 = vpop.f32.mrf.mxu2 }
0x2c25   :  { %v4759_v4 = vadd.f32 %v4758_v7, %v4739_v6 }
0x2c27   :  { %v4767_v9 = vadd.f32 %v4766_v41, %v4759_v4 }
0x2c29   :  { %4768 = vst.msk [vmem:[#allocation29] sm:$0xff] %vm907_vm7, %v4767_v9 }
0x2c2a   :  { %4779 = dma.vmem_to_hbm [thread:$0]  %s4775_s30, 128, %s4777_s16, [#allocation8]  }
0x2c2b   :  { %5613 = dma.done.wait [#allocation8], 128  }
0x2c2c   :  { %5614 = vsyncadd [#allocation8], 4294967168 }
0x2c2d   :  { %4784 = vsyncpa [#allocation7], 1 }
0x2c2e   :  { %4785 = vsyncpa [#allocation10], 1 }
0x2c2f   :  { %4786 = vsyncpa [#allocation13], 1 }
0x2c30   :  { %4787 = vsyncpa [#allocation16], 1 }
0x2c31   :  { %4788 = vsyncpa [#allocation19], 1 }
0x2c32   :  { %4789 = vsyncpa [#allocation22], 1 }
0x2c33   :  { %4790 = vsyncpa [#allocation25], 1 }
0x2c34   :  { %4791 = vsyncpa [#allocation28], 1 }
0x2c35   :  { %4792 = vsyncpa [#allocation8], 1 }
0x2c36   :  { %4793 = vsyncmov [#allocation5] }
0x2c39   :  { %s4794_s17 = vpop.sfrf %4793 }
0x2c3a   :  { %p4860_p0 = scmp.ne.s32.totalorder %s4794_s17, 0 }
0x2c3c   :  { %4798 = shalt.err (%p4860_p0)  }
0x2c3d   :  { %4800 = vsyncmov [#allocation5 + $0x1] }
0x2c40   :  { %s4801_s21 = vpop.sfrf %4800 }
0x2c41   :  { %p4861_p1 = scmp.ne.s32.totalorder %s4801_s21, 0 }
0x2c43   :  { %4805 = shalt.err (%p4861_p1)  }

</bundles_post_ra>
